<compile_context>
chip_gen: v5e
topology: v5e:2x2
jax: 0.10.0
libtpu: 0.0.40
codegen_flags: <defaults>
</compile_context>

<pallas_src>
import functools
import math

import numpy as np
import jax
import jax.numpy as jnp
from jax import lax
from jax.experimental import pallas as pl
from jax.experimental.pallas import tpu as pltpu


VMEM_LIMIT = 32 * 1024 * 1024  # explicit scoped-VMEM request, safe on v5e/v6e/v7x


# ----------------------------------------------------------------------------- helpers
def _round_up(x, m):
    return ((x + m - 1) // m) * m


def _sigmoid(x):
    # Exact sigmoid via tanh: the transcendental goes to the otherwise-idle EUP
    # slot and there is no VALU divide on the serial LSTM step path.
    return 0.5 * (jnp.tanh(0.5 * x) + 1.0)


# ----------------------------------------------------------------------------- CQT basis (host, numpy)
def build_cqt_kernels(sr, fmin, n_bins, bins_per_octave, filter_scale, n_bins_pad):
    """Analytic CQT basis (hann-windowed complex exponentials, l1-normalized,
    sqrt(length) librosa-style scaling folded in).  Real/imag parts are returned
    as (n_fft, n_bins_pad) matrices (zero-padded to a lane-dense 128 bins)."""
    # TODO(synk): exact nnAudio CQT1992v2 kernel generation (periodic hann,
    # np.r_ centering, filter_scale=1 defaults) is not bit-reproduced here; the
    # demo uses filter_scale<1 to keep kernel lengths / n_fft small.
    q = filter_scale / (2.0 ** (1.0 / bins_per_octave) - 1.0)
    freqs = fmin * 2.0 ** (np.arange(n_bins) / bins_per_octave)
    lengths = np.ceil(q * sr / freqs).astype(int)
    n_fft = int(2 ** np.ceil(np.log2(lengths.max())))
    kr = np.zeros((n_fft, n_bins_pad), np.float32)
    ki = np.zeros((n_fft, n_bins_pad), np.float32)
    for k in range(n_bins):
        l = int(lengths[k])
        win = np.hanning(l)
        t = np.arange(l) - l // 2
        sig = win * np.exp(1j * 2.0 * np.pi * freqs[k] * t / sr) / l
        sig = sig / np.linalg.norm(sig, 1)
        sig = sig * np.sqrt(l)
        start = n_fft // 2 - l // 2
        kr[start:start + l, k] = sig.real.astype(np.float32)
        ki[start:start + l, k] = sig.imag.astype(np.float32)
    return jnp.asarray(kr), jnp.asarray(ki), n_fft


# ----------------------------------------------------------------------------- kernel 1: CQT magnitude
def _cqt_mag_kernel(frames_ref, basis_ref, o_ref, *, nb_pad):
    # One fused matmul: RHS columns [0:nb_pad) = real basis, [nb_pad:2*nb_pad) = imag.
    ri = jnp.dot(frames_ref[...], basis_ref[...], preferred_element_type=jnp.float32)
    real = ri[:, :nb_pad]
    imag = ri[:, nb_pad:]
    o_ref[...] = jnp.sqrt(real * real + imag * imag)


def cqt_magnitude(frames2d, basis, nb_pad, row_tile):
    rows, n_fft = frames2d.shape
    grid = (rows // row_tile,)
    cost = pl.CostEstimate(
        flops=2 * rows * n_fft * 2 * nb_pad,
        transcendentals=rows * nb_pad,
        bytes_accessed=4 * (rows * n_fft + n_fft * 2 * nb_pad + rows * nb_pad),
    )
    return pl.pallas_call(
        functools.partial(_cqt_mag_kernel, nb_pad=nb_pad),
        out_shape=jax.ShapeDtypeStruct((rows, nb_pad), jnp.float32),
        grid=grid,
        in_specs=[
            pl.BlockSpec((row_tile, n_fft), lambda i: (i, 0)),
            pl.BlockSpec((n_fft, 2 * nb_pad), lambda i: (0, 0)),
        ],
        out_specs=pl.BlockSpec((row_tile, nb_pad), lambda i: (i, 0)),
        compiler_params=pltpu.CompilerParams(
            dimension_semantics=("parallel",), vmem_limit_bytes=VMEM_LIMIT),
        cost_estimate=cost,
    )(frames2d, basis)


# ----------------------------------------------------------------------------- kernel 2: fused 3-layer bi-LSTM
def _bilstm3_kernel(x_ref, w1_ref, u1_ref, b1_ref, w2_ref, u2_ref, b2_ref,
                    w3_ref, u3_ref, b3_ref, y_ref,
                    gx_ref, yf_ref, yb_ref, h_ref, c_ref, *, t_len, bp, hidden):
    h4 = 4 * hidden

    def run_layer(x2d, w_ref, u_ref, b_ref):
        # Hoisted input-to-hidden projection for BOTH directions: one MXU matmul
        # over all T*Bp rows (instead of T tiny M=B matmuls on the serial path).
        gx_ref[...] = (jnp.dot(x2d, w_ref[...], preferred_element_type=jnp.float32)
                       + b_ref[...])
        h_ref[...] = jnp.zeros_like(h_ref)
        c_ref[...] = jnp.zeros_like(c_ref)

        def cell(g, c):
            # PyTorch gate order i, f, g, o; hidden=128 => 128-lane aligned slices.
            i = _sigmoid(g[:, 0:hidden])
            f = _sigmoid(g[:, hidden:2 * hidden])
            gg = jnp.tanh(g[:, 2 * hidden:3 * hidden])
            o = _sigmoid(g[:, 3 * hidden:h4])
            c_new = f * c + i * gg
            h_new = o * jnp.tanh(c_new)
            return h_new, c_new

        def step(t, carry):
            tf = t
            tb = t_len - 1 - t
            off_f = pl.multiple_of(tf * bp, bp)
            off_b = pl.multiple_of(tb * bp, bp)
            # Single block-diagonal hidden-to-hidden matmul covering fwd + bwd.
            gh = jnp.dot(h_ref[...], u_ref[...], preferred_element_type=jnp.float32)
            g_f = gh[:, :h4] + gx_ref[pl.ds(off_f, bp)][:, :h4]
            g_b = gh[:, h4:] + gx_ref[pl.ds(off_b, bp)][:, h4:]
            c_prev = c_ref[...]
            hf, cf = cell(g_f, c_prev[:, :hidden])
            hb, cb = cell(g_b, c_prev[:, hidden:])
            h_ref[...] = jnp.concatenate([hf, hb], axis=1)
            c_ref[...] = jnp.concatenate([cf, cb], axis=1)
            yf_ref[pl.ds(off_f, bp)] = hf
            yb_ref[pl.ds(off_b, bp)] = hb
            return carry

        lax.fori_loop(0, t_len, step, 0)
        # Lane-dense (T*Bp, 2H) layer output, kept in VMEM for the next layer.
        return jnp.concatenate([yf_ref[...], yb_ref[...]], axis=-1)

    h1 = run_layer(x_ref[...], w1_ref, u1_ref, b1_ref)
    h2 = run_layer(h1, w2_ref, u2_ref, b2_ref)
    h3 = run_layer(h2, w3_ref, u3_ref, b3_ref)
    y_ref[...] = h3


def bilstm3(x2d, fused_params, t_len, bp, hidden):
    # TODO(synk): on v7x the independent fwd/bwd directions could be sharded
    # across the 2 TensorCores (core_map / parallel grid axis of 2) instead of
    # being fused into one block-diagonal matmul per step.
    # NOTE: gates_x is kept whole in VMEM; for very long sequences it would need
    # to be tiled/streamed, but even T~2k fits comfortably at these widths.
    (w1, u1, b1), (w2, u2, b2), (w3, u3, b3) = fused_params
    kernel = functools.partial(_bilstm3_kernel, t_len=t_len, bp=bp, hidden=hidden)
    return pl.pallas_call(
        kernel,
        out_shape=jax.ShapeDtypeStruct((t_len * bp, 2 * hidden), jnp.float32),
        scratch_shapes=[
            pltpu.VMEM((t_len * bp, 8 * hidden), jnp.float32),  # gates_x (fwd|bwd)
            pltpu.VMEM((t_len * bp, hidden), jnp.float32),      # fwd outputs
            pltpu.VMEM((t_len * bp, hidden), jnp.float32),      # bwd outputs
            pltpu.VMEM((bp, 2 * hidden), jnp.float32),          # h = [h_fwd | h_bwd]
            pltpu.VMEM((bp, 2 * hidden), jnp.float32),          # c = [c_fwd | c_bwd]
        ],
        compiler_params=pltpu.CompilerParams(vmem_limit_bytes=VMEM_LIMIT),
    )(x2d, w1, u1, b1, w2, u2, b2, w3, u3, b3)


# ----------------------------------------------------------------------------- kernels 3/4: BatchNorm (2-pass) + proj + sigmoid
def _bn_stats_kernel(x_ref, sum_ref, sq_ref):
    @pl.when(pl.program_id(0) == 0)
    def _():
        sum_ref[...] = jnp.zeros_like(sum_ref)
        sq_ref[...] = jnp.zeros_like(sq_ref)

    x = x_ref[...]  # padded rows are exactly zero -> contribute nothing
    sum_ref[...] += jnp.sum(x, axis=0, keepdims=True)
    sq_ref[...] += jnp.sum(x * x, axis=0, keepdims=True)


def bn_stats(feats_pad, row_tile):
    rows_pad, chans = feats_pad.shape
    return pl.pallas_call(
        _bn_stats_kernel,
        out_shape=(jax.ShapeDtypeStruct((1, chans), jnp.float32),
                   jax.ShapeDtypeStruct((1, chans), jnp.float32)),
        grid=(rows_pad // row_tile,),
        in_specs=[pl.BlockSpec((row_tile, chans), lambda i: (i, 0))],
        out_specs=(pl.BlockSpec((1, chans), lambda i: (0, 0)),
                   pl.BlockSpec((1, chans), lambda i: (0, 0))),
        compiler_params=pltpu.CompilerParams(dimension_semantics=("arbitrary",)),
    )(feats_pad)


def _bn_proj_sig_kernel(x_ref, sc_ref, sh_ref, wp_ref, bp_ref, o_ref):
    xn = x_ref[...] * sc_ref[...] + sh_ref[...]
    logits = jnp.dot(xn, wp_ref[...], preferred_element_type=jnp.float32) + bp_ref[...]
    o_ref[...] = _sigmoid(logits)


def bn_proj_sigmoid(feats_pad, scale, shift, wp, bproj, row_tile):
    rows_pad, chans = feats_pad.shape
    cpad = wp.shape[1]
    return pl.pallas_call(
        _bn_proj_sig_kernel,
        out_shape=jax.ShapeDtypeStruct((rows_pad, cpad), jnp.float32),
        grid=(rows_pad // row_tile,),
        in_specs=[
            pl.BlockSpec((row_tile, chans), lambda i: (i, 0)),
            pl.BlockSpec((1, chans), lambda i: (0, 0)),
            pl.BlockSpec((1, chans), lambda i: (0, 0)),
            pl.BlockSpec((chans, cpad), lambda i: (0, 0)),
            pl.BlockSpec((1, cpad), lambda i: (0, 0)),
        ],
        out_specs=pl.BlockSpec((row_tile, cpad), lambda i: (i, 0)),
        compiler_params=pltpu.CompilerParams(dimension_semantics=("parallel",)),
    )(feats_pad, scale, shift, wp, bproj)


# ----------------------------------------------------------------------------- full forward
def rnn_model_forward(audio, *, cqt_basis, n_fft, hop, fused_lstm, hidden,
                      bn_gamma, bn_beta, proj_w, proj_b, n_bins_pad, num_classes,
                      eps=1e-5):
    batch, _ = audio.shape
    pad = n_fft // 2
    x = jnp.pad(audio.astype(jnp.float32), ((0, 0), (pad, pad)), mode="reflect")
    t_frames = (x.shape[1] - n_fft) // hop + 1
    # TODO(synk): stream the hop-strided frame windows straight from HBM inside
    # the CQT kernel (memory_space=pl.ANY + make_async_copy over pl.ds(t*hop,
    # n_fft)) instead of materializing the 4x-overlapping frames tensor; at the
    # demo length L=4096 this gather is negligible.
    idx = (jnp.arange(t_frames) * hop)[:, None] + jnp.arange(n_fft)[None, :]
    frames = x[:, idx]                                         # (B, T, n_fft)

    rows = batch * t_frames
    row_tile = 512 if rows >= 512 else _round_up(rows, 8)      # 512: ~85% HBM roofline, safe on all gens
    rows_pad = _round_up(rows, row_tile)
    frames2d = frames.reshape(rows, n_fft)
    if rows_pad > rows:
        frames2d = jnp.pad(frames2d, ((0, rows_pad - rows), (0, 0)))

    mag = cqt_magnitude(frames2d, cqt_basis, n_bins_pad, row_tile)[:rows]
    cqt = mag / jnp.max(mag)                                   # cqt / cqt.max(); padded bins stay 0

    # (B, T, bins) -> time-major, batch padded to a sublane multiple, flattened 2D.
    bpad = _round_up(batch, 8)
    x_tbd = jnp.transpose(cqt.reshape(batch, t_frames, n_bins_pad), (1, 0, 2))
    x_tbd = jnp.pad(x_tbd, ((0, 0), (0, bpad - batch), (0, 0)))
    x2d = x_tbd.reshape(t_frames * bpad, n_bins_pad)

    y2d = bilstm3(x2d, fused_lstm, t_frames, bpad, hidden)     # (T*Bp, 2H)
    feats = y2d.reshape(t_frames, bpad, 2 * hidden)[:, :batch]
    feats = jnp.transpose(feats, (1, 0, 2)).reshape(rows, 2 * hidden)

    # BatchNorm1d (training-mode batch statistics), two-pass, then Linear + sigmoid.
    rtile = 512 if rows >= 512 else _round_up(rows, 8)
    rows_pad2 = _round_up(rows, rtile)
    featsp = jnp.pad(feats, ((0, rows_pad2 - rows), (0, 0)))   # zero rows: sums unaffected
    s, sq = bn_stats(featsp, rtile)
    mean = s / rows
    var = jnp.maximum(sq / rows - mean * mean, 0.0)
    scale = bn_gamma * lax.rsqrt(var + eps)
    shift = bn_beta - mean * scale
    out = bn_proj_sigmoid(featsp, scale, shift, proj_w, proj_b, rtile)
    return out[:rows, :num_classes].reshape(batch, t_frames, num_classes)


# ----------------------------------------------------------------------------- pure-JAX reference
def reference_forward(audio, cqt_kr, cqt_ki, n_fft, hop, lstm_params, hidden,
                      bn_gamma, bn_beta, proj_w, proj_b, n_bins, num_classes):
    hp = jax.lax.Precision.HIGHEST
    batch, _ = audio.shape
    pad = n_fft // 2
    x = jnp.pad(audio.astype(jnp.float32), ((0, 0), (pad, pad)), mode="reflect")
    t_frames = (x.shape[1] - n_fft) // hop + 1
    idx = (jnp.arange(t_frames) * hop)[:, None] + jnp.arange(n_fft)[None, :]
    frames = x[:, idx]
    real = jnp.einsum("btf,fk->btk", frames, cqt_kr[:, :n_bins], precision=hp)
    imag = jnp.einsum("btf,fk->btk", frames, cqt_ki[:, :n_bins], precision=hp)
    cqt = jnp.sqrt(real * real + imag * imag)
    cqt = cqt / jnp.max(cqt)
    h_seq = jnp.transpose(cqt, (1, 0, 2))  # (T, B, n_bins)

    def run_dir(x_tbd, w, u, b, reverse):
        xs = x_tbd[::-1] if reverse else x_tbd
        b0 = b[0]

        def step(carry, x_t):
            h, c = carry
            gates = (jnp.dot(x_t, w, precision=hp)
                     + jnp.dot(h, u, precision=hp) + b0)
            i = _sigmoid(gates[:, 0:hidden])
            f = _sigmoid(gates[:, hidden:2 * hidden])
            g = jnp.tanh(gates[:, 2 * hidden:3 * hidden])
            o = _sigmoid(gates[:, 3 * hidden:4 * hidden])
            c = f * c + i * g
            h = o * jnp.tanh(c)
            return (h, c), h

        zeros = jnp.zeros((x_tbd.shape[1], hidden), jnp.float32)
        _, ys = lax.scan(step, (zeros, zeros), xs)
        return ys[::-1] if reverse else ys

    for (wf, uf, bf, wr, ur, br) in lstm_params:
        fwd = run_dir(h_seq, wf, uf, bf, False)
        bwd = run_dir(h_seq, wr, ur, br, True)
        h_seq = jnp.concatenate([fwd, bwd], axis=-1)

    feats = jnp.transpose(h_seq, (1, 0, 2)).reshape(batch * t_frames, 2 * hidden)
    mean = jnp.mean(feats, axis=0, keepdims=True)
    var = jnp.mean((feats - mean) ** 2, axis=0, keepdims=True)
    xn = (feats - mean) / jnp.sqrt(var + 1e-5)
    xn = xn * bn_gamma + bn_beta
    logits = jnp.dot(xn, proj_w[:, :num_classes], precision=hp) + proj_b[0, :num_classes]
    return _sigmoid(logits).reshape(batch, t_frames, num_classes)


# ----------------------------------------------------------------------------- params
def init_lstm_params(key, input_size, hidden, num_layers):
    params = []
    d_in = input_size
    bound = 1.0 / math.sqrt(hidden)
    for _ in range(num_layers):
        dir_params = []
        for _ in range(2):  # forward, backward
            key, k1, k2, k3 = jax.random.split(key, 4)
            w = jax.random.uniform(k1, (d_in, 4 * hidden), jnp.float32, -bound, bound)
            u = jax.random.uniform(k2, (hidden, 4 * hidden), jnp.float32, -bound, bound)
            b = jax.random.uniform(k3, (1, 4 * hidden), jnp.float32, -bound, bound)
            dir_params.append((w, u, b))
        (wf, uf, bf), (wr, ur, br) = dir_params
        params.append((wf, uf, bf, wr, ur, br))
        d_in = 2 * hidden
    return params, key


def fuse_lstm_params(lstm_params, hidden, d_in_pad_first):
    """Pack each layer's per-direction weights into a fused form consumed by the
    single bi-LSTM kernel: W_cat (D_pad, 8H) = [W_fwd | W_bwd] (zero-padded input
    rows for layer 1), U_blk (2H, 8H) = blockdiag(U_fwd, U_bwd), b_cat (1, 8H)."""
    fused = []
    for li, (wf, uf, bf, wr, ur, br) in enumerate(lstm_params):
        d_in = wf.shape[0]
        d_pad = d_in_pad_first if li == 0 else d_in
        wc = jnp.zeros((d_pad, 8 * hidden), jnp.float32)
        wc = wc.at[:d_in, :4 * hidden].set(wf).at[:d_in, 4 * hidden:].set(wr)
        ub = jnp.zeros((2 * hidden, 8 * hidden), jnp.float32)
        ub = ub.at[:hidden, :4 * hidden].set(uf).at[hidden:, 4 * hidden:].set(ur)
        bc = jnp.concatenate([bf, br], axis=1)
        fused.append((wc, ub, bc))
    return fused


# ----------------------------------------------------------------------------- main
if __name__ == "__main__":
    # CQT config (demo-small kernel lengths via filter_scale; 84 bins as in the module)
    SR, HOP, FMIN, N_BINS, BPO, FILTER_SCALE = 22050, 512, 32.70, 84, 12, 0.1
    N_BINS_PAD = 128   # lane-dense CQT output, sliced back to 84
    N_CLS_PAD = 128    # lane-dense projection output, sliced back to 21

    # Small shapes consistent with the module's forward (hidden_size=128 default)
    B, L = 2, 4096
    HIDDEN, NUM_LAYERS, NUM_CLASSES = 128, 3, 21
    INPUT_SIZE = N_BINS  # 84, as in RNNModel

    kr, ki, n_fft = build_cqt_kernels(SR, FMIN, N_BINS, BPO, FILTER_SCALE, N_BINS_PAD)
    basis = jnp.concatenate([kr, ki], axis=1)  # fused [real|imag] RHS, (n_fft, 256)

    key = jax.random.PRNGKey(0)
    key, k_audio = jax.random.split(key)
    audio = jax.random.normal(k_audio, (B, L), jnp.float32)

    lstm_params, key = init_lstm_params(key, INPUT_SIZE, HIDDEN, NUM_LAYERS)
    fused_lstm = fuse_lstm_params(lstm_params, HIDDEN, N_BINS_PAD)

    key, kp1, kp2 = jax.random.split(key, 3)
    bound = 1.0 / math.sqrt(2 * HIDDEN)
    proj_w = jnp.zeros((2 * HIDDEN, N_CLS_PAD), jnp.float32).at[:, :NUM_CLASSES].set(
        jax.random.uniform(kp1, (2 * HIDDEN, NUM_CLASSES), jnp.float32, -bound, bound))
    proj_b = jnp.zeros((1, N_CLS_PAD), jnp.float32).at[:, :NUM_CLASSES].set(
        jax.random.uniform(kp2, (1, NUM_CLASSES), jnp.float32, -bound, bound))
    # Fresh BatchNorm1d: gamma=1, beta=0, training-mode batch statistics.
    bn_gamma = jnp.ones((1, 2 * HIDDEN), jnp.float32)
    bn_beta = jnp.zeros((1, 2 * HIDDEN), jnp.float32)

    fwd = jax.jit(functools.partial(
        rnn_model_forward, cqt_basis=basis, n_fft=n_fft, hop=HOP,
        fused_lstm=fused_lstm, hidden=HIDDEN, bn_gamma=bn_gamma, bn_beta=bn_beta,
        proj_w=proj_w, proj_b=proj_b, n_bins_pad=N_BINS_PAD, num_classes=NUM_CLASSES))

    out = jax.block_until_ready(fwd(audio))

    ref = reference_forward(audio, kr, ki, n_fft, HOP, lstm_params, HIDDEN,
                            bn_gamma, bn_beta, proj_w, proj_b, N_BINS, NUM_CLASSES)
    ref = jax.block_until_ready(ref)

    assert out.shape == ref.shape, (out.shape, ref.shape)
    assert bool(jnp.all(jnp.isfinite(out)))
    assert bool(jnp.allclose(out, ref, atol=5e-3, rtol=5e-3)), \
        float(jnp.max(jnp.abs(out - ref)))

    print("KERNEL_OK")
</pallas_src>

<mosaic_0001>
module attributes {stable_mosaic.version = 11 : i64} {
  func.func @_cqt_mag_kernel(%arg0: i32, %arg1: memref<24x2048xf32, #tpu.memory_space<vmem>>, %arg2: memref<2048x256xf32, #tpu.memory_space<vmem>>, %arg3: memref<24x128xf32, #tpu.memory_space<vmem>>) attributes {dimension_semantics = [#tpu.dimension_semantics<parallel>], iteration_bounds = array<i64: 1>, scalar_prefetch = 0 : i64, scratch_operands = 0 : i64, tpu.core_type = #tpu.core_type<tc>, window_params = [{transform_indices = @transform_0, window_bounds = array<i64: 24, 2048>}, {pipeline_mode = #tpu.pipeline_mode<synchronous>, transform_indices = @transform_1, window_bounds = array<i64: 2048, 256>}, {transform_indices = @transform_2, window_bounds = array<i64: 24, 128>}]} {
    %c0 = arith.constant 0 : index
    %c0_0 = arith.constant 0 : index
    %0 = vector.load %arg1[%c0, %c0_0] : memref<24x2048xf32, #tpu.memory_space<vmem>>, vector<24x2048xf32>
    %c0_1 = arith.constant 0 : index
    %c0_2 = arith.constant 0 : index
    %1 = vector.load %arg2[%c0_1, %c0_2] : memref<2048x256xf32, #tpu.memory_space<vmem>>, vector<2048x256xf32>
    %cst = arith.constant dense<0.000000e+00> : vector<24x256xf32>
    %2 = tpu.matmul %0, %1, %cst {dimension_numbers = #tpu.dot_dimension_numbers<[1], [0], [0], [1], [0, 0, 1, 1], [], []>} : vector<24x2048xf32>, vector<2048x256xf32>, vector<24x256xf32> -> vector<24x256xf32>
    %3 = vector.extract_strided_slice %2 {offsets = [0, 0], sizes = [24, 128], strides = [1, 1]} : vector<24x256xf32> to vector<24x128xf32>
    %4 = vector.extract_strided_slice %2 {offsets = [0, 128], sizes = [24, 128], strides = [1, 1]} : vector<24x256xf32> to vector<24x128xf32>
    %5 = arith.mulf %3, %3 : vector<24x128xf32>
    %6 = arith.mulf %4, %4 : vector<24x128xf32>
    %7 = arith.addf %5, %6 : vector<24x128xf32>
    %8 = math.sqrt %7 : vector<24x128xf32>
    %c0_3 = arith.constant 0 : index
    %c0_4 = arith.constant 0 : index
    %9 = vector.load %arg3[%c0_3, %c0_4] : memref<24x128xf32, #tpu.memory_space<vmem>>, vector<24x128xf32>
    tpu.vector_store %arg3[%c0_3, %c0_4], %8 {strides = array<i32>} : memref<24x128xf32, #tpu.memory_space<vmem>>, vector<24x128xf32>,
    return
  }
  func.func @transform_0(%arg0: i32) -> (i32, i32) {
    %c0_i32 = arith.constant 0 : i32
    %c0_i32_0 = arith.constant 0 : i32
    return %arg0, %c0_i32 : i32, i32
  }
  func.func @transform_1(%arg0: i32) -> (i32, i32) {
    %c0_i32 = arith.constant 0 : i32
    %c0_i32_0 = arith.constant 0 : i32
    %c0_i32_1 = arith.constant 0 : i32
    return %c0_i32, %c0_i32_0 : i32, i32
  }
  func.func @transform_2(%arg0: i32) -> (i32, i32) {
    %c0_i32 = arith.constant 0 : i32
    %c0_i32_0 = arith.constant 0 : i32
    return %arg0, %c0_i32 : i32, i32
  }
}

module attributes {stable_mosaic.version = 11 : i64} {
  func.func @_bilstm3_kernel(%arg0: memref<72x128xf32, #tpu.memory_space<vmem>>, %arg1: memref<128x1024xf32, #tpu.memory_space<vmem>>, %arg2: memref<256x1024xf32, #tpu.memory_space<vmem>>, %arg3: memref<1x1024xf32, #tpu.memory_space<vmem>>, %arg4: memref<256x1024xf32, #tpu.memory_space<vmem>>, %arg5: memref<256x1024xf32, #tpu.memory_space<vmem>>, %arg6: memref<1x1024xf32, #tpu.memory_space<vmem>>, %arg7: memref<256x1024xf32, #tpu.memory_space<vmem>>, %arg8: memref<256x1024xf32, #tpu.memory_space<vmem>>, %arg9: memref<1x1024xf32, #tpu.memory_space<vmem>>, %arg10: memref<72x256xf32, #tpu.memory_space<vmem>>, %arg11: memref<72x1024xf32, #tpu.memory_space<vmem>>, %arg12: memref<72x128xf32, #tpu.memory_space<vmem>>, %arg13: memref<72x128xf32, #tpu.memory_space<vmem>>, %arg14: memref<8x256xf32, #tpu.memory_space<vmem>>, %arg15: memref<8x256xf32, #tpu.memory_space<vmem>>) attributes {dimension_semantics = [], scalar_prefetch = 0 : i64, scratch_operands = 5 : i64, tpu.core_type = #tpu.core_type<tc>} {
    %c0 = arith.constant 0 : index
    %c0_0 = arith.constant 0 : index
    %0 = vector.load %arg0[%c0, %c0_0] : memref<72x128xf32, #tpu.memory_space<vmem>>, vector<72x128xf32>
    %c0_1 = arith.constant 0 : index
    %c0_2 = arith.constant 0 : index
    %1 = vector.load %arg1[%c0_1, %c0_2] : memref<128x1024xf32, #tpu.memory_space<vmem>>, vector<128x1024xf32>
    %cst = arith.constant dense<0.000000e+00> : vector<72x1024xf32>
    %2 = tpu.matmul %0, %1, %cst {dimension_numbers = #tpu.dot_dimension_numbers<[1], [0], [0], [1], [0, 0, 1, 1], [], []>} : vector<72x128xf32>, vector<128x1024xf32>, vector<72x1024xf32> -> vector<72x1024xf32>
    %c0_3 = arith.constant 0 : index
    %c0_4 = arith.constant 0 : index
    %3 = vector.load %arg3[%c0_3, %c0_4] : memref<1x1024xf32, #tpu.memory_space<vmem>>, vector<1x1024xf32>
    %4 = vector.broadcast %3 : vector<1x1024xf32> to vector<72x1024xf32>
    %5 = arith.addf %2, %4 : vector<72x1024xf32>
    %c0_5 = arith.constant 0 : index
    %c0_6 = arith.constant 0 : index
    %6 = vector.load %arg11[%c0_5, %c0_6] : memref<72x1024xf32, #tpu.memory_space<vmem>>, vector<72x1024xf32>
    tpu.vector_store %arg11[%c0_5, %c0_6], %5 {strides = array<i32>} : memref<72x1024xf32, #tpu.memory_space<vmem>>, vector<72x1024xf32>,
    %cst_7 = arith.constant 0.000000e+00 : f32
    %7 = vector.broadcast %cst_7 : f32 to vector<8x256xf32>
    %c0_8 = arith.constant 0 : index
    %c0_9 = arith.constant 0 : index
    %8 = vector.load %arg14[%c0_8, %c0_9] : memref<8x256xf32, #tpu.memory_space<vmem>>, vector<8x256xf32>
    tpu.vector_store %arg14[%c0_8, %c0_9], %7 {strides = array<i32>} : memref<8x256xf32, #tpu.memory_space<vmem>>, vector<8x256xf32>,
    %cst_10 = arith.constant 0.000000e+00 : f32
    %9 = vector.broadcast %cst_10 : f32 to vector<8x256xf32>
    %c0_11 = arith.constant 0 : index
    %c0_12 = arith.constant 0 : index
    %10 = vector.load %arg15[%c0_11, %c0_12] : memref<8x256xf32, #tpu.memory_space<vmem>>, vector<8x256xf32>
    tpu.vector_store %arg15[%c0_11, %c0_12], %9 {strides = array<i32>} : memref<8x256xf32, #tpu.memory_space<vmem>>, vector<8x256xf32>,
    %c0_i32 = arith.constant 0 : i32
    %c9_i32 = arith.constant 9 : i32
    %11 = arith.addi %c0_i32, %c9_i32 : i32
    %c1_i32 = arith.constant 1 : i32
    scf.for %arg16 = %c0_i32 to %11 step %c1_i32  : i32 {
      %c8_i32 = arith.constant 8 : i32
      %44 = arith.subi %c8_i32, %arg16 : i32
      %c8_i32_62 = arith.constant 8 : i32
      %45 = arith.muli %arg16, %c8_i32_62 : i32
      %46 = tpu.assume_multiple %45, 8 : i32
      %c8_i32_63 = arith.constant 8 : i32
      %47 = arith.muli %44, %c8_i32_63 : i32
      %48 = tpu.assume_multiple %47, 8 : i32
      %c0_64 = arith.constant 0 : index
      %c0_65 = arith.constant 0 : index
      %49 = vector.load %arg14[%c0_64, %c0_65] : memref<8x256xf32, #tpu.memory_space<vmem>>, vector<8x256xf32>
      %c0_66 = arith.constant 0 : index
      %c0_67 = arith.constant 0 : index
      %50 = vector.load %arg2[%c0_66, %c0_67] : memref<256x1024xf32, #tpu.memory_space<vmem>>, vector<256x1024xf32>
      %cst_68 = arith.constant dense<0.000000e+00> : vector<8x1024xf32>
      %51 = tpu.matmul %49, %50, %cst_68 {dimension_numbers = #tpu.dot_dimension_numbers<[1], [0], [0], [1], [0, 0, 1, 1], [], []>} : vector<8x256xf32>, vector<256x1024xf32>, vector<8x1024xf32> -> vector<8x1024xf32>
      %52 = vector.extract_strided_slice %51 {offsets = [0, 0], sizes = [8, 512], strides = [1, 1]} : vector<8x1024xf32> to vector<8x512xf32>
      %53 = arith.index_cast %46 : i32 to index
      %c0_69 = arith.constant 0 : index
      %54 = vector.load %arg11[%53, %c0_69] : memref<72x1024xf32, #tpu.memory_space<vmem>>, vector<8x1024xf32>
      %55 = vector.extract_strided_slice %54 {offsets = [0, 0], sizes = [8, 512], strides = [1, 1]} : vector<8x1024xf32> to vector<8x512xf32>
      %56 = arith.addf %52, %55 : vector<8x512xf32>
      %57 = vector.extract_strided_slice %51 {offsets = [0, 512], sizes = [8, 512], strides = [1, 1]} : vector<8x1024xf32> to vector<8x512xf32>
      %58 = arith.index_cast %48 : i32 to index
      %c0_70 = arith.constant 0 : index
      %59 = vector.load %arg11[%58, %c0_70] : memref<72x1024xf32, #tpu.memory_space<vmem>>, vector<8x1024xf32>
      %60 = vector.extract_strided_slice %59 {offsets = [0, 512], sizes = [8, 512], strides = [1, 1]} : vector<8x1024xf32> to vector<8x512xf32>
      %61 = arith.addf %57, %60 : vector<8x512xf32>
      %c0_71 = arith.constant 0 : index
      %c0_72 = arith.constant 0 : index
      %62 = vector.load %arg15[%c0_71, %c0_72] : memref<8x256xf32, #tpu.memory_space<vmem>>, vector<8x256xf32>
      %63 = vector.extract_strided_slice %62 {offsets = [0, 0], sizes = [8, 128], strides = [1, 1]} : vector<8x256xf32> to vector<8x128xf32>
      %64 = vector.extract_strided_slice %56 {offsets = [0, 0], sizes = [8, 128], strides = [1, 1]} : vector<8x512xf32> to vector<8x128xf32>
      %cst_73 = arith.constant 5.000000e-01 : f32
      %65 = vector.broadcast %cst_73 : f32 to vector<8x128xf32>
      %66 = arith.mulf %65, %64 : vector<8x128xf32>
      %67 = math.tanh %66 : vector<8x128xf32>
      %cst_74 = arith.constant 1.000000e+00 : f32
      %68 = vector.broadcast %cst_74 : f32 to vector<8x128xf32>
      %69 = arith.addf %67, %68 : vector<8x128xf32>
      %cst_75 = arith.constant 5.000000e-01 : f32
      %70 = vector.broadcast %cst_75 : f32 to vector<8x128xf32>
      %71 = arith.mulf %70, %69 : vector<8x128xf32>
      %72 = vector.extract_strided_slice %56 {offsets = [0, 128], sizes = [8, 128], strides = [1, 1]} : vector<8x512xf32> to vector<8x128xf32>
      %cst_76 = arith.constant 5.000000e-01 : f32
      %73 = vector.broadcast %cst_76 : f32 to vector<8x128xf32>
      %74 = arith.mulf %73, %72 : vector<8x128xf32>
      %75 = math.tanh %74 : vector<8x128xf32>
      %cst_77 = arith.constant 1.000000e+00 : f32
      %76 = vector.broadcast %cst_77 : f32 to vector<8x128xf32>
      %77 = arith.addf %75, %76 : vector<8x128xf32>
      %cst_78 = arith.constant 5.000000e-01 : f32
      %78 = vector.broadcast %cst_78 : f32 to vector<8x128xf32>
      %79 = arith.mulf %78, %77 : vector<8x128xf32>
      %80 = vector.extract_strided_slice %56 {offsets = [0, 256], sizes = [8, 128], strides = [1, 1]} : vector<8x512xf32> to vector<8x128xf32>
      %81 = math.tanh %80 : vector<8x128xf32>
      %82 = vector.extract_strided_slice %56 {offsets = [0, 384], sizes = [8, 128], strides = [1, 1]} : vector<8x512xf32> to vector<8x128xf32>
      %cst_79 = arith.constant 5.000000e-01 : f32
      %83 = vector.broadcast %cst_79 : f32 to vector<8x128xf32>
      %84 = arith.mulf %83, %82 : vector<8x128xf32>
      %85 = math.tanh %84 : vector<8x128xf32>
      %cst_80 = arith.constant 1.000000e+00 : f32
      %86 = vector.broadcast %cst_80 : f32 to vector<8x128xf32>
      %87 = arith.addf %85, %86 : vector<8x128xf32>
      %cst_81 = arith.constant 5.000000e-01 : f32
      %88 = vector.broadcast %cst_81 : f32 to vector<8x128xf32>
      %89 = arith.mulf %88, %87 : vector<8x128xf32>
      %90 = arith.mulf %79, %63 : vector<8x128xf32>
      %91 = arith.mulf %71, %81 : vector<8x128xf32>
      %92 = arith.addf %90, %91 : vector<8x128xf32>
      %93 = math.tanh %92 : vector<8x128xf32>
      %94 = arith.mulf %89, %93 : vector<8x128xf32>
      %95 = vector.extract_strided_slice %62 {offsets = [0, 128], sizes = [8, 128], strides = [1, 1]} : vector<8x256xf32> to vector<8x128xf32>
      %96 = vector.extract_strided_slice %61 {offsets = [0, 0], sizes = [8, 128], strides = [1, 1]} : vector<8x512xf32> to vector<8x128xf32>
      %cst_82 = arith.constant 5.000000e-01 : f32
      %97 = vector.broadcast %cst_82 : f32 to vector<8x128xf32>
      %98 = arith.mulf %97, %96 : vector<8x128xf32>
      %99 = math.tanh %98 : vector<8x128xf32>
      %cst_83 = arith.constant 1.000000e+00 : f32
      %100 = vector.broadcast %cst_83 : f32 to vector<8x128xf32>
      %101 = arith.addf %99, %100 : vector<8x128xf32>
      %cst_84 = arith.constant 5.000000e-01 : f32
      %102 = vector.broadcast %cst_84 : f32 to vector<8x128xf32>
      %103 = arith.mulf %102, %101 : vector<8x128xf32>
      %104 = vector.extract_strided_slice %61 {offsets = [0, 128], sizes = [8, 128], strides = [1, 1]} : vector<8x512xf32> to vector<8x128xf32>
      %cst_85 = arith.constant 5.000000e-01 : f32
      %105 = vector.broadcast %cst_85 : f32 to vector<8x128xf32>
      %106 = arith.mulf %105, %104 : vector<8x128xf32>
      %107 = math.tanh %106 : vector<8x128xf32>
      %cst_86 = arith.constant 1.000000e+00 : f32
      %108 = vector.broadcast %cst_86 : f32 to vector<8x128xf32>
      %109 = arith.addf %107, %108 : vector<8x128xf32>
      %cst_87 = arith.constant 5.000000e-01 : f32
      %110 = vector.broadcast %cst_87 : f32 to vector<8x128xf32>
      %111 = arith.mulf %110, %109 : vector<8x128xf32>
      %112 = vector.extract_strided_slice %61 {offsets = [0, 256], sizes = [8, 128], strides = [1, 1]} : vector<8x512xf32> to vector<8x128xf32>
      %113 = math.tanh %112 : vector<8x128xf32>
      %114 = vector.extract_strided_slice %61 {offsets = [0, 384], sizes = [8, 128], strides = [1, 1]} : vector<8x512xf32> to vector<8x128xf32>
      %cst_88 = arith.constant 5.000000e-01 : f32
      %115 = vector.broadcast %cst_88 : f32 to vector<8x128xf32>
      %116 = arith.mulf %115, %114 : vector<8x128xf32>
      %117 = math.tanh %116 : vector<8x128xf32>
      %cst_89 = arith.constant 1.000000e+00 : f32
      %118 = vector.broadcast %cst_89 : f32 to vector<8x128xf32>
      %119 = arith.addf %117, %118 : vector<8x128xf32>
      %cst_90 = arith.constant 5.000000e-01 : f32
      %120 = vector.broadcast %cst_90 : f32 to vector<8x128xf32>
      %121 = arith.mulf %120, %119 : vector<8x128xf32>
      %122 = arith.mulf %111, %95 : vector<8x128xf32>
      %123 = arith.mulf %103, %113 : vector<8x128xf32>
      %124 = arith.addf %122, %123 : vector<8x128xf32>
      %125 = math.tanh %124 : vector<8x128xf32>
      %126 = arith.mulf %121, %125 : vector<8x128xf32>
      %127 = tpu.concatenate %94, %126 in 1 : vector<8x128xf32>, vector<8x128xf32> -> vector<8x256xf32>
      %c0_91 = arith.constant 0 : index
      %c0_92 = arith.constant 0 : index
      %128 = vector.load %arg14[%c0_91, %c0_92] : memref<8x256xf32, #tpu.memory_space<vmem>>, vector<8x256xf32>
      tpu.vector_store %arg14[%c0_91, %c0_92], %127 {strides = array<i32>} : memref<8x256xf32, #tpu.memory_space<vmem>>, vector<8x256xf32>,
      %129 = tpu.concatenate %92, %124 in 1 : vector<8x128xf32>, vector<8x128xf32> -> vector<8x256xf32>
      %c0_93 = arith.constant 0 : index
      %c0_94 = arith.constant 0 : index
      %130 = vector.load %arg15[%c0_93, %c0_94] : memref<8x256xf32, #tpu.memory_space<vmem>>, vector<8x256xf32>
      tpu.vector_store %arg15[%c0_93, %c0_94], %129 {strides = array<i32>} : memref<8x256xf32, #tpu.memory_space<vmem>>, vector<8x256xf32>,
      %131 = arith.index_cast %46 : i32 to index
      %c0_95 = arith.constant 0 : index
      %132 = vector.load %arg12[%131, %c0_95] : memref<72x128xf32, #tpu.memory_space<vmem>>, vector<8x128xf32>
      tpu.vector_store %arg12[%131, %c0_95], %94 {strides = array<i32>} : memref<72x128xf32, #tpu.memory_space<vmem>>, vector<8x128xf32>,
      %133 = arith.index_cast %48 : i32 to index
      %c0_96 = arith.constant 0 : index
      %134 = vector.load %arg13[%133, %c0_96] : memref<72x128xf32, #tpu.memory_space<vmem>>, vector<8x128xf32>
      tpu.vector_store %arg13[%133, %c0_96], %126 {strides = array<i32>} : memref<72x128xf32, #tpu.memory_space<vmem>>, vector<8x128xf32>,
    }
    %c9_i32_13 = arith.constant 9 : i32
    %c0_14 = arith.constant 0 : index
    %c0_15 = arith.constant 0 : index
    %12 = vector.load %arg12[%c0_14, %c0_15] : memref<72x128xf32, #tpu.memory_space<vmem>>, vector<72x128xf32>
    %c0_16 = arith.constant 0 : index
    %c0_17 = arith.constant 0 : index
    %13 = vector.load %arg13[%c0_16, %c0_17] : memref<72x128xf32, #tpu.memory_space<vmem>>, vector<72x128xf32>
    %14 = tpu.concatenate %12, %13 in 1 : vector<72x128xf32>, vector<72x128xf32> -> vector<72x256xf32>
    %c0_18 = arith.constant 0 : index
    %c0_19 = arith.constant 0 : index
    %15 = vector.load %arg4[%c0_18, %c0_19] : memref<256x1024xf32, #tpu.memory_space<vmem>>, vector<256x1024xf32>
    %cst_20 = arith.constant dense<0.000000e+00> : vector<72x1024xf32>
    %16 = tpu.matmul %14, %15, %cst_20 {dimension_numbers = #tpu.dot_dimension_numbers<[1], [0], [0], [1], [0, 0, 1, 1], [], []>} : vector<72x256xf32>, vector<256x1024xf32>, vector<72x1024xf32> -> vector<72x1024xf32>
    %c0_21 = arith.constant 0 : index
    %c0_22 = arith.constant 0 : index
    %17 = vector.load %arg6[%c0_21, %c0_22] : memref<1x1024xf32, #tpu.memory_space<vmem>>, vector<1x1024xf32>
    %18 = vector.broadcast %17 : vector<1x1024xf32> to vector<72x1024xf32>
    %19 = arith.addf %16, %18 : vector<72x1024xf32>
    %c0_23 = arith.constant 0 : index
    %c0_24 = arith.constant 0 : index
    %20 = vector.load %arg11[%c0_23, %c0_24] : memref<72x1024xf32, #tpu.memory_space<vmem>>, vector<72x1024xf32>
    tpu.vector_store %arg11[%c0_23, %c0_24], %19 {strides = array<i32>} : memref<72x1024xf32, #tpu.memory_space<vmem>>, vector<72x1024xf32>,
    %cst_25 = arith.constant 0.000000e+00 : f32
    %21 = vector.broadcast %cst_25 : f32 to vector<8x256xf32>
    %c0_26 = arith.constant 0 : index
    %c0_27 = arith.constant 0 : index
    %22 = vector.load %arg14[%c0_26, %c0_27] : memref<8x256xf32, #tpu.memory_space<vmem>>, vector<8x256xf32>
    tpu.vector_store %arg14[%c0_26, %c0_27], %21 {strides = array<i32>} : memref<8x256xf32, #tpu.memory_space<vmem>>, vector<8x256xf32>,
    %cst_28 = arith.constant 0.000000e+00 : f32
    %23 = vector.broadcast %cst_28 : f32 to vector<8x256xf32>
    %c0_29 = arith.constant 0 : index
    %c0_30 = arith.constant 0 : index
    %24 = vector.load %arg15[%c0_29, %c0_30] : memref<8x256xf32, #tpu.memory_space<vmem>>, vector<8x256xf32>
    tpu.vector_store %arg15[%c0_29, %c0_30], %23 {strides = array<i32>} : memref<8x256xf32, #tpu.memory_space<vmem>>, vector<8x256xf32>,
    %c0_i32_31 = arith.constant 0 : i32
    %c9_i32_32 = arith.constant 9 : i32
    %25 = arith.addi %c0_i32_31, %c9_i32_32 : i32
    %c1_i32_33 = arith.constant 1 : i32
    scf.for %arg16 = %c0_i32_31 to %25 step %c1_i32_33  : i32 {
      %c8_i32 = arith.constant 8 : i32
      %44 = arith.subi %c8_i32, %arg16 : i32
      %c8_i32_62 = arith.constant 8 : i32
      %45 = arith.muli %arg16, %c8_i32_62 : i32
      %46 = tpu.assume_multiple %45, 8 : i32
      %c8_i32_63 = arith.constant 8 : i32
      %47 = arith.muli %44, %c8_i32_63 : i32
      %48 = tpu.assume_multiple %47, 8 : i32
      %c0_64 = arith.constant 0 : index
      %c0_65 = arith.constant 0 : index
      %49 = vector.load %arg14[%c0_64, %c0_65] : memref<8x256xf32, #tpu.memory_space<vmem>>, vector<8x256xf32>
      %c0_66 = arith.constant 0 : index
      %c0_67 = arith.constant 0 : index
      %50 = vector.load %arg5[%c0_66, %c0_67] : memref<256x1024xf32, #tpu.memory_space<vmem>>, vector<256x1024xf32>
      %cst_68 = arith.constant dense<0.000000e+00> : vector<8x1024xf32>
      %51 = tpu.matmul %49, %50, %cst_68 {dimension_numbers = #tpu.dot_dimension_numbers<[1], [0], [0], [1], [0, 0, 1, 1], [], []>} : vector<8x256xf32>, vector<256x1024xf32>, vector<8x1024xf32> -> vector<8x1024xf32>
      %52 = vector.extract_strided_slice %51 {offsets = [0, 0], sizes = [8, 512], strides = [1, 1]} : vector<8x1024xf32> to vector<8x512xf32>
      %53 = arith.index_cast %46 : i32 to index
      %c0_69 = arith.constant 0 : index
      %54 = vector.load %arg11[%53, %c0_69] : memref<72x1024xf32, #tpu.memory_space<vmem>>, vector<8x1024xf32>
      %55 = vector.extract_strided_slice %54 {offsets = [0, 0], sizes = [8, 512], strides = [1, 1]} : vector<8x1024xf32> to vector<8x512xf32>
      %56 = arith.addf %52, %55 : vector<8x512xf32>
      %57 = vector.extract_strided_slice %51 {offsets = [0, 512], sizes = [8, 512], strides = [1, 1]} : vector<8x1024xf32> to vector<8x512xf32>
      %58 = arith.index_cast %48 : i32 to index
      %c0_70 = arith.constant 0 : index
      %59 = vector.load %arg11[%58, %c0_70] : memref<72x1024xf32, #tpu.memory_space<vmem>>, vector<8x1024xf32>
      %60 = vector.extract_strided_slice %59 {offsets = [0, 512], sizes = [8, 512], strides = [1, 1]} : vector<8x1024xf32> to vector<8x512xf32>
      %61 = arith.addf %57, %60 : vector<8x512xf32>
      %c0_71 = arith.constant 0 : index
      %c0_72 = arith.constant 0 : index
      %62 = vector.load %arg15[%c0_71, %c0_72] : memref<8x256xf32, #tpu.memory_space<vmem>>, vector<8x256xf32>
      %63 = vector.extract_strided_slice %62 {offsets = [0, 0], sizes = [8, 128], strides = [1, 1]} : vector<8x256xf32> to vector<8x128xf32>
      %64 = vector.extract_strided_slice %56 {offsets = [0, 0], sizes = [8, 128], strides = [1, 1]} : vector<8x512xf32> to vector<8x128xf32>
      %cst_73 = arith.constant 5.000000e-01 : f32
      %65 = vector.broadcast %cst_73 : f32 to vector<8x128xf32>
      %66 = arith.mulf %65, %64 : vector<8x128xf32>
      %67 = math.tanh %66 : vector<8x128xf32>
      %cst_74 = arith.constant 1.000000e+00 : f32
      %68 = vector.broadcast %cst_74 : f32 to vector<8x128xf32>
      %69 = arith.addf %67, %68 : vector<8x128xf32>
      %cst_75 = arith.constant 5.000000e-01 : f32
      %70 = vector.broadcast %cst_75 : f32 to vector<8x128xf32>
      %71 = arith.mulf %70, %69 : vector<8x128xf32>
      %72 = vector.extract_strided_slice %56 {offsets = [0, 128], sizes = [8, 128], strides = [1, 1]} : vector<8x512xf32> to vector<8x128xf32>
      %cst_76 = arith.constant 5.000000e-01 : f32
      %73 = vector.broadcast %cst_76 : f32 to vector<8x128xf32>
      %74 = arith.mulf %73, %72 : vector<8x128xf32>
      %75 = math.tanh %74 : vector<8x128xf32>
      %cst_77 = arith.constant 1.000000e+00 : f32
      %76 = vector.broadcast %cst_77 : f32 to vector<8x128xf32>
      %77 = arith.addf %75, %76 : vector<8x128xf32>
      %cst_78 = arith.constant 5.000000e-01 : f32
      %78 = vector.broadcast %cst_78 : f32 to vector<8x128xf32>
      %79 = arith.mulf %78, %77 : vector<8x128xf32>
      %80 = vector.extract_strided_slice %56 {offsets = [0, 256], sizes = [8, 128], strides = [1, 1]} : vector<8x512xf32> to vector<8x128xf32>
      %81 = math.tanh %80 : vector<8x128xf32>
      %82 = vector.extract_strided_slice %56 {offsets = [0, 384], sizes = [8, 128], strides = [1, 1]} : vector<8x512xf32> to vector<8x128xf32>
      %cst_79 = arith.constant 5.000000e-01 : f32
      %83 = vector.broadcast %cst_79 : f32 to vector<8x128xf32>
      %84 = arith.mulf %83, %82 : vector<8x128xf32>
      %85 = math.tanh %84 : vector<8x128xf32>
      %cst_80 = arith.constant 1.000000e+00 : f32
      %86 = vector.broadcast %cst_80 : f32 to vector<8x128xf32>
      %87 = arith.addf %85, %86 : vector<8x128xf32>
      %cst_81 = arith.constant 5.000000e-01 : f32
      %88 = vector.broadcast %cst_81 : f32 to vector<8x128xf32>
      %89 = arith.mulf %88, %87 : vector<8x128xf32>
      %90 = arith.mulf %79, %63 : vector<8x128xf32>
      %91 = arith.mulf %71, %81 : vector<8x128xf32>
      %92 = arith.addf %90, %91 : vector<8x128xf32>
      %93 = math.tanh %92 : vector<8x128xf32>
      %94 = arith.mulf %89, %93 : vector<8x128xf32>
      %95 = vector.extract_strided_slice %62 {offsets = [0, 128], sizes = [8, 128], strides = [1, 1]} : vector<8x256xf32> to vector<8x128xf32>
      %96 = vector.extract_strided_slice %61 {offsets = [0, 0], sizes = [8, 128], strides = [1, 1]} : vector<8x512xf32> to vector<8x128xf32>
      %cst_82 = arith.constant 5.000000e-01 : f32
      %97 = vector.broadcast %cst_82 : f32 to vector<8x128xf32>
      %98 = arith.mulf %97, %96 : vector<8x128xf32>
      %99 = math.tanh %98 : vector<8x128xf32>
      %cst_83 = arith.constant 1.000000e+00 : f32
      %100 = vector.broadcast %cst_83 : f32 to vector<8x128xf32>
      %101 = arith.addf %99, %100 : vector<8x128xf32>
      %cst_84 = arith.constant 5.000000e-01 : f32
      %102 = vector.broadcast %cst_84 : f32 to vector<8x128xf32>
      %103 = arith.mulf %102, %101 : vector<8x128xf32>
      %104 = vector.extract_strided_slice %61 {offsets = [0, 128], sizes = [8, 128], strides = [1, 1]} : vector<8x512xf32> to vector<8x128xf32>
      %cst_85 = arith.constant 5.000000e-01 : f32
      %105 = vector.broadcast %cst_85 : f32 to vector<8x128xf32>
      %106 = arith.mulf %105, %104 : vector<8x128xf32>
      %107 = math.tanh %106 : vector<8x128xf32>
      %cst_86 = arith.constant 1.000000e+00 : f32
      %108 = vector.broadcast %cst_86 : f32 to vector<8x128xf32>
      %109 = arith.addf %107, %108 : vector<8x128xf32>
      %cst_87 = arith.constant 5.000000e-01 : f32
      %110 = vector.broadcast %cst_87 : f32 to vector<8x128xf32>
      %111 = arith.mulf %110, %109 : vector<8x128xf32>
      %112 = vector.extract_strided_slice %61 {offsets = [0, 256], sizes = [8, 128], strides = [1, 1]} : vector<8x512xf32> to vector<8x128xf32>
      %113 = math.tanh %112 : vector<8x128xf32>
      %114 = vector.extract_strided_slice %61 {offsets = [0, 384], sizes = [8, 128], strides = [1, 1]} : vector<8x512xf32> to vector<8x128xf32>
      %cst_88 = arith.constant 5.000000e-01 : f32
      %115 = vector.broadcast %cst_88 : f32 to vector<8x128xf32>
      %116 = arith.mulf %115, %114 : vector<8x128xf32>
      %117 = math.tanh %116 : vector<8x128xf32>
      %cst_89 = arith.constant 1.000000e+00 : f32
      %118 = vector.broadcast %cst_89 : f32 to vector<8x128xf32>
      %119 = arith.addf %117, %118 : vector<8x128xf32>
      %cst_90 = arith.constant 5.000000e-01 : f32
      %120 = vector.broadcast %cst_90 : f32 to vector<8x128xf32>
      %121 = arith.mulf %120, %119 : vector<8x128xf32>
      %122 = arith.mulf %111, %95 : vector<8x128xf32>
      %123 = arith.mulf %103, %113 : vector<8x128xf32>
      %124 = arith.addf %122, %123 : vector<8x128xf32>
      %125 = math.tanh %124 : vector<8x128xf32>
      %126 = arith.mulf %121, %125 : vector<8x128xf32>
      %127 = tpu.concatenate %94, %126 in 1 : vector<8x128xf32>, vector<8x128xf32> -> vector<8x256xf32>
      %c0_91 = arith.constant 0 : index
      %c0_92 = arith.constant 0 : index
      %128 = vector.load %arg14[%c0_91, %c0_92] : memref<8x256xf32, #tpu.memory_space<vmem>>, vector<8x256xf32>
      tpu.vector_store %arg14[%c0_91, %c0_92], %127 {strides = array<i32>} : memref<8x256xf32, #tpu.memory_space<vmem>>, vector<8x256xf32>,
      %129 = tpu.concatenate %92, %124 in 1 : vector<8x128xf32>, vector<8x128xf32> -> vector<8x256xf32>
      %c0_93 = arith.constant 0 : index
      %c0_94 = arith.constant 0 : index
      %130 = vector.load %arg15[%c0_93, %c0_94] : memref<8x256xf32, #tpu.memory_space<vmem>>, vector<8x256xf32>
      tpu.vector_store %arg15[%c0_93, %c0_94], %129 {strides = array<i32>} : memref<8x256xf32, #tpu.memory_space<vmem>>, vector<8x256xf32>,
      %131 = arith.index_cast %46 : i32 to index
      %c0_95 = arith.constant 0 : index
      %132 = vector.load %arg12[%131, %c0_95] : memref<72x128xf32, #tpu.memory_space<vmem>>, vector<8x128xf32>
      tpu.vector_store %arg12[%131, %c0_95], %94 {strides = array<i32>} : memref<72x128xf32, #tpu.memory_space<vmem>>, vector<8x128xf32>,
      %133 = arith.index_cast %48 : i32 to index
      %c0_96 = arith.constant 0 : index
      %134 = vector.load %arg13[%133, %c0_96] : memref<72x128xf32, #tpu.memory_space<vmem>>, vector<8x128xf32>
      tpu.vector_store %arg13[%133, %c0_96], %126 {strides = array<i32>} : memref<72x128xf32, #tpu.memory_space<vmem>>, vector<8x128xf32>,
    }
    %c9_i32_34 = arith.constant 9 : i32
    %c0_35 = arith.constant 0 : index
    %c0_36 = arith.constant 0 : index
    %26 = vector.load %arg12[%c0_35, %c0_36] : memref<72x128xf32, #tpu.memory_space<vmem>>, vector<72x128xf32>
    %c0_37 = arith.constant 0 : index
    %c0_38 = arith.constant 0 : index
    %27 = vector.load %arg13[%c0_37, %c0_38] : memref<72x128xf32, #tpu.memory_space<vmem>>, vector<72x128xf32>
    %28 = tpu.concatenate %26, %27 in 1 : vector<72x128xf32>, vector<72x128xf32> -> vector<72x256xf32>
    %c0_39 = arith.constant 0 : index
    %c0_40 = arith.constant 0 : index
    %29 = vector.load %arg7[%c0_39, %c0_40] : memref<256x1024xf32, #tpu.memory_space<vmem>>, vector<256x1024xf32>
    %cst_41 = arith.constant dense<0.000000e+00> : vector<72x1024xf32>
    %30 = tpu.matmul %28, %29, %cst_41 {dimension_numbers = #tpu.dot_dimension_numbers<[1], [0], [0], [1], [0, 0, 1, 1], [], []>} : vector<72x256xf32>, vector<256x1024xf32>, vector<72x1024xf32> -> vector<72x1024xf32>
    %c0_42 = arith.constant 0 : index
    %c0_43 = arith.constant 0 : index
    %31 = vector.load %arg9[%c0_42, %c0_43] : memref<1x1024xf32, #tpu.memory_space<vmem>>, vector<1x1024xf32>
    %32 = vector.broadcast %31 : vector<1x1024xf32> to vector<72x1024xf32>
    %33 = arith.addf %30, %32 : vector<72x1024xf32>
    %c0_44 = arith.constant 0 : index
    %c0_45 = arith.constant 0 : index
    %34 = vector.load %arg11[%c0_44, %c0_45] : memref<72x1024xf32, #tpu.memory_space<vmem>>, vector<72x1024xf32>
    tpu.vector_store %arg11[%c0_44, %c0_45], %33 {strides = array<i32>} : memref<72x1024xf32, #tpu.memory_space<vmem>>, vector<72x1024xf32>,
    %cst_46 = arith.constant 0.000000e+00 : f32
    %35 = vector.broadcast %cst_46 : f32 to vector<8x256xf32>
    %c0_47 = arith.constant 0 : index
    %c0_48 = arith.constant 0 : index
    %36 = vector.load %arg14[%c0_47, %c0_48] : memref<8x256xf32, #tpu.memory_space<vmem>>, vector<8x256xf32>
    tpu.vector_store %arg14[%c0_47, %c0_48], %35 {strides = array<i32>} : memref<8x256xf32, #tpu.memory_space<vmem>>, vector<8x256xf32>,
    %cst_49 = arith.constant 0.000000e+00 : f32
    %37 = vector.broadcast %cst_49 : f32 to vector<8x256xf32>
    %c0_50 = arith.constant 0 : index
    %c0_51 = arith.constant 0 : index
    %38 = vector.load %arg15[%c0_50, %c0_51] : memref<8x256xf32, #tpu.memory_space<vmem>>, vector<8x256xf32>
    tpu.vector_store %arg15[%c0_50, %c0_51], %37 {strides = array<i32>} : memref<8x256xf32, #tpu.memory_space<vmem>>, vector<8x256xf32>,
    %c0_i32_52 = arith.constant 0 : i32
    %c9_i32_53 = arith.constant 9 : i32
    %39 = arith.addi %c0_i32_52, %c9_i32_53 : i32
    %c1_i32_54 = arith.constant 1 : i32
    scf.for %arg16 = %c0_i32_52 to %39 step %c1_i32_54  : i32 {
      %c8_i32 = arith.constant 8 : i32
      %44 = arith.subi %c8_i32, %arg16 : i32
      %c8_i32_62 = arith.constant 8 : i32
      %45 = arith.muli %arg16, %c8_i32_62 : i32
      %46 = tpu.assume_multiple %45, 8 : i32
      %c8_i32_63 = arith.constant 8 : i32
      %47 = arith.muli %44, %c8_i32_63 : i32
      %48 = tpu.assume_multiple %47, 8 : i32
      %c0_64 = arith.constant 0 : index
      %c0_65 = arith.constant 0 : index
      %49 = vector.load %arg14[%c0_64, %c0_65] : memref<8x256xf32, #tpu.memory_space<vmem>>, vector<8x256xf32>
      %c0_66 = arith.constant 0 : index
      %c0_67 = arith.constant 0 : index
      %50 = vector.load %arg8[%c0_66, %c0_67] : memref<256x1024xf32, #tpu.memory_space<vmem>>, vector<256x1024xf32>
      %cst_68 = arith.constant dense<0.000000e+00> : vector<8x1024xf32>
      %51 = tpu.matmul %49, %50, %cst_68 {dimension_numbers = #tpu.dot_dimension_numbers<[1], [0], [0], [1], [0, 0, 1, 1], [], []>} : vector<8x256xf32>, vector<256x1024xf32>, vector<8x1024xf32> -> vector<8x1024xf32>
      %52 = vector.extract_strided_slice %51 {offsets = [0, 0], sizes = [8, 512], strides = [1, 1]} : vector<8x1024xf32> to vector<8x512xf32>
      %53 = arith.index_cast %46 : i32 to index
      %c0_69 = arith.constant 0 : index
      %54 = vector.load %arg11[%53, %c0_69] : memref<72x1024xf32, #tpu.memory_space<vmem>>, vector<8x1024xf32>
      %55 = vector.extract_strided_slice %54 {offsets = [0, 0], sizes = [8, 512], strides = [1, 1]} : vector<8x1024xf32> to vector<8x512xf32>
      %56 = arith.addf %52, %55 : vector<8x512xf32>
      %57 = vector.extract_strided_slice %51 {offsets = [0, 512], sizes = [8, 512], strides = [1, 1]} : vector<8x1024xf32> to vector<8x512xf32>
      %58 = arith.index_cast %48 : i32 to index
      %c0_70 = arith.constant 0 : index
      %59 = vector.load %arg11[%58, %c0_70] : memref<72x1024xf32, #tpu.memory_space<vmem>>, vector<8x1024xf32>
      %60 = vector.extract_strided_slice %59 {offsets = [0, 512], sizes = [8, 512], strides = [1, 1]} : vector<8x1024xf32> to vector<8x512xf32>
      %61 = arith.addf %57, %60 : vector<8x512xf32>
      %c0_71 = arith.constant 0 : index
      %c0_72 = arith.constant 0 : index
      %62 = vector.load %arg15[%c0_71, %c0_72] : memref<8x256xf32, #tpu.memory_space<vmem>>, vector<8x256xf32>
      %63 = vector.extract_strided_slice %62 {offsets = [0, 0], sizes = [8, 128], strides = [1, 1]} : vector<8x256xf32> to vector<8x128xf32>
      %64 = vector.extract_strided_slice %56 {offsets = [0, 0], sizes = [8, 128], strides = [1, 1]} : vector<8x512xf32> to vector<8x128xf32>
      %cst_73 = arith.constant 5.000000e-01 : f32
      %65 = vector.broadcast %cst_73 : f32 to vector<8x128xf32>
      %66 = arith.mulf %65, %64 : vector<8x128xf32>
      %67 = math.tanh %66 : vector<8x128xf32>
      %cst_74 = arith.constant 1.000000e+00 : f32
      %68 = vector.broadcast %cst_74 : f32 to vector<8x128xf32>
      %69 = arith.addf %67, %68 : vector<8x128xf32>
      %cst_75 = arith.constant 5.000000e-01 : f32
      %70 = vector.broadcast %cst_75 : f32 to vector<8x128xf32>
      %71 = arith.mulf %70, %69 : vector<8x128xf32>
      %72 = vector.extract_strided_slice %56 {offsets = [0, 128], sizes = [8, 128], strides = [1, 1]} : vector<8x512xf32> to vector<8x128xf32>
      %cst_76 = arith.constant 5.000000e-01 : f32
      %73 = vector.broadcast %cst_76 : f32 to vector<8x128xf32>
      %74 = arith.mulf %73, %72 : vector<8x128xf32>
      %75 = math.tanh %74 : vector<8x128xf32>
      %cst_77 = arith.constant 1.000000e+00 : f32
      %76 = vector.broadcast %cst_77 : f32 to vector<8x128xf32>
      %77 = arith.addf %75, %76 : vector<8x128xf32>
      %cst_78 = arith.constant 5.000000e-01 : f32
      %78 = vector.broadcast %cst_78 : f32 to vector<8x128xf32>
      %79 = arith.mulf %78, %77 : vector<8x128xf32>
      %80 = vector.extract_strided_slice %56 {offsets = [0, 256], sizes = [8, 128], strides = [1, 1]} : vector<8x512xf32> to vector<8x128xf32>
      %81 = math.tanh %80 : vector<8x128xf32>
      %82 = vector.extract_strided_slice %56 {offsets = [0, 384], sizes = [8, 128], strides = [1, 1]} : vector<8x512xf32> to vector<8x128xf32>
      %cst_79 = arith.constant 5.000000e-01 : f32
      %83 = vector.broadcast %cst_79 : f32 to vector<8x128xf32>
      %84 = arith.mulf %83, %82 : vector<8x128xf32>
      %85 = math.tanh %84 : vector<8x128xf32>
      %cst_80 = arith.constant 1.000000e+00 : f32
      %86 = vector.broadcast %cst_80 : f32 to vector<8x128xf32>
      %87 = arith.addf %85, %86 : vector<8x128xf32>
      %cst_81 = arith.constant 5.000000e-01 : f32
      %88 = vector.broadcast %cst_81 : f32 to vector<8x128xf32>
      %89 = arith.mulf %88, %87 : vector<8x128xf32>
      %90 = arith.mulf %79, %63 : vector<8x128xf32>
      %91 = arith.mulf %71, %81 : vector<8x128xf32>
      %92 = arith.addf %90, %91 : vector<8x128xf32>
      %93 = math.tanh %92 : vector<8x128xf32>
      %94 = arith.mulf %89, %93 : vector<8x128xf32>
      %95 = vector.extract_strided_slice %62 {offsets = [0, 128], sizes = [8, 128], strides = [1, 1]} : vector<8x256xf32> to vector<8x128xf32>
      %96 = vector.extract_strided_slice %61 {offsets = [0, 0], sizes = [8, 128], strides = [1, 1]} : vector<8x512xf32> to vector<8x128xf32>
      %cst_82 = arith.constant 5.000000e-01 : f32
      %97 = vector.broadcast %cst_82 : f32 to vector<8x128xf32>
      %98 = arith.mulf %97, %96 : vector<8x128xf32>
      %99 = math.tanh %98 : vector<8x128xf32>
      %cst_83 = arith.constant 1.000000e+00 : f32
      %100 = vector.broadcast %cst_83 : f32 to vector<8x128xf32>
      %101 = arith.addf %99, %100 : vector<8x128xf32>
      %cst_84 = arith.constant 5.000000e-01 : f32
      %102 = vector.broadcast %cst_84 : f32 to vector<8x128xf32>
      %103 = arith.mulf %102, %101 : vector<8x128xf32>
      %104 = vector.extract_strided_slice %61 {offsets = [0, 128], sizes = [8, 128], strides = [1, 1]} : vector<8x512xf32> to vector<8x128xf32>
      %cst_85 = arith.constant 5.000000e-01 : f32
      %105 = vector.broadcast %cst_85 : f32 to vector<8x128xf32>
      %106 = arith.mulf %105, %104 : vector<8x128xf32>
      %107 = math.tanh %106 : vector<8x128xf32>
      %cst_86 = arith.constant 1.000000e+00 : f32
      %108 = vector.broadcast %cst_86 : f32 to vector<8x128xf32>
      %109 = arith.addf %107, %108 : vector<8x128xf32>
      %cst_87 = arith.constant 5.000000e-01 : f32
      %110 = vector.broadcast %cst_87 : f32 to vector<8x128xf32>
      %111 = arith.mulf %110, %109 : vector<8x128xf32>
      %112 = vector.extract_strided_slice %61 {offsets = [0, 256], sizes = [8, 128], strides = [1, 1]} : vector<8x512xf32> to vector<8x128xf32>
      %113 = math.tanh %112 : vector<8x128xf32>
      %114 = vector.extract_strided_slice %61 {offsets = [0, 384], sizes = [8, 128], strides = [1, 1]} : vector<8x512xf32> to vector<8x128xf32>
      %cst_88 = arith.constant 5.000000e-01 : f32
      %115 = vector.broadcast %cst_88 : f32 to vector<8x128xf32>
      %116 = arith.mulf %115, %114 : vector<8x128xf32>
      %117 = math.tanh %116 : vector<8x128xf32>
      %cst_89 = arith.constant 1.000000e+00 : f32
      %118 = vector.broadcast %cst_89 : f32 to vector<8x128xf32>
      %119 = arith.addf %117, %118 : vector<8x128xf32>
      %cst_90 = arith.constant 5.000000e-01 : f32
      %120 = vector.broadcast %cst_90 : f32 to vector<8x128xf32>
      %121 = arith.mulf %120, %119 : vector<8x128xf32>
      %122 = arith.mulf %111, %95 : vector<8x128xf32>
      %123 = arith.mulf %103, %113 : vector<8x128xf32>
      %124 = arith.addf %122, %123 : vector<8x128xf32>
      %125 = math.tanh %124 : vector<8x128xf32>
      %126 = arith.mulf %121, %125 : vector<8x128xf32>
      %127 = tpu.concatenate %94, %126 in 1 : vector<8x128xf32>, vector<8x128xf32> -> vector<8x256xf32>
      %c0_91 = arith.constant 0 : index
      %c0_92 = arith.constant 0 : index
      %128 = vector.load %arg14[%c0_91, %c0_92] : memref<8x256xf32, #tpu.memory_space<vmem>>, vector<8x256xf32>
      tpu.vector_store %arg14[%c0_91, %c0_92], %127 {strides = array<i32>} : memref<8x256xf32, #tpu.memory_space<vmem>>, vector<8x256xf32>,
      %129 = tpu.concatenate %92, %124 in 1 : vector<8x128xf32>, vector<8x128xf32> -> vector<8x256xf32>
      %c0_93 = arith.constant 0 : index
      %c0_94 = arith.constant 0 : index
      %130 = vector.load %arg15[%c0_93, %c0_94] : memref<8x256xf32, #tpu.memory_space<vmem>>, vector<8x256xf32>
      tpu.vector_store %arg15[%c0_93, %c0_94], %129 {strides = array<i32>} : memref<8x256xf32, #tpu.memory_space<vmem>>, vector<8x256xf32>,
      %131 = arith.index_cast %46 : i32 to index
      %c0_95 = arith.constant 0 : index
      %132 = vector.load %arg12[%131, %c0_95] : memref<72x128xf32, #tpu.memory_space<vmem>>, vector<8x128xf32>
      tpu.vector_store %arg12[%131, %c0_95], %94 {strides = array<i32>} : memref<72x128xf32, #tpu.memory_space<vmem>>, vector<8x128xf32>,
      %133 = arith.index_cast %48 : i32 to index
      %c0_96 = arith.constant 0 : index
      %134 = vector.load %arg13[%133, %c0_96] : memref<72x128xf32, #tpu.memory_space<vmem>>, vector<8x128xf32>
      tpu.vector_store %arg13[%133, %c0_96], %126 {strides = array<i32>} : memref<72x128xf32, #tpu.memory_space<vmem>>, vector<8x128xf32>,
    }
    %c9_i32_55 = arith.constant 9 : i32
    %c0_56 = arith.constant 0 : index
    %c0_57 = arith.constant 0 : index
    %40 = vector.load %arg12[%c0_56, %c0_57] : memref<72x128xf32, #tpu.memory_space<vmem>>, vector<72x128xf32>
    %c0_58 = arith.constant 0 : index
    %c0_59 = arith.constant 0 : index
    %41 = vector.load %arg13[%c0_58, %c0_59] : memref<72x128xf32, #tpu.memory_space<vmem>>, vector<72x128xf32>
    %42 = tpu.concatenate %40, %41 in 1 : vector<72x128xf32>, vector<72x128xf32> -> vector<72x256xf32>
    %c0_60 = arith.constant 0 : index
    %c0_61 = arith.constant 0 : index
    %43 = vector.load %arg10[%c0_60, %c0_61] : memref<72x256xf32, #tpu.memory_space<vmem>>, vector<72x256xf32>
    tpu.vector_store %arg10[%c0_60, %c0_61], %42 {strides = array<i32>} : memref<72x256xf32, #tpu.memory_space<vmem>>, vector<72x256xf32>,
    return
  }
}

module attributes {stable_mosaic.version = 11 : i64} {
  func.func @_bn_stats_kernel(%arg0: i32, %arg1: memref<24x256xf32, #tpu.memory_space<vmem>>, %arg2: memref<1x256xf32, #tpu.memory_space<vmem>>, %arg3: memref<1x256xf32, #tpu.memory_space<vmem>>) attributes {dimension_semantics = [#tpu.dimension_semantics<arbitrary>], iteration_bounds = array<i64: 1>, scalar_prefetch = 0 : i64, scratch_operands = 0 : i64, tpu.core_type = #tpu.core_type<tc>, window_params = [{transform_indices = @transform_0, window_bounds = array<i64: 24, 256>}, {pipeline_mode = #tpu.pipeline_mode<synchronous>, transform_indices = @transform_1, window_bounds = array<i64: 1, 256>}, {pipeline_mode = #tpu.pipeline_mode<synchronous>, transform_indices = @transform_2, window_bounds = array<i64: 1, 256>}]} {
    %c0_i32 = arith.constant 0 : i32
    %0 = arith.cmpi eq, %arg0, %c0_i32 : i32
    %1 = arith.extui %0 : i1 to i32
    %c0_i32_0 = arith.constant 0 : i32
    %2 = arith.cmpi ne, %1, %c0_i32_0 : i32
    scf.if %2 {
      %cst_11 = arith.constant 0.000000e+00 : f32
      %15 = vector.broadcast %cst_11 : f32 to vector<1x256xf32>
      %c0_12 = arith.constant 0 : index
      %c0_13 = arith.constant 0 : index
      %16 = vector.load %arg2[%c0_12, %c0_13] : memref<1x256xf32, #tpu.memory_space<vmem>>, vector<1x256xf32>
      tpu.vector_store %arg2[%c0_12, %c0_13], %15 {strides = array<i32>} : memref<1x256xf32, #tpu.memory_space<vmem>>, vector<1x256xf32>,
      %cst_14 = arith.constant 0.000000e+00 : f32
      %17 = vector.broadcast %cst_14 : f32 to vector<1x256xf32>
      %c0_15 = arith.constant 0 : index
      %c0_16 = arith.constant 0 : index
      %18 = vector.load %arg3[%c0_15, %c0_16] : memref<1x256xf32, #tpu.memory_space<vmem>>, vector<1x256xf32>
      tpu.vector_store %arg3[%c0_15, %c0_16], %17 {strides = array<i32>} : memref<1x256xf32, #tpu.memory_space<vmem>>, vector<1x256xf32>,
    } else {
    }
    %c0 = arith.constant 0 : index
    %c0_1 = arith.constant 0 : index
    %3 = vector.load %arg1[%c0, %c0_1] : memref<24x256xf32, #tpu.memory_space<vmem>>, vector<24x256xf32>
    %c0_2 = arith.constant 0 : index
    %c0_3 = arith.constant 0 : index
    %4 = vector.load %arg2[%c0_2, %c0_3] : memref<1x256xf32, #tpu.memory_space<vmem>>, vector<1x256xf32>
    %cst = arith.constant dense<0.000000e+00> : vector<256xf32>
    %5 = vector.multi_reduction <add>, %3, %cst [0] : vector<24x256xf32> to vector<256xf32>
    %6 = vector.shape_cast %5 : vector<256xf32> to vector<1x256xf32>
    %7 = arith.addf %4, %6 : vector<1x256xf32>
    %c0_4 = arith.constant 0 : index
    %c0_5 = arith.constant 0 : index
    %8 = vector.load %arg2[%c0_4, %c0_5] : memref<1x256xf32, #tpu.memory_space<vmem>>, vector<1x256xf32>
    tpu.vector_store %arg2[%c0_4, %c0_5], %7 {strides = array<i32>} : memref<1x256xf32, #tpu.memory_space<vmem>>, vector<1x256xf32>,
    %c0_6 = arith.constant 0 : index
    %c0_7 = arith.constant 0 : index
    %9 = vector.load %arg3[%c0_6, %c0_7] : memref<1x256xf32, #tpu.memory_space<vmem>>, vector<1x256xf32>
    %10 = arith.mulf %3, %3 : vector<24x256xf32>
    %cst_8 = arith.constant dense<0.000000e+00> : vector<256xf32>
    %11 = vector.multi_reduction <add>, %10, %cst_8 [0] : vector<24x256xf32> to vector<256xf32>
    %12 = vector.shape_cast %11 : vector<256xf32> to vector<1x256xf32>
    %13 = arith.addf %9, %12 : vector<1x256xf32>
    %c0_9 = arith.constant 0 : index
    %c0_10 = arith.constant 0 : index
    %14 = vector.load %arg3[%c0_9, %c0_10] : memref<1x256xf32, #tpu.memory_space<vmem>>, vector<1x256xf32>
    tpu.vector_store %arg3[%c0_9, %c0_10], %13 {strides = array<i32>} : memref<1x256xf32, #tpu.memory_space<vmem>>, vector<1x256xf32>,
    return
  }
  func.func @transform_0(%arg0: i32) -> (i32, i32) {
    %c0_i32 = arith.constant 0 : i32
    %c0_i32_0 = arith.constant 0 : i32
    return %arg0, %c0_i32 : i32, i32
  }
  func.func @transform_1(%arg0: i32) -> (i32, i32) {
    %c0_i32 = arith.constant 0 : i32
    %c0_i32_0 = arith.constant 0 : i32
    %c0_i32_1 = arith.constant 0 : i32
    return %c0_i32, %c0_i32_0 : i32, i32
  }
  func.func @transform_2(%arg0: i32) -> (i32, i32) {
    %c0_i32 = arith.constant 0 : i32
    %c0_i32_0 = arith.constant 0 : i32
    %c0_i32_1 = arith.constant 0 : i32
    return %c0_i32, %c0_i32_0 : i32, i32
  }
}

module attributes {stable_mosaic.version = 11 : i64} {
  func.func @_bn_proj_sig_kernel(%arg0: i32, %arg1: memref<24x256xf32, #tpu.memory_space<vmem>>, %arg2: memref<1x256xf32, #tpu.memory_space<vmem>>, %arg3: memref<1x256xf32, #tpu.memory_space<vmem>>, %arg4: memref<256x128xf32, #tpu.memory_space<vmem>>, %arg5: memref<1x128xf32, #tpu.memory_space<vmem>>, %arg6: memref<24x128xf32, #tpu.memory_space<vmem>>) attributes {dimension_semantics = [#tpu.dimension_semantics<parallel>], iteration_bounds = array<i64: 1>, scalar_prefetch = 0 : i64, scratch_operands = 0 : i64, tpu.core_type = #tpu.core_type<tc>, window_params = [{transform_indices = @transform_0, window_bounds = array<i64: 24, 256>}, {pipeline_mode = #tpu.pipeline_mode<synchronous>, transform_indices = @transform_1, window_bounds = array<i64: 1, 256>}, {pipeline_mode = #tpu.pipeline_mode<synchronous>, transform_indices = @transform_2, window_bounds = array<i64: 1, 256>}, {pipeline_mode = #tpu.pipeline_mode<synchronous>, transform_indices = @transform_3, window_bounds = array<i64: 256, 128>}, {pipeline_mode = #tpu.pipeline_mode<synchronous>, transform_indices = @transform_4, window_bounds = array<i64: 1, 128>}, {transform_indices = @transform_5, window_bounds = array<i64: 24, 128>}]} {
    %c0 = arith.constant 0 : index
    %c0_0 = arith.constant 0 : index
    %0 = vector.load %arg1[%c0, %c0_0] : memref<24x256xf32, #tpu.memory_space<vmem>>, vector<24x256xf32>
    %c0_1 = arith.constant 0 : index
    %c0_2 = arith.constant 0 : index
    %1 = vector.load %arg2[%c0_1, %c0_2] : memref<1x256xf32, #tpu.memory_space<vmem>>, vector<1x256xf32>
    %2 = vector.broadcast %1 : vector<1x256xf32> to vector<24x256xf32>
    %3 = arith.mulf %0, %2 : vector<24x256xf32>
    %c0_3 = arith.constant 0 : index
    %c0_4 = arith.constant 0 : index
    %4 = vector.load %arg3[%c0_3, %c0_4] : memref<1x256xf32, #tpu.memory_space<vmem>>, vector<1x256xf32>
    %5 = vector.broadcast %4 : vector<1x256xf32> to vector<24x256xf32>
    %6 = arith.addf %3, %5 : vector<24x256xf32>
    %c0_5 = arith.constant 0 : index
    %c0_6 = arith.constant 0 : index
    %7 = vector.load %arg4[%c0_5, %c0_6] : memref<256x128xf32, #tpu.memory_space<vmem>>, vector<256x128xf32>
    %cst = arith.constant dense<0.000000e+00> : vector<24x128xf32>
    %8 = tpu.matmul %6, %7, %cst {dimension_numbers = #tpu.dot_dimension_numbers<[1], [0], [0], [1], [0, 0, 1, 1], [], []>} : vector<24x256xf32>, vector<256x128xf32>, vector<24x128xf32> -> vector<24x128xf32>
    %c0_7 = arith.constant 0 : index
    %c0_8 = arith.constant 0 : index
    %9 = vector.load %arg5[%c0_7, %c0_8] : memref<1x128xf32, #tpu.memory_space<vmem>>, vector<1x128xf32>
    %10 = vector.broadcast %9 : vector<1x128xf32> to vector<24x128xf32>
    %11 = arith.addf %8, %10 : vector<24x128xf32>
    %cst_9 = arith.constant 5.000000e-01 : f32
    %12 = vector.broadcast %cst_9 : f32 to vector<24x128xf32>
    %13 = arith.mulf %12, %11 : vector<24x128xf32>
    %14 = math.tanh %13 : vector<24x128xf32>
    %cst_10 = arith.constant 1.000000e+00 : f32
    %15 = vector.broadcast %cst_10 : f32 to vector<24x128xf32>
    %16 = arith.addf %14, %15 : vector<24x128xf32>
    %cst_11 = arith.constant 5.000000e-01 : f32
    %17 = vector.broadcast %cst_11 : f32 to vector<24x128xf32>
    %18 = arith.mulf %17, %16 : vector<24x128xf32>
    %c0_12 = arith.constant 0 : index
    %c0_13 = arith.constant 0 : index
    %19 = vector.load %arg6[%c0_12, %c0_13] : memref<24x128xf32, #tpu.memory_space<vmem>>, vector<24x128xf32>
    tpu.vector_store %arg6[%c0_12, %c0_13], %18 {strides = array<i32>} : memref<24x128xf32, #tpu.memory_space<vmem>>, vector<24x128xf32>,
    return
  }
  func.func @transform_0(%arg0: i32) -> (i32, i32) {
    %c0_i32 = arith.constant 0 : i32
    %c0_i32_0 = arith.constant 0 : i32
    return %arg0, %c0_i32 : i32, i32
  }
  func.func @transform_1(%arg0: i32) -> (i32, i32) {
    %c0_i32 = arith.constant 0 : i32
    %c0_i32_0 = arith.constant 0 : i32
    %c0_i32_1 = arith.constant 0 : i32
    return %c0_i32, %c0_i32_0 : i32, i32
  }
  func.func @transform_2(%arg0: i32) -> (i32, i32) {
    %c0_i32 = arith.constant 0 : i32
    %c0_i32_0 = arith.constant 0 : i32
    %c0_i32_1 = arith.constant 0 : i32
    return %c0_i32, %c0_i32_0 : i32, i32
  }
  func.func @transform_3(%arg0: i32) -> (i32, i32) {
    %c0_i32 = arith.constant 0 : i32
    %c0_i32_0 = arith.constant 0 : i32
    %c0_i32_1 = arith.constant 0 : i32
    return %c0_i32, %c0_i32_0 : i32, i32
  }
  func.func @transform_4(%arg0: i32) -> (i32, i32) {
    %c0_i32 = arith.constant 0 : i32
    %c0_i32_0 = arith.constant 0 : i32
    %c0_i32_1 = arith.constant 0 : i32
    return %c0_i32, %c0_i32_0 : i32, i32
  }
  func.func @transform_5(%arg0: i32) -> (i32, i32) {
    %c0_i32 = arith.constant 0 : i32
    %c0_i32_0 = arith.constant 0 : i32
    return %arg0, %c0_i32 : i32, i32
  }
}

</mosaic_0001>

<bundles_post_ra>
// kernel: rnn_model_forward.6
= control target key start
LH: loop header
LB: loop body
LE: loop exit
PB: predicated region body
PF: predicated region fallthrough
CT: control target
= control target key end

     0   :  { %v14_v0 = vlaneseq  ;;  %v94_v11 = vmov 0.0   ;;  %vm46_vm1 = vcmask 1040384   ;;  %s158_s0 = inlined_call_operand.vmem [shape: f32[24,256], index: 0, kind: input, shape index: {}]   ;;  %s159_s1 = inlined_call_operand.vmem [shape: f32[1,256], index: 1, kind: output, shape index: {0}]   ;;  %s160_s2 = inlined_call_operand.vmem [shape: f32[1,256], index: 2, kind: output, shape index: {1}]  }
   0x1   :  { %v20_v1 = vld [vmem:[%s158_s0] sm:$0xff]  ;;  %v21_v2 = vld [vmem:[%s158_s0 + $0x8] sm:$0xff]  ;;  %v22_v3 = vld [vmem:[%s158_s0 + $0x10] sm:$0xff] }
   0x2   :  { %vm119_vm0 = vcmp.lt.s32.totalorder %v14_v0, 256  ;;  %v23_v5 = vld [vmem:[%s158_s0 + $0x18] sm:$0xff]  ;;  %v24_v6 = vld [vmem:[%s158_s0 + $0x20] sm:$0xff]  ;;  %v25_v7 = vld [vmem:[%s158_s0 + $0x28] sm:$0xff]  ;;  %v27_v8 = vadd.f32 %v22_v3, %v20_v1  ;;  %v56_v9 = vmul.f32 %v20_v1, %v20_v1  ;;  %v57_v10 = vmul.f32 %v21_v2, %v21_v2 }
   0x3   :  { %18 = vst.msk [vmem:[%s159_s1] sm:$0x3] %vm119_vm0, %v94_v11  ;;  %v35_v12 = vadd.f32 %v23_v5, %v21_v2  ;;  %v58_v13 = vmul.f32 %v22_v3, %v22_v3  ;;  %v59_v14 = vmul.f32 %v23_v5, %v23_v5  ;;  %v60_v15 = vmul.f32 %v24_v6, %v24_v6 }
   0x4   :  { %v28_v16 = vadd.f32 %v27_v8, %v24_v6  ;;  %19 = vst.msk [vmem:[%s160_s2] sm:$0x3] %vm119_vm0, %v94_v11  ;;  %v61_v17 = vmul.f32 %v25_v7, %v25_v7 }
   0x5   :  { %v36_v18 = vadd.f32 %v35_v12, %v25_v7  ;;  %v62_v19 = vadd.f32 %v58_v13, %v56_v9  ;;  %v70_v20 = vadd.f32 %v59_v14, %v57_v10 }
   0x6   :  { %v29_v21 = vrot.slane %v28_v16, 4 }
   0x7   :  { %v37_v22 = vrot.slane %v36_v18, 4  ;;  %v63_v23 = vadd.f32 %v62_v19, %v60_v15  ;;  %v71_v24 = vadd.f32 %v70_v20, %v61_v17 }
   0x8   :  { %v30_v25 = vadd.f32 %v29_v21, %v28_v16 }
   0x9   :  { %v38_v26 = vadd.f32 %v37_v22, %v36_v18  ;;  %v64_v27 = vrot.slane %v63_v23, 4  ;;  %v72_v28 = vrot.slane %v71_v24, 4 }
   0xa   :  { %v31_v29 = vrot.slane %v30_v25, 2  ;;  %v26_v45 = vld [vmem:[%s159_s1] sm:$0x3] }
   0xb   :  { %v39_v30 = vrot.slane %v38_v26, 2  ;;  %v65_v31 = vadd.f32 %v64_v27, %v63_v23  ;;  %v73_v32 = vadd.f32 %v72_v28, %v71_v24  ;;  %v55_v50 = vld [vmem:[%s160_s2] sm:$0x3] }
   0xc   :  { %v32_v33 = vadd.f32 %v31_v29, %v30_v25 }
   0xd   :  { %v40_v34 = vadd.f32 %v39_v30, %v38_v26  ;;  %v66_v35 = vrot.slane %v65_v31, 2  ;;  %v74_v36 = vrot.slane %v73_v32, 2 }
   0xe   :  { %v33_v37 = vrot.slane %v32_v33, 1 }
   0xf   :  { %v41_v38 = vrot.slane %v40_v34, 1  ;;  %v67_v39 = vadd.f32 %v66_v35, %v65_v31  ;;  %v75_v40 = vadd.f32 %v74_v36, %v73_v32 }
  0x10   :  { %v34_v41 = vadd.f32 %v33_v37, %v32_v33 }
  0x11   :  { %v42_v42 = vadd.f32 %v41_v38, %v40_v34  ;;  %v68_v43 = vrot.slane %v67_v39, 1  ;;  %v76_v44 = vrot.slane %v75_v40, 1 }
  0x13   :  { %v45_v46 = vrot.slane %v42_v42, 7  ;;  %v69_v47 = vadd.f32 %v68_v43, %v67_v39  ;;  %v77_v48 = vadd.f32 %v76_v44, %v75_v40 }
  0x15   :  { %v47_v49 = vsel %vm46_vm1, %v34_v41, %v45_v46  ;;  %v80_v51 = vrot.slane %v77_v48, 7 }
  0x16   :  { %v49_v52 = vadd.f32 %v47_v49, %v26_v45 }
  0x17   :  { %v81_v53 = vsel %vm46_vm1, %v69_v47, %v80_v51 }
  0x18   :  { %54 = vst.msk [vmem:[%s159_s1] sm:$0x3] %vm119_vm0, %v49_v52  ;;  %v83_v54 = vadd.f32 %v81_v53, %v55_v50 }
  0x1a   :  { %84 = vst.msk [vmem:[%s160_s2] sm:$0x3] %vm119_vm0, %v83_v54 }

// kernel: rnn_model_forward.4
= control target key start
LH: loop header
LB: loop body
LE: loop exit
PB: predicated region body
PF: predicated region fallthrough
CT: control target
= control target key end

     0   :  { %s3396_s1 = inlined_call_operand.vmem [shape: f32[2048,256], index: 1, kind: input, shape index: {}]   ;;  %s3397_s0 = inlined_call_operand.vmem [shape: f32[24,2048], index: 0, kind: input, shape index: {}]   ;;  %s3398_s2 = inlined_call_operand.vmem [shape: f32[24,128], index: 2, kind: output, shape index: {}]  }
   0x1   :  { %v89_v0 = vld [vmem:[%s3396_s1 + $0xf0] sm:$0xff]  ;;  %v87_v2 = vld [vmem:[%s3396_s1 + $0xe0] sm:$0xff] }
   0x2   :  { %v153_v1 = vld [vmem:[%s3396_s1 + $0x2f0] sm:$0xff]  ;;  %571 = vmatpush.msra.mxu0 %v89_v0  ;;  %v151_v4 = vld [vmem:[%s3396_s1 + $0x2e0] sm:$0xff] }
   0x3   :  { %623 = vmatpush.msra.mxu2 %v153_v1  ;;  %v121_v3 = vld [vmem:[%s3396_s1 + $0x1f0] sm:$0xff]  ;;  %v119_v7 = vld [vmem:[%s3396_s1 + $0x1e0] sm:$0xff] }
   0x4   :  { %v185_v5 = vld [vmem:[%s3396_s1 + $0x3f0] sm:$0xff]  ;;  %597 = vmatpush.msra.mxu1 %v121_v3  ;;  %572 = vmatpush.msra.mxu0 %v87_v2  ;;  %v183_v9 = vld [vmem:[%s3396_s1 + $0x3e0] sm:$0xff] }
   0x5   :  { %649 = vmatpush.msra.mxu3 %v185_v5  ;;  %v85_v6 = vld [vmem:[%s3396_s1 + $0xd0] sm:$0xff]  ;;  %624 = vmatpush.msra.mxu2 %v151_v4  ;;  %v83_v11 = vld [vmem:[%s3396_s1 + $0xc0] sm:$0xff] }
   0x6   :  { %v149_v8 = vld [vmem:[%s3396_s1 + $0x2d0] sm:$0xff]  ;;  %598 = vmatpush.msra.mxu1 %v119_v7  ;;  %v147_v12 = vld [vmem:[%s3396_s1 + $0x2c0] sm:$0xff]  ;;  %573 = vmatpush.msra.mxu0 %v85_v6 }
   0x7   :  { %v117_v10 = vld [vmem:[%s3396_s1 + $0x1d0] sm:$0xff]  ;;  %650 = vmatpush.msra.mxu3 %v183_v9  ;;  %625 = vmatpush.msra.mxu2 %v149_v8  ;;  %v115_v14 = vld [vmem:[%s3396_s1 + $0x1c0] sm:$0xff] }
   0x8   :  { %v181_v13 = vld [vmem:[%s3396_s1 + $0x3d0] sm:$0xff]  ;;  %v179_v15 = vld [vmem:[%s3396_s1 + $0x3c0] sm:$0xff]  ;;  %599 = vmatpush.msra.mxu1 %v117_v10  ;;  %574 = vmatpush.msra.mxu0 %v83_v11 }
   0x9   :  { %651 = vmatpush.msra.mxu3 %v181_v13  ;;  %v81_v16 = vld [vmem:[%s3396_s1 + $0xb0] sm:$0xff]  ;;  %626 = vmatpush.msra.mxu2 %v147_v12  ;;  %v79_v20 = vld [vmem:[%s3396_s1 + $0xa0] sm:$0xff] }
   0xa   :  { %v145_v17 = vld [vmem:[%s3396_s1 + $0x2b0] sm:$0xff]  ;;  %600 = vmatpush.msra.mxu1 %v115_v14  ;;  %v143_v21 = vld [vmem:[%s3396_s1 + $0x2a0] sm:$0xff]  ;;  %575 = vmatpush.msra.mxu0 %v81_v16 }
   0xb   :  { %v113_v18 = vld [vmem:[%s3396_s1 + $0x1b0] sm:$0xff]  ;;  %652 = vmatpush.msra.mxu3 %v179_v15  ;;  %627 = vmatpush.msra.mxu2 %v145_v17  ;;  %v111_v22 = vld [vmem:[%s3396_s1 + $0x1a0] sm:$0xff] }
   0xc   :  { %v177_v19 = vld [vmem:[%s3396_s1 + $0x3b0] sm:$0xff]  ;;  %v175_v23 = vld [vmem:[%s3396_s1 + $0x3a0] sm:$0xff]  ;;  %601 = vmatpush.msra.mxu1 %v113_v18  ;;  %576 = vmatpush.msra.mxu0 %v79_v20 }
   0xd   :  { %653 = vmatpush.msra.mxu3 %v177_v19  ;;  %v77_v24 = vld [vmem:[%s3396_s1 + $0x90] sm:$0xff]  ;;  %628 = vmatpush.msra.mxu2 %v143_v21  ;;  %v75_v28 = vld [vmem:[%s3396_s1 + $0x80] sm:$0xff] }
   0xe   :  { %v141_v25 = vld [vmem:[%s3396_s1 + $0x290] sm:$0xff]  ;;  %602 = vmatpush.msra.mxu1 %v111_v22  ;;  %v139_v29 = vld [vmem:[%s3396_s1 + $0x280] sm:$0xff]  ;;  %577 = vmatpush.msra.mxu0 %v77_v24 }
   0xf   :  { %v109_v26 = vld [vmem:[%s3396_s1 + $0x190] sm:$0xff]  ;;  %654 = vmatpush.msra.mxu3 %v175_v23  ;;  %629 = vmatpush.msra.mxu2 %v141_v25  ;;  %v107_v30 = vld [vmem:[%s3396_s1 + $0x180] sm:$0xff] }
  0x10   :  { %v173_v27 = vld [vmem:[%s3396_s1 + $0x390] sm:$0xff]  ;;  %v171_v31 = vld [vmem:[%s3396_s1 + $0x380] sm:$0xff]  ;;  %603 = vmatpush.msra.mxu1 %v109_v26  ;;  %578 = vmatpush.msra.mxu0 %v75_v28 }
  0x11   :  { %655 = vmatpush.msra.mxu3 %v173_v27  ;;  %v73_v32 = vld [vmem:[%s3396_s1 + $0x70] sm:$0xff]  ;;  %630 = vmatpush.msra.mxu2 %v139_v29  ;;  %v71_v36 = vld [vmem:[%s3396_s1 + $0x60] sm:$0xff] }
  0x12   :  { %v137_v33 = vld [vmem:[%s3396_s1 + $0x270] sm:$0xff]  ;;  %604 = vmatpush.msra.mxu1 %v107_v30  ;;  %v135_v37 = vld [vmem:[%s3396_s1 + $0x260] sm:$0xff]  ;;  %579 = vmatpush.msra.mxu0 %v73_v32  ;;  %v14_v32 = vld [vmem:[%s3397_s0 + $0x18] sm:$0xff] }
  0x13   :  { %v105_v34 = vld [vmem:[%s3396_s1 + $0x170] sm:$0xff]  ;;  %656 = vmatpush.msra.mxu3 %v171_v31  ;;  %631 = vmatpush.msra.mxu2 %v137_v33  ;;  %v103_v38 = vld [vmem:[%s3396_s1 + $0x160] sm:$0xff]  ;;  %v12_v33 = vld [vmem:[%s3397_s0 + $0x8] sm:$0xff] }
  0x14   :  { %v169_v35 = vld [vmem:[%s3396_s1 + $0x370] sm:$0xff]  ;;  %v167_v39 = vld [vmem:[%s3396_s1 + $0x360] sm:$0xff]  ;;  %605 = vmatpush.msra.mxu1 %v105_v34  ;;  %580 = vmatpush.msra.mxu0 %v71_v36 }
  0x15   :  { %657 = vmatpush.msra.mxu3 %v169_v35  ;;  %v69_v40 = vld [vmem:[%s3396_s1 + $0x50] sm:$0xff]  ;;  %632 = vmatpush.msra.mxu2 %v135_v37  ;;  %v67_v44 = vld [vmem:[%s3396_s1 + $0x40] sm:$0xff] }
  0x16   :  { %v133_v41 = vld [vmem:[%s3396_s1 + $0x250] sm:$0xff]  ;;  %606 = vmatpush.msra.mxu1 %v103_v38  ;;  %v131_v45 = vld [vmem:[%s3396_s1 + $0x240] sm:$0xff]  ;;  %581 = vmatpush.msra.mxu0 %v69_v40 }
  0x17   :  { %v101_v42 = vld [vmem:[%s3396_s1 + $0x150] sm:$0xff]  ;;  %658 = vmatpush.msra.mxu3 %v167_v39  ;;  %633 = vmatpush.msra.mxu2 %v133_v41  ;;  %v99_v46 = vld [vmem:[%s3396_s1 + $0x140] sm:$0xff] }
  0x18   :  { %v165_v43 = vld [vmem:[%s3396_s1 + $0x350] sm:$0xff]  ;;  %v163_v47 = vld [vmem:[%s3396_s1 + $0x340] sm:$0xff]  ;;  %607 = vmatpush.msra.mxu1 %v101_v42  ;;  %582 = vmatpush.msra.mxu0 %v67_v44 }
  0x19   :  { %659 = vmatpush.msra.mxu3 %v165_v43  ;;  %v65_v48 = vld [vmem:[%s3396_s1 + $0x30] sm:$0xff]  ;;  %634 = vmatpush.msra.mxu2 %v131_v45  ;;  %v63_v52 = vld [vmem:[%s3396_s1 + $0x20] sm:$0xff] }
  0x1a   :  { %v129_v49 = vld [vmem:[%s3396_s1 + $0x230] sm:$0xff]  ;;  %608 = vmatpush.msra.mxu1 %v99_v46  ;;  %v127_v53 = vld [vmem:[%s3396_s1 + $0x220] sm:$0xff]  ;;  %583 = vmatpush.msra.mxu0 %v65_v48 }
  0x1b   :  { %v97_v50 = vld [vmem:[%s3396_s1 + $0x130] sm:$0xff]  ;;  %660 = vmatpush.msra.mxu3 %v163_v47  ;;  %635 = vmatpush.msra.mxu2 %v129_v49  ;;  %v95_v54 = vld [vmem:[%s3396_s1 + $0x120] sm:$0xff] }
  0x1c   :  { %v161_v51 = vld [vmem:[%s3396_s1 + $0x330] sm:$0xff]  ;;  %v159_v55 = vld [vmem:[%s3396_s1 + $0x320] sm:$0xff]  ;;  %609 = vmatpush.msra.mxu1 %v97_v50  ;;  %584 = vmatpush.msra.mxu0 %v63_v52  ;;  %v30_v52 = vld [vmem:[%s3397_s0 + $0x98] sm:$0xff] }
  0x1d   :  { %661 = vmatpush.msra.mxu3 %v161_v51  ;;  %v61_v56 = vld [vmem:[%s3396_s1 + $0x10] sm:$0xff]  ;;  %636 = vmatpush.msra.mxu2 %v127_v53  ;;  %v59_v60 = vld [vmem:[%s3396_s1] sm:$0xff]  ;;  %v28_v53 = vld [vmem:[%s3397_s0 + $0x88] sm:$0xff] }
  0x1e   :  { %v125_v57 = vld [vmem:[%s3396_s1 + $0x210] sm:$0xff]  ;;  %610 = vmatpush.msra.mxu1 %v95_v54  ;;  %v123_v61 = vld [vmem:[%s3396_s1 + $0x200] sm:$0xff]  ;;  %585 = vmatpush.msra.mxu0 %v61_v56 }
  0x1f   :  { %v93_v58 = vld [vmem:[%s3396_s1 + $0x110] sm:$0xff]  ;;  %662 = vmatpush.msra.mxu3 %v159_v55  ;;  %637 = vmatpush.msra.mxu2 %v125_v57  ;;  %v91_v0 = vld [vmem:[%s3396_s1 + $0x100] sm:$0xff] }
  0x20   :  { %v157_v59 = vld [vmem:[%s3396_s1 + $0x310] sm:$0xff]  ;;  %611 = vmatpush.msra.mxu1 %v93_v58  ;;  %v155_v1 = vld [vmem:[%s3396_s1 + $0x300] sm:$0xff]  ;;  %586 = vmatpush.msra.mxu0 %v59_v60 }
  0x21   :  { %v217_v62 = vld [vmem:[%s3396_s1 + $0x4f0] sm:$0xff]  ;;  %663 = vmatpush.msra.mxu3 %v157_v59  ;;  %638 = vmatpush.msra.mxu2 %v123_v61  ;;  %v215_v2 = vld [vmem:[%s3396_s1 + $0x4e0] sm:$0xff] }
  0x22   :  { %v281_v63 = vld [vmem:[%s3396_s1 + $0x6f0] sm:$0xff]  ;;  %675 = vmatpush.msrb.mxu0 %v217_v62  ;;  %v279_v4 = vld [vmem:[%s3396_s1 + $0x6e0] sm:$0xff]  ;;  %612 = vmatpush.msra.mxu1 %v91_v0 }
  0x23   :  { %v249_v3 = vld [vmem:[%s3396_s1 + $0x5f0] sm:$0xff]  ;;  %727 = vmatpush.msrb.mxu2 %v281_v63  ;;  %664 = vmatpush.msra.mxu3 %v155_v1  ;;  %v247_v7 = vld [vmem:[%s3396_s1 + $0x5e0] sm:$0xff] }
  0x24   :  { %v313_v5 = vld [vmem:[%s3396_s1 + $0x7f0] sm:$0xff]  ;;  %676 = vmatpush.msrb.mxu0 %v215_v2  ;;  %701 = vmatpush.msrb.mxu1 %v249_v3  ;;  %v311_v9 = vld [vmem:[%s3396_s1 + $0x7e0] sm:$0xff] }
  0x25   :  { %v213_v6 = vld [vmem:[%s3396_s1 + $0x4d0] sm:$0xff]  ;;  %728 = vmatpush.msrb.mxu2 %v279_v4  ;;  %753 = vmatpush.msrb.mxu3 %v313_v5  ;;  %v211_v10 = vld [vmem:[%s3396_s1 + $0x4c0] sm:$0xff] }
  0x26   :  { %v277_v8 = vld [vmem:[%s3396_s1 + $0x6d0] sm:$0xff]  ;;  %677 = vmatpush.msrb.mxu0 %v213_v6  ;;  %702 = vmatpush.msrb.mxu1 %v247_v7  ;;  %v275_v12 = vld [vmem:[%s3396_s1 + $0x6c0] sm:$0xff] }
  0x27   :  { %v245_v11 = vld [vmem:[%s3396_s1 + $0x5d0] sm:$0xff]  ;;  %729 = vmatpush.msrb.mxu2 %v277_v8  ;;  %754 = vmatpush.msrb.mxu3 %v311_v9  ;;  %v243_v15 = vld [vmem:[%s3396_s1 + $0x5c0] sm:$0xff]  ;;  %v46_v8 = vld [vmem:[%s3397_s0 + $0x118] sm:$0xff] }
  0x28   :  { %v309_v13 = vld [vmem:[%s3396_s1 + $0x7d0] sm:$0xff]  ;;  %678 = vmatpush.msrb.mxu0 %v211_v10  ;;  %703 = vmatpush.msrb.mxu1 %v245_v11  ;;  %v307_v17 = vld [vmem:[%s3396_s1 + $0x7c0] sm:$0xff]  ;;  %v44_v11 = vld [vmem:[%s3397_s0 + $0x108] sm:$0xff] }
  0x29   :  { %v209_v14 = vld [vmem:[%s3396_s1 + $0x4b0] sm:$0xff]  ;;  %730 = vmatpush.msrb.mxu2 %v275_v12  ;;  %755 = vmatpush.msrb.mxu3 %v309_v13  ;;  %v207_v18 = vld [vmem:[%s3396_s1 + $0x4a0] sm:$0xff] }
  0x2a   :  { %v273_v16 = vld [vmem:[%s3396_s1 + $0x6b0] sm:$0xff]  ;;  %679 = vmatpush.msrb.mxu0 %v209_v14  ;;  %704 = vmatpush.msrb.mxu1 %v243_v15  ;;  %v271_v20 = vld [vmem:[%s3396_s1 + $0x6a0] sm:$0xff] }
  0x2b   :  { %v241_v19 = vld [vmem:[%s3396_s1 + $0x5b0] sm:$0xff]  ;;  %731 = vmatpush.msrb.mxu2 %v273_v16  ;;  %756 = vmatpush.msrb.mxu3 %v307_v17  ;;  %v239_v23 = vld [vmem:[%s3396_s1 + $0x5a0] sm:$0xff] }
  0x2c   :  { %v305_v21 = vld [vmem:[%s3396_s1 + $0x7b0] sm:$0xff]  ;;  %680 = vmatpush.msrb.mxu0 %v207_v18  ;;  %705 = vmatpush.msrb.mxu1 %v241_v19  ;;  %v303_v25 = vld [vmem:[%s3396_s1 + $0x7a0] sm:$0xff] }
  0x2d   :  { %v205_v22 = vld [vmem:[%s3396_s1 + $0x490] sm:$0xff]  ;;  %732 = vmatpush.msrb.mxu2 %v271_v20  ;;  %757 = vmatpush.msrb.mxu3 %v305_v21  ;;  %v11_v27 = vld [vmem:[%s3397_s0] sm:$0xff] }
  0x2e   :  { %v269_v24 = vld [vmem:[%s3396_s1 + $0x690] sm:$0xff]  ;;  %681 = vmatpush.msrb.mxu0 %v205_v22  ;;  %706 = vmatpush.msrb.mxu1 %v239_v23  ;;  %v203_v28 = vld [vmem:[%s3396_s1 + $0x480] sm:$0xff] }
  0x2f   :  { %v13_v26 = vld [vmem:[%s3397_s0 + $0x10] sm:$0xff]  ;;  %733 = vmatpush.msrb.mxu2 %v269_v24  ;;  %758 = vmatpush.msrb.mxu3 %v303_v25  ;;  %v267_v30 = vld [vmem:[%s3396_s1 + $0x680] sm:$0xff] }
  0x30   :  { %v237_v29 = vld [vmem:[%s3396_s1 + $0x590] sm:$0xff]  ;;  %639 = vmatmul.f32.vlgmr.msra.gmra.mxu2 %v13_v26  ;;  %587 = vmatmul.f32.vlgmr.msra.gmra.mxu0 %v11_v27  ;;  %v235_v35 = vld [vmem:[%s3396_s1 + $0x580] sm:$0xff] }
  0x31   :  { %v301_v31 = vld [vmem:[%s3396_s1 + $0x790] sm:$0xff]  ;;  %682 = vmatpush.msrb.mxu0 %v203_v28  ;;  %707 = vmatpush.msrb.mxu1 %v237_v29  ;;  %v299_v37 = vld [vmem:[%s3396_s1 + $0x780] sm:$0xff]  ;;  %v18_v28 = vld [vmem:[%s3397_s0 + $0x38] sm:$0xff] }
  0x32   :  { %v201_v34 = vld [vmem:[%s3396_s1 + $0x470] sm:$0xff]  ;;  %734 = vmatpush.msrb.mxu2 %v267_v30  ;;  %759 = vmatpush.msrb.mxu3 %v301_v31  ;;  %v199_v38 = vld [vmem:[%s3396_s1 + $0x460] sm:$0xff] }
  0x33   :  { %v265_v36 = vld [vmem:[%s3396_s1 + $0x670] sm:$0xff]  ;;  %665 = vmatmul.f32.vlgmr.msra.gmra.mxu3 %v14_v32  ;;  %613 = vmatmul.f32.vlgmr.msra.gmra.mxu1 %v12_v33  ;;  %v263_v40 = vld [vmem:[%s3396_s1 + $0x660] sm:$0xff]  ;;  %v16_v33 = vld [vmem:[%s3397_s0 + $0x28] sm:$0xff] }
  0x34   :  { %v233_v39 = vld [vmem:[%s3396_s1 + $0x570] sm:$0xff]  ;;  %683 = vmatpush.msrb.mxu0 %v201_v34  ;;  %708 = vmatpush.msrb.mxu1 %v235_v35  ;;  %v231_v43 = vld [vmem:[%s3396_s1 + $0x560] sm:$0xff] }
  0x35   :  { %v297_v41 = vld [vmem:[%s3396_s1 + $0x770] sm:$0xff]  ;;  %735 = vmatpush.msrb.mxu2 %v265_v36  ;;  %760 = vmatpush.msrb.mxu3 %v299_v37  ;;  %v295_v45 = vld [vmem:[%s3396_s1 + $0x760] sm:$0xff] }
  0x36   :  { %v197_v42 = vld [vmem:[%s3396_s1 + $0x450] sm:$0xff]  ;;  %684 = vmatpush.msrb.mxu0 %v199_v38  ;;  %709 = vmatpush.msrb.mxu1 %v233_v39  ;;  %v27_v47 = vld [vmem:[%s3397_s0 + $0x80] sm:$0xff] }
  0x37   :  { %v261_v44 = vld [vmem:[%s3396_s1 + $0x650] sm:$0xff]  ;;  %736 = vmatpush.msrb.mxu2 %v263_v40  ;;  %761 = vmatpush.msrb.mxu3 %v297_v41  ;;  %v195_v48 = vld [vmem:[%s3396_s1 + $0x440] sm:$0xff] }
  0x38   :  { %v29_v46 = vld [vmem:[%s3397_s0 + $0x90] sm:$0xff]  ;;  %685 = vmatpush.msrb.mxu0 %v197_v42  ;;  %710 = vmatpush.msrb.mxu1 %v231_v43  ;;  %v259_v50 = vld [vmem:[%s3396_s1 + $0x640] sm:$0xff] }
  0x39   :  { %v229_v49 = vld [vmem:[%s3396_s1 + $0x550] sm:$0xff]  ;;  %737 = vmatpush.msrb.mxu2 %v261_v44  ;;  %762 = vmatpush.msrb.mxu3 %v295_v45  ;;  %v227_v55 = vld [vmem:[%s3396_s1 + $0x540] sm:$0xff] }
  0x3a   :  { %v293_v51 = vld [vmem:[%s3396_s1 + $0x750] sm:$0xff]  ;;  %642 = vmatmul.f32.gmra.mxu2 %v29_v46  ;;  %590 = vmatmul.f32.gmra.mxu0 %v27_v47  ;;  %v291_v57 = vld [vmem:[%s3396_s1 + $0x740] sm:$0xff] }
  0x3b   :  { %686 = vmatpush.msrb.mxu0 %v195_v48  ;;  %711 = vmatpush.msrb.mxu1 %v229_v49  ;;  %v193_v54 = vld [vmem:[%s3396_s1 + $0x430] sm:$0xff]  ;;  %v191_v58 = vld [vmem:[%s3396_s1 + $0x420] sm:$0xff] }
  0x3c   :  { %738 = vmatpush.msrb.mxu2 %v259_v50  ;;  %763 = vmatpush.msrb.mxu3 %v293_v51  ;;  %v257_v56 = vld [vmem:[%s3396_s1 + $0x630] sm:$0xff]  ;;  %v255_v60 = vld [vmem:[%s3396_s1 + $0x620] sm:$0xff] }
  0x3d   :  { %668 = vmatmul.f32.gmra.mxu3 %v30_v52  ;;  %616 = vmatmul.f32.gmra.mxu1 %v28_v53  ;;  %v225_v59 = vld [vmem:[%s3396_s1 + $0x530] sm:$0xff]  ;;  %v223_v63 = vld [vmem:[%s3396_s1 + $0x520] sm:$0xff]  ;;  %v32_v52 = vld [vmem:[%s3397_s0 + $0xa8] sm:$0xff] }
  0x3e   :  { %687 = vmatpush.msrb.mxu0 %v193_v54  ;;  %712 = vmatpush.msrb.mxu1 %v227_v55  ;;  %v289_v61 = vld [vmem:[%s3396_s1 + $0x730] sm:$0xff]  ;;  %v287_v1 = vld [vmem:[%s3396_s1 + $0x720] sm:$0xff]  ;;  %v34_v53 = vld [vmem:[%s3397_s0 + $0xb8] sm:$0xff] }
  0x3f   :  { %739 = vmatpush.msrb.mxu2 %v257_v56  ;;  %764 = vmatpush.msrb.mxu3 %v291_v57  ;;  %v189_v62 = vld [vmem:[%s3396_s1 + $0x410] sm:$0xff]  ;;  %v43_v3 = vld [vmem:[%s3397_s0 + $0x100] sm:$0xff] }
  0x40   :  { %688 = vmatpush.msrb.mxu0 %v191_v58  ;;  %713 = vmatpush.msrb.mxu1 %v225_v59  ;;  %v253_v0 = vld [vmem:[%s3396_s1 + $0x610] sm:$0xff]  ;;  %v187_v4 = vld [vmem:[%s3396_s1 + $0x400] sm:$0xff] }
  0x41   :  { %740 = vmatpush.msrb.mxu2 %v255_v60  ;;  %765 = vmatpush.msrb.mxu3 %v289_v61  ;;  %v45_v2 = vld [vmem:[%s3397_s0 + $0x110] sm:$0xff]  ;;  %v251_v6 = vld [vmem:[%s3396_s1 + $0x600] sm:$0xff] }
  0x42   :  { %689 = vmatpush.msrb.mxu0 %v189_v62  ;;  %714 = vmatpush.msrb.mxu1 %v223_v63  ;;  %v221_v5 = vld [vmem:[%s3396_s1 + $0x510] sm:$0xff]  ;;  %v219_v12 = vld [vmem:[%s3396_s1 + $0x500] sm:$0xff] }
  0x43   :  { %741 = vmatpush.msrb.mxu2 %v253_v0  ;;  %766 = vmatpush.msrb.mxu3 %v287_v1  ;;  %v285_v7 = vld [vmem:[%s3396_s1 + $0x710] sm:$0xff]  ;;  %v283_v13 = vld [vmem:[%s3396_s1 + $0x700] sm:$0xff] }
  0x44   :  { %645 = vmatmul.f32.gmra.mxu2 %v45_v2  ;;  %593 = vmatmul.f32.gmra.mxu0 %v43_v3  ;;  %v345_v9 = vld [vmem:[%s3396_s1 + $0x8f0] sm:$0xff]  ;;  %v343_v14 = vld [vmem:[%s3396_s1 + $0x8e0] sm:$0xff] }
  0x45   :  { %690 = vmatpush.msrb.mxu0 %v187_v4  ;;  %715 = vmatpush.msrb.mxu1 %v221_v5  ;;  %v409_v10 = vld [vmem:[%s3396_s1 + $0xaf0] sm:$0xff]  ;;  %v407_v16 = vld [vmem:[%s3396_s1 + $0xae0] sm:$0xff] }
  0x46   :  { %742 = vmatpush.msrb.mxu2 %v251_v6  ;;  %767 = vmatpush.msrb.mxu3 %v285_v7  ;;  %v377_v15 = vld [vmem:[%s3396_s1 + $0x9f0] sm:$0xff]  ;;  %v375_v19 = vld [vmem:[%s3396_s1 + $0x9e0] sm:$0xff] }
  0x47   :  { %671 = vmatmul.f32.gmra.mxu3 %v46_v8  ;;  %779 = vmatpush.msra.mxu0 %v345_v9  ;;  %v441_v17 = vld [vmem:[%s3396_s1 + $0xbf0] sm:$0xff]  ;;  %v439_v21 = vld [vmem:[%s3396_s1 + $0xbe0] sm:$0xff]  ;;  %v48_v8 = vld [vmem:[%s3397_s0 + $0x128] sm:$0xff] }
  0x48   :  { %831 = vmatpush.msra.mxu2 %v409_v10  ;;  %619 = vmatmul.f32.gmra.mxu1 %v44_v11  ;;  %v341_v18 = vld [vmem:[%s3396_s1 + $0x8d0] sm:$0xff]  ;;  %v339_v23 = vld [vmem:[%s3396_s1 + $0x8c0] sm:$0xff]  ;;  %v50_v9 = vld [vmem:[%s3397_s0 + $0x138] sm:$0xff] }
  0x49   :  { %716 = vmatpush.msrb.mxu1 %v219_v12  ;;  %768 = vmatpush.msrb.mxu3 %v283_v13  ;;  %v405_v20 = vld [vmem:[%s3396_s1 + $0xad0] sm:$0xff]  ;;  %v403_v25 = vld [vmem:[%s3396_s1 + $0xac0] sm:$0xff] }
  0x4a   :  { %780 = vmatpush.msra.mxu0 %v343_v14  ;;  %832 = vmatpush.msra.mxu2 %v407_v16  ;;  %v17_v22 = vld [vmem:[%s3397_s0 + $0x30] sm:$0xff]  ;;  %v15_v27 = vld [vmem:[%s3397_s0 + $0x20] sm:$0xff] }
  0x4b   :  { %805 = vmatpush.msra.mxu1 %v377_v15  ;;  %857 = vmatpush.msra.mxu3 %v441_v17  ;;  %v373_v24 = vld [vmem:[%s3396_s1 + $0x9d0] sm:$0xff]  ;;  %v371_v30 = vld [vmem:[%s3396_s1 + $0x9c0] sm:$0xff] }
  0x4c   :  { %781 = vmatpush.msra.mxu0 %v341_v18  ;;  %833 = vmatpush.msra.mxu2 %v405_v20  ;;  %v437_v26 = vld [vmem:[%s3396_s1 + $0xbd0] sm:$0xff]  ;;  %v435_v32 = vld [vmem:[%s3396_s1 + $0xbc0] sm:$0xff] }
  0x4d   :  { %806 = vmatpush.msra.mxu1 %v375_v19  ;;  %858 = vmatpush.msra.mxu3 %v439_v21  ;;  %v337_v29 = vld [vmem:[%s3396_s1 + $0x8b0] sm:$0xff]  ;;  %v335_v34 = vld [vmem:[%s3396_s1 + $0x8a0] sm:$0xff] }
  0x4e   :  { %743 = vmatmul.f32.vlgmr.msrb.gmra.mxu2 %v17_v22  ;;  %782 = vmatpush.msra.mxu0 %v339_v23  ;;  %v401_v31 = vld [vmem:[%s3396_s1 + $0xab0] sm:$0xff]  ;;  %v399_v36 = vld [vmem:[%s3396_s1 + $0xaa0] sm:$0xff] }
  0x4f   :  { %807 = vmatpush.msra.mxu1 %v373_v24  ;;  %834 = vmatpush.msra.mxu2 %v403_v25  ;;  %v369_v35 = vld [vmem:[%s3396_s1 + $0x9b0] sm:$0xff]  ;;  %v367_v39 = vld [vmem:[%s3396_s1 + $0x9a0] sm:$0xff] }
  0x50   :  { %859 = vmatpush.msra.mxu3 %v437_v26  ;;  %691 = vmatmul.f32.vlgmr.msrb.gmra.mxu0 %v15_v27  ;;  %v433_v37 = vld [vmem:[%s3396_s1 + $0xbb0] sm:$0xff]  ;;  %v431_v41 = vld [vmem:[%s3396_s1 + $0xba0] sm:$0xff] }
  0x51   :  { %769 = vmatmul.f32.vlgmr.msrb.gmra.mxu3 %v18_v28  ;;  %783 = vmatpush.msra.mxu0 %v337_v29  ;;  %v333_v38 = vld [vmem:[%s3396_s1 + $0x890] sm:$0xff]  ;;  %v331_v42 = vld [vmem:[%s3396_s1 + $0x880] sm:$0xff]  ;;  %v20_v28 = vld [vmem:[%s3397_s0 + $0x48] sm:$0xff] }
  0x52   :  { %808 = vmatpush.msra.mxu1 %v371_v30  ;;  %835 = vmatpush.msra.mxu2 %v401_v31  ;;  %v397_v40 = vld [vmem:[%s3396_s1 + $0xa90] sm:$0xff]  ;;  %v395_v44 = vld [vmem:[%s3396_s1 + $0xa80] sm:$0xff]  ;;  %v22_v29 = vld [vmem:[%s3397_s0 + $0x58] sm:$0xff] }
  0x53   :  { %860 = vmatpush.msra.mxu3 %v435_v32  ;;  %717 = vmatmul.f32.vlgmr.msrb.gmra.mxu1 %v16_v33  ;;  %v365_v43 = vld [vmem:[%s3396_s1 + $0x990] sm:$0xff]  ;;  %v31_v46 = vld [vmem:[%s3397_s0 + $0xa0] sm:$0xff] }
  0x54   :  { %784 = vmatpush.msra.mxu0 %v335_v34  ;;  %809 = vmatpush.msra.mxu1 %v369_v35  ;;  %v429_v45 = vld [vmem:[%s3396_s1 + $0xb90] sm:$0xff]  ;;  %v363_v49 = vld [vmem:[%s3396_s1 + $0x980] sm:$0xff] }
  0x55   :  { %836 = vmatpush.msra.mxu2 %v399_v36  ;;  %861 = vmatpush.msra.mxu3 %v433_v37  ;;  %v33_v47 = vld [vmem:[%s3397_s0 + $0xb0] sm:$0xff]  ;;  %v427_v51 = vld [vmem:[%s3396_s1 + $0xb80] sm:$0xff] }
  0x56   :  { %785 = vmatpush.msra.mxu0 %v333_v38  ;;  %810 = vmatpush.msra.mxu1 %v367_v39  ;;  %v329_v48 = vld [vmem:[%s3396_s1 + $0x870] sm:$0xff]  ;;  %v327_v54 = vld [vmem:[%s3396_s1 + $0x860] sm:$0xff] }
  0x57   :  { %837 = vmatpush.msra.mxu2 %v397_v40  ;;  %862 = vmatpush.msra.mxu3 %v431_v41  ;;  %v393_v50 = vld [vmem:[%s3396_s1 + $0xa70] sm:$0xff]  ;;  %v391_v56 = vld [vmem:[%s3396_s1 + $0xa60] sm:$0xff] }
  0x58   :  { %786 = vmatpush.msra.mxu0 %v331_v42  ;;  %811 = vmatpush.msra.mxu1 %v365_v43  ;;  %v361_v55 = vld [vmem:[%s3396_s1 + $0x970] sm:$0xff]  ;;  %v359_v59 = vld [vmem:[%s3396_s1 + $0x960] sm:$0xff] }
  0x59   :  { %838 = vmatpush.msra.mxu2 %v395_v44  ;;  %863 = vmatpush.msra.mxu3 %v429_v45  ;;  %v425_v57 = vld [vmem:[%s3396_s1 + $0xb70] sm:$0xff]  ;;  %v423_v61 = vld [vmem:[%s3396_s1 + $0xb60] sm:$0xff] }
  0x5a   :  { %694 = vmatmul.f32.gmra.mxu0 %v31_v46  ;;  %746 = vmatmul.f32.gmra.mxu2 %v33_v47  ;;  %v325_v58 = vld [vmem:[%s3396_s1 + $0x850] sm:$0xff]  ;;  %v323_v62 = vld [vmem:[%s3396_s1 + $0x840] sm:$0xff] }
  0x5b   :  { %787 = vmatpush.msra.mxu0 %v329_v48  ;;  %812 = vmatpush.msra.mxu1 %v363_v49  ;;  %v389_v60 = vld [vmem:[%s3396_s1 + $0xa50] sm:$0xff]  ;;  %v387_v0 = vld [vmem:[%s3396_s1 + $0xa40] sm:$0xff]  ;;  %v36_v48 = vld [vmem:[%s3397_s0 + $0xc8] sm:$0xff] }
  0x5c   :  { %839 = vmatpush.msra.mxu2 %v393_v50  ;;  %864 = vmatpush.msra.mxu3 %v427_v51  ;;  %v357_v63 = vld [vmem:[%s3396_s1 + $0x950] sm:$0xff]  ;;  %v47_v2 = vld [vmem:[%s3397_s0 + $0x120] sm:$0xff]  ;;  %v38_v49 = vld [vmem:[%s3397_s0 + $0xd8] sm:$0xff] }
  0x5d   :  { %720 = vmatmul.f32.gmra.mxu1 %v32_v52  ;;  %772 = vmatmul.f32.gmra.mxu3 %v34_v53  ;;  %v421_v1 = vld [vmem:[%s3396_s1 + $0xb50] sm:$0xff]  ;;  %v355_v5 = vld [vmem:[%s3396_s1 + $0x940] sm:$0xff] }
  0x5e   :  { %788 = vmatpush.msra.mxu0 %v327_v54  ;;  %813 = vmatpush.msra.mxu1 %v361_v55  ;;  %v49_v3 = vld [vmem:[%s3397_s0 + $0x130] sm:$0xff]  ;;  %v419_v7 = vld [vmem:[%s3396_s1 + $0xb40] sm:$0xff] }
  0x5f   :  { %840 = vmatpush.msra.mxu2 %v391_v56  ;;  %865 = vmatpush.msra.mxu3 %v425_v57  ;;  %v321_v4 = vld [vmem:[%s3396_s1 + $0x830] sm:$0xff]  ;;  %v319_v10 = vld [vmem:[%s3396_s1 + $0x820] sm:$0xff] }
  0x60   :  { %789 = vmatpush.msra.mxu0 %v325_v58  ;;  %814 = vmatpush.msra.mxu1 %v359_v59  ;;  %v385_v6 = vld [vmem:[%s3396_s1 + $0xa30] sm:$0xff]  ;;  %v383_v12 = vld [vmem:[%s3396_s1 + $0xa20] sm:$0xff] }
  0x61   :  { %841 = vmatpush.msra.mxu2 %v389_v60  ;;  %866 = vmatpush.msra.mxu3 %v423_v61  ;;  %v353_v11 = vld [vmem:[%s3396_s1 + $0x930] sm:$0xff]  ;;  %v351_v15 = vld [vmem:[%s3396_s1 + $0x920] sm:$0xff] }
  0x62   :  { %790 = vmatpush.msra.mxu0 %v323_v62  ;;  %815 = vmatpush.msra.mxu1 %v357_v63  ;;  %v417_v13 = vld [vmem:[%s3396_s1 + $0xb30] sm:$0xff]  ;;  %v415_v17 = vld [vmem:[%s3396_s1 + $0xb20] sm:$0xff] }
  0x63   :  { %842 = vmatpush.msra.mxu2 %v387_v0  ;;  %867 = vmatpush.msra.mxu3 %v421_v1  ;;  %v317_v14 = vld [vmem:[%s3396_s1 + $0x810] sm:$0xff]  ;;  %v315_v18 = vld [vmem:[%s3396_s1 + $0x800] sm:$0xff] }
  0x64   :  { %697 = vmatmul.f32.gmra.mxu0 %v47_v2  ;;  %749 = vmatmul.f32.gmra.mxu2 %v49_v3  ;;  %v381_v16 = vld [vmem:[%s3396_s1 + $0xa10] sm:$0xff]  ;;  %v379_v20 = vld [vmem:[%s3396_s1 + $0xa00] sm:$0xff] }
  0x65   :  { %791 = vmatpush.msra.mxu0 %v321_v4  ;;  %816 = vmatpush.msra.mxu1 %v355_v5  ;;  %v349_v19 = vld [vmem:[%s3396_s1 + $0x910] sm:$0xff]  ;;  %v19_v22 = vld [vmem:[%s3397_s0 + $0x40] sm:$0xff]  ;;  %v52_v4 = vld [vmem:[%s3397_s0 + $0x148] sm:$0xff] }
  0x66   :  { %843 = vmatpush.msra.mxu2 %v385_v6  ;;  %868 = vmatpush.msra.mxu3 %v419_v7  ;;  %v413_v21 = vld [vmem:[%s3396_s1 + $0xb10] sm:$0xff]  ;;  %v347_v26 = vld [vmem:[%s3396_s1 + $0x900] sm:$0xff]  ;;  %v54_v5 = vld [vmem:[%s3397_s0 + $0x158] sm:$0xff] }
  0x67   :  { %723 = vmatmul.f32.gmra.mxu1 %v48_v8  ;;  %775 = vmatmul.f32.gmra.mxu3 %v50_v9  ;;  %v21_v23 = vld [vmem:[%s3397_s0 + $0x50] sm:$0xff]  ;;  %v411_v27 = vld [vmem:[%s3396_s1 + $0xb00] sm:$0xff] }
  0x68   :  { %792 = vmatpush.msra.mxu0 %v319_v10  ;;  %817 = vmatpush.msra.mxu1 %v353_v11  ;;  %v473_v24 = vld [vmem:[%s3396_s1 + $0xcf0] sm:$0xff]  ;;  %v471_v30 = vld [vmem:[%s3396_s1 + $0xce0] sm:$0xff] }
  0x69   :  { %844 = vmatpush.msra.mxu2 %v383_v12  ;;  %869 = vmatpush.msra.mxu3 %v417_v13  ;;  %v537_v25 = vld [vmem:[%s3396_s1 + $0xef0] sm:$0xff]  ;;  %v535_v32 = vld [vmem:[%s3396_s1 + $0xee0] sm:$0xff] }
  0x6a   :  { %793 = vmatpush.msra.mxu0 %v317_v14  ;;  %818 = vmatpush.msra.mxu1 %v351_v15  ;;  %v505_v31 = vld [vmem:[%s3396_s1 + $0xdf0] sm:$0xff]  ;;  %v503_v35 = vld [vmem:[%s3396_s1 + $0xde0] sm:$0xff] }
  0x6b   :  { %845 = vmatpush.msra.mxu2 %v381_v16  ;;  %870 = vmatpush.msra.mxu3 %v415_v17  ;;  %v569_v33 = vld [vmem:[%s3396_s1 + $0xff0] sm:$0xff]  ;;  %v567_v37 = vld [vmem:[%s3396_s1 + $0xfe0] sm:$0xff] }
  0x6c   :  { %794 = vmatpush.msra.mxu0 %v315_v18  ;;  %819 = vmatpush.msra.mxu1 %v349_v19  ;;  %v469_v34 = vld [vmem:[%s3396_s1 + $0xcd0] sm:$0xff]  ;;  %v467_v38 = vld [vmem:[%s3396_s1 + $0xcc0] sm:$0xff] }
  0x6d   :  { %846 = vmatpush.msra.mxu2 %v379_v20  ;;  %871 = vmatpush.msra.mxu3 %v413_v21  ;;  %v533_v36 = vld [vmem:[%s3396_s1 + $0xed0] sm:$0xff]  ;;  %v531_v40 = vld [vmem:[%s3396_s1 + $0xec0] sm:$0xff] }
  0x6e   :  { %795 = vmatmul.f32.vlgmr.msra.gmra.mxu0 %v19_v22  ;;  %847 = vmatmul.f32.vlgmr.msra.gmra.mxu2 %v21_v23  ;;  %v501_v39 = vld [vmem:[%s3396_s1 + $0xdd0] sm:$0xff]  ;;  %v35_v42 = vld [vmem:[%s3397_s0 + $0xc0] sm:$0xff] }
  0x6f   :  { %883 = vmatpush.msrb.mxu0 %v473_v24  ;;  %935 = vmatpush.msrb.mxu2 %v537_v25  ;;  %v565_v41 = vld [vmem:[%s3396_s1 + $0xfd0] sm:$0xff]  ;;  %v499_v45 = vld [vmem:[%s3396_s1 + $0xdc0] sm:$0xff] }
  0x70   :  { %820 = vmatpush.msra.mxu1 %v347_v26  ;;  %872 = vmatpush.msra.mxu3 %v411_v27  ;;  %v37_v43 = vld [vmem:[%s3397_s0 + $0xd0] sm:$0xff]  ;;  %v563_v47 = vld [vmem:[%s3396_s1 + $0xfc0] sm:$0xff] }
  0x71   :  { %821 = vmatmul.f32.vlgmr.msra.gmra.mxu1 %v20_v28  ;;  %873 = vmatmul.f32.vlgmr.msra.gmra.mxu3 %v22_v29  ;;  %v465_v44 = vld [vmem:[%s3396_s1 + $0xcb0] sm:$0xff]  ;;  %v463_v50 = vld [vmem:[%s3396_s1 + $0xca0] sm:$0xff] }
  0x72   :  { %884 = vmatpush.msrb.mxu0 %v471_v30  ;;  %909 = vmatpush.msrb.mxu1 %v505_v31  ;;  %v529_v46 = vld [vmem:[%s3396_s1 + $0xeb0] sm:$0xff]  ;;  %v527_v52 = vld [vmem:[%s3396_s1 + $0xea0] sm:$0xff] }
  0x73   :  { %936 = vmatpush.msrb.mxu2 %v535_v32  ;;  %961 = vmatpush.msrb.mxu3 %v569_v33  ;;  %v497_v51 = vld [vmem:[%s3396_s1 + $0xdb0] sm:$0xff]  ;;  %v495_v55 = vld [vmem:[%s3396_s1 + $0xda0] sm:$0xff] }
  0x74   :  { %885 = vmatpush.msrb.mxu0 %v469_v34  ;;  %910 = vmatpush.msrb.mxu1 %v503_v35  ;;  %v561_v53 = vld [vmem:[%s3396_s1 + $0xfb0] sm:$0xff]  ;;  %v559_v57 = vld [vmem:[%s3396_s1 + $0xfa0] sm:$0xff] }
  0x75   :  { %937 = vmatpush.msrb.mxu2 %v533_v36  ;;  %962 = vmatpush.msrb.mxu3 %v567_v37  ;;  %v461_v54 = vld [vmem:[%s3396_s1 + $0xc90] sm:$0xff]  ;;  %v459_v58 = vld [vmem:[%s3396_s1 + $0xc80] sm:$0xff]  ;;  %v90_v36 = vld [vmem:[%s3396_s1 + $0xf8] sm:$0xff] }
  0x76   :  { %886 = vmatpush.msrb.mxu0 %v467_v38  ;;  %911 = vmatpush.msrb.mxu1 %v501_v39  ;;  %v525_v56 = vld [vmem:[%s3396_s1 + $0xe90] sm:$0xff]  ;;  %v523_v60 = vld [vmem:[%s3396_s1 + $0xe80] sm:$0xff]  ;;  %v154_v37 = vld [vmem:[%s3396_s1 + $0x2f8] sm:$0xff] }
  0x77   :  { %938 = vmatpush.msrb.mxu2 %v531_v40  ;;  %963 = vmatpush.msrb.mxu3 %v565_v41  ;;  %v493_v59 = vld [vmem:[%s3396_s1 + $0xd90] sm:$0xff]  ;;  %v51_v62 = vld [vmem:[%s3397_s0 + $0x140] sm:$0xff]  ;;  %v24_v40 = vld [vmem:[%s3397_s0 + $0x68] sm:$0xff] }
  0x78   :  { %798 = vmatmul.f32.gmra.mxu0 %v35_v42  ;;  %850 = vmatmul.f32.gmra.mxu2 %v37_v43  ;;  %v557_v61 = vld [vmem:[%s3396_s1 + $0xf90] sm:$0xff]  ;;  %v491_v1 = vld [vmem:[%s3396_s1 + $0xd80] sm:$0xff]  ;;  %v26_v41 = vld [vmem:[%s3397_s0 + $0x78] sm:$0xff] }
  0x79   :  { %887 = vmatpush.msrb.mxu0 %v465_v44  ;;  %912 = vmatpush.msrb.mxu1 %v499_v45  ;;  %v53_v63 = vld [vmem:[%s3397_s0 + $0x150] sm:$0xff]  ;;  %v555_v3 = vld [vmem:[%s3396_s1 + $0xf80] sm:$0xff]  ;;  %v88_v42 = vld [vmem:[%s3396_s1 + $0xe8] sm:$0xff] }
  0x7a   :  { %939 = vmatpush.msrb.mxu2 %v529_v46  ;;  %964 = vmatpush.msrb.mxu3 %v563_v47  ;;  %v457_v0 = vld [vmem:[%s3396_s1 + $0xc70] sm:$0xff]  ;;  %v455_v6 = vld [vmem:[%s3396_s1 + $0xc60] sm:$0xff]  ;;  %v122_v43 = vld [vmem:[%s3396_s1 + $0x1f8] sm:$0xff] }
  0x7b   :  { %824 = vmatmul.f32.gmra.mxu1 %v36_v48  ;;  %876 = vmatmul.f32.gmra.mxu3 %v38_v49  ;;  %v521_v2 = vld [vmem:[%s3396_s1 + $0xe70] sm:$0xff]  ;;  %v519_v8 = vld [vmem:[%s3396_s1 + $0xe60] sm:$0xff]  ;;  %v152_v44 = vld [vmem:[%s3396_s1 + $0x2e8] sm:$0xff] }
  0x7c   :  { %888 = vmatpush.msrb.mxu0 %v463_v50  ;;  %913 = vmatpush.msrb.mxu1 %v497_v51  ;;  %v489_v7 = vld [vmem:[%s3396_s1 + $0xd70] sm:$0xff]  ;;  %v487_v11 = vld [vmem:[%s3396_s1 + $0xd60] sm:$0xff]  ;;  %v186_v45 = vld [vmem:[%s3396_s1 + $0x3f8] sm:$0xff] }
  0x7d   :  { %940 = vmatpush.msrb.mxu2 %v527_v52  ;;  %965 = vmatpush.msrb.mxu3 %v561_v53  ;;  %v553_v9 = vld [vmem:[%s3396_s1 + $0xf70] sm:$0xff]  ;;  %v551_v13 = vld [vmem:[%s3396_s1 + $0xf60] sm:$0xff]  ;;  %v86_v46 = vld [vmem:[%s3396_s1 + $0xd8] sm:$0xff] }
  0x7e   :  { %889 = vmatpush.msrb.mxu0 %v461_v54  ;;  %914 = vmatpush.msrb.mxu1 %v495_v55  ;;  %v453_v10 = vld [vmem:[%s3396_s1 + $0xc50] sm:$0xff]  ;;  %v451_v14 = vld [vmem:[%s3396_s1 + $0xc40] sm:$0xff]  ;;  %v120_v47 = vld [vmem:[%s3396_s1 + $0x1e8] sm:$0xff] }
  0x7f   :  { %941 = vmatpush.msrb.mxu2 %v525_v56  ;;  %966 = vmatpush.msrb.mxu3 %v559_v57  ;;  %v517_v12 = vld [vmem:[%s3396_s1 + $0xe50] sm:$0xff]  ;;  %v515_v16 = vld [vmem:[%s3396_s1 + $0xe40] sm:$0xff]  ;;  %v150_v48 = vld [vmem:[%s3396_s1 + $0x2d8] sm:$0xff] }
  0x80   :  { %890 = vmatpush.msrb.mxu0 %v459_v58  ;;  %915 = vmatpush.msrb.mxu1 %v493_v59  ;;  %v485_v15 = vld [vmem:[%s3396_s1 + $0xd50] sm:$0xff]  ;;  %v483_v19 = vld [vmem:[%s3396_s1 + $0xd40] sm:$0xff]  ;;  %v184_v49 = vld [vmem:[%s3396_s1 + $0x3e8] sm:$0xff] }
  0x81   :  { %942 = vmatpush.msrb.mxu2 %v523_v60  ;;  %967 = vmatpush.msrb.mxu3 %v557_v61  ;;  %v549_v17 = vld [vmem:[%s3396_s1 + $0xf50] sm:$0xff]  ;;  %v547_v21 = vld [vmem:[%s3396_s1 + $0xf40] sm:$0xff]  ;;  %v84_v50 = vld [vmem:[%s3396_s1 + $0xc8] sm:$0xff] }
  0x82   :  { %801 = vmatmul.f32.gmra.mxu0 %v51_v62  ;;  %853 = vmatmul.f32.gmra.mxu2 %v53_v63  ;;  %v449_v18 = vld [vmem:[%s3396_s1 + $0xc30] sm:$0xff]  ;;  %v447_v22 = vld [vmem:[%s3396_s1 + $0xc20] sm:$0xff]  ;;  %v118_v51 = vld [vmem:[%s3396_s1 + $0x1d8] sm:$0xff] }
  0x83   :  { %891 = vmatpush.msrb.mxu0 %v457_v0  ;;  %916 = vmatpush.msrb.mxu1 %v491_v1  ;;  %v513_v20 = vld [vmem:[%s3396_s1 + $0xe30] sm:$0xff]  ;;  %v511_v24 = vld [vmem:[%s3396_s1 + $0xe20] sm:$0xff]  ;;  %v148_v52 = vld [vmem:[%s3396_s1 + $0x2c8] sm:$0xff] }
  0x84   :  { %943 = vmatpush.msrb.mxu2 %v521_v2  ;;  %968 = vmatpush.msrb.mxu3 %v555_v3  ;;  %v481_v23 = vld [vmem:[%s3396_s1 + $0xd30] sm:$0xff]  ;;  %v479_v27 = vld [vmem:[%s3396_s1 + $0xd20] sm:$0xff]  ;;  %v182_v53 = vld [vmem:[%s3396_s1 + $0x3d8] sm:$0xff] }
  0x85   :  { %827 = vmatmul.f32.gmra.mxu1 %v52_v4  ;;  %879 = vmatmul.f32.gmra.mxu3 %v54_v5  ;;  %v545_v25 = vld [vmem:[%s3396_s1 + $0xf30] sm:$0xff]  ;;  %v543_v29 = vld [vmem:[%s3396_s1 + $0xf20] sm:$0xff]  ;;  %v82_v56 = vld [vmem:[%s3396_s1 + $0xb8] sm:$0xff] }
  0x86   :  { %892 = vmatpush.msrb.mxu0 %v455_v6  ;;  %917 = vmatpush.msrb.mxu1 %v489_v7  ;;  %v445_v26 = vld [vmem:[%s3396_s1 + $0xc10] sm:$0xff]  ;;  %v443_v30 = vld [vmem:[%s3396_s1 + $0xc00] sm:$0xff]  ;;  %v116_v57 = vld [vmem:[%s3396_s1 + $0x1c8] sm:$0xff] }
  0x87   :  { %944 = vmatpush.msrb.mxu2 %v519_v8  ;;  %969 = vmatpush.msrb.mxu3 %v553_v9  ;;  %v509_v28 = vld [vmem:[%s3396_s1 + $0xe10] sm:$0xff]  ;;  %v507_v32 = vld [vmem:[%s3396_s1 + $0xe00] sm:$0xff]  ;;  %v146_v58 = vld [vmem:[%s3396_s1 + $0x2b8] sm:$0xff] }
  0x88   :  { %893 = vmatpush.msrb.mxu0 %v453_v10  ;;  %918 = vmatpush.msrb.mxu1 %v487_v11  ;;  %v477_v31 = vld [vmem:[%s3396_s1 + $0xd10] sm:$0xff]  ;;  %v23_v34 = vld [vmem:[%s3397_s0 + $0x60] sm:$0xff]  ;;  %v180_v59 = vld [vmem:[%s3396_s1 + $0x3c8] sm:$0xff] }
  0x89   :  { %945 = vmatpush.msrb.mxu2 %v517_v12  ;;  %970 = vmatpush.msrb.mxu3 %v551_v13  ;;  %v541_v33 = vld [vmem:[%s3396_s1 + $0xf10] sm:$0xff]  ;;  %v475_v38 = vld [vmem:[%s3396_s1 + $0xd00] sm:$0xff]  ;;  %v40_v60 = vld [vmem:[%s3397_s0 + $0xe8] sm:$0xff] }
  0x8a   :  { %894 = vmatpush.msrb.mxu0 %v451_v14  ;;  %919 = vmatpush.msrb.mxu1 %v485_v15  ;;  %v25_v35 = vld [vmem:[%s3397_s0 + $0x70] sm:$0xff]  ;;  %v539_v39 = vld [vmem:[%s3396_s1 + $0xf00] sm:$0xff]  ;;  %v42_v61 = vld [vmem:[%s3397_s0 + $0xf8] sm:$0xff] }
  0x8b   :  { %946 = vmatpush.msrb.mxu2 %v515_v16  ;;  %971 = vmatpush.msrb.mxu3 %v549_v17  ;;  %v39_v54 = vld [vmem:[%s3397_s0 + $0xe0] sm:$0xff]  ;;  %v41_v55 = vld [vmem:[%s3397_s0 + $0xf0] sm:$0xff]  ;;  %v80_v62 = vld [vmem:[%s3396_s1 + $0xa8] sm:$0xff] }
  0x8c   :  { %895 = vmatpush.msrb.mxu0 %v449_v18  ;;  %920 = vmatpush.msrb.mxu1 %v483_v19  ;;  %v114_v63 = vld [vmem:[%s3396_s1 + $0x1b8] sm:$0xff]  ;;  %v144_v0 = vld [vmem:[%s3396_s1 + $0x2a8] sm:$0xff]  ;;  %v55_v10 = vld [vmem:[%s3397_s0 + $0x160] sm:$0xff] }
  0x8d   :  { %947 = vmatpush.msrb.mxu2 %v513_v20  ;;  %972 = vmatpush.msrb.mxu3 %v547_v21  ;;  %v178_v1 = vld [vmem:[%s3396_s1 + $0x3b8] sm:$0xff]  ;;  %v112_v3 = vld [vmem:[%s3396_s1 + $0x1a8] sm:$0xff]  ;;  %v57_v11 = vld [vmem:[%s3397_s0 + $0x170] sm:$0xff] }
  0x8e   :  { %896 = vmatpush.msrb.mxu0 %v447_v22  ;;  %921 = vmatpush.msrb.mxu1 %v481_v23  ;;  %v78_v2 = vld [vmem:[%s3396_s1 + $0x98] sm:$0xff]  ;;  %v176_v5 = vld [vmem:[%s3396_s1 + $0x3a8] sm:$0xff] }
  0x8f   :  { %948 = vmatpush.msrb.mxu2 %v511_v24  ;;  %973 = vmatpush.msrb.mxu3 %v545_v25  ;;  %v142_v4 = vld [vmem:[%s3396_s1 + $0x298] sm:$0xff]  ;;  %v76_v6 = vld [vmem:[%s3396_s1 + $0x88] sm:$0xff] }
  0x90   :  { %897 = vmatpush.msrb.mxu0 %v445_v26  ;;  %922 = vmatpush.msrb.mxu1 %v479_v27  ;;  %v110_v7 = vld [vmem:[%s3396_s1 + $0x198] sm:$0xff]  ;;  %v140_v8 = vld [vmem:[%s3396_s1 + $0x288] sm:$0xff] }
  0x91   :  { %949 = vmatpush.msrb.mxu2 %v509_v28  ;;  %974 = vmatpush.msrb.mxu3 %v543_v29  ;;  %v174_v9 = vld [vmem:[%s3396_s1 + $0x398] sm:$0xff]  ;;  %v108_v13 = vld [vmem:[%s3396_s1 + $0x188] sm:$0xff] }
  0x92   :  { %898 = vmatpush.msrb.mxu0 %v443_v30  ;;  %923 = vmatpush.msrb.mxu1 %v477_v31  ;;  %v74_v12 = vld [vmem:[%s3396_s1 + $0x78] sm:$0xff]  ;;  %v172_v15 = vld [vmem:[%s3396_s1 + $0x388] sm:$0xff] }
  0x93   :  { %950 = vmatpush.msrb.mxu2 %v507_v32  ;;  %975 = vmatpush.msrb.mxu3 %v541_v33  ;;  %v138_v14 = vld [vmem:[%s3396_s1 + $0x278] sm:$0xff]  ;;  %v56_v16 = vld [vmem:[%s3397_s0 + $0x168] sm:$0xff] }
  0x94   :  { %899 = vmatmul.f32.vlgmr.msrb.gmra.mxu0 %v23_v34  ;;  %951 = vmatmul.f32.vlgmr.msrb.gmra.mxu2 %v25_v35  ;;  %v58_v17 = vld [vmem:[%s3397_s0 + $0x178] sm:$0xff]  ;;  %v72_v18 = vld [vmem:[%s3396_s1 + $0x68] sm:$0xff] }
  0x95   :  { %987 = vmatpush.msra.mxu0 %v90_v36  ;;  %1039 = vmatpush.msra.mxu2 %v154_v37  ;;  %v106_v19 = vld [vmem:[%s3396_s1 + $0x178] sm:$0xff]  ;;  %v136_v20 = vld [vmem:[%s3396_s1 + $0x268] sm:$0xff] }
  0x96   :  { %924 = vmatpush.msrb.mxu1 %v475_v38  ;;  %976 = vmatpush.msrb.mxu3 %v539_v39  ;;  %v170_v21 = vld [vmem:[%s3396_s1 + $0x378] sm:$0xff]  ;;  %v104_v23 = vld [vmem:[%s3396_s1 + $0x168] sm:$0xff] }
  0x97   :  { %925 = vmatmul.f32.vlgmr.msrb.gmra.mxu1 %v24_v40  ;;  %977 = vmatmul.f32.vlgmr.msrb.gmra.mxu3 %v26_v41  ;;  %v70_v22 = vld [vmem:[%s3396_s1 + $0x58] sm:$0xff]  ;;  %v168_v25 = vld [vmem:[%s3396_s1 + $0x368] sm:$0xff] }
  0x98   :  { %988 = vmatpush.msra.mxu0 %v88_v42  ;;  %1013 = vmatpush.msra.mxu1 %v122_v43  ;;  %v134_v24 = vld [vmem:[%s3396_s1 + $0x258] sm:$0xff]  ;;  %v68_v26 = vld [vmem:[%s3396_s1 + $0x48] sm:$0xff] }
  0x99   :  { %1040 = vmatpush.msra.mxu2 %v152_v44  ;;  %1065 = vmatpush.msra.mxu3 %v186_v45  ;;  %v102_v27 = vld [vmem:[%s3396_s1 + $0x158] sm:$0xff]  ;;  %v132_v28 = vld [vmem:[%s3396_s1 + $0x248] sm:$0xff] }
  0x9a   :  { %989 = vmatpush.msra.mxu0 %v86_v46  ;;  %1014 = vmatpush.msra.mxu1 %v120_v47  ;;  %v166_v29 = vld [vmem:[%s3396_s1 + $0x358] sm:$0xff]  ;;  %v100_v31 = vld [vmem:[%s3396_s1 + $0x148] sm:$0xff] }
  0x9b   :  { %1041 = vmatpush.msra.mxu2 %v150_v48  ;;  %1066 = vmatpush.msra.mxu3 %v184_v49  ;;  %v66_v30 = vld [vmem:[%s3396_s1 + $0x38] sm:$0xff]  ;;  %v164_v34 = vld [vmem:[%s3396_s1 + $0x348] sm:$0xff] }
  0x9c   :  { %990 = vmatpush.msra.mxu0 %v84_v50  ;;  %1015 = vmatpush.msra.mxu1 %v118_v51  ;;  %v130_v33 = vld [vmem:[%s3396_s1 + $0x238] sm:$0xff]  ;;  %v64_v36 = vld [vmem:[%s3396_s1 + $0x28] sm:$0xff] }
  0x9d   :  { %1042 = vmatpush.msra.mxu2 %v148_v52  ;;  %1067 = vmatpush.msra.mxu3 %v182_v53  ;;  %v98_v37 = vld [vmem:[%s3396_s1 + $0x138] sm:$0xff]  ;;  %v128_v39 = vld [vmem:[%s3396_s1 + $0x228] sm:$0xff] }
  0x9e   :  { %902 = vmatmul.f32.gmra.mxu0 %v39_v54  ;;  %954 = vmatmul.f32.gmra.mxu2 %v41_v55  ;;  %v162_v40 = vld [vmem:[%s3396_s1 + $0x338] sm:$0xff]  ;;  %v96_v42 = vld [vmem:[%s3396_s1 + $0x128] sm:$0xff] }
  0x9f   :  { %991 = vmatpush.msra.mxu0 %v82_v56  ;;  %1016 = vmatpush.msra.mxu1 %v116_v57  ;;  %v62_v41 = vld [vmem:[%s3396_s1 + $0x18] sm:$0xff]  ;;  %v160_v45 = vld [vmem:[%s3396_s1 + $0x328] sm:$0xff] }
  0xa0   :  { %1043 = vmatpush.msra.mxu2 %v146_v58  ;;  %1068 = vmatpush.msra.mxu3 %v180_v59  ;;  %v126_v44 = vld [vmem:[%s3396_s1 + $0x218] sm:$0xff]  ;;  %v60_v47 = vld [vmem:[%s3396_s1 + $0x8] sm:$0xff] }
  0xa1   :  { %928 = vmatmul.f32.gmra.mxu1 %v40_v60  ;;  %980 = vmatmul.f32.gmra.mxu3 %v42_v61  ;;  %v94_v48 = vld [vmem:[%s3396_s1 + $0x118] sm:$0xff]  ;;  %v124_v49 = vld [vmem:[%s3396_s1 + $0x208] sm:$0xff] }
  0xa2   :  { %992 = vmatpush.msra.mxu0 %v80_v62  ;;  %1017 = vmatpush.msra.mxu1 %v114_v63  ;;  %v158_v50 = vld [vmem:[%s3396_s1 + $0x318] sm:$0xff]  ;;  %v92_v55 = vld [vmem:[%s3396_s1 + $0x108] sm:$0xff] }
  0xa3   :  { %1044 = vmatpush.msra.mxu2 %v144_v0  ;;  %1069 = vmatpush.msra.mxu3 %v178_v1  ;;  %v218_v52 = vld [vmem:[%s3396_s1 + $0x4f8] sm:$0xff]  ;;  %v156_v56 = vld [vmem:[%s3396_s1 + $0x308] sm:$0xff] }
  0xa4   :  { %993 = vmatpush.msra.mxu0 %v78_v2  ;;  %1018 = vmatpush.msra.mxu1 %v112_v3  ;;  %v282_v53 = vld [vmem:[%s3396_s1 + $0x6f8] sm:$0xff]  ;;  %v216_v57 = vld [vmem:[%s3396_s1 + $0x4e8] sm:$0xff] }
  0xa5   :  { %1045 = vmatpush.msra.mxu2 %v142_v4  ;;  %1070 = vmatpush.msra.mxu3 %v176_v5  ;;  %v250_v58 = vld [vmem:[%s3396_s1 + $0x5f8] sm:$0xff]  ;;  %v280_v60 = vld [vmem:[%s3396_s1 + $0x6e8] sm:$0xff] }
  0xa6   :  { %994 = vmatpush.msra.mxu0 %v76_v6  ;;  %1019 = vmatpush.msra.mxu1 %v110_v7  ;;  %v314_v61 = vld [vmem:[%s3396_s1 + $0x7f8] sm:$0xff]  ;;  %v248_v0 = vld [vmem:[%s3396_s1 + $0x5e8] sm:$0xff] }
  0xa7   :  { %1046 = vmatpush.msra.mxu2 %v140_v8  ;;  %1071 = vmatpush.msra.mxu3 %v174_v9  ;;  %v214_v63 = vld [vmem:[%s3396_s1 + $0x4d8] sm:$0xff]  ;;  %v312_v3 = vld [vmem:[%s3396_s1 + $0x7e8] sm:$0xff] }
  0xa8   :  { %905 = vmatmul.f32.gmra.mxu0 %v55_v10  ;;  %957 = vmatmul.f32.gmra.mxu2 %v57_v11  ;;  %v278_v2 = vld [vmem:[%s3396_s1 + $0x6d8] sm:$0xff]  ;;  %v212_v4 = vld [vmem:[%s3396_s1 + $0x4c8] sm:$0xff] }
  0xa9   :  { %995 = vmatpush.msra.mxu0 %v74_v12  ;;  %1020 = vmatpush.msra.mxu1 %v108_v13  ;;  %v246_v5 = vld [vmem:[%s3396_s1 + $0x5d8] sm:$0xff]  ;;  %v276_v7 = vld [vmem:[%s3396_s1 + $0x6c8] sm:$0xff] }
  0xaa   :  { %1047 = vmatpush.msra.mxu2 %v138_v14  ;;  %1072 = vmatpush.msra.mxu3 %v172_v15  ;;  %v310_v8 = vld [vmem:[%s3396_s1 + $0x7d8] sm:$0xff]  ;;  %v244_v11 = vld [vmem:[%s3396_s1 + $0x5c8] sm:$0xff] }
  0xab   :  { %931 = vmatmul.f32.gmra.mxu1 %v56_v16  ;;  %983 = vmatmul.f32.gmra.mxu3 %v58_v17  ;;  %v210_v10 = vld [vmem:[%s3396_s1 + $0x4b8] sm:$0xff]  ;;  %v308_v14 = vld [vmem:[%s3396_s1 + $0x7c8] sm:$0xff]  ;;  %v1461_v16 = vld [vmem:[%s3397_s0] sm:$0xff] }
  0xac   :  { %996 = vmatpush.msra.mxu0 %v72_v18  ;;  %1021 = vmatpush.msra.mxu1 %v106_v19  ;;  %v274_v13 = vld [vmem:[%s3396_s1 + $0x6b8] sm:$0xff]  ;;  %v1462_v17 = vld [vmem:[%s3397_s0 + $0x10] sm:$0xff]  ;;  %v208_v18 = vld [vmem:[%s3396_s1 + $0x4a8] sm:$0xff] }
  0xad   :  { %1048 = vmatpush.msra.mxu2 %v136_v20  ;;  %1073 = vmatpush.msra.mxu3 %v170_v21  ;;  %v588_v32 = vpop.f32.mrf.mxu0  ;;  %v242_v19 = vld [vmem:[%s3396_s1 + $0x5b8] sm:$0xff]  ;;  %v272_v21 = vld [vmem:[%s3396_s1 + $0x6a8] sm:$0xff] }
  0xae   :  { %997 = vmatpush.msra.mxu0 %v70_v22  ;;  %1022 = vmatpush.msra.mxu1 %v104_v23  ;;  %v306_v22 = vld [vmem:[%s3396_s1 + $0x7b8] sm:$0xff]  ;;  %v1463_v23 = vld [vmem:[%s3397_s0 + $0x8] sm:$0xff] }
  0xaf   :  { %1049 = vmatpush.msra.mxu2 %v134_v24  ;;  %1074 = vmatpush.msra.mxu3 %v168_v25  ;;  %v1464_v24 = vld [vmem:[%s3397_s0 + $0x18] sm:$0xff] }
  0xb0   :  { %998 = vmatpush.msra.mxu0 %v68_v26  ;;  %1023 = vmatpush.msra.mxu1 %v102_v27  ;;  %v614_v35 = vpop.f32.mrf.mxu1  ;;  %v206_v25 = vld [vmem:[%s3396_s1 + $0x498] sm:$0xff]  ;;  %v240_v26 = vld [vmem:[%s3396_s1 + $0x5a8] sm:$0xff] }
  0xb1   :  { %1050 = vmatpush.msra.mxu2 %v132_v28  ;;  %1075 = vmatpush.msra.mxu3 %v166_v29  ;;  %v615_v38 = vadd.f32 %v614_v35, %v588_v32  ;;  %v270_v28 = vld [vmem:[%s3396_s1 + $0x698] sm:$0xff]  ;;  %v304_v29 = vld [vmem:[%s3396_s1 + $0x7a8] sm:$0xff] }
  0xb2   :  { %999 = vmatpush.msra.mxu0 %v66_v30  ;;  %1024 = vmatpush.msra.mxu1 %v100_v31  ;;  %v204_v31 = vld [vmem:[%s3396_s1 + $0x488] sm:$0xff]  ;;  %v238_v32 = vld [vmem:[%s3396_s1 + $0x598] sm:$0xff] }
  0xb3   :  { %1051 = vmatpush.msra.mxu2 %v130_v33  ;;  %1076 = vmatpush.msra.mxu3 %v164_v34  ;;  %v640_v43 = vpop.f32.mrf.mxu2  ;;  %v268_v34 = vld [vmem:[%s3396_s1 + $0x688] sm:$0xff]  ;;  %v302_v35 = vld [vmem:[%s3396_s1 + $0x798] sm:$0xff] }
  0xb4   :  { %1000 = vmatpush.msra.mxu0 %v64_v36  ;;  %1025 = vmatpush.msra.mxu1 %v98_v37  ;;  %v641_v46 = vadd.f32 %v640_v43, %v615_v38  ;;  %v202_v37 = vld [vmem:[%s3396_s1 + $0x478] sm:$0xff]  ;;  %v236_v38 = vld [vmem:[%s3396_s1 + $0x588] sm:$0xff]  ;;  %v1465_v43 = vld [vmem:[%s3397_s0 + $0x80] sm:$0xff] }
  0xb5   :  { %1052 = vmatpush.msra.mxu2 %v128_v39  ;;  %1077 = vmatpush.msra.mxu3 %v162_v40  ;;  %v266_v40 = vld [vmem:[%s3396_s1 + $0x678] sm:$0xff] }
  0xb6   :  { %1001 = vmatpush.msra.mxu0 %v62_v41  ;;  %1026 = vmatpush.msra.mxu1 %v96_v42  ;;  %v666_v51 = vpop.f32.mrf.mxu3  ;;  %v300_v41 = vld [vmem:[%s3396_s1 + $0x788] sm:$0xff] }
  0xb7   :  { %1053 = vmatpush.msra.mxu2 %v126_v44  ;;  %1078 = vmatpush.msra.mxu3 %v160_v45  ;;  %v2628_v54 = vadd.f32 %v666_v51, %v641_v46  ;;  %v591_v59 = vpop.f32.mrf.mxu0  ;;  %v1466_v44 = vld [vmem:[%s3397_s0 + $0x90] sm:$0xff]  ;;  %v200_v45 = vld [vmem:[%s3396_s1 + $0x468] sm:$0xff]  ;;  %v234_v46 = vld [vmem:[%s3396_s1 + $0x578] sm:$0xff] }
  0xb8   :  { %1002 = vmatpush.msra.mxu0 %v60_v47  ;;  %1027 = vmatpush.msra.mxu1 %v94_v48  ;;  %v264_v48 = vld [vmem:[%s3396_s1 + $0x668] sm:$0xff] }
  0xb9   :  { %1054 = vmatpush.msra.mxu2 %v124_v49  ;;  %1079 = vmatpush.msra.mxu3 %v158_v50  ;;  %v298_v49 = vld [vmem:[%s3396_s1 + $0x778] sm:$0xff]  ;;  %v1467_v51 = vld [vmem:[%s3397_s0 + $0x88] sm:$0xff] }
  0xba   :  { %1091 = vmatpush.msrb.mxu0 %v218_v52  ;;  %v617_v62 = vpop.f32.mrf.mxu1  ;;  %1028 = vmatpush.msra.mxu1 %v92_v55  ;;  %v1468_v52 = vld [vmem:[%s3397_s0 + $0x98] sm:$0xff]  ;;  %v232_v55 = vld [vmem:[%s3396_s1 + $0x568] sm:$0xff] }
  0xbb   :  { %1143 = vmatpush.msrb.mxu2 %v282_v53  ;;  %1080 = vmatpush.msra.mxu3 %v156_v56  ;;  %v618_v1 = vadd.f32 %v617_v62, %v591_v59  ;;  %v198_v53 = vld [vmem:[%s3396_s1 + $0x458] sm:$0xff]  ;;  %v296_v56 = vld [vmem:[%s3396_s1 + $0x768] sm:$0xff] }
  0xbc   :  { %1092 = vmatpush.msrb.mxu0 %v216_v57  ;;  %1117 = vmatpush.msrb.mxu1 %v250_v58  ;;  %v196_v58 = vld [vmem:[%s3396_s1 + $0x448] sm:$0xff]  ;;  %v230_v59 = vld [vmem:[%s3396_s1 + $0x558] sm:$0xff] }
  0xbd   :  { %1144 = vmatpush.msrb.mxu2 %v280_v60  ;;  %1169 = vmatpush.msrb.mxu3 %v314_v61  ;;  %v643_v6 = vpop.f32.mrf.mxu2  ;;  %v260_v62 = vld [vmem:[%s3396_s1 + $0x648] sm:$0xff] }
  0xbe   :  { %1093 = vmatpush.msrb.mxu0 %v214_v63  ;;  %1118 = vmatpush.msrb.mxu1 %v248_v0  ;;  %v644_v9 = vadd.f32 %v643_v6, %v618_v1  ;;  %v294_v63 = vld [vmem:[%s3396_s1 + $0x758] sm:$0xff] }
  0xbf   :  { %1145 = vmatpush.msrb.mxu2 %v278_v2  ;;  %1170 = vmatpush.msrb.mxu3 %v312_v3  ;;  %v194_v1 = vld [vmem:[%s3396_s1 + $0x438] sm:$0xff]  ;;  %v228_v2 = vld [vmem:[%s3396_s1 + $0x548] sm:$0xff] }
  0xc0   :  { %1094 = vmatpush.msrb.mxu0 %v212_v4  ;;  %1119 = vmatpush.msrb.mxu1 %v246_v5  ;;  %v669_v12 = vpop.f32.mrf.mxu3  ;;  %v258_v4 = vld [vmem:[%s3396_s1 + $0x638] sm:$0xff]  ;;  %v292_v5 = vld [vmem:[%s3396_s1 + $0x748] sm:$0xff] }
  0xc1   :  { %1146 = vmatpush.msrb.mxu2 %v276_v7  ;;  %1171 = vmatpush.msrb.mxu3 %v310_v8  ;;  %v2684_v15 = vadd.f32 %v669_v12, %v644_v9  ;;  %v594_v20 = vpop.f32.mrf.mxu0  ;;  %v1469_v7 = vld [vmem:[%s3397_s0 + $0x100] sm:$0xff]  ;;  %v1470_v8 = vld [vmem:[%s3397_s0 + $0x110] sm:$0xff]  ;;  %v192_v9 = vld [vmem:[%s3396_s1 + $0x428] sm:$0xff] }
  0xc2   :  { %1003 = vmatmul.f32.vlgmr.msra.gmra.mxu0 %v1461_v16  ;;  %1055 = vmatmul.f32.vlgmr.msra.gmra.mxu2 %v1462_v17  ;;  %v256_v12 = vld [vmem:[%s3396_s1 + $0x628] sm:$0xff]  ;;  %v1472_v17 = vld [vmem:[%s3397_s0 + $0x118] sm:$0xff] }
  0xc3   :  { %1095 = vmatpush.msrb.mxu0 %v210_v10  ;;  %1120 = vmatpush.msrb.mxu1 %v244_v11  ;;  %v226_v10 = vld [vmem:[%s3396_s1 + $0x538] sm:$0xff]  ;;  %v1471_v16 = vld [vmem:[%s3397_s0 + $0x108] sm:$0xff] }
  0xc4   :  { %1147 = vmatpush.msrb.mxu2 %v274_v13  ;;  %1172 = vmatpush.msrb.mxu3 %v308_v14  ;;  %v290_v13 = vld [vmem:[%s3396_s1 + $0x738] sm:$0xff] }
  0xc5   :  { %1029 = vmatmul.f32.vlgmr.msra.gmra.mxu1 %v1463_v23  ;;  %1081 = vmatmul.f32.vlgmr.msra.gmra.mxu3 %v1464_v24  ;;  %v620_v27 = vpop.f32.mrf.mxu1  ;;  %v222_v23 = vld [vmem:[%s3396_s1 + $0x518] sm:$0xff] }
  0xc6   :  { %1096 = vmatpush.msrb.mxu0 %v208_v18  ;;  %1121 = vmatpush.msrb.mxu1 %v242_v19  ;;  %v621_v30 = vadd.f32 %v620_v27, %v594_v20  ;;  %v190_v18 = vld [vmem:[%s3396_s1 + $0x418] sm:$0xff]  ;;  %v224_v19 = vld [vmem:[%s3396_s1 + $0x528] sm:$0xff] }
  0xc7   :  { %1148 = vmatpush.msrb.mxu2 %v272_v21  ;;  %1173 = vmatpush.msrb.mxu3 %v306_v22  ;;  %v646_v33 = vpop.f32.mrf.mxu2  ;;  %v288_v20 = vld [vmem:[%s3396_s1 + $0x728] sm:$0xff] }
  0xc8   :  { %1097 = vmatpush.msrb.mxu0 %v206_v25  ;;  %1122 = vmatpush.msrb.mxu1 %v240_v26  ;;  %v647_v36 = vadd.f32 %v646_v33, %v621_v30  ;;  %v188_v22 = vld [vmem:[%s3396_s1 + $0x408] sm:$0xff]  ;;  %v286_v26 = vld [vmem:[%s3396_s1 + $0x718] sm:$0xff]  ;;  %v1473_v33 = vld [vmem:[%s3397_s0 + $0x20] sm:$0xff] }
  0xc9   :  { %1149 = vmatpush.msrb.mxu2 %v270_v28  ;;  %1174 = vmatpush.msrb.mxu3 %v304_v29  ;;  %v252_v25 = vld [vmem:[%s3396_s1 + $0x608] sm:$0xff]  ;;  %v346_v28 = vld [vmem:[%s3396_s1 + $0x8f8] sm:$0xff] }
  0xca   :  { %1098 = vmatpush.msrb.mxu0 %v204_v31  ;;  %1123 = vmatpush.msrb.mxu1 %v238_v32  ;;  %v672_v39 = vpop.f32.mrf.mxu3  ;;  %v410_v29 = vld [vmem:[%s3396_s1 + $0xaf8] sm:$0xff]  ;;  %v220_v31 = vld [vmem:[%s3396_s1 + $0x508] sm:$0xff] }
  0xcb   :  { %1150 = vmatpush.msrb.mxu2 %v268_v34  ;;  %1175 = vmatpush.msrb.mxu3 %v302_v35  ;;  %v2746_v42 = vadd.f32 %v672_v39, %v647_v36  ;;  %v284_v32 = vld [vmem:[%s3396_s1 + $0x708] sm:$0xff]  ;;  %v1474_v34 = vld [vmem:[%s3397_s0 + $0x30] sm:$0xff] }
  0xcc   :  { %1006 = vmatmul.f32.gmra.mxu0 %v1465_v43  ;;  %1058 = vmatmul.f32.gmra.mxu2 %v1466_v44  ;;  %v344_v36 = vld [vmem:[%s3396_s1 + $0x8e8] sm:$0xff] }
  0xcd   :  { %1099 = vmatpush.msrb.mxu0 %v202_v37  ;;  %1124 = vmatpush.msrb.mxu1 %v236_v38  ;;  %v692_v47 = vpop.f32.mrf.mxu0  ;;  %v378_v37 = vld [vmem:[%s3396_s1 + $0x9f8] sm:$0xff]  ;;  %v1475_v44 = vld [vmem:[%s3397_s0 + $0x28] sm:$0xff] }
  0xce   :  { %1151 = vmatpush.msrb.mxu2 %v266_v40  ;;  %1176 = vmatpush.msrb.mxu3 %v300_v41  ;;  %v693_v50 = vadd.f32 %v692_v47, %v2628_v54  ;;  %v262_v54 = vld [vmem:[%s3396_s1 + $0x658] sm:$0xff]  ;;  %v408_v40 = vld [vmem:[%s3396_s1 + $0xae8] sm:$0xff] }
  0xcf   :  { %1032 = vmatmul.f32.gmra.mxu1 %v1467_v51  ;;  %1084 = vmatmul.f32.gmra.mxu3 %v1468_v52  ;;  %v442_v41 = vld [vmem:[%s3396_s1 + $0xbf8] sm:$0xff]  ;;  %v376_v47 = vld [vmem:[%s3396_s1 + $0x9e8] sm:$0xff] }
  0xd0   :  { %1100 = vmatpush.msrb.mxu0 %v200_v45  ;;  %1125 = vmatpush.msrb.mxu1 %v234_v46  ;;  %v718_v57 = vpop.f32.mrf.mxu1  ;;  %v1476_v45 = vld [vmem:[%s3397_s0 + $0x38] sm:$0xff] }
  0xd1   :  { %1152 = vmatpush.msrb.mxu2 %v264_v48  ;;  %1177 = vmatpush.msrb.mxu3 %v298_v49  ;;  %v719_v60 = vadd.f32 %v718_v57, %v693_v50  ;;  %v744_v61 = vpop.f32.mrf.mxu2  ;;  %v342_v46 = vld [vmem:[%s3396_s1 + $0x8d8] sm:$0xff]  ;;  %v440_v48 = vld [vmem:[%s3396_s1 + $0xbe8] sm:$0xff] }
  0xd2   :  { %1101 = vmatpush.msrb.mxu0 %v198_v53  ;;  %1126 = vmatpush.msrb.mxu1 %v232_v55  ;;  %v340_v50 = vld [vmem:[%s3396_s1 + $0x8c8] sm:$0xff]  ;;  %v374_v51 = vld [vmem:[%s3396_s1 + $0x9d8] sm:$0xff] }
  0xd3   :  { %1153 = vmatpush.msrb.mxu2 %v262_v54  ;;  %1178 = vmatpush.msrb.mxu3 %v296_v56  ;;  %v745_v0 = vadd.f32 %v744_v61, %v719_v60  ;;  %v404_v53 = vld [vmem:[%s3396_s1 + $0xac8] sm:$0xff]  ;;  %v438_v55 = vld [vmem:[%s3396_s1 + $0xbd8] sm:$0xff]  ;;  %v1477_v61 = vld [vmem:[%s3397_s0 + $0xa0] sm:$0xff] }
  0xd4   :  { %1102 = vmatpush.msrb.mxu0 %v196_v58  ;;  %1127 = vmatpush.msrb.mxu1 %v230_v59  ;;  %v770_v3 = vpop.f32.mrf.mxu3  ;;  %v338_v56 = vld [vmem:[%s3396_s1 + $0x8b8] sm:$0xff]  ;;  %v372_v57 = vld [vmem:[%s3396_s1 + $0x9c8] sm:$0xff] }
  0xd5   :  { %1154 = vmatpush.msrb.mxu2 %v260_v62  ;;  %1179 = vmatpush.msrb.mxu3 %v294_v63  ;;  %v2809_v6 = vadd.f32 %v770_v3, %v745_v0  ;;  %v402_v59 = vld [vmem:[%s3396_s1 + $0xab8] sm:$0xff]  ;;  %v436_v60 = vld [vmem:[%s3396_s1 + $0xbc8] sm:$0xff]  ;;  %v1478_v62 = vld [vmem:[%s3397_s0 + $0xb0] sm:$0xff] }
  0xd6   :  { %1009 = vmatmul.f32.gmra.mxu0 %v1469_v7  ;;  %1061 = vmatmul.f32.gmra.mxu2 %v1470_v8  ;;  %v336_v0 = vld [vmem:[%s3396_s1 + $0x8a8] sm:$0xff] }
  0xd7   :  { %1103 = vmatpush.msrb.mxu0 %v194_v1  ;;  %1128 = vmatpush.msrb.mxu1 %v228_v2  ;;  %v695_v11 = vpop.f32.mrf.mxu0  ;;  %v370_v1 = vld [vmem:[%s3396_s1 + $0x9b8] sm:$0xff]  ;;  %v1479_v8 = vld [vmem:[%s3397_s0 + $0xa8] sm:$0xff] }
  0xd8   :  { %1155 = vmatpush.msrb.mxu2 %v258_v4  ;;  %1180 = vmatpush.msrb.mxu3 %v292_v5  ;;  %v696_v14 = vadd.f32 %v695_v11, %v2684_v15  ;;  %v254_v15 = vld [vmem:[%s3396_s1 + $0x618] sm:$0xff]  ;;  %v400_v4 = vld [vmem:[%s3396_s1 + $0xaa8] sm:$0xff] }
  0xd9   :  { %1035 = vmatmul.f32.gmra.mxu1 %v1471_v16  ;;  %1087 = vmatmul.f32.gmra.mxu3 %v1472_v17  ;;  %v434_v5 = vld [vmem:[%s3396_s1 + $0xbb8] sm:$0xff]  ;;  %v368_v11 = vld [vmem:[%s3396_s1 + $0x9a8] sm:$0xff] }
  0xda   :  { %1104 = vmatpush.msrb.mxu0 %v192_v9  ;;  %1129 = vmatpush.msrb.mxu1 %v226_v10  ;;  %v721_v21 = vpop.f32.mrf.mxu1  ;;  %v1480_v9 = vld [vmem:[%s3397_s0 + $0xb8] sm:$0xff] }
  0xdb   :  { %1156 = vmatpush.msrb.mxu2 %v256_v12  ;;  %1181 = vmatpush.msrb.mxu3 %v290_v13  ;;  %v722_v24 = vadd.f32 %v721_v21, %v696_v14  ;;  %v334_v10 = vld [vmem:[%s3396_s1 + $0x898] sm:$0xff]  ;;  %v432_v12 = vld [vmem:[%s3396_s1 + $0xba8] sm:$0xff] }
  0xdc   :  { %1105 = vmatpush.msrb.mxu0 %v190_v18  ;;  %1130 = vmatpush.msrb.mxu1 %v224_v19  ;;  %v332_v14 = vld [vmem:[%s3396_s1 + $0x888] sm:$0xff]  ;;  %v366_v16 = vld [vmem:[%s3396_s1 + $0x998] sm:$0xff] }
  0xdd   :  { %1157 = vmatpush.msrb.mxu2 %v254_v15  ;;  %1182 = vmatpush.msrb.mxu3 %v288_v20  ;;  %v747_v27 = vpop.f32.mrf.mxu2  ;;  %v396_v18 = vld [vmem:[%s3396_s1 + $0xa88] sm:$0xff]  ;;  %v430_v19 = vld [vmem:[%s3396_s1 + $0xb98] sm:$0xff] }
  0xde   :  { %1106 = vmatpush.msrb.mxu0 %v188_v22  ;;  %1131 = vmatpush.msrb.mxu1 %v222_v23  ;;  %v748_v30 = vadd.f32 %v747_v27, %v722_v24  ;;  %v330_v20 = vld [vmem:[%s3396_s1 + $0x878] sm:$0xff]  ;;  %v364_v21 = vld [vmem:[%s3396_s1 + $0x988] sm:$0xff] }
  0xdf   :  { %1158 = vmatpush.msrb.mxu2 %v252_v25  ;;  %1183 = vmatpush.msrb.mxu3 %v286_v26  ;;  %v394_v23 = vld [vmem:[%s3396_s1 + $0xa78] sm:$0xff]  ;;  %v428_v24 = vld [vmem:[%s3396_s1 + $0xb88] sm:$0xff]  ;;  %v1481_v25 = vld [vmem:[%s3397_s0 + $0x120] sm:$0xff] }
  0xe0   :  { %1107 = vmatmul.f32.vlgmr.msrb.gmra.mxu0 %v1473_v33  ;;  %1159 = vmatmul.f32.vlgmr.msrb.gmra.mxu2 %v1474_v34  ;;  %v773_v35 = vpop.f32.mrf.mxu3  ;;  %v1482_v26 = vld [vmem:[%s3397_s0 + $0x130] sm:$0xff]  ;;  %v426_v33 = vld [vmem:[%s3396_s1 + $0xb78] sm:$0xff] }
  0xe1   :  { %1195 = vmatpush.msra.mxu0 %v346_v28  ;;  %1247 = vmatpush.msra.mxu2 %v410_v29  ;;  %v698_v38 = vpop.f32.mrf.mxu0  ;;  %v2884_v39 = vadd.f32 %v773_v35, %v748_v30  ;;  %v328_v28 = vld [vmem:[%s3396_s1 + $0x868] sm:$0xff]  ;;  %v362_v29 = vld [vmem:[%s3396_s1 + $0x978] sm:$0xff] }
  0xe2   :  { %1132 = vmatpush.msrb.mxu1 %v220_v31  ;;  %1184 = vmatpush.msrb.mxu3 %v284_v32  ;;  %v699_v43 = vadd.f32 %v698_v38, %v2746_v42  ;;  %v406_v42 = vld [vmem:[%s3396_s1 + $0xad8] sm:$0xff]  ;;  %v392_v32 = vld [vmem:[%s3396_s1 + $0xa68] sm:$0xff] }
  0xe3   :  { %1133 = vmatmul.f32.vlgmr.msrb.gmra.mxu1 %v1475_v44  ;;  %1185 = vmatmul.f32.vlgmr.msrb.gmra.mxu3 %v1476_v45  ;;  %v1483_v35 = vld [vmem:[%s3397_s0 + $0x128] sm:$0xff]  ;;  %v358_v44 = vld [vmem:[%s3396_s1 + $0x958] sm:$0xff] }
  0xe4   :  { %1196 = vmatpush.msra.mxu0 %v344_v36  ;;  %1221 = vmatpush.msra.mxu1 %v378_v37  ;;  %v724_v49 = vpop.f32.mrf.mxu1  ;;  %v1484_v36 = vld [vmem:[%s3397_s0 + $0x138] sm:$0xff]  ;;  %v360_v38 = vld [vmem:[%s3396_s1 + $0x968] sm:$0xff] }
  0xe5   :  { %1248 = vmatpush.msra.mxu2 %v408_v40  ;;  %1273 = vmatpush.msra.mxu3 %v442_v41  ;;  %v725_v52 = vadd.f32 %v724_v49, %v699_v43  ;;  %v326_v37 = vld [vmem:[%s3396_s1 + $0x858] sm:$0xff]  ;;  %v424_v40 = vld [vmem:[%s3396_s1 + $0xb68] sm:$0xff] }
  0xe6   :  { %1197 = vmatpush.msra.mxu0 %v342_v46  ;;  %1222 = vmatpush.msra.mxu1 %v376_v47  ;;  %v324_v43 = vld [vmem:[%s3396_s1 + $0x848] sm:$0xff]  ;;  %v422_v47 = vld [vmem:[%s3396_s1 + $0xb58] sm:$0xff] }
  0xe7   :  { %1249 = vmatpush.msra.mxu2 %v406_v42  ;;  %1274 = vmatpush.msra.mxu3 %v440_v48  ;;  %v750_v54 = vpop.f32.mrf.mxu2  ;;  %v388_v46 = vld [vmem:[%s3396_s1 + $0xa48] sm:$0xff]  ;;  %v322_v42 = vld [vmem:[%s3396_s1 + $0x838] sm:$0xff] }
  0xe8   :  { %1198 = vmatpush.msra.mxu0 %v340_v50  ;;  %1223 = vmatpush.msra.mxu1 %v374_v51  ;;  %v751_v58 = vadd.f32 %v750_v54, %v725_v52  ;;  %v356_v48 = vld [vmem:[%s3396_s1 + $0x948] sm:$0xff]  ;;  %v386_v50 = vld [vmem:[%s3396_s1 + $0xa38] sm:$0xff] }
  0xe9   :  { %1250 = vmatpush.msra.mxu2 %v404_v53  ;;  %1275 = vmatpush.msra.mxu3 %v438_v55  ;;  %v420_v51 = vld [vmem:[%s3396_s1 + $0xb48] sm:$0xff]  ;;  %v354_v55 = vld [vmem:[%s3396_s1 + $0x938] sm:$0xff] }
  0xea   :  { %1110 = vmatmul.f32.gmra.mxu0 %v1477_v61  ;;  %1162 = vmatmul.f32.gmra.mxu2 %v1478_v62  ;;  %v776_v63 = vpop.f32.mrf.mxu3  ;;  %v320_v53 = vld [vmem:[%s3396_s1 + $0x828] sm:$0xff]  ;;  %v382_v62 = vld [vmem:[%s3396_s1 + $0xa18] sm:$0xff] }
  0xeb   :  { %1199 = vmatpush.msra.mxu0 %v338_v56  ;;  %1224 = vmatpush.msra.mxu1 %v372_v57  ;;  %v2947_v2 = vadd.f32 %v776_v63, %v751_v58  ;;  %v796_v3 = vpop.f32.mrf.mxu0  ;;  %v384_v54 = vld [vmem:[%s3396_s1 + $0xa28] sm:$0xff]  ;;  %v418_v56 = vld [vmem:[%s3396_s1 + $0xb38] sm:$0xff] }
  0xec   :  { %1251 = vmatpush.msra.mxu2 %v402_v59  ;;  %1276 = vmatpush.msra.mxu3 %v436_v60  ;;  %v797_v7 = vadd.f32 %v796_v3, %v2809_v6  ;;  %v398_v6 = vld [vmem:[%s3396_s1 + $0xa98] sm:$0xff]  ;;  %v352_v59 = vld [vmem:[%s3396_s1 + $0x928] sm:$0xff] }
  0xed   :  { %1136 = vmatmul.f32.gmra.mxu1 %v1479_v8  ;;  %1188 = vmatmul.f32.gmra.mxu3 %v1480_v9  ;;  %v318_v58 = vld [vmem:[%s3396_s1 + $0x818] sm:$0xff]  ;;  %v416_v63 = vld [vmem:[%s3396_s1 + $0xb28] sm:$0xff] }
  0xee   :  { %1200 = vmatpush.msra.mxu0 %v336_v0  ;;  %1225 = vmatpush.msra.mxu1 %v370_v1  ;;  %v822_v13 = vpop.f32.mrf.mxu1  ;;  %v316_v1 = vld [vmem:[%s3396_s1 + $0x808] sm:$0xff]  ;;  %v350_v3 = vld [vmem:[%s3396_s1 + $0x918] sm:$0xff] }
  0xef   :  { %1252 = vmatpush.msra.mxu2 %v400_v4  ;;  %1277 = vmatpush.msra.mxu3 %v434_v5  ;;  %v823_v17 = vadd.f32 %v822_v13, %v797_v7  ;;  %v380_v4 = vld [vmem:[%s3396_s1 + $0xa08] sm:$0xff]  ;;  %v474_v8 = vld [vmem:[%s3396_s1 + $0xcf8] sm:$0xff]  ;;  %v1486_v13 = vld [vmem:[%s3397_s0 + $0x50] sm:$0xff] }
  0xf0   :  { %1201 = vmatpush.msra.mxu0 %v334_v10  ;;  %1226 = vmatpush.msra.mxu1 %v368_v11  ;;  %v538_v9 = vld [vmem:[%s3396_s1 + $0xef8] sm:$0xff]  ;;  %v348_v10 = vld [vmem:[%s3396_s1 + $0x908] sm:$0xff] }
  0xf1   :  { %1253 = vmatpush.msra.mxu2 %v398_v6  ;;  %1278 = vmatpush.msra.mxu3 %v432_v12  ;;  %v848_v15 = vpop.f32.mrf.mxu2  ;;  %v412_v11 = vld [vmem:[%s3396_s1 + $0xb08] sm:$0xff]  ;;  %v1485_v12 = vld [vmem:[%s3397_s0 + $0x40] sm:$0xff] }
  0xf2   :  { %1202 = vmatpush.msra.mxu0 %v332_v14  ;;  %1227 = vmatpush.msra.mxu1 %v366_v16  ;;  %v849_v22 = vadd.f32 %v848_v15, %v823_v17  ;;  %v472_v16 = vld [vmem:[%s3396_s1 + $0xce8] sm:$0xff]  ;;  %v506_v17 = vld [vmem:[%s3396_s1 + $0xdf8] sm:$0xff] }
  0xf3   :  { %1254 = vmatpush.msra.mxu2 %v396_v18  ;;  %1279 = vmatpush.msra.mxu3 %v430_v19  ;;  %v536_v18 = vld [vmem:[%s3396_s1 + $0xee8] sm:$0xff]  ;;  %v570_v19 = vld [vmem:[%s3396_s1 + $0xff8] sm:$0xff] }
  0xf4   :  { %1113 = vmatmul.f32.gmra.mxu0 %v1481_v25  ;;  %1165 = vmatmul.f32.gmra.mxu2 %v1482_v26  ;;  %v874_v27 = vpop.f32.mrf.mxu3  ;;  %v534_v25 = vld [vmem:[%s3396_s1 + $0xed8] sm:$0xff]  ;;  %v568_v26 = vld [vmem:[%s3396_s1 + $0xfe8] sm:$0xff] }
  0xf5   :  { %1203 = vmatpush.msra.mxu0 %v330_v20  ;;  %1228 = vmatpush.msra.mxu1 %v364_v21  ;;  %v799_v30 = vpop.f32.mrf.mxu0  ;;  %v3010_v31 = vadd.f32 %v874_v27, %v849_v22  ;;  %v1487_v20 = vld [vmem:[%s3397_s0 + $0x48] sm:$0xff]  ;;  %v1488_v21 = vld [vmem:[%s3397_s0 + $0x58] sm:$0xff] }
  0xf6   :  { %1255 = vmatpush.msra.mxu2 %v394_v23  ;;  %1280 = vmatpush.msra.mxu3 %v428_v24  ;;  %v800_v34 = vadd.f32 %v799_v30, %v2884_v39  ;;  %v390_v39 = vld [vmem:[%s3396_s1 + $0xa58] sm:$0xff]  ;;  %v504_v23 = vld [vmem:[%s3396_s1 + $0xde8] sm:$0xff] }
  0xf7   :  { %1139 = vmatmul.f32.gmra.mxu1 %v1483_v35  ;;  %1191 = vmatmul.f32.gmra.mxu3 %v1484_v36  ;;  %v470_v22 = vld [vmem:[%s3396_s1 + $0xcd8] sm:$0xff]  ;;  %v468_v27 = vld [vmem:[%s3396_s1 + $0xcc8] sm:$0xff]  ;;  %v1489_v36 = vld [vmem:[%s3397_s0 + $0xc0] sm:$0xff] }
  0xf8   :  { %1204 = vmatpush.msra.mxu0 %v328_v28  ;;  %1229 = vmatpush.msra.mxu1 %v362_v29  ;;  %v825_v41 = vpop.f32.mrf.mxu1  ;;  %v502_v28 = vld [vmem:[%s3396_s1 + $0xdd8] sm:$0xff]  ;;  %v532_v29 = vld [vmem:[%s3396_s1 + $0xec8] sm:$0xff] }
  0xf9   :  { %1256 = vmatpush.msra.mxu2 %v392_v32  ;;  %1281 = vmatpush.msra.mxu3 %v426_v33  ;;  %v826_v45 = vadd.f32 %v825_v41, %v800_v34  ;;  %v566_v30 = vld [vmem:[%s3396_s1 + $0xfd8] sm:$0xff]  ;;  %v500_v33 = vld [vmem:[%s3396_s1 + $0xdc8] sm:$0xff] }
  0xfa   :  { %1205 = vmatpush.msra.mxu0 %v326_v37  ;;  %1230 = vmatpush.msra.mxu1 %v360_v38  ;;  %v466_v32 = vld [vmem:[%s3396_s1 + $0xcb8] sm:$0xff]  ;;  %v564_v35 = vld [vmem:[%s3396_s1 + $0xfc8] sm:$0xff]  ;;  %v1490_v37 = vld [vmem:[%s3397_s0 + $0xd0] sm:$0xff] }
  0xfb   :  { %1257 = vmatpush.msra.mxu2 %v390_v39  ;;  %1282 = vmatpush.msra.mxu3 %v424_v40  ;;  %v851_v49 = vpop.f32.mrf.mxu2  ;;  %v530_v34 = vld [vmem:[%s3396_s1 + $0xeb8] sm:$0xff]  ;;  %v464_v38 = vld [vmem:[%s3396_s1 + $0xca8] sm:$0xff] }
  0xfc   :  { %1206 = vmatpush.msra.mxu0 %v324_v43  ;;  %1231 = vmatpush.msra.mxu1 %v358_v44  ;;  %v852_v52 = vadd.f32 %v851_v49, %v826_v45  ;;  %v498_v39 = vld [vmem:[%s3396_s1 + $0xdb8] sm:$0xff]  ;;  %v528_v41 = vld [vmem:[%s3396_s1 + $0xea8] sm:$0xff] }
  0xfd   :  { %1258 = vmatpush.msra.mxu2 %v388_v46  ;;  %1283 = vmatpush.msra.mxu3 %v422_v47  ;;  %v562_v43 = vld [vmem:[%s3396_s1 + $0xfb8] sm:$0xff]  ;;  %v1491_v45 = vld [vmem:[%s3397_s0 + $0xc8] sm:$0xff] }
  0xfe   :  { %1207 = vmatpush.msra.mxu0 %v322_v42  ;;  %1232 = vmatpush.msra.mxu1 %v356_v48  ;;  %v877_v57 = vpop.f32.mrf.mxu3  ;;  %v1492_v46 = vld [vmem:[%s3397_s0 + $0xd8] sm:$0xff]  ;;  %v496_v42 = vld [vmem:[%s3396_s1 + $0xda8] sm:$0xff] }
  0xff   :  { %1259 = vmatpush.msra.mxu2 %v386_v50  ;;  %1284 = vmatpush.msra.mxu3 %v420_v51  ;;  %v802_v60 = vpop.f32.mrf.mxu0  ;;  %v3079_v61 = vadd.f32 %v877_v57, %v852_v52  ;;  %v462_v47 = vld [vmem:[%s3396_s1 + $0xc98] sm:$0xff]  ;;  %v560_v48 = vld [vmem:[%s3396_s1 + $0xfa8] sm:$0xff] }
 0x100   :  { %1208 = vmatpush.msra.mxu0 %v320_v53  ;;  %1233 = vmatpush.msra.mxu1 %v354_v55  ;;  %v803_v0 = vadd.f32 %v802_v60, %v2947_v2  ;;  %v414_v2 = vld [vmem:[%s3396_s1 + $0xb18] sm:$0xff]  ;;  %v460_v50 = vld [vmem:[%s3396_s1 + $0xc88] sm:$0xff] }
 0x101   :  { %1260 = vmatpush.msra.mxu2 %v384_v54  ;;  %1285 = vmatpush.msra.mxu3 %v418_v56  ;;  %v494_v51 = vld [vmem:[%s3396_s1 + $0xd98] sm:$0xff]  ;;  %v524_v53 = vld [vmem:[%s3396_s1 + $0xe88] sm:$0xff] }
 0x102   :  { %1209 = vmatpush.msra.mxu0 %v318_v58  ;;  %1234 = vmatpush.msra.mxu1 %v352_v59  ;;  %v828_v5 = vpop.f32.mrf.mxu1  ;;  %v558_v55 = vld [vmem:[%s3396_s1 + $0xf98] sm:$0xff]  ;;  %v492_v57 = vld [vmem:[%s3396_s1 + $0xd88] sm:$0xff] }
 0x103   :  { %1261 = vmatpush.msra.mxu2 %v382_v62  ;;  %1286 = vmatpush.msra.mxu3 %v416_v63  ;;  %v829_v7 = vadd.f32 %v828_v5, %v803_v0  ;;  %v458_v56 = vld [vmem:[%s3396_s1 + $0xc78] sm:$0xff]  ;;  %v556_v60 = vld [vmem:[%s3396_s1 + $0xf88] sm:$0xff]  ;;  %v1493_v62 = vld [vmem:[%s3397_s0 + $0x140] sm:$0xff] }
 0x104   :  { %1210 = vmatpush.msra.mxu0 %v316_v1  ;;  %1235 = vmatpush.msra.mxu1 %v350_v3  ;;  %v522_v59 = vld [vmem:[%s3396_s1 + $0xe78] sm:$0xff]  ;;  %v1494_v63 = vld [vmem:[%s3397_s0 + $0x150] sm:$0xff]  ;;  %v456_v1 = vld [vmem:[%s3396_s1 + $0xc68] sm:$0xff] }
 0x105   :  { %1262 = vmatpush.msra.mxu2 %v380_v4  ;;  %1287 = vmatpush.msra.mxu3 %v414_v2  ;;  %v854_v6 = vpop.f32.mrf.mxu2  ;;  %v490_v3 = vld [vmem:[%s3396_s1 + $0xd78] sm:$0xff]  ;;  %v520_v5 = vld [vmem:[%s3396_s1 + $0xe68] sm:$0xff] }
 0x106   :  { %1211 = vmatmul.f32.vlgmr.msra.gmra.mxu0 %v1485_v12  ;;  %1263 = vmatmul.f32.vlgmr.msra.gmra.mxu2 %v1486_v13  ;;  %v855_v14 = vadd.f32 %v854_v6, %v829_v7  ;;  %v554_v7 = vld [vmem:[%s3396_s1 + $0xf78] sm:$0xff]  ;;  %v488_v6 = vld [vmem:[%s3396_s1 + $0xd68] sm:$0xff] }
 0x107   :  { %1299 = vmatpush.msrb.mxu0 %v474_v8  ;;  %1351 = vmatpush.msrb.mxu2 %v538_v9  ;;  %v1495_v9 = vld [vmem:[%s3397_s0 + $0x148] sm:$0xff] }
 0x108   :  { %1236 = vmatpush.msra.mxu1 %v348_v10  ;;  %1288 = vmatpush.msra.mxu3 %v412_v11  ;;  %v880_v15 = vpop.f32.mrf.mxu3  ;;  %v1496_v10 = vld [vmem:[%s3397_s0 + $0x158] sm:$0xff]  ;;  %v552_v12 = vld [vmem:[%s3396_s1 + $0xf68] sm:$0xff] }
 0x109   :  { %1237 = vmatmul.f32.vlgmr.msra.gmra.mxu1 %v1487_v20  ;;  %1289 = vmatmul.f32.vlgmr.msra.gmra.mxu3 %v1488_v21  ;;  %v3142_v24 = vadd.f32 %v880_v15, %v855_v14  ;;  %v454_v11 = vld [vmem:[%s3396_s1 + $0xc58] sm:$0xff]  ;;  %v452_v14 = vld [vmem:[%s3396_s1 + $0xc48] sm:$0xff] }
 0x10a   :  { %1300 = vmatpush.msrb.mxu0 %v472_v16  ;;  %1325 = vmatpush.msrb.mxu1 %v506_v17  ;;  %v486_v16 = vld [vmem:[%s3396_s1 + $0xd58] sm:$0xff]  ;;  %v484_v20 = vld [vmem:[%s3396_s1 + $0xd48] sm:$0xff] }
 0x10b   :  { %1352 = vmatpush.msrb.mxu2 %v536_v18  ;;  %1377 = vmatpush.msrb.mxu3 %v570_v19  ;;  %v516_v18 = vld [vmem:[%s3396_s1 + $0xe48] sm:$0xff]  ;;  %v550_v19 = vld [vmem:[%s3396_s1 + $0xf58] sm:$0xff] }
 0x10c   :  { %1301 = vmatpush.msrb.mxu0 %v470_v22  ;;  %1326 = vmatpush.msrb.mxu1 %v504_v23  ;;  %v450_v15 = vld [vmem:[%s3396_s1 + $0xc38] sm:$0xff]  ;;  %v548_v23 = vld [vmem:[%s3396_s1 + $0xf48] sm:$0xff] }
 0x10d   :  { %1353 = vmatpush.msrb.mxu2 %v534_v25  ;;  %1378 = vmatpush.msrb.mxu3 %v568_v26  ;;  %v514_v22 = vld [vmem:[%s3396_s1 + $0xe38] sm:$0xff]  ;;  %v448_v26 = vld [vmem:[%s3396_s1 + $0xc28] sm:$0xff] }
 0x10e   :  { %1302 = vmatpush.msrb.mxu0 %v468_v27  ;;  %1327 = vmatpush.msrb.mxu1 %v502_v28  ;;  %v482_v27 = vld [vmem:[%s3396_s1 + $0xd38] sm:$0xff]  ;;  %v512_v28 = vld [vmem:[%s3396_s1 + $0xe28] sm:$0xff] }
 0x10f   :  { %1354 = vmatpush.msrb.mxu2 %v532_v29  ;;  %1379 = vmatpush.msrb.mxu3 %v566_v30  ;;  %v546_v29 = vld [vmem:[%s3396_s1 + $0xf38] sm:$0xff] }
 0x110   :  { %1214 = vmatmul.f32.gmra.mxu0 %v1489_v36  ;;  %1266 = vmatmul.f32.gmra.mxu2 %v1490_v37  ;;  %v510_v36 = vld [vmem:[%s3396_s1 + $0xe18] sm:$0xff]  ;;  %v544_v37 = vld [vmem:[%s3396_s1 + $0xf28] sm:$0xff] }
 0x111   :  { %1303 = vmatpush.msrb.mxu0 %v466_v32  ;;  %1328 = vmatpush.msrb.mxu1 %v500_v33  ;;  %v900_v40 = vpop.f32.mrf.mxu0  ;;  %v446_v32 = vld [vmem:[%s3396_s1 + $0xc18] sm:$0xff]  ;;  %v480_v33 = vld [vmem:[%s3396_s1 + $0xd28] sm:$0xff] }
 0x112   :  { %1355 = vmatpush.msrb.mxu2 %v530_v34  ;;  %1380 = vmatpush.msrb.mxu3 %v564_v35  ;;  %v901_v44 = vadd.f32 %v900_v40, %v3010_v31  ;;  %v526_v31 = vld [vmem:[%s3396_s1 + $0xe98] sm:$0xff] }
 0x113   :  { %1240 = vmatmul.f32.gmra.mxu1 %v1491_v45  ;;  %1292 = vmatmul.f32.gmra.mxu3 %v1492_v46  ;;  %v478_v40 = vld [vmem:[%s3396_s1 + $0xd18] sm:$0xff]  ;;  %v476_v45 = vld [vmem:[%s3396_s1 + $0xd08] sm:$0xff] }
 0x114   :  { %1304 = vmatpush.msrb.mxu0 %v464_v38  ;;  %1329 = vmatpush.msrb.mxu1 %v498_v39  ;;  %v926_v49 = vpop.f32.mrf.mxu1  ;;  %v444_v39 = vld [vmem:[%s3396_s1 + $0xc08] sm:$0xff] }
 0x115   :  { %1356 = vmatpush.msrb.mxu2 %v528_v41  ;;  %1381 = vmatpush.msrb.mxu3 %v562_v43  ;;  %v927_v52 = vadd.f32 %v926_v49, %v901_v44  ;;  %v508_v41 = vld [vmem:[%s3396_s1 + $0xe08] sm:$0xff] }
 0x116   :  { %1305 = vmatpush.msrb.mxu0 %v462_v47  ;;  %1330 = vmatpush.msrb.mxu1 %v496_v42  ;;  %v540_v46 = vld [vmem:[%s3396_s1 + $0xf08] sm:$0xff]  ;;  %v1497_v42 = vld [vmem:[%s3397_s0 + $0x60] sm:$0xff] }
 0x117   :  { %1357 = vmatpush.msrb.mxu2 %v526_v31  ;;  %1382 = vmatpush.msrb.mxu3 %v560_v48  ;;  %v952_v54 = vpop.f32.mrf.mxu2  ;;  %v1498_v31 = vld [vmem:[%s3397_s0 + $0x70] sm:$0xff]  ;;  %v1499_v49 = vld [vmem:[%s3397_s0 + $0x68] sm:$0xff] }
 0x118   :  { %1306 = vmatpush.msrb.mxu0 %v460_v50  ;;  %1331 = vmatpush.msrb.mxu1 %v494_v51  ;;  %v953_v58 = vadd.f32 %v952_v54, %v927_v52  ;;  %v1500_v50 = vld [vmem:[%s3397_s0 + $0x78] sm:$0xff]  ;;  %v1503_v54 = vld [vmem:[%s3397_s0 + $0xe8] sm:$0xff] }
 0x119   :  { %1358 = vmatpush.msrb.mxu2 %v524_v53  ;;  %1383 = vmatpush.msrb.mxu3 %v558_v55  ;;  %v1501_v53 = vld [vmem:[%s3397_s0 + $0xe0] sm:$0xff]  ;;  %v1502_v55 = vld [vmem:[%s3397_s0 + $0xf0] sm:$0xff] }
 0x11a   :  { %1217 = vmatmul.f32.gmra.mxu0 %v1493_v62  ;;  %1269 = vmatmul.f32.gmra.mxu2 %v1494_v63  ;;  %v978_v0 = vpop.f32.mrf.mxu3 }
 0x11b   :  { %1307 = vmatpush.msrb.mxu0 %v458_v56  ;;  %1332 = vmatpush.msrb.mxu1 %v492_v57  ;;  %v903_v4 = vpop.f32.mrf.mxu0  ;;  %v3247_v2 = vadd.f32 %v978_v0, %v953_v58  ;;  %v1504_v56 = vld [vmem:[%s3397_s0 + $0xf8] sm:$0xff]  ;;  %v1505_v57 = vld [vmem:[%s3397_s0 + $0x160] sm:$0xff]  ;;  %v1506_v58 = vld [vmem:[%s3397_s0 + $0x170] sm:$0xff] }
 0x11c   :  { %1359 = vmatpush.msrb.mxu2 %v522_v59  ;;  %1384 = vmatpush.msrb.mxu3 %v556_v60  ;;  %v904_v8 = vadd.f32 %v903_v4, %v3079_v61  ;;  %v518_v61 = vld [vmem:[%s3396_s1 + $0xe58] sm:$0xff]  ;;  %v1507_v59 = vld [vmem:[%s3397_s0 + $0x168] sm:$0xff] }
 0x11d   :  { %1243 = vmatmul.f32.gmra.mxu1 %v1495_v9  ;;  %1295 = vmatmul.f32.gmra.mxu3 %v1496_v10  ;;  %v1508_v60 = vld [vmem:[%s3397_s0 + $0x178] sm:$0xff] }
 0x11e   :  { %1308 = vmatpush.msrb.mxu0 %v456_v1  ;;  %1333 = vmatpush.msrb.mxu1 %v490_v3  ;;  %v929_v13 = vpop.f32.mrf.mxu1 }
 0x11f   :  { %1360 = vmatpush.msrb.mxu2 %v520_v5  ;;  %1385 = vmatpush.msrb.mxu3 %v554_v7  ;;  %v930_v17 = vadd.f32 %v929_v13, %v904_v8 }
 0x120   :  { %1309 = vmatpush.msrb.mxu0 %v454_v11  ;;  %1334 = vmatpush.msrb.mxu1 %v488_v6 }
 0x121   :  { %1361 = vmatpush.msrb.mxu2 %v518_v61  ;;  %1386 = vmatpush.msrb.mxu3 %v552_v12  ;;  %v955_v21 = vpop.f32.mrf.mxu2 }
 0x122   :  { %1310 = vmatpush.msrb.mxu0 %v452_v14  ;;  %1335 = vmatpush.msrb.mxu1 %v486_v16  ;;  %v956_v25 = vadd.f32 %v955_v21, %v930_v17 }
 0x123   :  { %1362 = vmatpush.msrb.mxu2 %v516_v18  ;;  %1387 = vmatpush.msrb.mxu3 %v550_v19 }
 0x124   :  { %1311 = vmatpush.msrb.mxu0 %v450_v15  ;;  %1336 = vmatpush.msrb.mxu1 %v484_v20  ;;  %v981_v30 = vpop.f32.mrf.mxu3 }
 0x125   :  { %1363 = vmatpush.msrb.mxu2 %v514_v22  ;;  %1388 = vmatpush.msrb.mxu3 %v548_v23  ;;  %v906_v34 = vpop.f32.mrf.mxu0  ;;  %v3316_v35 = vadd.f32 %v981_v30, %v956_v25 }
 0x126   :  { %1312 = vmatpush.msrb.mxu0 %v448_v26  ;;  %1337 = vmatpush.msrb.mxu1 %v482_v27  ;;  %v907_v38 = vadd.f32 %v906_v34, %v3142_v24  ;;  %v542_v24 = vld [vmem:[%s3396_s1 + $0xf18] sm:$0xff] }
 0x127   :  { %1364 = vmatpush.msrb.mxu2 %v512_v28  ;;  %1389 = vmatpush.msrb.mxu3 %v546_v29 }
 0x128   :  { %1313 = vmatpush.msrb.mxu0 %v446_v32  ;;  %1338 = vmatpush.msrb.mxu1 %v480_v33  ;;  %v932_v43 = vpop.f32.mrf.mxu1 }
 0x129   :  { %1365 = vmatpush.msrb.mxu2 %v510_v36  ;;  %1390 = vmatpush.msrb.mxu3 %v544_v37  ;;  %v933_v44 = vadd.f32 %v932_v43, %v907_v38 }
 0x12a   :  { %1314 = vmatpush.msrb.mxu0 %v444_v39  ;;  %1339 = vmatpush.msrb.mxu1 %v478_v40 }
 0x12b   :  { %1366 = vmatpush.msrb.mxu2 %v508_v41  ;;  %1391 = vmatpush.msrb.mxu3 %v542_v24  ;;  %v958_v47 = vpop.f32.mrf.mxu2 }
 0x12c   :  { %1315 = vmatmul.f32.vlgmr.msrb.gmra.mxu0 %v1497_v42  ;;  %1367 = vmatmul.f32.vlgmr.msrb.gmra.mxu2 %v1498_v31  ;;  %v959_v48 = vadd.f32 %v958_v47, %v933_v44 }
 0x12d   :  { %1340 = vmatpush.msrb.mxu1 %v476_v45  ;;  %1392 = vmatpush.msrb.mxu3 %v540_v46 }
 0x12e   :  { %1341 = vmatmul.f32.vlgmr.msrb.gmra.mxu1 %v1499_v49  ;;  %1393 = vmatmul.f32.vlgmr.msrb.gmra.mxu3 %v1500_v50  ;;  %v984_v51 = vpop.f32.mrf.mxu3 }
 0x12f   :  { %v3355_v52 = vadd.f32 %v984_v51, %v959_v48 }
 0x134   :  { %1318 = vmatmul.f32.gmra.mxu0 %v1501_v53  ;;  %1370 = vmatmul.f32.gmra.mxu2 %v1502_v55 }
 0x136   :  { %1344 = vmatmul.f32.gmra.mxu1 %v1503_v54  ;;  %1396 = vmatmul.f32.gmra.mxu3 %v1504_v56 }
 0x13c   :  { %1321 = vmatmul.f32.gmra.mxu0 %v1505_v57  ;;  %1373 = vmatmul.f32.gmra.mxu2 %v1506_v58 }
 0x13e   :  { %1347 = vmatmul.f32.gmra.mxu1 %v1507_v59  ;;  %1399 = vmatmul.f32.gmra.mxu3 %v1508_v60 }
 0x13f   :  { %v1004_v62 = vpop.f32.mrf.mxu0 }
 0x142   :  { %v1030_v63 = vpop.f32.mrf.mxu1 }
 0x143   :  { %v1031_v20 = vadd.f32 %v1030_v63, %v1004_v62 }
 0x145   :  { %v1056_v0 = vpop.f32.mrf.mxu2 }
 0x146   :  { %v1057_v22 = vadd.f32 %v1056_v0, %v1031_v20 }
 0x148   :  { %v1082_v1 = vpop.f32.mrf.mxu3 }
 0x149   :  { %v1007_v3 = vpop.f32.mrf.mxu0  ;;  %v1083_v27 = vadd.f32 %v1082_v1, %v1057_v22 }
 0x14c   :  { %v1033_v4 = vpop.f32.mrf.mxu1 }
 0x14d   :  { %v1034_v28 = vadd.f32 %v1033_v4, %v1007_v3 }
 0x14f   :  { %v1059_v5 = vpop.f32.mrf.mxu2 }
 0x150   :  { %v1060_v32 = vadd.f32 %v1059_v5, %v1034_v28 }
 0x152   :  { %v1085_v7 = vpop.f32.mrf.mxu3 }
 0x153   :  { %v1010_v8 = vpop.f32.mrf.mxu0  ;;  %v1086_v39 = vadd.f32 %v1085_v7, %v1060_v32 }
 0x156   :  { %v1036_v9 = vpop.f32.mrf.mxu1 }
 0x157   :  { %v1037_v37 = vadd.f32 %v1036_v9, %v1010_v8 }
 0x159   :  { %v1062_v10 = vpop.f32.mrf.mxu2 }
 0x15a   :  { %v1063_v24 = vadd.f32 %v1062_v10, %v1037_v37 }
 0x15c   :  { %v1088_v11 = vpop.f32.mrf.mxu3 }
 0x15d   :  { %v1108_v6 = vpop.f32.mrf.mxu0  ;;  %v1089_v42 = vadd.f32 %v1088_v11, %v1063_v24  ;;  %v1405_v24 = vmul.f32 %v3355_v52, %v3355_v52 }
 0x15e   :  { %v1109_v29 = vadd.f32 %v1108_v6, %v1083_v27 }
 0x160   :  { %v1134_v61 = vpop.f32.mrf.mxu1 }
 0x161   :  { %v1135_v34 = vadd.f32 %v1134_v61, %v1109_v29  ;;  %v1404_v29 = vmul.f32 %v3316_v35, %v3316_v35 }
 0x163   :  { %v1160_v12 = vpop.f32.mrf.mxu2 }
 0x164   :  { %v1161_v38 = vadd.f32 %v1160_v12, %v1135_v34 }
 0x166   :  { %v1186_v13 = vpop.f32.mrf.mxu3 }
 0x167   :  { %v1111_v14 = vpop.f32.mrf.mxu0  ;;  %v1187_v43 = vadd.f32 %v1186_v13, %v1161_v38 }
 0x168   :  { %v1112_v41 = vadd.f32 %v1111_v14, %v1086_v39 }
 0x16a   :  { %v1137_v16 = vpop.f32.mrf.mxu1 }
 0x16b   :  { %v1138_v46 = vadd.f32 %v1137_v16, %v1112_v41  ;;  %v1403_v16 = vmul.f32 %v3247_v2, %v3247_v2 }
 0x16d   :  { %v1163_v17 = vpop.f32.mrf.mxu2 }
 0x16e   :  { %v1164_v31 = vadd.f32 %v1163_v17, %v1138_v46 }
 0x170   :  { %v1189_v18 = vpop.f32.mrf.mxu3 }
 0x171   :  { %v1114_v19 = vpop.f32.mrf.mxu0  ;;  %v1190_v55 = vadd.f32 %v1189_v18, %v1164_v31 }
 0x172   :  { %v1115_v49 = vadd.f32 %v1114_v19, %v1089_v42 }
 0x174   :  { %v1140_v15 = vpop.f32.mrf.mxu1 }
 0x175   :  { %v1141_v54 = vadd.f32 %v1140_v15, %v1115_v49 }
 0x177   :  { %v1166_v21 = vpop.f32.mrf.mxu2 }
 0x178   :  { %v1167_v58 = vadd.f32 %v1166_v21, %v1141_v54 }
 0x17a   :  { %v1192_v23 = vpop.f32.mrf.mxu3 }
 0x17b   :  { %v1193_v3 = vadd.f32 %v1192_v23, %v1167_v58 }
 0x183   :  { %v1212_v25 = vpop.f32.mrf.mxu0 }
 0x184   :  { %v1213_v45 = vadd.f32 %v1212_v25, %v1187_v43 }
 0x186   :  { %v1238_v26 = vpop.f32.mrf.mxu1 }
 0x187   :  { %v1239_v50 = vadd.f32 %v1238_v26, %v1213_v45 }
 0x189   :  { %v1264_v30 = vpop.f32.mrf.mxu2 }
 0x18a   :  { %v1265_v53 = vadd.f32 %v1264_v30, %v1239_v50 }
 0x18c   :  { %v1290_v33 = vpop.f32.mrf.mxu3 }
 0x18d   :  { %v1215_v36 = vpop.f32.mrf.mxu0  ;;  %v1291_v59 = vadd.f32 %v1290_v33, %v1265_v53 }
 0x18e   :  { %v1216_v56 = vadd.f32 %v1215_v36, %v1190_v55 }
 0x190   :  { %v1241_v40 = vpop.f32.mrf.mxu1 }
 0x191   :  { %v1242_v0 = vadd.f32 %v1241_v40, %v1216_v56 }
 0x193   :  { %v1267_v44 = vpop.f32.mrf.mxu2 }
 0x194   :  { %v1268_v4 = vadd.f32 %v1267_v44, %v1242_v0 }
 0x196   :  { %v1293_v47 = vpop.f32.mrf.mxu3 }
 0x197   :  { %v1218_v48 = vpop.f32.mrf.mxu0  ;;  %v1294_v10 = vadd.f32 %v1293_v47, %v1268_v4 }
 0x198   :  { %v1219_v5 = vadd.f32 %v1218_v48, %v1193_v3 }
 0x19a   :  { %v1244_v51 = vpop.f32.mrf.mxu1 }
 0x19b   :  { %v1245_v61 = vadd.f32 %v1244_v51, %v1219_v5 }
 0x19d   :  { %v1270_v57 = vpop.f32.mrf.mxu2 }
 0x19e   :  { %v1271_v17 = vadd.f32 %v1270_v57, %v1245_v61 }
 0x1a0   :  { %v1296_v60 = vpop.f32.mrf.mxu3 }
 0x1a1   :  { %v1297_v21 = vadd.f32 %v1296_v60, %v1271_v17 }
 0x1a9   :  { %v1316_v62 = vpop.f32.mrf.mxu0 }
 0x1aa   :  { %v1317_v63 = vadd.f32 %v1316_v62, %v1291_v59 }
 0x1ab   :  { %v1342_v1 = vpop.f32.mrf.mxu1 }
 0x1ac   :  { %v1343_v7 = vadd.f32 %v1342_v1, %v1317_v63 }
 0x1af   :  { %v1368_v8 = vpop.f32.mrf.mxu2 }
 0x1b0   :  { %v1369_v9 = vadd.f32 %v1368_v8, %v1343_v7 }
 0x1b1   :  { %v1319_v11 = vpop.f32.mrf.mxu0  ;;  %v1394_v6 = vpop.f32.mrf.mxu3 }
 0x1b2   :  { %v1395_v12 = vadd.f32 %v1394_v6, %v1369_v9  ;;  %v1320_v13 = vadd.f32 %v1319_v11, %v1294_v10 }
 0x1b3   :  { %v1345_v14 = vpop.f32.mrf.mxu1 }
 0x1b4   :  { %v1406_v18 = vmul.f32 %v1395_v12, %v1395_v12  ;;  %v1346_v15 = vadd.f32 %v1345_v14, %v1320_v13 }
 0x1b6   :  { %v1409_v19 = vadd.f32 %v1406_v18, %v1403_v16 }
 0x1b7   :  { %v1371_v20 = vpop.f32.mrf.mxu2 }
 0x1b8   :  { %1455 = vrsqrt.f32 %v1409_v19  ;;  %v1372_v22 = vadd.f32 %v1371_v20, %v1346_v15  ;;  %vm1419_vm0 = vcmp.eq.f32.partialorder %v1409_v19, inf  ;;  %v1422_v31 = vand.u32 2147483648, %v1409_v19 }
 0x1b9   :  { %v1322_v23 = vpop.f32.mrf.mxu0  ;;  %v1397_v25 = vpop.f32.mrf.mxu3  ;;  %vm1421_vm1 = vcmp.eq.f32.partialorder %v1409_v19, 0.0 }
 0x1ba   :  { %v1323_v26 = vadd.f32 %v1322_v23, %v1297_v21  ;;  %v1398_v27 = vadd.f32 %v1397_v25, %v1372_v22 }
 0x1bb   :  { %v1348_v28 = vpop.f32.mrf.mxu1 }
 0x1bc   :  { %v1407_v30 = vmul.f32 %v1398_v27, %v1398_v27  ;;  %v1349_v33 = vadd.f32 %v1348_v28, %v1323_v26 }
 0x1be   :  { %v1456_v32 = vpop.eup %1455  ;;  %v1410_v34 = vadd.f32 %v1407_v30, %v1404_v29 }
 0x1bf   :  { %v1413_v2 = vmul.f32 %v1456_v32, %v1409_v19  ;;  %v1374_v36 = vpop.f32.mrf.mxu2 }
 0x1c0   :  { %v1375_v37 = vadd.f32 %v1374_v36, %v1349_v33  ;;  %1457 = vrsqrt.f32 %v1410_v34  ;;  %vm1431_vm2 = vcmp.eq.f32.partialorder %v1410_v34, inf  ;;  %v1434_v58 = vand.u32 2147483648, %v1410_v34 }
 0x1c1   :  { %v1414_v38 = vmul.f32 %v1456_v32, %v1413_v2  ;;  %v1400_v39 = vpop.f32.mrf.mxu3  ;;  %vm1433_vm3 = vcmp.eq.f32.partialorder %v1410_v34, 0.0 }
 0x1c2   :  { %v1401_v40 = vadd.f32 %v1400_v39, %v1375_v37 }
 0x1c3   :  { %v1415_v41 = vmul.f32 0.5, %v1414_v38 }
 0x1c4   :  { %v1408_v43 = vmul.f32 %v1401_v40, %v1401_v40 }
 0x1c5   :  { %v1416_v44 = vsub.f32 1.5, %v1415_v41 }
 0x1c6   :  { %v1411_v45 = vadd.f32 %v1408_v43, %v1405_v24  ;;  %v1458_v46 = vpop.eup %1457 }
 0x1c7   :  { %v1417_v35 = vmul.f32 %v1456_v32, %v1416_v44  ;;  %v1425_v47 = vmul.f32 %v1458_v46, %v1410_v34 }
 0x1c8   :  { %1459 = vrsqrt.f32 %v1411_v45  ;;  %vm1443_vm4 = vcmp.eq.f32.partialorder %v1411_v45, inf  ;;  %v1446_v3 = vand.u32 2147483648, %v1411_v45  ;;  %vm1445_vm5 = vcmp.eq.f32.partialorder %v1411_v45, 0.0 }
 0x1c9   :  { %v1418_v42 = vmul.f32 %v1417_v35, %v1409_v19  ;;  %v1426_v48 = vmul.f32 %v1458_v46, %v1425_v47 }
 0x1cb   :  { %v1420_v49 = vsel %vm1419_vm0, %v1409_v19, %v1418_v42  ;;  %v1427_v51 = vmul.f32 0.5, %v1426_v48 }
 0x1cc   :  { %v1423_v50 = vsel %vm1421_vm1, %v1422_v31, %v1420_v49 }
 0x1cd   :  { %1448 = vst [vmem:[%s3398_s2] sm:$0xff] %v1423_v50  ;;  %v1428_v53 = vsub.f32 1.5, %v1427_v51 }
 0x1ce   :  { %v1460_v52 = vpop.eup %1459 }
 0x1cf   :  { %v1437_v55 = vmul.f32 %v1460_v52, %v1411_v45  ;;  %v1429_v54 = vmul.f32 %v1458_v46, %v1428_v53 }
 0x1d1   :  { %v1438_v56 = vmul.f32 %v1460_v52, %v1437_v55  ;;  %v1430_v57 = vmul.f32 %v1429_v54, %v1410_v34 }
 0x1d3   :  { %v1439_v59 = vmul.f32 0.5, %v1438_v56  ;;  %v1432_v60 = vsel %vm1431_vm2, %v1410_v34, %v1430_v57 }
 0x1d4   :  { %v1435_v62 = vsel %vm1433_vm3, %v1434_v58, %v1432_v60 }
 0x1d5   :  { %v1440_v63 = vsub.f32 1.5, %v1439_v59  ;;  %1449 = vst [vmem:[%s3398_s2 + $0x8] sm:$0xff] %v1435_v62 }
 0x1d7   :  { %v1441_v0 = vmul.f32 %v1460_v52, %v1440_v63 }
 0x1d9   :  { %v1442_v1 = vmul.f32 %v1441_v0, %v1411_v45 }
 0x1db   :  { %v1444_v4 = vsel %vm1443_vm4, %v1411_v45, %v1442_v1 }
 0x1dc   :  { %v1447_v5 = vsel %vm1445_vm5, %v1446_v3, %v1444_v4 }
 0x1dd   :  { %1450 = vst [vmem:[%s3398_s2 + $0x10] sm:$0xff] %v1447_v5 }

// kernel: rnn_model_forward.7
= control target key start
LH: loop header
LB: loop body
LE: loop exit
PB: predicated region body
PF: predicated region fallthrough
CT: control target
= control target key end

     0   :  { %s358_s3 = inlined_call_operand.vmem [shape: f32[256,128], index: 3, kind: input, shape index: {}]   ;;  %s359_s4 = inlined_call_operand.vmem [shape: f32[1,128], index: 4, kind: input, shape index: {}]   ;;  %s360_s1 = inlined_call_operand.vmem [shape: f32[1,256], index: 1, kind: input, shape index: {}]   ;;  %s361_s0 = inlined_call_operand.vmem [shape: f32[24,256], index: 0, kind: input, shape index: {}]   ;;  %s362_s2 = inlined_call_operand.vmem [shape: f32[1,256], index: 2, kind: input, shape index: {}]   ;;  %s363_s5 = inlined_call_operand.vmem [shape: f32[24,128], index: 5, kind: output, shape index: {}]  }
   0x1   :  { %v65_v0 = vld [vmem:[%s358_s3 + $0x78] sm:$0xff]  ;;  %v64_v1 = vld [vmem:[%s358_s3 + $0x70] sm:$0xff]  ;;  %v63_v4 = vld [vmem:[%s358_s3 + $0x68] sm:$0xff] }
   0x2   :  { %v81_v2 = vld [vmem:[%s358_s3 + $0xf8] sm:$0xff]  ;;  %157 = vmatpush.msra.mxu2 %v65_v0  ;;  %v80_v3 = vld [vmem:[%s358_s3 + $0xf0] sm:$0xff]  ;;  %v79_v5 = vld [vmem:[%s358_s3 + $0xe8] sm:$0xff]  ;;  %86 = vmatpush.msra.mxu0 %v65_v0 }
   0x3   :  { %173 = vmatpush.msra.mxu3 %v81_v2  ;;  %112 = vmatpush.msra.mxu1 %v81_v2  ;;  %v62_v6 = vld [vmem:[%s358_s3 + $0x60] sm:$0xff]  ;;  %v61_v8 = vld [vmem:[%s358_s3 + $0x58] sm:$0xff]  ;;  %v60_v10 = vld [vmem:[%s358_s3 + $0x50] sm:$0xff] }
   0x4   :  { %158 = vmatpush.msra.mxu2 %v64_v1  ;;  %v78_v7 = vld [vmem:[%s358_s3 + $0xe0] sm:$0xff]  ;;  %87 = vmatpush.msra.mxu0 %v64_v1  ;;  %v77_v9 = vld [vmem:[%s358_s3 + $0xd8] sm:$0xff]  ;;  %v76_v11 = vld [vmem:[%s358_s3 + $0xd0] sm:$0xff] }
   0x5   :  { %174 = vmatpush.msra.mxu3 %v80_v3  ;;  %113 = vmatpush.msra.mxu1 %v80_v3  ;;  %v59_v12 = vld [vmem:[%s358_s3 + $0x48] sm:$0xff]  ;;  %v58_v14 = vld [vmem:[%s358_s3 + $0x40] sm:$0xff]  ;;  %v57_v16 = vld [vmem:[%s358_s3 + $0x38] sm:$0xff] }
   0x6   :  { %159 = vmatpush.msra.mxu2 %v63_v4  ;;  %88 = vmatpush.msra.mxu0 %v63_v4  ;;  %v75_v13 = vld [vmem:[%s358_s3 + $0xc8] sm:$0xff]  ;;  %v74_v15 = vld [vmem:[%s358_s3 + $0xc0] sm:$0xff]  ;;  %v73_v17 = vld [vmem:[%s358_s3 + $0xb8] sm:$0xff] }
   0x7   :  { %175 = vmatpush.msra.mxu3 %v79_v5  ;;  %114 = vmatpush.msra.mxu1 %v79_v5  ;;  %v56_v18 = vld [vmem:[%s358_s3 + $0x30] sm:$0xff]  ;;  %v26_v20 = vld [vmem:[%s360_s1] sm:$0x3]  ;;  %v55_v21 = vld [vmem:[%s358_s3 + $0x28] sm:$0xff] }
   0x8   :  { %160 = vmatpush.msra.mxu2 %v62_v6  ;;  %89 = vmatpush.msra.mxu0 %v62_v6  ;;  %v72_v19 = vld [vmem:[%s358_s3 + $0xb0] sm:$0xff]  ;;  %v71_v22 = vld [vmem:[%s358_s3 + $0xa8] sm:$0xff]  ;;  %v54_v23 = vld [vmem:[%s358_s3 + $0x20] sm:$0xff]  ;;  %v28_v25 = vperm.slane %v26_v20, 0  ;;  %v29_v26 = vperm.slane %v26_v20, 1 }
   0x9   :  { %176 = vmatpush.msra.mxu3 %v78_v7  ;;  %115 = vmatpush.msra.mxu1 %v78_v7  ;;  %v70_v24 = vld [vmem:[%s358_s3 + $0xa0] sm:$0xff]  ;;  %v22_v27 = vld [vmem:[%s361_s0 + $0x10] sm:$0xff]  ;;  %v23_v29 = vld [vmem:[%s361_s0 + $0x18] sm:$0xff] }
   0xa   :  { %161 = vmatpush.msra.mxu2 %v61_v8  ;;  %90 = vmatpush.msra.mxu0 %v61_v8  ;;  %v38_v28 = vld [vmem:[%s362_s2] sm:$0x3]  ;;  %v53_v30 = vld [vmem:[%s358_s3 + $0x18] sm:$0xff]  ;;  %v21_v33 = vld [vmem:[%s361_s0 + $0x8] sm:$0xff]  ;;  %v34_v36 = vmul.f32 %v28_v25, %v22_v27  ;;  %v35_v38 = vmul.f32 %v29_v26, %v23_v29 }
   0xb   :  { %177 = vmatpush.msra.mxu3 %v77_v9  ;;  %116 = vmatpush.msra.mxu1 %v77_v9  ;;  %v69_v31 = vld [vmem:[%s358_s3 + $0x98] sm:$0xff]  ;;  %v20_v32 = vld [vmem:[%s361_s0] sm:$0xff]  ;;  %v52_v34 = vld [vmem:[%s358_s3 + $0x10] sm:$0xff]  ;;  %v40_v37 = vperm.slane %v38_v28, 0  ;;  %v41_v39 = vperm.slane %v38_v28, 1  ;;  %v33_v43 = vmul.f32 %v29_v26, %v21_v33 }
   0xc   :  { %162 = vmatpush.msra.mxu2 %v60_v10  ;;  %91 = vmatpush.msra.mxu0 %v60_v10  ;;  %v68_v35 = vld [vmem:[%s358_s3 + $0x90] sm:$0xff]  ;;  %v51_v40 = vld [vmem:[%s358_s3 + $0x8] sm:$0xff]  ;;  %v32_v42 = vmul.f32 %v28_v25, %v20_v32  ;;  %v50_v44 = vld [vmem:[%s358_s3] sm:$0xff] }
   0xd   :  { %178 = vmatpush.msra.mxu3 %v76_v11  ;;  %117 = vmatpush.msra.mxu1 %v76_v11  ;;  %v67_v41 = vld [vmem:[%s358_s3 + $0x88] sm:$0xff]  ;;  %v46_v45 = vadd.f32 %v40_v37, %v34_v36  ;;  %v66_v46 = vld [vmem:[%s358_s3 + $0x80] sm:$0xff]  ;;  %v47_v47 = vadd.f32 %v41_v39, %v35_v38  ;;  %v45_v51 = vadd.f32 %v41_v39, %v33_v43 }
   0xe   :  { %163 = vmatpush.msra.mxu2 %v59_v12  ;;  %92 = vmatpush.msra.mxu0 %v59_v12  ;;  %v24_v48 = vld [vmem:[%s361_s0 + $0x20] sm:$0xff]  ;;  %v25_v49 = vld [vmem:[%s361_s0 + $0x28] sm:$0xff]  ;;  %v44_v50 = vadd.f32 %v40_v37, %v32_v42 }
   0xf   :  { %179 = vmatpush.msra.mxu3 %v75_v13  ;;  %118 = vmatpush.msra.mxu1 %v75_v13  ;;  %v36_v52 = vmul.f32 %v28_v25, %v24_v48  ;;  %v37_v53 = vmul.f32 %v29_v26, %v25_v49  ;;  %v189_v56 = vld [vmem:[%s359_s4] ss:$0 sm:$0xff] }
  0x10   :  { %164 = vmatpush.msra.mxu2 %v58_v14  ;;  %93 = vmatpush.msra.mxu0 %v58_v14 }
  0x11   :  { %180 = vmatpush.msra.mxu3 %v74_v15  ;;  %119 = vmatpush.msra.mxu1 %v74_v15  ;;  %v48_v54 = vadd.f32 %v40_v37, %v36_v52  ;;  %v49_v55 = vadd.f32 %v41_v39, %v37_v53 }
  0x12   :  { %165 = vmatpush.msra.mxu2 %v57_v16  ;;  %94 = vmatpush.msra.mxu0 %v57_v16 }
  0x13   :  { %181 = vmatpush.msra.mxu3 %v73_v17  ;;  %120 = vmatpush.msra.mxu1 %v73_v17 }
  0x14   :  { %166 = vmatpush.msra.mxu2 %v56_v18  ;;  %95 = vmatpush.msra.mxu0 %v56_v18 }
  0x15   :  { %182 = vmatpush.msra.mxu3 %v72_v19  ;;  %121 = vmatpush.msra.mxu1 %v72_v19 }
  0x16   :  { %167 = vmatpush.msra.mxu2 %v55_v21  ;;  %96 = vmatpush.msra.mxu0 %v55_v21 }
  0x17   :  { %183 = vmatpush.msra.mxu3 %v71_v22  ;;  %122 = vmatpush.msra.mxu1 %v71_v22 }
  0x18   :  { %168 = vmatpush.msra.mxu2 %v54_v23  ;;  %97 = vmatpush.msra.mxu0 %v54_v23 }
  0x19   :  { %184 = vmatpush.msra.mxu3 %v70_v24  ;;  %123 = vmatpush.msra.mxu1 %v70_v24 }
  0x1a   :  { %169 = vmatpush.msra.mxu2 %v53_v30  ;;  %98 = vmatpush.msra.mxu0 %v53_v30 }
  0x1b   :  { %185 = vmatpush.msra.mxu3 %v69_v31  ;;  %124 = vmatpush.msra.mxu1 %v69_v31 }
  0x1c   :  { %170 = vmatpush.msra.mxu2 %v52_v34  ;;  %99 = vmatpush.msra.mxu0 %v52_v34 }
  0x1d   :  { %186 = vmatpush.msra.mxu3 %v68_v35  ;;  %125 = vmatpush.msra.mxu1 %v68_v35 }
  0x1e   :  { %171 = vmatpush.msra.mxu2 %v51_v40  ;;  %100 = vmatpush.msra.mxu0 %v51_v40 }
  0x1f   :  { %187 = vmatpush.msra.mxu3 %v67_v41  ;;  %126 = vmatpush.msra.mxu1 %v67_v41 }
  0x20   :  { %172 = vmatpush.msra.mxu2 %v50_v44  ;;  %101 = vmatpush.msra.mxu0 %v50_v44 }
  0x21   :  { %188 = vmatpush.msra.mxu3 %v66_v46  ;;  %105 = vmatmul.f32.vlgmr.msra.gmra.mxu2 %v46_v45 }
  0x22   :  { %131 = vmatmul.f32.vlgmr.msra.gmra.mxu3 %v47_v47  ;;  %127 = vmatpush.msra.mxu1 %v66_v46 }
  0x23   :  { %102 = vmatmul.f32.vlgmr.msra.gmra.mxu0 %v44_v50  ;;  %128 = vmatmul.f32.vlgmr.msra.gmra.mxu1 %v45_v51 }
  0x29   :  { %108 = vmatmul.f32.gmra.mxu2 %v48_v54 }
  0x2a   :  { %134 = vmatmul.f32.gmra.mxu3 %v49_v55 }
  0xa0   :  { %v103_v57 = vpop.f32.mrf.mxu0  ;;  %v129_v58 = vpop.f32.mrf.mxu1 }
  0xa1   :  { %v104_v59 = vadd.f32 %v189_v56, %v103_v57 }
  0xa3   :  { %v130_v60 = vadd.f32 %v129_v58, %v104_v59 }
  0xa4   :  { %v106_v61 = vpop.f32.mrf.mxu2 }
  0xa5   :  { %v132_v62 = vpop.f32.mrf.mxu3  ;;  %v107_v63 = vadd.f32 %v189_v56, %v106_v61  ;;  %v138_v0 = vmul.f32 0.5, %v130_v60 }
  0xa7   :  { %v133_v1 = vadd.f32 %v132_v62, %v107_v63  ;;  %190 = vtanh.f32 %v138_v0 }
  0xa9   :  { %v139_v2 = vmul.f32 0.5, %v133_v1 }
  0xab   :  { %192 = vtanh.f32 %v139_v2 }
  0xac   :  { %v109_v3 = vpop.f32.mrf.mxu2 }
  0xad   :  { %v135_v4 = vpop.f32.mrf.mxu3  ;;  %v191_v5 = vpop.eup %190  ;;  %v110_v6 = vadd.f32 %v189_v56, %v109_v3 }
  0xae   :  { %v144_v7 = vadd.f32 1.0, %v191_v5 }
  0xaf   :  { %v136_v8 = vadd.f32 %v135_v4, %v110_v6 }
  0xb0   :  { %v147_v9 = vmul.f32 0.5, %v144_v7 }
  0xb1   :  { %v193_v10 = vpop.eup %192  ;;  %v140_v11 = vmul.f32 0.5, %v136_v8 }
  0xb2   :  { %v145_v12 = vadd.f32 1.0, %v193_v10  ;;  %150 = vst [vmem:[%s363_s5] sm:$0xff] %v147_v9 }
  0xb3   :  { %194 = vtanh.f32 %v140_v11 }
  0xb4   :  { %v148_v13 = vmul.f32 0.5, %v145_v12 }
  0xb6   :  { %151 = vst [vmem:[%s363_s5 + $0x8] sm:$0xff] %v148_v13 }
  0xb9   :  { %v195_v14 = vpop.eup %194 }
  0xba   :  { %v146_v15 = vadd.f32 1.0, %v195_v14 }
  0xbc   :  { %v149_v16 = vmul.f32 0.5, %v146_v15 }
  0xbe   :  { %152 = vst [vmem:[%s363_s5 + $0x10] sm:$0xff] %v149_v16 }

// kernel: rnn_model_forward.5
= control target key start
LH: loop header
LB: loop body
LE: loop exit
PB: predicated region body
PF: predicated region fallthrough
CT: control target
= control target key end

     0   :  { %s10125_s1 = inlined_call_operand.vmem [shape: f32[128,1024], index: 1, kind: input, shape index: {}]   ;;  %s10126_s2 = inlined_call_operand.vmem [shape: f32[256,1024], index: 2, kind: input, shape index: {}]   ;;  %s10127_s4 = inlined_call_operand.vmem [shape: f32[256,1024], index: 4, kind: input, shape index: {}]   ;;  %s10128_s5 = inlined_call_operand.vmem [shape: f32[256,1024], index: 5, kind: input, shape index: {}]   ;;  %s10129_s6 = inlined_call_operand.vmem [shape: f32[1,1024], index: 6, kind: input, shape index: {}]   ;;  %s10130_s7 = inlined_call_operand.vmem [shape: f32[256,1024], index: 7, kind: input, shape index: {}]   ;;  %s10131_s8 = inlined_call_operand.vmem [shape: f32[256,1024], index: 8, kind: input, shape index: {}]   ;;  %s10132_s9 = inlined_call_operand.vmem [shape: f32[1,1024], index: 9, kind: input, shape index: {}]   ;;  %s10133_s10 = inlined_call_operand.vmem [shape: f32[72,256], index: 10, kind: output, shape index: {}]   ;;  %s10134_s0 = inlined_call_operand.vmem [shape: f32[72,128], index: 0, kind: input, shape index: {}]   ;;  %s10135_s3 = inlined_call_operand.vmem [shape: f32[1,1024], index: 3, kind: input, shape index: {}]  }
   0x1   :  { %v166_v0 = vld [vmem:[%s10125_s1 + $0x3d0] sm:$0xff]  ;;  %v167_v1 = vld [vmem:[%s10125_s1 + $0x3d8] sm:$0xff]  ;;  %v164_v6 = vld [vmem:[%s10125_s1 + $0x3c0] sm:$0xff] }
   0x2   :  { %v158_v2 = vld [vmem:[%s10125_s1 + $0x390] sm:$0xff]  ;;  %278 = vmatpush.msra.mxu2 %v166_v0  ;;  %322 = vmatpush.msra.mxu3 %v167_v1  ;;  %v159_v3 = vld [vmem:[%s10125_s1 + $0x398] sm:$0xff]  ;;  %v165_v7 = vld [vmem:[%s10125_s1 + $0x3c8] sm:$0xff] }
   0x3   :  { %v150_v4 = vld [vmem:[%s10125_s1 + $0x350] sm:$0xff]  ;;  %v151_v5 = vld [vmem:[%s10125_s1 + $0x358] sm:$0xff]  ;;  %v156_v8 = vld [vmem:[%s10125_s1 + $0x380] sm:$0xff]  ;;  %190 = vmatpush.msra.mxu0 %v164_v6  ;;  %234 = vmatpush.msra.mxu1 %v165_v7 }
   0x4   :  { %279 = vmatpush.msra.mxu2 %v158_v2  ;;  %323 = vmatpush.msra.mxu3 %v159_v3  ;;  %v157_v9 = vld [vmem:[%s10125_s1 + $0x388] sm:$0xff]  ;;  %v142_v10 = vld [vmem:[%s10125_s1 + $0x310] sm:$0xff]  ;;  %v143_v11 = vld [vmem:[%s10125_s1 + $0x318] sm:$0xff] }
   0x5   :  { %v148_v12 = vld [vmem:[%s10125_s1 + $0x340] sm:$0xff]  ;;  %v149_v13 = vld [vmem:[%s10125_s1 + $0x348] sm:$0xff]  ;;  %191 = vmatpush.msra.mxu0 %v156_v8  ;;  %235 = vmatpush.msra.mxu1 %v157_v9  ;;  %v134_v14 = vld [vmem:[%s10125_s1 + $0x2d0] sm:$0xff] }
   0x6   :  { %280 = vmatpush.msra.mxu2 %v150_v4  ;;  %324 = vmatpush.msra.mxu3 %v151_v5  ;;  %v135_v15 = vld [vmem:[%s10125_s1 + $0x2d8] sm:$0xff]  ;;  %v140_v16 = vld [vmem:[%s10125_s1 + $0x300] sm:$0xff]  ;;  %v141_v17 = vld [vmem:[%s10125_s1 + $0x308] sm:$0xff] }
   0x7   :  { %192 = vmatpush.msra.mxu0 %v148_v12  ;;  %236 = vmatpush.msra.mxu1 %v149_v13  ;;  %v126_v18 = vld [vmem:[%s10125_s1 + $0x290] sm:$0xff]  ;;  %v127_v19 = vld [vmem:[%s10125_s1 + $0x298] sm:$0xff]  ;;  %v132_v20 = vld [vmem:[%s10125_s1 + $0x2c0] sm:$0xff] }
   0x8   :  { %281 = vmatpush.msra.mxu2 %v142_v10  ;;  %325 = vmatpush.msra.mxu3 %v143_v11  ;;  %v133_v21 = vld [vmem:[%s10125_s1 + $0x2c8] sm:$0xff]  ;;  %v118_v22 = vld [vmem:[%s10125_s1 + $0x250] sm:$0xff]  ;;  %v119_v23 = vld [vmem:[%s10125_s1 + $0x258] sm:$0xff] }
   0x9   :  { %193 = vmatpush.msra.mxu0 %v140_v16  ;;  %237 = vmatpush.msra.mxu1 %v141_v17  ;;  %v124_v24 = vld [vmem:[%s10125_s1 + $0x280] sm:$0xff]  ;;  %v125_v25 = vld [vmem:[%s10125_s1 + $0x288] sm:$0xff]  ;;  %v110_v26 = vld [vmem:[%s10125_s1 + $0x210] sm:$0xff] }
   0xa   :  { %282 = vmatpush.msra.mxu2 %v134_v14  ;;  %326 = vmatpush.msra.mxu3 %v135_v15  ;;  %v111_v27 = vld [vmem:[%s10125_s1 + $0x218] sm:$0xff]  ;;  %v116_v28 = vld [vmem:[%s10125_s1 + $0x240] sm:$0xff]  ;;  %v117_v29 = vld [vmem:[%s10125_s1 + $0x248] sm:$0xff] }
   0xb   :  { %194 = vmatpush.msra.mxu0 %v132_v20  ;;  %238 = vmatpush.msra.mxu1 %v133_v21  ;;  %v102_v30 = vld [vmem:[%s10125_s1 + $0x1d0] sm:$0xff]  ;;  %v103_v31 = vld [vmem:[%s10125_s1 + $0x1d8] sm:$0xff]  ;;  %v108_v32 = vld [vmem:[%s10125_s1 + $0x200] sm:$0xff] }
   0xc   :  { %283 = vmatpush.msra.mxu2 %v126_v18  ;;  %327 = vmatpush.msra.mxu3 %v127_v19  ;;  %v109_v33 = vld [vmem:[%s10125_s1 + $0x208] sm:$0xff]  ;;  %v94_v34 = vld [vmem:[%s10125_s1 + $0x190] sm:$0xff]  ;;  %v95_v35 = vld [vmem:[%s10125_s1 + $0x198] sm:$0xff] }
   0xd   :  { %195 = vmatpush.msra.mxu0 %v124_v24  ;;  %239 = vmatpush.msra.mxu1 %v125_v25  ;;  %v100_v36 = vld [vmem:[%s10125_s1 + $0x1c0] sm:$0xff]  ;;  %v101_v37 = vld [vmem:[%s10125_s1 + $0x1c8] sm:$0xff]  ;;  %v86_v38 = vld [vmem:[%s10125_s1 + $0x150] sm:$0xff] }
   0xe   :  { %284 = vmatpush.msra.mxu2 %v118_v22  ;;  %328 = vmatpush.msra.mxu3 %v119_v23  ;;  %v87_v39 = vld [vmem:[%s10125_s1 + $0x158] sm:$0xff]  ;;  %v92_v40 = vld [vmem:[%s10125_s1 + $0x180] sm:$0xff]  ;;  %v93_v41 = vld [vmem:[%s10125_s1 + $0x188] sm:$0xff] }
   0xf   :  { %196 = vmatpush.msra.mxu0 %v116_v28  ;;  %240 = vmatpush.msra.mxu1 %v117_v29  ;;  %v78_v42 = vld [vmem:[%s10125_s1 + $0x110] sm:$0xff]  ;;  %v79_v43 = vld [vmem:[%s10125_s1 + $0x118] sm:$0xff]  ;;  %v84_v44 = vld [vmem:[%s10125_s1 + $0x140] sm:$0xff] }
  0x10   :  { %285 = vmatpush.msra.mxu2 %v110_v26  ;;  %329 = vmatpush.msra.mxu3 %v111_v27  ;;  %v85_v45 = vld [vmem:[%s10125_s1 + $0x148] sm:$0xff]  ;;  %v70_v46 = vld [vmem:[%s10125_s1 + $0xd0] sm:$0xff]  ;;  %v71_v47 = vld [vmem:[%s10125_s1 + $0xd8] sm:$0xff] }
  0x11   :  { %197 = vmatpush.msra.mxu0 %v108_v32  ;;  %241 = vmatpush.msra.mxu1 %v109_v33  ;;  %v76_v48 = vld [vmem:[%s10125_s1 + $0x100] sm:$0xff]  ;;  %v77_v49 = vld [vmem:[%s10125_s1 + $0x108] sm:$0xff]  ;;  %v62_v50 = vld [vmem:[%s10125_s1 + $0x90] sm:$0xff] }
  0x12   :  { %286 = vmatpush.msra.mxu2 %v102_v30  ;;  %330 = vmatpush.msra.mxu3 %v103_v31  ;;  %v63_v51 = vld [vmem:[%s10125_s1 + $0x98] sm:$0xff]  ;;  %v68_v52 = vld [vmem:[%s10125_s1 + $0xc0] sm:$0xff]  ;;  %v69_v53 = vld [vmem:[%s10125_s1 + $0xc8] sm:$0xff] }
  0x13   :  { %198 = vmatpush.msra.mxu0 %v100_v36  ;;  %242 = vmatpush.msra.mxu1 %v101_v37  ;;  %v54_v54 = vld [vmem:[%s10125_s1 + $0x50] sm:$0xff]  ;;  %v55_v55 = vld [vmem:[%s10125_s1 + $0x58] sm:$0xff]  ;;  %v60_v56 = vld [vmem:[%s10125_s1 + $0x80] sm:$0xff] }
  0x14   :  { %287 = vmatpush.msra.mxu2 %v94_v34  ;;  %331 = vmatpush.msra.mxu3 %v95_v35  ;;  %v61_v57 = vld [vmem:[%s10125_s1 + $0x88] sm:$0xff]  ;;  %v46_v58 = vld [vmem:[%s10125_s1 + $0x10] sm:$0xff]  ;;  %v47_v59 = vld [vmem:[%s10125_s1 + $0x18] sm:$0xff] }
  0x15   :  { %199 = vmatpush.msra.mxu0 %v92_v40  ;;  %243 = vmatpush.msra.mxu1 %v93_v41  ;;  %v5226_v60 = vld [vmem:[%s10134_s0] sm:$0xff]  ;;  %v170_v61 = vld [vmem:[%s10125_s1 + $0x3f0] sm:$0xff]  ;;  %v171_v62 = vld [vmem:[%s10125_s1 + $0x3f8] sm:$0xff] }
  0x16   :  { %288 = vmatpush.msra.mxu2 %v86_v38  ;;  %332 = vmatpush.msra.mxu3 %v87_v39  ;;  %v52_v63 = vld [vmem:[%s10125_s1 + $0x40] sm:$0xff]  ;;  %v53_v0 = vld [vmem:[%s10125_s1 + $0x48] sm:$0xff]  ;;  %v162_v1 = vld [vmem:[%s10125_s1 + $0x3b0] sm:$0xff] }
  0x17   :  { %200 = vmatpush.msra.mxu0 %v84_v44  ;;  %244 = vmatpush.msra.mxu1 %v85_v45  ;;  %v163_v2 = vld [vmem:[%s10125_s1 + $0x3b8] sm:$0xff]  ;;  %v44_v3 = vld [vmem:[%s10125_s1] sm:$0xff]  ;;  %v45_v4 = vld [vmem:[%s10125_s1 + $0x8] sm:$0xff] }
  0x18   :  { %289 = vmatpush.msra.mxu2 %v78_v42  ;;  %333 = vmatpush.msra.mxu3 %v79_v43  ;;  %v168_v5 = vld [vmem:[%s10125_s1 + $0x3e0] sm:$0xff]  ;;  %v169_v6 = vld [vmem:[%s10125_s1 + $0x3e8] sm:$0xff]  ;;  %v154_v7 = vld [vmem:[%s10125_s1 + $0x370] sm:$0xff] }
  0x19   :  { %201 = vmatpush.msra.mxu0 %v76_v48  ;;  %245 = vmatpush.msra.mxu1 %v77_v49  ;;  %v155_v8 = vld [vmem:[%s10125_s1 + $0x378] sm:$0xff]  ;;  %v5271_v9 = vld [vmem:[%s10134_s0 + $0x8] sm:$0xff]  ;;  %v160_v10 = vld [vmem:[%s10125_s1 + $0x3a0] sm:$0xff] }
  0x1a   :  { %290 = vmatpush.msra.mxu2 %v70_v46  ;;  %334 = vmatpush.msra.mxu3 %v71_v47  ;;  %v161_v11 = vld [vmem:[%s10125_s1 + $0x3a8] sm:$0xff]  ;;  %v146_v12 = vld [vmem:[%s10125_s1 + $0x330] sm:$0xff]  ;;  %v147_v13 = vld [vmem:[%s10125_s1 + $0x338] sm:$0xff] }
  0x1b   :  { %202 = vmatpush.msra.mxu0 %v68_v52  ;;  %246 = vmatpush.msra.mxu1 %v69_v53  ;;  %v152_v14 = vld [vmem:[%s10125_s1 + $0x360] sm:$0xff]  ;;  %v153_v15 = vld [vmem:[%s10125_s1 + $0x368] sm:$0xff]  ;;  %v138_v16 = vld [vmem:[%s10125_s1 + $0x2f0] sm:$0xff] }
  0x1c   :  { %291 = vmatpush.msra.mxu2 %v62_v50  ;;  %335 = vmatpush.msra.mxu3 %v63_v51  ;;  %v139_v17 = vld [vmem:[%s10125_s1 + $0x2f8] sm:$0xff]  ;;  %v144_v18 = vld [vmem:[%s10125_s1 + $0x320] sm:$0xff]  ;;  %v145_v19 = vld [vmem:[%s10125_s1 + $0x328] sm:$0xff] }
  0x1d   :  { %203 = vmatpush.msra.mxu0 %v60_v56  ;;  %247 = vmatpush.msra.mxu1 %v61_v57  ;;  %v130_v20 = vld [vmem:[%s10125_s1 + $0x2b0] sm:$0xff]  ;;  %v131_v21 = vld [vmem:[%s10125_s1 + $0x2b8] sm:$0xff]  ;;  %v136_v23 = vld [vmem:[%s10125_s1 + $0x2e0] sm:$0xff] }
  0x1e   :  { %292 = vmatpush.msra.mxu2 %v54_v54  ;;  %336 = vmatpush.msra.mxu3 %v55_v55  ;;  %v5316_v22 = vld [vmem:[%s10134_s0 + $0x10] sm:$0xff]  ;;  %v137_v24 = vld [vmem:[%s10125_s1 + $0x2e8] sm:$0xff]  ;;  %v123_v26 = vld [vmem:[%s10125_s1 + $0x278] sm:$0xff] }
  0x1f   :  { %204 = vmatpush.msra.mxu0 %v52_v63  ;;  %248 = vmatpush.msra.mxu1 %v53_v0  ;;  %v122_v25 = vld [vmem:[%s10125_s1 + $0x270] sm:$0xff]  ;;  %v128_v27 = vld [vmem:[%s10125_s1 + $0x2a0] sm:$0xff]  ;;  %v129_v28 = vld [vmem:[%s10125_s1 + $0x2a8] sm:$0xff] }
  0x20   :  { %293 = vmatpush.msra.mxu2 %v46_v58  ;;  %337 = vmatpush.msra.mxu3 %v47_v59  ;;  %v114_v29 = vld [vmem:[%s10125_s1 + $0x230] sm:$0xff]  ;;  %v115_v30 = vld [vmem:[%s10125_s1 + $0x238] sm:$0xff]  ;;  %v120_v31 = vld [vmem:[%s10125_s1 + $0x260] sm:$0xff] }
  0x21   :  { %294 = vmatmul.f32.vlgmr.msra.gmra.mxu2 %v5226_v60  ;;  %338 = vmatmul.f32.vlgmr.msra.gmra.mxu3 %v5226_v60  ;;  %v121_v32 = vld [vmem:[%s10125_s1 + $0x268] sm:$0xff]  ;;  %v106_v33 = vld [vmem:[%s10125_s1 + $0x1f0] sm:$0xff]  ;;  %v107_v34 = vld [vmem:[%s10125_s1 + $0x1f8] sm:$0xff] }
  0x22   :  { %454 = vmatpush.msrb.mxu2 %v170_v61  ;;  %498 = vmatpush.msrb.mxu3 %v171_v62  ;;  %v5361_v35 = vld [vmem:[%s10134_s0 + $0x18] sm:$0xff]  ;;  %v112_v36 = vld [vmem:[%s10125_s1 + $0x220] sm:$0xff]  ;;  %v113_v37 = vld [vmem:[%s10125_s1 + $0x228] sm:$0xff] }
  0x23   :  { %205 = vmatpush.msra.mxu0 %v44_v3  ;;  %249 = vmatpush.msra.mxu1 %v45_v4  ;;  %v98_v38 = vld [vmem:[%s10125_s1 + $0x1b0] sm:$0xff]  ;;  %v99_v39 = vld [vmem:[%s10125_s1 + $0x1b8] sm:$0xff]  ;;  %v104_v40 = vld [vmem:[%s10125_s1 + $0x1e0] sm:$0xff] }
  0x24   :  { %455 = vmatpush.msrb.mxu2 %v162_v1  ;;  %499 = vmatpush.msrb.mxu3 %v163_v2  ;;  %v105_v41 = vld [vmem:[%s10125_s1 + $0x1e8] sm:$0xff]  ;;  %v90_v42 = vld [vmem:[%s10125_s1 + $0x170] sm:$0xff]  ;;  %v91_v43 = vld [vmem:[%s10125_s1 + $0x178] sm:$0xff] }
  0x25   :  { %206 = vmatmul.f32.vlgmr.msra.gmra.mxu0 %v5226_v60  ;;  %250 = vmatmul.f32.vlgmr.msra.gmra.mxu1 %v5226_v60  ;;  %v96_v44 = vld [vmem:[%s10125_s1 + $0x1a0] sm:$0xff]  ;;  %v97_v45 = vld [vmem:[%s10125_s1 + $0x1a8] sm:$0xff]  ;;  %v82_v46 = vld [vmem:[%s10125_s1 + $0x130] sm:$0xff] }
  0x26   :  { %366 = vmatpush.msrb.mxu0 %v168_v5  ;;  %410 = vmatpush.msrb.mxu1 %v169_v6  ;;  %v83_v47 = vld [vmem:[%s10125_s1 + $0x138] sm:$0xff]  ;;  %v5406_v48 = vld [vmem:[%s10134_s0 + $0x20] sm:$0xff]  ;;  %v89_v50 = vld [vmem:[%s10125_s1 + $0x168] sm:$0xff] }
  0x27   :  { %456 = vmatpush.msrb.mxu2 %v154_v7  ;;  %500 = vmatpush.msrb.mxu3 %v155_v8  ;;  %v88_v49 = vld [vmem:[%s10125_s1 + $0x160] sm:$0xff]  ;;  %v74_v51 = vld [vmem:[%s10125_s1 + $0xf0] sm:$0xff]  ;;  %v75_v52 = vld [vmem:[%s10125_s1 + $0xf8] sm:$0xff] }
  0x28   :  { %367 = vmatpush.msrb.mxu0 %v160_v10  ;;  %411 = vmatpush.msrb.mxu1 %v161_v11  ;;  %v80_v53 = vld [vmem:[%s10125_s1 + $0x120] sm:$0xff]  ;;  %v81_v54 = vld [vmem:[%s10125_s1 + $0x128] sm:$0xff]  ;;  %v66_v55 = vld [vmem:[%s10125_s1 + $0xb0] sm:$0xff] }
  0x29   :  { %297 = vmatmul.f32.gmra.mxu2 %v5271_v9  ;;  %341 = vmatmul.f32.gmra.mxu3 %v5271_v9  ;;  %v67_v56 = vld [vmem:[%s10125_s1 + $0xb8] sm:$0xff]  ;;  %v72_v57 = vld [vmem:[%s10125_s1 + $0xe0] sm:$0xff]  ;;  %v73_v58 = vld [vmem:[%s10125_s1 + $0xe8] sm:$0xff] }
  0x2a   :  { %457 = vmatpush.msrb.mxu2 %v146_v12  ;;  %501 = vmatpush.msrb.mxu3 %v147_v13  ;;  %v58_v59 = vld [vmem:[%s10125_s1 + $0x70] sm:$0xff]  ;;  %v59_v61 = vld [vmem:[%s10125_s1 + $0x78] sm:$0xff]  ;;  %v40_v62 = vld [vmem:[%s10134_s0 + $0x28] sm:$0xff] }
  0x2b   :  { %368 = vmatpush.msrb.mxu0 %v152_v14  ;;  %412 = vmatpush.msrb.mxu1 %v153_v15  ;;  %v64_v63 = vld [vmem:[%s10125_s1 + $0xa0] sm:$0xff]  ;;  %v65_v0 = vld [vmem:[%s10125_s1 + $0xa8] sm:$0xff]  ;;  %v50_v1 = vld [vmem:[%s10125_s1 + $0x30] sm:$0xff] }
  0x2c   :  { %458 = vmatpush.msrb.mxu2 %v138_v16  ;;  %502 = vmatpush.msrb.mxu3 %v139_v17  ;;  %v51_v2 = vld [vmem:[%s10125_s1 + $0x38] sm:$0xff]  ;;  %v56_v3 = vld [vmem:[%s10125_s1 + $0x60] sm:$0xff]  ;;  %v57_v4 = vld [vmem:[%s10125_s1 + $0x68] sm:$0xff] }
  0x2d   :  { %209 = vmatmul.f32.gmra.mxu0 %v5271_v9  ;;  %253 = vmatmul.f32.gmra.mxu1 %v5271_v9  ;;  %v48_v5 = vld [vmem:[%s10125_s1 + $0x20] sm:$0xff]  ;;  %v49_v6 = vld [vmem:[%s10125_s1 + $0x28] sm:$0xff]  ;;  %v41_v7 = vld [vmem:[%s10134_s0 + $0x30] sm:$0xff] }
  0x2e   :  { %369 = vmatpush.msrb.mxu0 %v144_v18  ;;  %413 = vmatpush.msrb.mxu1 %v145_v19  ;;  %v42_v8 = vld [vmem:[%s10134_s0 + $0x38] sm:$0xff]  ;;  %v5484_v10 = vld [vmem:[%s10134_s0 + $0x40] sm:$0xff] }
  0x2f   :  { %459 = vmatpush.msrb.mxu2 %v130_v20  ;;  %503 = vmatpush.msrb.mxu3 %v131_v21 }
  0x30   :  { %370 = vmatpush.msrb.mxu0 %v136_v23  ;;  %414 = vmatpush.msrb.mxu1 %v137_v24 }
  0x31   :  { %300 = vmatmul.f32.gmra.mxu2 %v5316_v22  ;;  %344 = vmatmul.f32.gmra.mxu3 %v5316_v22 }
  0x32   :  { %460 = vmatpush.msrb.mxu2 %v122_v25  ;;  %504 = vmatpush.msrb.mxu3 %v123_v26 }
  0x33   :  { %371 = vmatpush.msrb.mxu0 %v128_v27  ;;  %415 = vmatpush.msrb.mxu1 %v129_v28 }
  0x34   :  { %461 = vmatpush.msrb.mxu2 %v114_v29  ;;  %505 = vmatpush.msrb.mxu3 %v115_v30 }
  0x35   :  { %212 = vmatmul.f32.gmra.mxu0 %v5316_v22  ;;  %256 = vmatmul.f32.gmra.mxu1 %v5316_v22 }
  0x36   :  { %372 = vmatpush.msrb.mxu0 %v120_v31  ;;  %416 = vmatpush.msrb.mxu1 %v121_v32 }
  0x37   :  { %462 = vmatpush.msrb.mxu2 %v106_v33  ;;  %506 = vmatpush.msrb.mxu3 %v107_v34 }
  0x38   :  { %373 = vmatpush.msrb.mxu0 %v112_v36  ;;  %417 = vmatpush.msrb.mxu1 %v113_v37 }
  0x39   :  { %303 = vmatmul.f32.gmra.mxu2 %v5361_v35  ;;  %347 = vmatmul.f32.gmra.mxu3 %v5361_v35 }
  0x3a   :  { %463 = vmatpush.msrb.mxu2 %v98_v38  ;;  %507 = vmatpush.msrb.mxu3 %v99_v39 }
  0x3b   :  { %374 = vmatpush.msrb.mxu0 %v104_v40  ;;  %418 = vmatpush.msrb.mxu1 %v105_v41 }
  0x3c   :  { %464 = vmatpush.msrb.mxu2 %v90_v42  ;;  %508 = vmatpush.msrb.mxu3 %v91_v43 }
  0x3d   :  { %215 = vmatmul.f32.gmra.mxu0 %v5361_v35  ;;  %259 = vmatmul.f32.gmra.mxu1 %v5361_v35 }
  0x3e   :  { %375 = vmatpush.msrb.mxu0 %v96_v44  ;;  %419 = vmatpush.msrb.mxu1 %v97_v45 }
  0x3f   :  { %465 = vmatpush.msrb.mxu2 %v82_v46  ;;  %509 = vmatpush.msrb.mxu3 %v83_v47 }
  0x40   :  { %376 = vmatpush.msrb.mxu0 %v88_v49  ;;  %420 = vmatpush.msrb.mxu1 %v89_v50 }
  0x41   :  { %306 = vmatmul.f32.gmra.mxu2 %v5406_v48  ;;  %350 = vmatmul.f32.gmra.mxu3 %v5406_v48 }
  0x42   :  { %466 = vmatpush.msrb.mxu2 %v74_v51  ;;  %510 = vmatpush.msrb.mxu3 %v75_v52 }
  0x43   :  { %377 = vmatpush.msrb.mxu0 %v80_v53  ;;  %421 = vmatpush.msrb.mxu1 %v81_v54 }
  0x44   :  { %467 = vmatpush.msrb.mxu2 %v66_v55  ;;  %511 = vmatpush.msrb.mxu3 %v67_v56 }
  0x45   :  { %218 = vmatmul.f32.gmra.mxu0 %v5406_v48  ;;  %262 = vmatmul.f32.gmra.mxu1 %v5406_v48 }
  0x46   :  { %378 = vmatpush.msrb.mxu0 %v72_v57  ;;  %422 = vmatpush.msrb.mxu1 %v73_v58 }
  0x47   :  { %468 = vmatpush.msrb.mxu2 %v58_v59  ;;  %512 = vmatpush.msrb.mxu3 %v59_v61 }
  0x48   :  { %379 = vmatpush.msrb.mxu0 %v64_v63  ;;  %423 = vmatpush.msrb.mxu1 %v65_v0 }
  0x49   :  { %309 = vmatmul.f32.gmra.mxu2 %v40_v62  ;;  %353 = vmatmul.f32.gmra.mxu3 %v40_v62 }
  0x4a   :  { %469 = vmatpush.msrb.mxu2 %v50_v1  ;;  %513 = vmatpush.msrb.mxu3 %v51_v2 }
  0x4b   :  { %380 = vmatpush.msrb.mxu0 %v56_v3  ;;  %424 = vmatpush.msrb.mxu1 %v57_v4 }
  0x4d   :  { %221 = vmatmul.f32.gmra.mxu0 %v40_v62  ;;  %265 = vmatmul.f32.gmra.mxu1 %v40_v62 }
  0x4e   :  { %381 = vmatpush.msrb.mxu0 %v48_v5  ;;  %425 = vmatpush.msrb.mxu1 %v49_v6 }
  0x51   :  { %312 = vmatmul.f32.gmra.mxu2 %v41_v7  ;;  %356 = vmatmul.f32.gmra.mxu3 %v41_v7 }
  0x55   :  { %224 = vmatmul.f32.gmra.mxu0 %v41_v7  ;;  %268 = vmatmul.f32.gmra.mxu1 %v41_v7 }
  0x59   :  { %315 = vmatmul.f32.gmra.mxu2 %v42_v8  ;;  %359 = vmatmul.f32.gmra.mxu3 %v42_v8 }
  0x5d   :  { %227 = vmatmul.f32.gmra.mxu0 %v42_v8  ;;  %271 = vmatmul.f32.gmra.mxu1 %v42_v8 }
  0x61   :  { %318 = vmatmul.f32.gmra.mxu2 %v5484_v10  ;;  %362 = vmatmul.f32.gmra.mxu3 %v5484_v10 }
  0x65   :  { %230 = vmatmul.f32.gmra.mxu0 %v5484_v10  ;;  %274 = vmatmul.f32.gmra.mxu1 %v5484_v10 }
  0x69   :  { %470 = vmatmul.f32.vlgmr.msrb.gmra.mxu2 %v5226_v60  ;;  %514 = vmatmul.f32.vlgmr.msrb.gmra.mxu3 %v5226_v60 }
  0x6d   :  { %382 = vmatmul.f32.vlgmr.msrb.gmra.mxu0 %v5226_v60  ;;  %426 = vmatmul.f32.vlgmr.msrb.gmra.mxu1 %v5226_v60  ;;  %v5513_v60 = vld [vmem:[%s10135_s3] sm:$0xff]  ;;  %s5619_s3 = smov 0  }
  0x6e   :  { %v5519_v11 = vperm.slane %v5513_v60, 1  ;;  %v5522_v12 = vperm.slane %v5513_v60, 2  ;;  %v5525_v13 = vperm.slane %v5513_v60, 3 }
  0x71   :  { %473 = vmatmul.f32.gmra.mxu2 %v5271_v9  ;;  %517 = vmatmul.f32.gmra.mxu3 %v5271_v9 }
  0x75   :  { %385 = vmatmul.f32.gmra.mxu0 %v5271_v9  ;;  %429 = vmatmul.f32.gmra.mxu1 %v5271_v9  ;;  %v5516_v9 = vperm.slane %v5513_v60, 0 }
  0x79   :  { %476 = vmatmul.f32.gmra.mxu2 %v5316_v22  ;;  %520 = vmatmul.f32.gmra.mxu3 %v5316_v22 }
  0x7d   :  { %388 = vmatmul.f32.gmra.mxu0 %v5316_v22  ;;  %432 = vmatmul.f32.gmra.mxu1 %v5316_v22 }
  0x81   :  { %479 = vmatmul.f32.gmra.mxu2 %v5361_v35  ;;  %523 = vmatmul.f32.gmra.mxu3 %v5361_v35 }
  0x85   :  { %391 = vmatmul.f32.gmra.mxu0 %v5361_v35  ;;  %435 = vmatmul.f32.gmra.mxu1 %v5361_v35 }
  0x89   :  { %482 = vmatmul.f32.gmra.mxu2 %v5406_v48  ;;  %526 = vmatmul.f32.gmra.mxu3 %v5406_v48 }
  0x8d   :  { %394 = vmatmul.f32.gmra.mxu0 %v5406_v48  ;;  %438 = vmatmul.f32.gmra.mxu1 %v5406_v48 }
  0x91   :  { %485 = vmatmul.f32.gmra.mxu2 %v40_v62  ;;  %529 = vmatmul.f32.gmra.mxu3 %v40_v62 }
  0x95   :  { %397 = vmatmul.f32.gmra.mxu0 %v40_v62  ;;  %441 = vmatmul.f32.gmra.mxu1 %v40_v62 }
  0x99   :  { %488 = vmatmul.f32.gmra.mxu2 %v41_v7  ;;  %532 = vmatmul.f32.gmra.mxu3 %v41_v7 }
  0x9d   :  { %400 = vmatmul.f32.gmra.mxu0 %v41_v7  ;;  %444 = vmatmul.f32.gmra.mxu1 %v41_v7 }
  0xa1   :  { %491 = vmatmul.f32.gmra.mxu2 %v42_v8  ;;  %535 = vmatmul.f32.gmra.mxu3 %v42_v8 }
  0xa2   :  { %v207_v14 = vpop.f32.mrf.mxu0  ;;  %v251_v15 = vpop.f32.mrf.mxu1 }
  0xa3   :  { %v208_v16 = vadd.f32 %v207_v14, %v5516_v9  ;;  %v252_v17 = vadd.f32 %v251_v15, %v5519_v11 }
  0xa4   :  { %v295_v18 = vpop.f32.mrf.mxu2  ;;  %v339_v19 = vpop.f32.mrf.mxu3 }
  0xa5   :  { %v296_v20 = vadd.f32 %v295_v18, %v5522_v12  ;;  %v340_v21 = vadd.f32 %v339_v19, %v5525_v13  ;;  %542 = vst [vmem:[#allocation2] sm:$0xff] %v208_v16  ;;  %403 = vmatmul.f32.gmra.mxu0 %v42_v8  ;;  %447 = vmatmul.f32.gmra.mxu1 %v42_v8 }
  0xa6   :  { %543 = vst [vmem:[#allocation2 + $0x8] sm:$0xff] %v252_v17 }
  0xa7   :  { %544 = vst [vmem:[#allocation2 + $0x10] sm:$0xff] %v296_v20 }
  0xa8   :  { %545 = vst [vmem:[#allocation2 + $0x18] sm:$0xff] %v340_v21 }
  0xa9   :  { %494 = vmatmul.f32.gmra.mxu2 %v5484_v10  ;;  %538 = vmatmul.f32.gmra.mxu3 %v5484_v10 }
  0xaa   :  { %v210_v22 = vpop.f32.mrf.mxu0  ;;  %v254_v23 = vpop.f32.mrf.mxu1 }
  0xab   :  { %v211_v24 = vadd.f32 %v210_v22, %v5516_v9  ;;  %v255_v25 = vadd.f32 %v254_v23, %v5519_v11 }
  0xac   :  { %v298_v26 = vpop.f32.mrf.mxu2  ;;  %v342_v27 = vpop.f32.mrf.mxu3 }
  0xad   :  { %v299_v28 = vadd.f32 %v298_v26, %v5522_v12  ;;  %v343_v29 = vadd.f32 %v342_v27, %v5525_v13  ;;  %550 = vst [vmem:[#allocation2 + $0x40] sm:$0xff] %v211_v24  ;;  %406 = vmatmul.f32.gmra.mxu0 %v5484_v10  ;;  %450 = vmatmul.f32.gmra.mxu1 %v5484_v10  ;;  %v5568_v27 = vperm.slane %v5513_v60, 4 }
  0xae   :  { %551 = vst [vmem:[#allocation2 + $0x48] sm:$0xff] %v255_v25 }
  0xaf   :  { %552 = vst [vmem:[#allocation2 + $0x50] sm:$0xff] %v299_v28  ;;  %v5571_v28 = vperm.slane %v5513_v60, 5 }
  0xb0   :  { %553 = vst [vmem:[#allocation2 + $0x58] sm:$0xff] %v343_v29 }
  0xb2   :  { %v213_v30 = vpop.f32.mrf.mxu0  ;;  %v257_v31 = vpop.f32.mrf.mxu1 }
  0xb3   :  { %v214_v32 = vadd.f32 %v213_v30, %v5516_v9  ;;  %v258_v33 = vadd.f32 %v257_v31, %v5519_v11 }
  0xb4   :  { %v301_v34 = vpop.f32.mrf.mxu2  ;;  %v345_v35 = vpop.f32.mrf.mxu3 }
  0xb5   :  { %v302_v36 = vadd.f32 %v301_v34, %v5522_v12  ;;  %v346_v37 = vadd.f32 %v345_v35, %v5525_v13  ;;  %558 = vst [vmem:[#allocation2 + $0x80] sm:$0xff] %v214_v32 }
  0xb6   :  { %559 = vst [vmem:[#allocation2 + $0x88] sm:$0xff] %v258_v33 }
  0xb7   :  { %560 = vst [vmem:[#allocation2 + $0x90] sm:$0xff] %v302_v36 }
  0xb8   :  { %561 = vst [vmem:[#allocation2 + $0x98] sm:$0xff] %v346_v37 }
  0xba   :  { %v216_v38 = vpop.f32.mrf.mxu0  ;;  %v260_v39 = vpop.f32.mrf.mxu1 }
  0xbb   :  { %v217_v40 = vadd.f32 %v216_v38, %v5516_v9  ;;  %v261_v41 = vadd.f32 %v260_v39, %v5519_v11 }
  0xbc   :  { %v304_v42 = vpop.f32.mrf.mxu2  ;;  %v348_v43 = vpop.f32.mrf.mxu3 }
  0xbd   :  { %v305_v44 = vadd.f32 %v304_v42, %v5522_v12  ;;  %v349_v45 = vadd.f32 %v348_v43, %v5525_v13  ;;  %566 = vst [vmem:[#allocation2 + $0xc0] sm:$0xff] %v217_v40 }
  0xbe   :  { %567 = vst [vmem:[#allocation2 + $0xc8] sm:$0xff] %v261_v41 }
  0xbf   :  { %568 = vst [vmem:[#allocation2 + $0xd0] sm:$0xff] %v305_v44 }
  0xc0   :  { %569 = vst [vmem:[#allocation2 + $0xd8] sm:$0xff] %v349_v45 }
  0xc2   :  { %v219_v46 = vpop.f32.mrf.mxu0  ;;  %v263_v47 = vpop.f32.mrf.mxu1 }
  0xc3   :  { %v220_v48 = vadd.f32 %v219_v46, %v5516_v9  ;;  %v264_v49 = vadd.f32 %v263_v47, %v5519_v11 }
  0xc4   :  { %v307_v50 = vpop.f32.mrf.mxu2  ;;  %v351_v51 = vpop.f32.mrf.mxu3 }
  0xc5   :  { %v308_v52 = vadd.f32 %v307_v50, %v5522_v12  ;;  %v352_v53 = vadd.f32 %v351_v51, %v5525_v13  ;;  %574 = vst [vmem:[#allocation2 + $0x100] sm:$0xff] %v220_v48 }
  0xc6   :  { %575 = vst [vmem:[#allocation2 + $0x108] sm:$0xff] %v264_v49 }
  0xc7   :  { %576 = vst [vmem:[#allocation2 + $0x110] sm:$0xff] %v308_v52 }
  0xc8   :  { %577 = vst [vmem:[#allocation2 + $0x118] sm:$0xff] %v352_v53 }
  0xca   :  { %v222_v54 = vpop.f32.mrf.mxu0  ;;  %v266_v55 = vpop.f32.mrf.mxu1 }
  0xcb   :  { %v223_v56 = vadd.f32 %v222_v54, %v5516_v9  ;;  %v267_v57 = vadd.f32 %v266_v55, %v5519_v11 }
  0xcc   :  { %v310_v58 = vpop.f32.mrf.mxu2  ;;  %v354_v59 = vpop.f32.mrf.mxu3 }
  0xcd   :  { %v311_v61 = vadd.f32 %v310_v58, %v5522_v12  ;;  %v355_v62 = vadd.f32 %v354_v59, %v5525_v13  ;;  %582 = vst [vmem:[#allocation2 + $0x140] sm:$0xff] %v223_v56 }
  0xce   :  { %583 = vst [vmem:[#allocation2 + $0x148] sm:$0xff] %v267_v57 }
  0xcf   :  { %584 = vst [vmem:[#allocation2 + $0x150] sm:$0xff] %v311_v61 }
  0xd0   :  { %585 = vst [vmem:[#allocation2 + $0x158] sm:$0xff] %v355_v62 }
  0xd2   :  { %v225_v63 = vpop.f32.mrf.mxu0  ;;  %v269_v0 = vpop.f32.mrf.mxu1 }
  0xd3   :  { %v226_v1 = vadd.f32 %v225_v63, %v5516_v9  ;;  %v270_v2 = vadd.f32 %v269_v0, %v5519_v11 }
  0xd4   :  { %v313_v3 = vpop.f32.mrf.mxu2  ;;  %v357_v4 = vpop.f32.mrf.mxu3 }
  0xd5   :  { %v314_v5 = vadd.f32 %v313_v3, %v5522_v12  ;;  %v358_v6 = vadd.f32 %v357_v4, %v5525_v13  ;;  %590 = vst [vmem:[#allocation2 + $0x180] sm:$0xff] %v226_v1  ;;  %v4987_v3 = vmov 0.0  }
  0xd6   :  { %591 = vst [vmem:[#allocation2 + $0x188] sm:$0xff] %v270_v2 }
  0xd7   :  { %592 = vst [vmem:[#allocation2 + $0x190] sm:$0xff] %v314_v5 }
  0xd8   :  { %593 = vst [vmem:[#allocation2 + $0x198] sm:$0xff] %v358_v6 }
  0xd9   :  { %614 = vst [vmem:[#allocation5] sm:$0xff] %v4987_v3 }
  0xda   :  { %v228_v7 = vpop.f32.mrf.mxu0  ;;  %v272_v8 = vpop.f32.mrf.mxu1  ;;  %615 = vst [vmem:[#allocation5 + $0x8] sm:$0xff] %v4987_v3 }
  0xdb   :  { %v229_v10 = vadd.f32 %v228_v7, %v5516_v9  ;;  %v273_v14 = vadd.f32 %v272_v8, %v5519_v11  ;;  %616 = vst [vmem:[#allocation6 + $0x8] sm:$0xff] %v4987_v3 }
  0xdc   :  { %v316_v15 = vpop.f32.mrf.mxu2  ;;  %v360_v16 = vpop.f32.mrf.mxu3  ;;  %617 = vst [vmem:[#allocation6] sm:$0xff] %v4987_v3 }
  0xdd   :  { %v317_v17 = vadd.f32 %v316_v15, %v5522_v12  ;;  %v361_v18 = vadd.f32 %v360_v16, %v5525_v13  ;;  %598 = vst [vmem:[#allocation2 + $0x1c0] sm:$0xff] %v229_v10 }
  0xde   :  { %599 = vst [vmem:[#allocation2 + $0x1c8] sm:$0xff] %v273_v14 }
  0xdf   :  { %600 = vst [vmem:[#allocation2 + $0x1d0] sm:$0xff] %v317_v17 }
  0xe0   :  { %601 = vst [vmem:[#allocation2 + $0x1d8] sm:$0xff] %v361_v18 }
  0xe2   :  { %v231_v19 = vpop.f32.mrf.mxu0  ;;  %v275_v20 = vpop.f32.mrf.mxu1 }
  0xe3   :  { %v232_v21 = vadd.f32 %v231_v19, %v5516_v9  ;;  %v276_v22 = vadd.f32 %v275_v20, %v5519_v11  ;;  %v5574_v9 = vperm.slane %v5513_v60, 6  ;;  %v5577_v11 = vperm.slane %v5513_v60, 7 }
  0xe4   :  { %v319_v23 = vpop.f32.mrf.mxu2  ;;  %v363_v24 = vpop.f32.mrf.mxu3 }
  0xe5   :  { %v320_v25 = vadd.f32 %v319_v23, %v5522_v12  ;;  %v364_v26 = vadd.f32 %v363_v24, %v5525_v13  ;;  %606 = vst [vmem:[#allocation2 + $0x200] sm:$0xff] %v232_v21 }
  0xe6   :  { %607 = vst [vmem:[#allocation2 + $0x208] sm:$0xff] %v276_v22 }
  0xe7   :  { %608 = vst [vmem:[#allocation2 + $0x210] sm:$0xff] %v320_v25 }
  0xe8   :  { %609 = vst [vmem:[#allocation2 + $0x218] sm:$0xff] %v364_v26 }
  0xea   :  { %v383_v29 = vpop.f32.mrf.mxu0  ;;  %v427_v12 = vpop.f32.mrf.mxu1 }
  0xeb   :  { %v384_v13 = vadd.f32 %v383_v29, %v5568_v27  ;;  %v428_v30 = vadd.f32 %v427_v12, %v5571_v28 }
  0xec   :  { %v471_v31 = vpop.f32.mrf.mxu2  ;;  %v515_v32 = vpop.f32.mrf.mxu3 }
  0xed   :  { %v472_v33 = vadd.f32 %v471_v31, %v5574_v9  ;;  %v516_v34 = vadd.f32 %v515_v32, %v5577_v11  ;;  %546 = vst [vmem:[#allocation2 + $0x20] sm:$0xff] %v384_v13 }
  0xee   :  { %547 = vst [vmem:[#allocation2 + $0x28] sm:$0xff] %v428_v30 }
  0xef   :  { %548 = vst [vmem:[#allocation2 + $0x30] sm:$0xff] %v472_v33 }
  0xf0   :  { %549 = vst [vmem:[#allocation2 + $0x38] sm:$0xff] %v516_v34 }
  0xf2   :  { %v386_v35 = vpop.f32.mrf.mxu0  ;;  %v430_v36 = vpop.f32.mrf.mxu1 }
  0xf3   :  { %v387_v60 = vadd.f32 %v386_v35, %v5568_v27  ;;  %v431_v37 = vadd.f32 %v430_v36, %v5571_v28 }
  0xf4   :  { %v474_v38 = vpop.f32.mrf.mxu2  ;;  %v518_v39 = vpop.f32.mrf.mxu3 }
  0xf5   :  { %v475_v40 = vadd.f32 %v474_v38, %v5574_v9  ;;  %v519_v41 = vadd.f32 %v518_v39, %v5577_v11  ;;  %554 = vst [vmem:[#allocation2 + $0x60] sm:$0xff] %v387_v60 }
  0xf6   :  { %555 = vst [vmem:[#allocation2 + $0x68] sm:$0xff] %v431_v37 }
  0xf7   :  { %556 = vst [vmem:[#allocation2 + $0x70] sm:$0xff] %v475_v40 }
  0xf8   :  { %557 = vst [vmem:[#allocation2 + $0x78] sm:$0xff] %v519_v41 }
  0xfa   :  { %v389_v42 = vpop.f32.mrf.mxu0  ;;  %v433_v43 = vpop.f32.mrf.mxu1 }
  0xfb   :  { %v390_v44 = vadd.f32 %v389_v42, %v5568_v27  ;;  %v434_v45 = vadd.f32 %v433_v43, %v5571_v28 }
  0xfc   :  { %v477_v46 = vpop.f32.mrf.mxu2  ;;  %v521_v47 = vpop.f32.mrf.mxu3 }
  0xfd   :  { %v478_v48 = vadd.f32 %v477_v46, %v5574_v9  ;;  %v522_v49 = vadd.f32 %v521_v47, %v5577_v11  ;;  %562 = vst [vmem:[#allocation2 + $0xa0] sm:$0xff] %v390_v44 }
  0xfe   :  { %563 = vst [vmem:[#allocation2 + $0xa8] sm:$0xff] %v434_v45 }
  0xff   :  { %564 = vst [vmem:[#allocation2 + $0xb0] sm:$0xff] %v478_v48 }
 0x100   :  { %565 = vst [vmem:[#allocation2 + $0xb8] sm:$0xff] %v522_v49 }
 0x102   :  { %v392_v50 = vpop.f32.mrf.mxu0  ;;  %v436_v51 = vpop.f32.mrf.mxu1 }
 0x103   :  { %v393_v52 = vadd.f32 %v392_v50, %v5568_v27  ;;  %v437_v53 = vadd.f32 %v436_v51, %v5571_v28 }
 0x104   :  { %v480_v54 = vpop.f32.mrf.mxu2  ;;  %v524_v55 = vpop.f32.mrf.mxu3 }
 0x105   :  { %v481_v56 = vadd.f32 %v480_v54, %v5574_v9  ;;  %v525_v57 = vadd.f32 %v524_v55, %v5577_v11  ;;  %570 = vst [vmem:[#allocation2 + $0xe0] sm:$0xff] %v393_v52 }
 0x106   :  { %571 = vst [vmem:[#allocation2 + $0xe8] sm:$0xff] %v437_v53 }
 0x107   :  { %572 = vst [vmem:[#allocation2 + $0xf0] sm:$0xff] %v481_v56 }
 0x108   :  { %573 = vst [vmem:[#allocation2 + $0xf8] sm:$0xff] %v525_v57 }
 0x10a   :  { %v395_v58 = vpop.f32.mrf.mxu0  ;;  %v439_v59 = vpop.f32.mrf.mxu1 }
 0x10b   :  { %v396_v61 = vadd.f32 %v395_v58, %v5568_v27  ;;  %v440_v62 = vadd.f32 %v439_v59, %v5571_v28 }
 0x10c   :  { %v483_v63 = vpop.f32.mrf.mxu2  ;;  %v527_v0 = vpop.f32.mrf.mxu3 }
 0x10d   :  { %v484_v1 = vadd.f32 %v483_v63, %v5574_v9  ;;  %v528_v2 = vadd.f32 %v527_v0, %v5577_v11  ;;  %578 = vst [vmem:[#allocation2 + $0x120] sm:$0xff] %v396_v61 }
 0x10e   :  { %579 = vst [vmem:[#allocation2 + $0x128] sm:$0xff] %v440_v62 }
 0x10f   :  { %580 = vst [vmem:[#allocation2 + $0x130] sm:$0xff] %v484_v1 }
 0x110   :  { %581 = vst [vmem:[#allocation2 + $0x138] sm:$0xff] %v528_v2 }
 0x112   :  { %v398_v4 = vpop.f32.mrf.mxu0  ;;  %v442_v5 = vpop.f32.mrf.mxu1 }
 0x113   :  { %v399_v6 = vadd.f32 %v398_v4, %v5568_v27  ;;  %v443_v7 = vadd.f32 %v442_v5, %v5571_v28 }
 0x114   :  { %v486_v8 = vpop.f32.mrf.mxu2  ;;  %v530_v10 = vpop.f32.mrf.mxu3 }
 0x115   :  { %v487_v14 = vadd.f32 %v486_v8, %v5574_v9  ;;  %v531_v15 = vadd.f32 %v530_v10, %v5577_v11  ;;  %586 = vst [vmem:[#allocation2 + $0x160] sm:$0xff] %v399_v6 }
 0x116   :  { %587 = vst [vmem:[#allocation2 + $0x168] sm:$0xff] %v443_v7 }
 0x117   :  { %588 = vst [vmem:[#allocation2 + $0x170] sm:$0xff] %v487_v14 }
 0x118   :  { %589 = vst [vmem:[#allocation2 + $0x178] sm:$0xff] %v531_v15 }
 0x11a   :  { %v401_v16 = vpop.f32.mrf.mxu0  ;;  %v445_v17 = vpop.f32.mrf.mxu1 }
 0x11b   :  { %v402_v18 = vadd.f32 %v401_v16, %v5568_v27  ;;  %v446_v19 = vadd.f32 %v445_v17, %v5571_v28 }
 0x11c   :  { %v489_v20 = vpop.f32.mrf.mxu2  ;;  %v533_v21 = vpop.f32.mrf.mxu3 }
 0x11d   :  { %v490_v22 = vadd.f32 %v489_v20, %v5574_v9  ;;  %v534_v23 = vadd.f32 %v533_v21, %v5577_v11  ;;  %594 = vst [vmem:[#allocation2 + $0x1a0] sm:$0xff] %v402_v18 }
 0x11e   :  { %595 = vst [vmem:[#allocation2 + $0x1a8] sm:$0xff] %v446_v19 }
 0x11f   :  { %596 = vst [vmem:[#allocation2 + $0x1b0] sm:$0xff] %v490_v22 }
 0x120   :  { %597 = vst [vmem:[#allocation2 + $0x1b8] sm:$0xff] %v534_v23 }
 0x122   :  { %v404_v24 = vpop.f32.mrf.mxu0  ;;  %v448_v25 = vpop.f32.mrf.mxu1 }
 0x123   :  { %v405_v26 = vadd.f32 %v404_v24, %v5568_v27  ;;  %v449_v29 = vadd.f32 %v448_v25, %v5571_v28 }
 0x124   :  { %v492_v12 = vpop.f32.mrf.mxu2  ;;  %v536_v13 = vpop.f32.mrf.mxu3 }
 0x125   :  { %v493_v30 = vadd.f32 %v492_v12, %v5574_v9  ;;  %v537_v31 = vadd.f32 %v536_v13, %v5577_v11  ;;  %602 = vst [vmem:[#allocation2 + $0x1e0] sm:$0xff] %v405_v26 }
 0x126   :  { %603 = vst [vmem:[#allocation2 + $0x1e8] sm:$0xff] %v449_v29 }
 0x127   :  { %604 = vst [vmem:[#allocation2 + $0x1f0] sm:$0xff] %v493_v30 }
 0x128   :  { %605 = vst [vmem:[#allocation2 + $0x1f8] sm:$0xff] %v537_v31 }
 0x12a   :  { %v407_v32 = vpop.f32.mrf.mxu0  ;;  %v451_v33 = vpop.f32.mrf.mxu1 }
 0x12b   :  { %v408_v34 = vadd.f32 %v407_v32, %v5568_v27  ;;  %v452_v35 = vadd.f32 %v451_v33, %v5571_v28 }
 0x12c   :  { %v495_v36 = vpop.f32.mrf.mxu2  ;;  %v539_v60 = vpop.f32.mrf.mxu3 }
 0x12d   :  { %v496_v37 = vadd.f32 %v495_v36, %v5574_v9  ;;  %v540_v38 = vadd.f32 %v539_v60, %v5577_v11  ;;  %610 = vst [vmem:[#allocation2 + $0x220] sm:$0xff] %v408_v34 }
 0x12e   :  { %611 = vst [vmem:[#allocation2 + $0x228] sm:$0xff] %v452_v35 }
 0x12f   :  { %612 = vst [vmem:[#allocation2 + $0x230] sm:$0xff] %v496_v37 }
 0x130   :  { %613 = vst [vmem:[#allocation2 + $0x238] sm:$0xff] %v540_v38 }
 0x131 LB: > { %v749_v27 = vld [vmem:[%s10126_s2 + $0x3c0] sm:$0xff]  ;;  %v750_v9 = vld [vmem:[%s10126_s2 + $0x3c8] sm:$0xff]  ;;  %s4818_s13 = sshll.u32 %s4977_s3, 3  ;;  %s624_s18 = ssub.s32 8, %s4977_s3  ;;  %s4977_s3 = sphi %s5619_s3, %s623_s3  }
 0x132   : > { %v877_v28 = vld [vmem:[%s10126_s2 + $0x7c0] sm:$0xff]  ;;  %885 = vmatpush.msra.mxu0 %v749_v27  ;;  %v878_v11 = vld [vmem:[%s10126_s2 + $0x7c8] sm:$0xff]  ;;  %925 = vmatpush.msra.mxu2 %v750_v9  ;;  %v879_v9 = vld [vmem:[%s10126_s2 + $0x7d0] sm:$0xff]  ;;  %s1205_s14 = sshra.s32 %s4818_s13, 3  ;;  %s1273_s17 = scalar_lea.vmem [#allocation3], %s4818_s13 }
 0x133   : > { %905 = vmatpush.msra.mxu1 %v877_v28  ;;  %v741_v39 = vld [vmem:[%s10126_s2 + $0x380] sm:$0xff]  ;;  %945 = vmatpush.msra.mxu3 %v878_v11  ;;  %v742_v41 = vld [vmem:[%s10126_s2 + $0x388] sm:$0xff]  ;;  %v751_v28 = vld [vmem:[%s10126_s2 + $0x3d0] sm:$0xff]  ;;  %s4836_s15 = sshll.u32 %s1205_s14, 6  ;;  %s6418_s19 = sshll.u32 %s624_s18, 3 }
 0x134   : > { %v869_v40 = vld [vmem:[%s10126_s2 + $0x780] sm:$0xff]  ;;  %v870_v42 = vld [vmem:[%s10126_s2 + $0x788] sm:$0xff]  ;;  %886 = vmatpush.msra.mxu0 %v741_v39  ;;  %926 = vmatpush.msra.mxu2 %v742_v41  ;;  %v752_v11 = vld [vmem:[%s10126_s2 + $0x3d8] sm:$0xff]  ;;  %s1209_s16 = scalar_lea.vmem [#allocation2], %s4836_s15  ;;  %s1218_s20 = sshra.s32 %s6418_s19, 3 }
 0x135   : > { %v733_v43 = vld [vmem:[%s10126_s2 + $0x340] sm:$0xff]  ;;  %906 = vmatpush.msra.mxu1 %v869_v40  ;;  %v734_v45 = vld [vmem:[%s10126_s2 + $0x348] sm:$0xff]  ;;  %946 = vmatpush.msra.mxu3 %v870_v42  ;;  %v880_v39 = vld [vmem:[%s10126_s2 + $0x7d8] sm:$0xff]  ;;  %s4837_s21 = sshll.u32 %s1218_s20, 6  ;;  %s1275_s23 = scalar_lea.vmem [#allocation4], %s6418_s19 }
 0x136   : > { %v861_v44 = vld [vmem:[%s10126_s2 + $0x740] sm:$0xff]  ;;  %v862_v46 = vld [vmem:[%s10126_s2 + $0x748] sm:$0xff]  ;;  %887 = vmatpush.msra.mxu0 %v733_v43  ;;  %927 = vmatpush.msra.mxu2 %v734_v45  ;;  %v743_v40 = vld [vmem:[%s10126_s2 + $0x390] sm:$0xff]  ;;  %s1222_s22 = scalar_lea.vmem [#allocation2], %s4837_s21  ;;  %s623_s3 = sadd.s32 1, %s4977_s3  }
 0x137   : > { %v725_v47 = vld [vmem:[%s10126_s2 + $0x300] sm:$0xff]  ;;  %907 = vmatpush.msra.mxu1 %v861_v44  ;;  %v726_v49 = vld [vmem:[%s10126_s2 + $0x308] sm:$0xff]  ;;  %947 = vmatpush.msra.mxu3 %v862_v46  ;;  %v871_v41 = vld [vmem:[%s10126_s2 + $0x790] sm:$0xff]  ;;  %p620_p0 = scmp.ge.s32.totalorder %s623_s3, 9  }
 0x138   : > { %v853_v48 = vld [vmem:[%s10126_s2 + $0x700] sm:$0xff]  ;;  %v854_v50 = vld [vmem:[%s10126_s2 + $0x708] sm:$0xff]  ;;  %888 = vmatpush.msra.mxu0 %v725_v47  ;;  %928 = vmatpush.msra.mxu2 %v726_v49  ;;  %v744_v42 = vld [vmem:[%s10126_s2 + $0x398] sm:$0xff] }
 0x139   : > { %v717_v51 = vld [vmem:[%s10126_s2 + $0x2c0] sm:$0xff]  ;;  %908 = vmatpush.msra.mxu1 %v853_v48  ;;  %v718_v53 = vld [vmem:[%s10126_s2 + $0x2c8] sm:$0xff]  ;;  %948 = vmatpush.msra.mxu3 %v854_v50  ;;  %v872_v43 = vld [vmem:[%s10126_s2 + $0x798] sm:$0xff] }
 0x13a   : > { %v845_v52 = vld [vmem:[%s10126_s2 + $0x6c0] sm:$0xff]  ;;  %v846_v54 = vld [vmem:[%s10126_s2 + $0x6c8] sm:$0xff]  ;;  %889 = vmatpush.msra.mxu0 %v717_v51  ;;  %929 = vmatpush.msra.mxu2 %v718_v53  ;;  %v735_v44 = vld [vmem:[%s10126_s2 + $0x350] sm:$0xff] }
 0x13b   : > { %v709_v55 = vld [vmem:[%s10126_s2 + $0x280] sm:$0xff]  ;;  %909 = vmatpush.msra.mxu1 %v845_v52  ;;  %v710_v57 = vld [vmem:[%s10126_s2 + $0x288] sm:$0xff]  ;;  %949 = vmatpush.msra.mxu3 %v846_v54  ;;  %v863_v45 = vld [vmem:[%s10126_s2 + $0x750] sm:$0xff] }
 0x13c   : > { %v837_v56 = vld [vmem:[%s10126_s2 + $0x680] sm:$0xff]  ;;  %v838_v58 = vld [vmem:[%s10126_s2 + $0x688] sm:$0xff]  ;;  %890 = vmatpush.msra.mxu0 %v709_v55  ;;  %930 = vmatpush.msra.mxu2 %v710_v57  ;;  %v736_v46 = vld [vmem:[%s10126_s2 + $0x358] sm:$0xff] }
 0x13d   : > { %v701_v59 = vld [vmem:[%s10126_s2 + $0x240] sm:$0xff]  ;;  %910 = vmatpush.msra.mxu1 %v837_v56  ;;  %v702_v62 = vld [vmem:[%s10126_s2 + $0x248] sm:$0xff]  ;;  %950 = vmatpush.msra.mxu3 %v838_v58  ;;  %v864_v47 = vld [vmem:[%s10126_s2 + $0x758] sm:$0xff] }
 0x13e   : > { %v829_v61 = vld [vmem:[%s10126_s2 + $0x640] sm:$0xff]  ;;  %v830_v63 = vld [vmem:[%s10126_s2 + $0x648] sm:$0xff]  ;;  %891 = vmatpush.msra.mxu0 %v701_v59  ;;  %931 = vmatpush.msra.mxu2 %v702_v62  ;;  %v727_v48 = vld [vmem:[%s10126_s2 + $0x310] sm:$0xff] }
 0x13f   : > { %v693_v0 = vld [vmem:[%s10126_s2 + $0x200] sm:$0xff]  ;;  %911 = vmatpush.msra.mxu1 %v829_v61  ;;  %v694_v2 = vld [vmem:[%s10126_s2 + $0x208] sm:$0xff]  ;;  %951 = vmatpush.msra.mxu3 %v830_v63  ;;  %v855_v49 = vld [vmem:[%s10126_s2 + $0x710] sm:$0xff] }
 0x140   : > { %v821_v1 = vld [vmem:[%s10126_s2 + $0x600] sm:$0xff]  ;;  %v822_v4 = vld [vmem:[%s10126_s2 + $0x608] sm:$0xff]  ;;  %892 = vmatpush.msra.mxu0 %v693_v0  ;;  %932 = vmatpush.msra.mxu2 %v694_v2  ;;  %v728_v50 = vld [vmem:[%s10126_s2 + $0x318] sm:$0xff] }
 0x141   : > { %v685_v5 = vld [vmem:[%s10126_s2 + $0x1c0] sm:$0xff]  ;;  %912 = vmatpush.msra.mxu1 %v821_v1  ;;  %v686_v7 = vld [vmem:[%s10126_s2 + $0x1c8] sm:$0xff]  ;;  %952 = vmatpush.msra.mxu3 %v822_v4  ;;  %v856_v51 = vld [vmem:[%s10126_s2 + $0x718] sm:$0xff] }
 0x142   : > { %v813_v6 = vld [vmem:[%s10126_s2 + $0x5c0] sm:$0xff]  ;;  %v814_v8 = vld [vmem:[%s10126_s2 + $0x5c8] sm:$0xff]  ;;  %893 = vmatpush.msra.mxu0 %v685_v5  ;;  %933 = vmatpush.msra.mxu2 %v686_v7  ;;  %v719_v52 = vld [vmem:[%s10126_s2 + $0x2d0] sm:$0xff] }
 0x143   : > { %v677_v10 = vld [vmem:[%s10126_s2 + $0x180] sm:$0xff]  ;;  %913 = vmatpush.msra.mxu1 %v813_v6  ;;  %v678_v15 = vld [vmem:[%s10126_s2 + $0x188] sm:$0xff]  ;;  %953 = vmatpush.msra.mxu3 %v814_v8  ;;  %v847_v53 = vld [vmem:[%s10126_s2 + $0x6d0] sm:$0xff] }
 0x144   : > { %v805_v14 = vld [vmem:[%s10126_s2 + $0x580] sm:$0xff]  ;;  %v806_v16 = vld [vmem:[%s10126_s2 + $0x588] sm:$0xff]  ;;  %894 = vmatpush.msra.mxu0 %v677_v10  ;;  %934 = vmatpush.msra.mxu2 %v678_v15  ;;  %v720_v54 = vld [vmem:[%s10126_s2 + $0x2d8] sm:$0xff] }
 0x145   : > { %v669_v17 = vld [vmem:[%s10126_s2 + $0x140] sm:$0xff]  ;;  %914 = vmatpush.msra.mxu1 %v805_v14  ;;  %v670_v19 = vld [vmem:[%s10126_s2 + $0x148] sm:$0xff]  ;;  %954 = vmatpush.msra.mxu3 %v806_v16  ;;  %v848_v55 = vld [vmem:[%s10126_s2 + $0x6d8] sm:$0xff] }
 0x146   : > { %v797_v18 = vld [vmem:[%s10126_s2 + $0x540] sm:$0xff]  ;;  %v798_v20 = vld [vmem:[%s10126_s2 + $0x548] sm:$0xff]  ;;  %895 = vmatpush.msra.mxu0 %v669_v17  ;;  %935 = vmatpush.msra.mxu2 %v670_v19  ;;  %v711_v56 = vld [vmem:[%s10126_s2 + $0x290] sm:$0xff] }
 0x147   : > { %v661_v21 = vld [vmem:[%s10126_s2 + $0x100] sm:$0xff]  ;;  %915 = vmatpush.msra.mxu1 %v797_v18  ;;  %v662_v23 = vld [vmem:[%s10126_s2 + $0x108] sm:$0xff]  ;;  %955 = vmatpush.msra.mxu3 %v798_v20  ;;  %v839_v57 = vld [vmem:[%s10126_s2 + $0x690] sm:$0xff] }
 0x148   : > { %v789_v22 = vld [vmem:[%s10126_s2 + $0x500] sm:$0xff]  ;;  %v790_v24 = vld [vmem:[%s10126_s2 + $0x508] sm:$0xff]  ;;  %896 = vmatpush.msra.mxu0 %v661_v21  ;;  %936 = vmatpush.msra.mxu2 %v662_v23  ;;  %v712_v58 = vld [vmem:[%s10126_s2 + $0x298] sm:$0xff] }
 0x149   : > { %v653_v25 = vld [vmem:[%s10126_s2 + $0xc0] sm:$0xff]  ;;  %916 = vmatpush.msra.mxu1 %v789_v22  ;;  %v654_v29 = vld [vmem:[%s10126_s2 + $0xc8] sm:$0xff]  ;;  %956 = vmatpush.msra.mxu3 %v790_v24  ;;  %v840_v59 = vld [vmem:[%s10126_s2 + $0x698] sm:$0xff] }
 0x14a   : > { %v781_v26 = vld [vmem:[%s10126_s2 + $0x4c0] sm:$0xff]  ;;  %v782_v12 = vld [vmem:[%s10126_s2 + $0x4c8] sm:$0xff]  ;;  %897 = vmatpush.msra.mxu0 %v653_v25  ;;  %937 = vmatpush.msra.mxu2 %v654_v29  ;;  %v703_v61 = vld [vmem:[%s10126_s2 + $0x250] sm:$0xff] }
 0x14b   : > { %v645_v13 = vld [vmem:[%s10126_s2 + $0x80] sm:$0xff]  ;;  %917 = vmatpush.msra.mxu1 %v781_v26  ;;  %v646_v31 = vld [vmem:[%s10126_s2 + $0x88] sm:$0xff]  ;;  %957 = vmatpush.msra.mxu3 %v782_v12  ;;  %v831_v62 = vld [vmem:[%s10126_s2 + $0x650] sm:$0xff] }
 0x14c   : > { %v773_v30 = vld [vmem:[%s10126_s2 + $0x480] sm:$0xff]  ;;  %v774_v32 = vld [vmem:[%s10126_s2 + $0x488] sm:$0xff]  ;;  %898 = vmatpush.msra.mxu0 %v645_v13  ;;  %938 = vmatpush.msra.mxu2 %v646_v31  ;;  %v704_v63 = vld [vmem:[%s10126_s2 + $0x258] sm:$0xff] }
 0x14d   : > { %v637_v33 = vld [vmem:[%s10126_s2 + $0x40] sm:$0xff]  ;;  %918 = vmatpush.msra.mxu1 %v773_v30  ;;  %v638_v35 = vld [vmem:[%s10126_s2 + $0x48] sm:$0xff]  ;;  %958 = vmatpush.msra.mxu3 %v774_v32  ;;  %v832_v0 = vld [vmem:[%s10126_s2 + $0x658] sm:$0xff] }
 0x14e   : > { %v765_v34 = vld [vmem:[%s10126_s2 + $0x440] sm:$0xff]  ;;  %v766_v36 = vld [vmem:[%s10126_s2 + $0x448] sm:$0xff]  ;;  %899 = vmatpush.msra.mxu0 %v637_v33  ;;  %939 = vmatpush.msra.mxu2 %v638_v35  ;;  %v695_v1 = vld [vmem:[%s10126_s2 + $0x210] sm:$0xff] }
 0x14f   : > { %v629_v60 = vld [vmem:[%s10126_s2] sm:$0xff]  ;;  %919 = vmatpush.msra.mxu1 %v765_v34  ;;  %v630_v38 = vld [vmem:[%s10126_s2 + $0x8] sm:$0xff]  ;;  %959 = vmatpush.msra.mxu3 %v766_v36  ;;  %v823_v2 = vld [vmem:[%s10126_s2 + $0x610] sm:$0xff] }
 0x150   : > { %v757_v37 = vld [vmem:[%s10126_s2 + $0x400] sm:$0xff]  ;;  %v758_v27 = vld [vmem:[%s10126_s2 + $0x408] sm:$0xff]  ;;  %900 = vmatpush.msra.mxu0 %v629_v60  ;;  %940 = vmatpush.msra.mxu2 %v630_v38  ;;  %v696_v4 = vld [vmem:[%s10126_s2 + $0x218] sm:$0xff] }
 0x151   : > { %920 = vmatpush.msra.mxu1 %v757_v37  ;;  %960 = vmatpush.msra.mxu3 %v758_v27  ;;  %v824_v5 = vld [vmem:[%s10126_s2 + $0x618] sm:$0xff]  ;;  %v687_v6 = vld [vmem:[%s10126_s2 + $0x1d0] sm:$0xff] }
 0x152   : > { %965 = vmatpush.msrb.mxu0 %v751_v28  ;;  %1005 = vmatpush.msrb.mxu2 %v752_v11  ;;  %v815_v7 = vld [vmem:[%s10126_s2 + $0x5d0] sm:$0xff]  ;;  %v688_v8 = vld [vmem:[%s10126_s2 + $0x1d8] sm:$0xff] }
 0x153   : > { %985 = vmatpush.msrb.mxu1 %v879_v9  ;;  %1025 = vmatpush.msrb.mxu3 %v880_v39  ;;  %v816_v10 = vld [vmem:[%s10126_s2 + $0x5d8] sm:$0xff]  ;;  %v679_v14 = vld [vmem:[%s10126_s2 + $0x190] sm:$0xff]  ;;  %v753_v39 = vld [vmem:[%s10126_s2 + $0x3e0] sm:$0xff] }
 0x154   : > { %966 = vmatpush.msrb.mxu0 %v743_v40  ;;  %1006 = vmatpush.msrb.mxu2 %v744_v42  ;;  %v807_v15 = vld [vmem:[%s10126_s2 + $0x590] sm:$0xff]  ;;  %v680_v16 = vld [vmem:[%s10126_s2 + $0x198] sm:$0xff]  ;;  %v881_v40 = vld [vmem:[%s10126_s2 + $0x7e0] sm:$0xff] }
 0x155   : > { %986 = vmatpush.msrb.mxu1 %v871_v41  ;;  %1026 = vmatpush.msrb.mxu3 %v872_v43  ;;  %v808_v17 = vld [vmem:[%s10126_s2 + $0x598] sm:$0xff]  ;;  %v671_v18 = vld [vmem:[%s10126_s2 + $0x150] sm:$0xff]  ;;  %v754_v41 = vld [vmem:[%s10126_s2 + $0x3e8] sm:$0xff] }
 0x156   : > { %967 = vmatpush.msrb.mxu0 %v735_v44  ;;  %1007 = vmatpush.msrb.mxu2 %v736_v46  ;;  %v799_v19 = vld [vmem:[%s10126_s2 + $0x550] sm:$0xff]  ;;  %v672_v20 = vld [vmem:[%s10126_s2 + $0x158] sm:$0xff]  ;;  %v882_v42 = vld [vmem:[%s10126_s2 + $0x7e8] sm:$0xff] }
 0x157   : > { %987 = vmatpush.msrb.mxu1 %v863_v45  ;;  %1027 = vmatpush.msrb.mxu3 %v864_v47  ;;  %v800_v21 = vld [vmem:[%s10126_s2 + $0x558] sm:$0xff]  ;;  %v663_v22 = vld [vmem:[%s10126_s2 + $0x110] sm:$0xff]  ;;  %v745_v43 = vld [vmem:[%s10126_s2 + $0x3a0] sm:$0xff] }
 0x158   : > { %968 = vmatpush.msrb.mxu0 %v727_v48  ;;  %1008 = vmatpush.msrb.mxu2 %v728_v50  ;;  %v791_v23 = vld [vmem:[%s10126_s2 + $0x510] sm:$0xff]  ;;  %v664_v24 = vld [vmem:[%s10126_s2 + $0x118] sm:$0xff]  ;;  %v873_v44 = vld [vmem:[%s10126_s2 + $0x7a0] sm:$0xff] }
 0x159   : > { %988 = vmatpush.msrb.mxu1 %v855_v49  ;;  %1028 = vmatpush.msrb.mxu3 %v856_v51  ;;  %v792_v25 = vld [vmem:[%s10126_s2 + $0x518] sm:$0xff]  ;;  %v655_v26 = vld [vmem:[%s10126_s2 + $0xd0] sm:$0xff]  ;;  %v746_v45 = vld [vmem:[%s10126_s2 + $0x3a8] sm:$0xff] }
 0x15a   : > { %969 = vmatpush.msrb.mxu0 %v719_v52  ;;  %1009 = vmatpush.msrb.mxu2 %v720_v54  ;;  %v783_v29 = vld [vmem:[%s10126_s2 + $0x4d0] sm:$0xff]  ;;  %v656_v12 = vld [vmem:[%s10126_s2 + $0xd8] sm:$0xff]  ;;  %v874_v46 = vld [vmem:[%s10126_s2 + $0x7a8] sm:$0xff] }
 0x15b   : > { %989 = vmatpush.msrb.mxu1 %v847_v53  ;;  %1029 = vmatpush.msrb.mxu3 %v848_v55  ;;  %v784_v13 = vld [vmem:[%s10126_s2 + $0x4d8] sm:$0xff]  ;;  %v5972_v30 = vld [vmem:[#allocation5] sm:$0xff]  ;;  %v737_v47 = vld [vmem:[%s10126_s2 + $0x360] sm:$0xff] }
 0x15c   : > { %970 = vmatpush.msrb.mxu0 %v711_v56  ;;  %1010 = vmatpush.msrb.mxu2 %v712_v58  ;;  %v5974_v31 = vld [vmem:[#allocation5 + $0x8] sm:$0xff]  ;;  %v647_v32 = vld [vmem:[%s10126_s2 + $0x90] sm:$0xff]  ;;  %v865_v48 = vld [vmem:[%s10126_s2 + $0x760] sm:$0xff] }
 0x15d   : > { %990 = vmatpush.msrb.mxu1 %v839_v57  ;;  %1030 = vmatpush.msrb.mxu3 %v840_v59  ;;  %v775_v33 = vld [vmem:[%s10126_s2 + $0x490] sm:$0xff]  ;;  %v648_v34 = vld [vmem:[%s10126_s2 + $0x98] sm:$0xff]  ;;  %v738_v49 = vld [vmem:[%s10126_s2 + $0x368] sm:$0xff] }
 0x15e   : > { %971 = vmatpush.msrb.mxu0 %v703_v61  ;;  %1011 = vmatpush.msrb.mxu2 %v704_v63  ;;  %v776_v35 = vld [vmem:[%s10126_s2 + $0x498] sm:$0xff]  ;;  %v639_v36 = vld [vmem:[%s10126_s2 + $0x50] sm:$0xff]  ;;  %v866_v50 = vld [vmem:[%s10126_s2 + $0x768] sm:$0xff] }
 0x15f   : > { %991 = vmatpush.msrb.mxu1 %v831_v62  ;;  %1031 = vmatpush.msrb.mxu3 %v832_v0  ;;  %v767_v60 = vld [vmem:[%s10126_s2 + $0x450] sm:$0xff]  ;;  %v640_v37 = vld [vmem:[%s10126_s2 + $0x58] sm:$0xff]  ;;  %v729_v51 = vld [vmem:[%s10126_s2 + $0x320] sm:$0xff] }
 0x160   : > { %972 = vmatpush.msrb.mxu0 %v695_v1  ;;  %1012 = vmatpush.msrb.mxu2 %v696_v4  ;;  %v768_v38 = vld [vmem:[%s10126_s2 + $0x458] sm:$0xff]  ;;  %v631_v27 = vld [vmem:[%s10126_s2 + $0x10] sm:$0xff]  ;;  %v857_v52 = vld [vmem:[%s10126_s2 + $0x720] sm:$0xff] }
 0x161   : > { %992 = vmatpush.msrb.mxu1 %v823_v2  ;;  %1032 = vmatpush.msrb.mxu3 %v824_v5  ;;  %v759_v28 = vld [vmem:[%s10126_s2 + $0x410] sm:$0xff]  ;;  %v632_v9 = vld [vmem:[%s10126_s2 + $0x18] sm:$0xff]  ;;  %v730_v53 = vld [vmem:[%s10126_s2 + $0x328] sm:$0xff] }
 0x162   : > { %973 = vmatpush.msrb.mxu0 %v687_v6  ;;  %1013 = vmatpush.msrb.mxu2 %v688_v8  ;;  %v760_v11 = vld [vmem:[%s10126_s2 + $0x418] sm:$0xff]  ;;  %v858_v54 = vld [vmem:[%s10126_s2 + $0x728] sm:$0xff]  ;;  %v721_v55 = vld [vmem:[%s10126_s2 + $0x2e0] sm:$0xff] }
 0x163   : > { %993 = vmatpush.msrb.mxu1 %v815_v7  ;;  %1033 = vmatpush.msrb.mxu3 %v816_v10  ;;  %v849_v56 = vld [vmem:[%s10126_s2 + $0x6e0] sm:$0xff]  ;;  %v722_v57 = vld [vmem:[%s10126_s2 + $0x2e8] sm:$0xff] }
 0x164   : > { %974 = vmatpush.msrb.mxu0 %v679_v14  ;;  %1014 = vmatpush.msrb.mxu2 %v680_v16  ;;  %v850_v58 = vld [vmem:[%s10126_s2 + $0x6e8] sm:$0xff]  ;;  %v713_v59 = vld [vmem:[%s10126_s2 + $0x2a0] sm:$0xff] }
 0x165   : > { %994 = vmatpush.msrb.mxu1 %v807_v15  ;;  %1034 = vmatpush.msrb.mxu3 %v808_v17  ;;  %v841_v61 = vld [vmem:[%s10126_s2 + $0x6a0] sm:$0xff]  ;;  %v714_v62 = vld [vmem:[%s10126_s2 + $0x2a8] sm:$0xff] }
 0x166   : > { %975 = vmatpush.msrb.mxu0 %v671_v18  ;;  %1015 = vmatpush.msrb.mxu2 %v672_v20  ;;  %v842_v63 = vld [vmem:[%s10126_s2 + $0x6a8] sm:$0xff]  ;;  %v705_v0 = vld [vmem:[%s10126_s2 + $0x260] sm:$0xff] }
 0x167   : > { %995 = vmatpush.msrb.mxu1 %v799_v19  ;;  %1035 = vmatpush.msrb.mxu3 %v800_v21  ;;  %v833_v1 = vld [vmem:[%s10126_s2 + $0x660] sm:$0xff]  ;;  %v706_v2 = vld [vmem:[%s10126_s2 + $0x268] sm:$0xff] }
 0x168   : > { %976 = vmatpush.msrb.mxu0 %v663_v22  ;;  %1016 = vmatpush.msrb.mxu2 %v664_v24  ;;  %v834_v4 = vld [vmem:[%s10126_s2 + $0x668] sm:$0xff]  ;;  %v697_v5 = vld [vmem:[%s10126_s2 + $0x220] sm:$0xff] }
 0x169   : > { %996 = vmatpush.msrb.mxu1 %v791_v23  ;;  %1036 = vmatpush.msrb.mxu3 %v792_v25  ;;  %v825_v6 = vld [vmem:[%s10126_s2 + $0x620] sm:$0xff]  ;;  %v698_v7 = vld [vmem:[%s10126_s2 + $0x228] sm:$0xff] }
 0x16a   : > { %977 = vmatpush.msrb.mxu0 %v655_v26  ;;  %1017 = vmatpush.msrb.mxu2 %v656_v12  ;;  %v826_v8 = vld [vmem:[%s10126_s2 + $0x628] sm:$0xff]  ;;  %v689_v10 = vld [vmem:[%s10126_s2 + $0x1e0] sm:$0xff] }
 0x16b   : > { %997 = vmatpush.msrb.mxu1 %v783_v29  ;;  %1037 = vmatpush.msrb.mxu3 %v784_v13  ;;  %v817_v14 = vld [vmem:[%s10126_s2 + $0x5e0] sm:$0xff]  ;;  %v690_v15 = vld [vmem:[%s10126_s2 + $0x1e8] sm:$0xff] }
 0x16c   : > { %941 = vmatmul.f32.vlgmr.msra.gmra.mxu2 %v5972_v30  ;;  %961 = vmatmul.f32.vlgmr.msra.gmra.mxu3 %v5974_v31  ;;  %v818_v16 = vld [vmem:[%s10126_s2 + $0x5e8] sm:$0xff]  ;;  %v681_v17 = vld [vmem:[%s10126_s2 + $0x1a0] sm:$0xff] }
 0x16d   : > { %978 = vmatpush.msrb.mxu0 %v647_v32  ;;  %998 = vmatpush.msrb.mxu1 %v775_v33  ;;  %v809_v18 = vld [vmem:[%s10126_s2 + $0x5a0] sm:$0xff]  ;;  %v682_v19 = vld [vmem:[%s10126_s2 + $0x1a8] sm:$0xff] }
 0x16e   : > { %1018 = vmatpush.msrb.mxu2 %v648_v34  ;;  %1038 = vmatpush.msrb.mxu3 %v776_v35  ;;  %v810_v20 = vld [vmem:[%s10126_s2 + $0x5a8] sm:$0xff]  ;;  %v673_v21 = vld [vmem:[%s10126_s2 + $0x160] sm:$0xff] }
 0x16f   : > { %979 = vmatpush.msrb.mxu0 %v639_v36  ;;  %999 = vmatpush.msrb.mxu1 %v767_v60  ;;  %v801_v22 = vld [vmem:[%s10126_s2 + $0x560] sm:$0xff]  ;;  %v674_v23 = vld [vmem:[%s10126_s2 + $0x168] sm:$0xff] }
 0x170   : > { %1019 = vmatpush.msrb.mxu2 %v640_v37  ;;  %1039 = vmatpush.msrb.mxu3 %v768_v38  ;;  %v802_v24 = vld [vmem:[%s10126_s2 + $0x568] sm:$0xff]  ;;  %v665_v25 = vld [vmem:[%s10126_s2 + $0x120] sm:$0xff] }
 0x171   : > { %901 = vmatmul.f32.vlgmr.msra.gmra.mxu0 %v5972_v30  ;;  %921 = vmatmul.f32.vlgmr.msra.gmra.mxu1 %v5974_v31  ;;  %v793_v26 = vld [vmem:[%s10126_s2 + $0x520] sm:$0xff]  ;;  %v666_v29 = vld [vmem:[%s10126_s2 + $0x128] sm:$0xff] }
 0x172   : > { %980 = vmatpush.msrb.mxu0 %v631_v27  ;;  %1000 = vmatpush.msrb.mxu1 %v759_v28  ;;  %v794_v12 = vld [vmem:[%s10126_s2 + $0x528] sm:$0xff]  ;;  %v657_v13 = vld [vmem:[%s10126_s2 + $0xe0] sm:$0xff] }
 0x173   : > { %1020 = vmatpush.msrb.mxu2 %v632_v9  ;;  %1040 = vmatpush.msrb.mxu3 %v760_v11  ;;  %v785_v32 = vld [vmem:[%s10126_s2 + $0x4e0] sm:$0xff]  ;;  %v658_v33 = vld [vmem:[%s10126_s2 + $0xe8] sm:$0xff] }
 0x174   : > { %1045 = vmatpush.msra.mxu0 %v753_v39  ;;  %1065 = vmatpush.msra.mxu1 %v881_v40  ;;  %v786_v34 = vld [vmem:[%s10126_s2 + $0x4e8] sm:$0xff]  ;;  %v649_v35 = vld [vmem:[%s10126_s2 + $0xa0] sm:$0xff] }
 0x175   : > { %1085 = vmatpush.msra.mxu2 %v754_v41  ;;  %1105 = vmatpush.msra.mxu3 %v882_v42  ;;  %v777_v36 = vld [vmem:[%s10126_s2 + $0x4a0] sm:$0xff]  ;;  %v650_v60 = vld [vmem:[%s10126_s2 + $0xa8] sm:$0xff]  ;;  %v755_v42 = vld [vmem:[%s10126_s2 + $0x3f0] sm:$0xff] }
 0x176   : > { %1046 = vmatpush.msra.mxu0 %v745_v43  ;;  %1066 = vmatpush.msra.mxu1 %v873_v44  ;;  %v778_v37 = vld [vmem:[%s10126_s2 + $0x4a8] sm:$0xff]  ;;  %v641_v38 = vld [vmem:[%s10126_s2 + $0x60] sm:$0xff]  ;;  %v883_v43 = vld [vmem:[%s10126_s2 + $0x7f0] sm:$0xff] }
 0x177   : > { %1086 = vmatpush.msra.mxu2 %v746_v45  ;;  %1106 = vmatpush.msra.mxu3 %v874_v46  ;;  %v769_v27 = vld [vmem:[%s10126_s2 + $0x460] sm:$0xff]  ;;  %v642_v28 = vld [vmem:[%s10126_s2 + $0x68] sm:$0xff]  ;;  %v756_v44 = vld [vmem:[%s10126_s2 + $0x3f8] sm:$0xff] }
 0x178   : > { %1047 = vmatpush.msra.mxu0 %v737_v47  ;;  %1067 = vmatpush.msra.mxu1 %v865_v48  ;;  %v770_v9 = vld [vmem:[%s10126_s2 + $0x468] sm:$0xff]  ;;  %v633_v11 = vld [vmem:[%s10126_s2 + $0x20] sm:$0xff]  ;;  %v884_v45 = vld [vmem:[%s10126_s2 + $0x7f8] sm:$0xff] }
 0x179   : > { %1087 = vmatpush.msra.mxu2 %v738_v49  ;;  %1107 = vmatpush.msra.mxu3 %v866_v50  ;;  %v761_v39 = vld [vmem:[%s10126_s2 + $0x420] sm:$0xff]  ;;  %v634_v40 = vld [vmem:[%s10126_s2 + $0x28] sm:$0xff]  ;;  %v747_v46 = vld [vmem:[%s10126_s2 + $0x3b0] sm:$0xff] }
 0x17a   : > { %1021 = vmatmul.f32.vlgmr.msrb.gmra.mxu2 %v5972_v30  ;;  %1041 = vmatmul.f32.vlgmr.msrb.gmra.mxu3 %v5974_v31  ;;  %v762_v41 = vld [vmem:[%s10126_s2 + $0x428] sm:$0xff]  ;;  %v875_v47 = vld [vmem:[%s10126_s2 + $0x7b0] sm:$0xff]  ;;  %v748_v48 = vld [vmem:[%s10126_s2 + $0x3b8] sm:$0xff] }
 0x17b   : > { %1048 = vmatpush.msra.mxu0 %v729_v51  ;;  %1068 = vmatpush.msra.mxu1 %v857_v52  ;;  %v876_v49 = vld [vmem:[%s10126_s2 + $0x7b8] sm:$0xff]  ;;  %v739_v50 = vld [vmem:[%s10126_s2 + $0x370] sm:$0xff] }
 0x17c   : > { %1088 = vmatpush.msra.mxu2 %v730_v53  ;;  %1108 = vmatpush.msra.mxu3 %v858_v54  ;;  %v867_v51 = vld [vmem:[%s10126_s2 + $0x770] sm:$0xff]  ;;  %v740_v52 = vld [vmem:[%s10126_s2 + $0x378] sm:$0xff] }
 0x17d   : > { %981 = vmatmul.f32.vlgmr.msrb.gmra.mxu0 %v5972_v30  ;;  %1001 = vmatmul.f32.vlgmr.msrb.gmra.mxu1 %v5974_v31  ;;  %v868_v53 = vld [vmem:[%s10126_s2 + $0x778] sm:$0xff]  ;;  %v731_v54 = vld [vmem:[%s10126_s2 + $0x330] sm:$0xff] }
 0x17e   : > { %1049 = vmatpush.msra.mxu0 %v721_v55  ;;  %1069 = vmatpush.msra.mxu1 %v849_v56  ;;  %v859_v55 = vld [vmem:[%s10126_s2 + $0x730] sm:$0xff]  ;;  %v732_v56 = vld [vmem:[%s10126_s2 + $0x338] sm:$0xff] }
 0x17f   : > { %1089 = vmatpush.msra.mxu2 %v722_v57  ;;  %1109 = vmatpush.msra.mxu3 %v850_v58  ;;  %v860_v57 = vld [vmem:[%s10126_s2 + $0x738] sm:$0xff]  ;;  %v723_v58 = vld [vmem:[%s10126_s2 + $0x2f0] sm:$0xff] }
 0x180   : > { %1050 = vmatpush.msra.mxu0 %v713_v59  ;;  %1070 = vmatpush.msra.mxu1 %v841_v61  ;;  %v851_v59 = vld [vmem:[%s10126_s2 + $0x6f0] sm:$0xff]  ;;  %v724_v61 = vld [vmem:[%s10126_s2 + $0x2f8] sm:$0xff] }
 0x181   : > { %1090 = vmatpush.msra.mxu2 %v714_v62  ;;  %1110 = vmatpush.msra.mxu3 %v842_v63  ;;  %v852_v62 = vld [vmem:[%s10126_s2 + $0x6f8] sm:$0xff]  ;;  %v715_v63 = vld [vmem:[%s10126_s2 + $0x2b0] sm:$0xff] }
 0x182   : > { %1051 = vmatpush.msra.mxu0 %v705_v0  ;;  %1071 = vmatpush.msra.mxu1 %v833_v1  ;;  %v843_v0 = vld [vmem:[%s10126_s2 + $0x6b0] sm:$0xff]  ;;  %v716_v1 = vld [vmem:[%s10126_s2 + $0x2b8] sm:$0xff] }
 0x183   : > { %1091 = vmatpush.msra.mxu2 %v706_v2  ;;  %1111 = vmatpush.msra.mxu3 %v834_v4  ;;  %v844_v2 = vld [vmem:[%s10126_s2 + $0x6b8] sm:$0xff]  ;;  %v707_v4 = vld [vmem:[%s10126_s2 + $0x270] sm:$0xff] }
 0x184   : > { %1052 = vmatpush.msra.mxu0 %v697_v5  ;;  %1072 = vmatpush.msra.mxu1 %v825_v6  ;;  %v835_v5 = vld [vmem:[%s10126_s2 + $0x670] sm:$0xff]  ;;  %v708_v6 = vld [vmem:[%s10126_s2 + $0x278] sm:$0xff] }
 0x185   : > { %1092 = vmatpush.msra.mxu2 %v698_v7  ;;  %1112 = vmatpush.msra.mxu3 %v826_v8  ;;  %v836_v7 = vld [vmem:[%s10126_s2 + $0x678] sm:$0xff]  ;;  %v699_v8 = vld [vmem:[%s10126_s2 + $0x230] sm:$0xff] }
 0x186   : > { %1053 = vmatpush.msra.mxu0 %v689_v10  ;;  %1073 = vmatpush.msra.mxu1 %v817_v14  ;;  %v827_v10 = vld [vmem:[%s10126_s2 + $0x630] sm:$0xff]  ;;  %v700_v14 = vld [vmem:[%s10126_s2 + $0x238] sm:$0xff] }
 0x187   : > { %1093 = vmatpush.msra.mxu2 %v690_v15  ;;  %1113 = vmatpush.msra.mxu3 %v818_v16  ;;  %v828_v15 = vld [vmem:[%s10126_s2 + $0x638] sm:$0xff]  ;;  %v691_v16 = vld [vmem:[%s10126_s2 + $0x1f0] sm:$0xff] }
 0x188   : > { %1054 = vmatpush.msra.mxu0 %v681_v17  ;;  %1074 = vmatpush.msra.mxu1 %v809_v18  ;;  %v819_v17 = vld [vmem:[%s10126_s2 + $0x5f0] sm:$0xff]  ;;  %v692_v18 = vld [vmem:[%s10126_s2 + $0x1f8] sm:$0xff] }
 0x189   : > { %1094 = vmatpush.msra.mxu2 %v682_v19  ;;  %1114 = vmatpush.msra.mxu3 %v810_v20  ;;  %v820_v19 = vld [vmem:[%s10126_s2 + $0x5f8] sm:$0xff]  ;;  %v683_v20 = vld [vmem:[%s10126_s2 + $0x1b0] sm:$0xff] }
 0x18a   : > { %1055 = vmatpush.msra.mxu0 %v673_v21  ;;  %1075 = vmatpush.msra.mxu1 %v801_v22  ;;  %v811_v21 = vld [vmem:[%s10126_s2 + $0x5b0] sm:$0xff]  ;;  %v684_v22 = vld [vmem:[%s10126_s2 + $0x1b8] sm:$0xff] }
 0x18b   : > { %1095 = vmatpush.msra.mxu2 %v674_v23  ;;  %1115 = vmatpush.msra.mxu3 %v802_v24  ;;  %v812_v23 = vld [vmem:[%s10126_s2 + $0x5b8] sm:$0xff]  ;;  %v675_v24 = vld [vmem:[%s10126_s2 + $0x170] sm:$0xff] }
 0x18c   : > { %1056 = vmatpush.msra.mxu0 %v665_v25  ;;  %1076 = vmatpush.msra.mxu1 %v793_v26  ;;  %v803_v25 = vld [vmem:[%s10126_s2 + $0x570] sm:$0xff]  ;;  %v676_v26 = vld [vmem:[%s10126_s2 + $0x178] sm:$0xff] }
 0x18d   : > { %1096 = vmatpush.msra.mxu2 %v666_v29  ;;  %1116 = vmatpush.msra.mxu3 %v794_v12  ;;  %v804_v29 = vld [vmem:[%s10126_s2 + $0x578] sm:$0xff]  ;;  %v667_v12 = vld [vmem:[%s10126_s2 + $0x130] sm:$0xff] }
 0x18e   : > { %1057 = vmatpush.msra.mxu0 %v657_v13  ;;  %1077 = vmatpush.msra.mxu1 %v785_v32  ;;  %v795_v13 = vld [vmem:[%s10126_s2 + $0x530] sm:$0xff]  ;;  %v668_v32 = vld [vmem:[%s10126_s2 + $0x138] sm:$0xff] }
 0x18f   : > { %1097 = vmatpush.msra.mxu2 %v658_v33  ;;  %1117 = vmatpush.msra.mxu3 %v786_v34  ;;  %v796_v33 = vld [vmem:[%s10126_s2 + $0x538] sm:$0xff]  ;;  %v659_v34 = vld [vmem:[%s10126_s2 + $0xf0] sm:$0xff] }
 0x190   : > { %1058 = vmatpush.msra.mxu0 %v649_v35  ;;  %1078 = vmatpush.msra.mxu1 %v777_v36  ;;  %v787_v35 = vld [vmem:[%s10126_s2 + $0x4f0] sm:$0xff]  ;;  %v660_v36 = vld [vmem:[%s10126_s2 + $0xf8] sm:$0xff] }
 0x191   : > { %1098 = vmatpush.msra.mxu2 %v650_v60  ;;  %1118 = vmatpush.msra.mxu3 %v778_v37  ;;  %v788_v60 = vld [vmem:[%s10126_s2 + $0x4f8] sm:$0xff]  ;;  %v651_v37 = vld [vmem:[%s10126_s2 + $0xb0] sm:$0xff] }
 0x192   : > { %1059 = vmatpush.msra.mxu0 %v641_v38  ;;  %1079 = vmatpush.msra.mxu1 %v769_v27  ;;  %v779_v38 = vld [vmem:[%s10126_s2 + $0x4b0] sm:$0xff]  ;;  %v652_v27 = vld [vmem:[%s10126_s2 + $0xb8] sm:$0xff] }
 0x193   : > { %1099 = vmatpush.msra.mxu2 %v642_v28  ;;  %1119 = vmatpush.msra.mxu3 %v770_v9  ;;  %v780_v28 = vld [vmem:[%s10126_s2 + $0x4b8] sm:$0xff]  ;;  %v643_v9 = vld [vmem:[%s10126_s2 + $0x70] sm:$0xff] }
 0x194   : > { %1060 = vmatpush.msra.mxu0 %v633_v11  ;;  %1080 = vmatpush.msra.mxu1 %v761_v39  ;;  %v771_v11 = vld [vmem:[%s10126_s2 + $0x470] sm:$0xff]  ;;  %v644_v39 = vld [vmem:[%s10126_s2 + $0x78] sm:$0xff] }
 0x195   : > { %1100 = vmatpush.msra.mxu2 %v634_v40  ;;  %1120 = vmatpush.msra.mxu3 %v762_v41  ;;  %v772_v40 = vld [vmem:[%s10126_s2 + $0x478] sm:$0xff]  ;;  %v635_v41 = vld [vmem:[%s10126_s2 + $0x30] sm:$0xff] }
 0x196   : > { %1125 = vmatpush.msrb.mxu0 %v755_v42  ;;  %1145 = vmatpush.msrb.mxu1 %v883_v43  ;;  %v763_v42 = vld [vmem:[%s10126_s2 + $0x430] sm:$0xff]  ;;  %v636_v43 = vld [vmem:[%s10126_s2 + $0x38] sm:$0xff] }
 0x197   : > { %1165 = vmatpush.msrb.mxu2 %v756_v44  ;;  %1185 = vmatpush.msrb.mxu3 %v884_v45  ;;  %v764_v44 = vld [vmem:[%s10126_s2 + $0x438] sm:$0xff] }
 0x198   : > { %1126 = vmatpush.msrb.mxu0 %v747_v46  ;;  %1146 = vmatpush.msrb.mxu1 %v875_v47  ;;  %v1210_v47 = vld [vmem:[%s1209_s16] sm:$0xff] }
 0x199   : > { %1166 = vmatpush.msrb.mxu2 %v748_v48  ;;  %1186 = vmatpush.msrb.mxu3 %v876_v49 }
 0x19a   : > { %1127 = vmatpush.msrb.mxu0 %v739_v50  ;;  %1147 = vmatpush.msrb.mxu1 %v867_v51  ;;  %v1211_v51 = vld [vmem:[%s1209_s16 + $0x8] sm:$0xff] }
 0x19b   : > { %1167 = vmatpush.msrb.mxu2 %v740_v52  ;;  %1187 = vmatpush.msrb.mxu3 %v868_v53 }
 0x19c   : > { %1128 = vmatpush.msrb.mxu0 %v731_v54  ;;  %1148 = vmatpush.msrb.mxu1 %v859_v55 }
 0x19d   : > { %1168 = vmatpush.msrb.mxu2 %v732_v56  ;;  %1188 = vmatpush.msrb.mxu3 %v860_v57  ;;  %v1212_v57 = vld [vmem:[%s1209_s16 + $0x10] sm:$0xff] }
 0x19e   : > { %1129 = vmatpush.msrb.mxu0 %v723_v58  ;;  %1149 = vmatpush.msrb.mxu1 %v851_v59 }
 0x19f   : > { %1169 = vmatpush.msrb.mxu2 %v724_v61  ;;  %1189 = vmatpush.msrb.mxu3 %v852_v62 }
 0x1a0   : > { %1130 = vmatpush.msrb.mxu0 %v715_v63  ;;  %1150 = vmatpush.msrb.mxu1 %v843_v0 }
 0x1a1   : > { %1170 = vmatpush.msrb.mxu2 %v716_v1  ;;  %1190 = vmatpush.msrb.mxu3 %v844_v2  ;;  %v1213_v2 = vld [vmem:[%s1209_s16 + $0x18] sm:$0xff] }
 0x1a2   : > { %1131 = vmatpush.msrb.mxu0 %v707_v4  ;;  %1151 = vmatpush.msrb.mxu1 %v835_v5 }
 0x1a3   : > { %1171 = vmatpush.msrb.mxu2 %v708_v6  ;;  %1191 = vmatpush.msrb.mxu3 %v836_v7 }
 0x1a4   : > { %1132 = vmatpush.msrb.mxu0 %v699_v8  ;;  %1152 = vmatpush.msrb.mxu1 %v827_v10  ;;  %v1231_v8 = vld [vmem:[#allocation6 + $0x8] sm:$0xff] }
 0x1a5   : > { %1172 = vmatpush.msrb.mxu2 %v700_v14  ;;  %1192 = vmatpush.msrb.mxu3 %v828_v15 }
 0x1a6   : > { %1133 = vmatpush.msrb.mxu0 %v691_v16  ;;  %1153 = vmatpush.msrb.mxu1 %v819_v17 }
 0x1a7   : > { %1173 = vmatpush.msrb.mxu2 %v692_v18  ;;  %1193 = vmatpush.msrb.mxu3 %v820_v19 }
 0x1a8   : > { %1134 = vmatpush.msrb.mxu0 %v683_v20  ;;  %1154 = vmatpush.msrb.mxu1 %v811_v21 }
 0x1a9   : > { %1174 = vmatpush.msrb.mxu2 %v684_v22  ;;  %1194 = vmatpush.msrb.mxu3 %v812_v23 }
 0x1aa   : > { %1101 = vmatmul.f32.vlgmr.msra.gmra.mxu2 %v5972_v30  ;;  %1121 = vmatmul.f32.vlgmr.msra.gmra.mxu3 %v5974_v31 }
 0x1ab   : > { %1135 = vmatpush.msrb.mxu0 %v675_v24  ;;  %1155 = vmatpush.msrb.mxu1 %v803_v25 }
 0x1ac   : > { %1175 = vmatpush.msrb.mxu2 %v676_v26  ;;  %1195 = vmatpush.msrb.mxu3 %v804_v29  ;;  %v1223_v26 = vld [vmem:[%s1222_s22 + $0x20] sm:$0xff] }
 0x1ad   : > { %1136 = vmatpush.msrb.mxu0 %v667_v12  ;;  %1156 = vmatpush.msrb.mxu1 %v795_v13 }
 0x1ae   : > { %1176 = vmatpush.msrb.mxu2 %v668_v32  ;;  %1196 = vmatpush.msrb.mxu3 %v796_v33  ;;  %v1224_v32 = vld [vmem:[%s1222_s22 + $0x28] sm:$0xff] }
 0x1af   : > { %1061 = vmatmul.f32.vlgmr.msra.gmra.mxu0 %v5972_v30  ;;  %1081 = vmatmul.f32.vlgmr.msra.gmra.mxu1 %v5974_v31 }
 0x1b0   : > { %1137 = vmatpush.msrb.mxu0 %v659_v34  ;;  %1157 = vmatpush.msrb.mxu1 %v787_v35 }
 0x1b1   : > { %1177 = vmatpush.msrb.mxu2 %v660_v36  ;;  %1197 = vmatpush.msrb.mxu3 %v788_v60 }
 0x1b2   : > { %1138 = vmatpush.msrb.mxu0 %v651_v37  ;;  %1158 = vmatpush.msrb.mxu1 %v779_v38 }
 0x1b3   : > { %1178 = vmatpush.msrb.mxu2 %v652_v27  ;;  %1198 = vmatpush.msrb.mxu3 %v780_v28  ;;  %v1225_v27 = vld [vmem:[%s1222_s22 + $0x30] sm:$0xff] }
 0x1b4   : > { %1139 = vmatpush.msrb.mxu0 %v643_v9  ;;  %1159 = vmatpush.msrb.mxu1 %v771_v11 }
 0x1b5   : > { %1179 = vmatpush.msrb.mxu2 %v644_v39  ;;  %1199 = vmatpush.msrb.mxu3 %v772_v40 }
 0x1b6   : > { %1140 = vmatpush.msrb.mxu0 %v635_v41  ;;  %1160 = vmatpush.msrb.mxu1 %v763_v42  ;;  %v1232_v42 = vld [vmem:[#allocation6] sm:$0xff] }
 0x1b7   : > { %1180 = vmatpush.msrb.mxu2 %v636_v43  ;;  %1200 = vmatpush.msrb.mxu3 %v764_v44 }
 0x1b8   : > { %1141 = vmatmul.f32.vlgmr.msrb.gmra.mxu0 %v5972_v30  ;;  %1161 = vmatmul.f32.vlgmr.msrb.gmra.mxu1 %v5974_v31 }
 0x1b9   : > { %1181 = vmatmul.f32.vlgmr.msrb.gmra.mxu2 %v5972_v30  ;;  %1201 = vmatmul.f32.vlgmr.msrb.gmra.mxu3 %v5974_v31 }
 0x1ee   : > { %v902_v45 = vpop.f32.mrf.mxu0  ;;  %v922_v46 = vpop.f32.mrf.mxu1 }
 0x1ef   : > { %v923_v48 = vadd.f32 %v922_v46, %v902_v45  ;;  %v942_v49 = vpop.f32.mrf.mxu2  ;;  %v962_v50 = vpop.f32.mrf.mxu3  ;;  %v1226_v45 = vld [vmem:[%s1222_s22 + $0x38] sm:$0xff] }
 0x1f0   : > { %v963_v52 = vadd.f32 %v962_v50, %v942_v49 }
 0x1f1   : > { %v1214_v53 = vadd.f32 %v1210_v47, %v923_v48 }
 0x1f2   : > { %v1215_v54 = vadd.f32 %v1211_v51, %v963_v52 }
 0x1f3   : > { %v1233_v55 = vmul.f32 0.5, %v1214_v53 }
 0x1f4   : > { %v1237_v56 = vmul.f32 0.5, %v1215_v54 }
 0x1f5   : > { %4867 = vtanh.f32 %v1233_v55 }
 0x1f6   : > { %4869 = vtanh.f32 %v1237_v56 }
 0x1fa   : > { %v982_v30 = vpop.f32.mrf.mxu0  ;;  %v1002_v31 = vpop.f32.mrf.mxu1 }
 0x1fb   : > { %v4868_v58 = vpop.eup %4867  ;;  %v1003_v59 = vadd.f32 %v1002_v31, %v982_v30 }
 0x1fc   : > { %v4870_v61 = vpop.eup %4869  ;;  %v1235_v4 = vadd.f32 1.0, %v4868_v58  ;;  %v1416_v58 = vld [vmem:[%s10127_s4 + $0x3c8] sm:$0xff] (%p620_p0) }
 0x1fd   : > { %v1239_v62 = vadd.f32 1.0, %v4870_v61  ;;  %v1216_v63 = vadd.f32 %v1212_v57, %v1003_v59  ;;  %v1022_v0 = vpop.f32.mrf.mxu2  ;;  %v1042_v1 = vpop.f32.mrf.mxu3  ;;  %v1408_v59 = vld [vmem:[%s10127_s4 + $0x388] sm:$0xff] (%p620_p0)  ;;  %1657 = vmatpush.msra.mxu2 (%p620_p0), %v1416_v58  ;;  %v1418_v58 = vld [vmem:[%s10127_s4 + $0x3d8] sm:$0xff] (%p620_p0) }
 0x1fe   : > { %v1043_v5 = vadd.f32 %v1042_v1, %v1022_v0  ;;  %v1236_v10 = vmul.f32 0.5, %v1235_v4  ;;  %v1544_v61 = vld [vmem:[%s10127_s4 + $0x7c8] sm:$0xff] (%p620_p0) }
 0x1ff   : > { %4871 = vtanh.f32 %v1216_v63  ;;  %v1240_v6 = vmul.f32 0.5, %v1239_v62  ;;  %1701 = vmatpush.msra.mxu3 (%p620_p0), %v1544_v61  ;;  %v1536_v62 = vld [vmem:[%s10127_s4 + $0x788] sm:$0xff] (%p620_p0)  ;;  %v1415_v63 = vld [vmem:[%s10127_s4 + $0x3c0] sm:$0xff] (%p620_p0)  ;;  %1658 = vmatpush.msra.mxu2 (%p620_p0), %v1408_v59  ;;  %v1546_v59 = vld [vmem:[%s10127_s4 + $0x7d8] sm:$0xff] (%p620_p0) }
 0x200   : > { %v1217_v7 = vadd.f32 %v1213_v2, %v1043_v5  ;;  %v1400_v0 = vld [vmem:[%s10127_s4 + $0x348] sm:$0xff] (%p620_p0)  ;;  %1569 = vmatpush.msra.mxu0 (%p620_p0), %v1415_v63  ;;  %v1407_v2 = vld [vmem:[%s10127_s4 + $0x380] sm:$0xff] (%p620_p0)  ;;  %v1410_v63 = vld [vmem:[%s10127_s4 + $0x398] sm:$0xff] (%p620_p0) }
 0x201   : > { %v1246_v15 = vmul.f32 %v1240_v6, %v1231_v8  ;;  %v1528_v1 = vld [vmem:[%s10127_s4 + $0x748] sm:$0xff] (%p620_p0)  ;;  %1702 = vmatpush.msra.mxu3 (%p620_p0), %v1536_v62  ;;  %v1543_v5 = vld [vmem:[%s10127_s4 + $0x7c0] sm:$0xff] (%p620_p0)  ;;  %1659 = vmatpush.msra.mxu2 (%p620_p0), %v1400_v0  ;;  %v1417_v0 = vld [vmem:[%s10127_s4 + $0x3d0] sm:$0xff] (%p620_p0) }
 0x202   : > { %v1242_v14 = vmul.f32 0.5, %v1217_v7  ;;  %v1392_v4 = vld [vmem:[%s10127_s4 + $0x308] sm:$0xff] (%p620_p0)  ;;  %1570 = vmatpush.msra.mxu0 (%p620_p0), %v1407_v2  ;;  %1613 = vmatpush.msra.mxu1 (%p620_p0), %v1543_v5  ;;  %v1399_v7 = vld [vmem:[%s10127_s4 + $0x340] sm:$0xff] (%p620_p0)  ;;  %v1538_v2 = vld [vmem:[%s10127_s4 + $0x798] sm:$0xff] (%p620_p0) }
 0x203   :  { %v1520_v6 = vld [vmem:[%s10127_s4 + $0x708] sm:$0xff] (%p620_p0)  ;;  %v1535_v8 = vld [vmem:[%s10127_s4 + $0x780] sm:$0xff] (%p620_p0)  ;;  %1703 = vmatpush.msra.mxu3 (%p620_p0), %v1528_v1  ;;  %1660 = vmatpush.msra.mxu2 (%p620_p0), %v1392_v4  ;;  %v1545_v4 = vld [vmem:[%s10127_s4 + $0x7d0] sm:$0xff] (%p620_p0) }
 0x204   : > { %4873 = vtanh.f32 %v1242_v14  ;;  %v1527_v14 = vld [vmem:[%s10127_s4 + $0x740] sm:$0xff] (%p620_p0)  ;;  %1571 = vmatpush.msra.mxu0 (%p620_p0), %v1399_v7  ;;  %1614 = vmatpush.msra.mxu1 (%p620_p0), %v1535_v8  ;;  %v1402_v5 = vld [vmem:[%s10127_s4 + $0x358] sm:$0xff] (%p620_p0) }
 0x205   : > { %v4872_v16 = vpop.eup %4871  ;;  %1704 = vmatpush.msra.mxu3 (%p620_p0), %v1520_v6  ;;  %v1295_v61 = vld [vmem:[%s10127_s4] sm:$0xff] (%p620_p0)  ;;  %v1409_v6 = vld [vmem:[%s10127_s4 + $0x390] sm:$0xff] (%p620_p0)  ;;  %v1530_v7 = vld [vmem:[%s10127_s4 + $0x758] sm:$0xff] (%p620_p0) }
 0x206   : > { %v1247_v17 = vmul.f32 %v4872_v16, %v1236_v10  ;;  %v1391_v10 = vld [vmem:[%s10127_s4 + $0x300] sm:$0xff] (%p620_p0)  ;;  %v1512_v16 = vld [vmem:[%s10127_s4 + $0x6c8] sm:$0xff] (%p620_p0)  ;;  %1615 = vmatpush.msra.mxu1 (%p620_p0), %v1527_v14  ;;  %v1537_v14 = vld [vmem:[%s10127_s4 + $0x790] sm:$0xff] (%p620_p0) }
 0x207   :  { %1572 = vmatpush.msra.mxu0 (%p620_p0), %v1391_v10  ;;  %1705 = vmatpush.msra.mxu3 (%p620_p0), %v1512_v16  ;;  %v1431_v62 = vld [vmem:[%s10127_s4 + $0x440] sm:$0xff] (%p620_p0)  ;;  %v1401_v16 = vld [vmem:[%s10127_s4 + $0x350] sm:$0xff] (%p620_p0) }
 0x208   : > { %v1248_v18 = vadd.f32 %v1247_v17, %v1246_v15  ;;  %v1384_v15 = vld [vmem:[%s10127_s4 + $0x2c8] sm:$0xff] (%p620_p0)  ;;  %v1383_v17 = vld [vmem:[%s10127_s4 + $0x2c0] sm:$0xff] (%p620_p0) }
 0x209   :  { %1661 = vmatpush.msra.mxu2 (%p620_p0), %v1384_v15  ;;  %1573 = vmatpush.msra.mxu0 (%p620_p0), %v1383_v17  ;;  %v1423_v1 = vld [vmem:[%s10127_s4 + $0x400] sm:$0xff] (%p620_p0)  ;;  %v1394_v15 = vld [vmem:[%s10127_s4 + $0x318] sm:$0xff] (%p620_p0) }
 0x20a   : > { %v4874_v19 = vpop.eup %4873  ;;  %4875 = vtanh.f32 %v1248_v18  ;;  %1271 = vst [vmem:[#allocation6 + $0x8] sm:$0xff] %v1248_v18  ;;  %v1519_v18 = vld [vmem:[%s10127_s4 + $0x700] sm:$0xff] (%p620_p0)  ;;  %v1522_v17 = vld [vmem:[%s10127_s4 + $0x718] sm:$0xff] (%p620_p0) }
 0x20b   : > { %v1244_v20 = vadd.f32 1.0, %v4874_v19  ;;  %2347 = vst [vmem:[#allocation6 + $0x8] sm:$0xff] (%p620_p0), %v4987_v3  ;;  %v1376_v19 = vld [vmem:[%s10127_s4 + $0x288] sm:$0xff] (%p620_p0)  ;;  %1616 = vmatpush.msra.mxu1 (%p620_p0), %v1519_v18  ;;  %v1529_v18 = vld [vmem:[%s10127_s4 + $0x750] sm:$0xff] (%p620_p0) }
 0x20c   :  { %1662 = vmatpush.msra.mxu2 (%p620_p0), %v1376_v19  ;;  %v1386_v19 = vld [vmem:[%s10127_s4 + $0x2d8] sm:$0xff] (%p620_p0) }
 0x20d   : > { %v1245_v21 = vmul.f32 0.5, %v1244_v20  ;;  %v1504_v20 = vld [vmem:[%s10127_s4 + $0x688] sm:$0xff] (%p620_p0) }
 0x20e   :  { %1706 = vmatpush.msra.mxu3 (%p620_p0), %v1504_v20  ;;  %v1393_v20 = vld [vmem:[%s10127_s4 + $0x310] sm:$0xff] (%p620_p0) }
 0x210   : > { %v4876_v22 = vpop.eup %4875 }
 0x211   : > { %v1250_v23 = vmul.f32 %v4876_v22, %v1245_v21  ;;  %v1375_v21 = vld [vmem:[%s10127_s4 + $0x280] sm:$0xff] (%p620_p0) }
 0x212   :  { %v1511_v22 = vld [vmem:[%s10127_s4 + $0x6c0] sm:$0xff] (%p620_p0)  ;;  %1574 = vmatpush.msra.mxu0 (%p620_p0), %v1375_v21  ;;  %v1514_v21 = vld [vmem:[%s10127_s4 + $0x6d8] sm:$0xff] (%p620_p0) }
 0x213   : > { %1269 = vst [vmem:[#allocation5] sm:$0xff] %v1250_v23  ;;  %1617 = vmatpush.msra.mxu1 (%p620_p0), %v1511_v22  ;;  %v1521_v22 = vld [vmem:[%s10127_s4 + $0x710] sm:$0xff] (%p620_p0) }
 0x214   : > { %1274 = vst [vmem:[%s1273_s17] sm:$0xff] %v1250_v23  ;;  %v1368_v23 = vld [vmem:[%s10127_s4 + $0x248] sm:$0xff] (%p620_p0) }
 0x215   :  { %2345 = vst [vmem:[#allocation5] sm:$0xff] (%p620_p0), %v4987_v3  ;;  %1663 = vmatpush.msra.mxu2 (%p620_p0), %v1368_v23  ;;  %v1378_v23 = vld [vmem:[%s10127_s4 + $0x298] sm:$0xff] (%p620_p0) }
 0x21b   :  { %v6656_v8 = vld [vmem:[#allocation3 + $0x8] sm:$0xff] (%p620_p0) }
 0x22c   : > { %v1062_v24 = vpop.f32.mrf.mxu0  ;;  %v1082_v25 = vpop.f32.mrf.mxu1 }
 0x22d   : > { %v1083_v29 = vadd.f32 %v1082_v25, %v1062_v24  ;;  %v1102_v12 = vpop.f32.mrf.mxu2  ;;  %v1122_v13 = vpop.f32.mrf.mxu3  ;;  %v1496_v24 = vld [vmem:[%s10127_s4 + $0x648] sm:$0xff] (%p620_p0)  ;;  %v1367_v25 = vld [vmem:[%s10127_s4 + $0x240] sm:$0xff] (%p620_p0) }
 0x22e   : > { %v1123_v33 = vadd.f32 %v1122_v13, %v1102_v12  ;;  %v1488_v12 = vld [vmem:[%s10127_s4 + $0x608] sm:$0xff] (%p620_p0)  ;;  %1707 = vmatpush.msra.mxu3 (%p620_p0), %v1496_v24  ;;  %v1359_v13 = vld [vmem:[%s10127_s4 + $0x200] sm:$0xff] (%p620_p0)  ;;  %1575 = vmatpush.msra.mxu0 (%p620_p0), %v1367_v25  ;;  %v1385_v24 = vld [vmem:[%s10127_s4 + $0x2d0] sm:$0xff] (%p620_p0) }
 0x22f   : > { %v1227_v34 = vadd.f32 %v1223_v26, %v1083_v29  ;;  %v1503_v26 = vld [vmem:[%s10127_s4 + $0x680] sm:$0xff] (%p620_p0)  ;;  %v1360_v29 = vld [vmem:[%s10127_s4 + $0x208] sm:$0xff] (%p620_p0)  ;;  %v1506_v25 = vld [vmem:[%s10127_s4 + $0x698] sm:$0xff] (%p620_p0) }
 0x230   : > { %v1228_v35 = vadd.f32 %v1224_v32, %v1123_v33  ;;  %v1495_v32 = vld [vmem:[%s10127_s4 + $0x640] sm:$0xff] (%p620_p0)  ;;  %v1352_v33 = vld [vmem:[%s10127_s4 + $0x1c8] sm:$0xff] (%p620_p0)  ;;  %1618 = vmatpush.msra.mxu1 (%p620_p0), %v1503_v26  ;;  %1664 = vmatpush.msra.mxu2 (%p620_p0), %v1360_v29  ;;  %v6700_v26 = vld [vmem:[#allocation3 + $0x10] sm:$0xff] (%p620_p0) }
 0x231   : > { %v1251_v36 = vmul.f32 0.5, %v1227_v34  ;;  %v1480_v34 = vld [vmem:[%s10127_s4 + $0x5c8] sm:$0xff] (%p620_p0)  ;;  %1708 = vmatpush.msra.mxu3 (%p620_p0), %v1488_v12  ;;  %1576 = vmatpush.msra.mxu0 (%p620_p0), %v1359_v13  ;;  %v1513_v12 = vld [vmem:[%s10127_s4 + $0x6d0] sm:$0xff] (%p620_p0)  ;;  %v1370_v13 = vld [vmem:[%s10127_s4 + $0x258] sm:$0xff] (%p620_p0) }
 0x232   : > { %v1255_v60 = vmul.f32 0.5, %v1228_v35  ;;  %v1351_v35 = vld [vmem:[%s10127_s4 + $0x1c0] sm:$0xff] (%p620_p0)  ;;  %1619 = vmatpush.msra.mxu1 (%p620_p0), %v1495_v32  ;;  %1665 = vmatpush.msra.mxu2 (%p620_p0), %v1352_v33  ;;  %v1377_v32 = vld [vmem:[%s10127_s4 + $0x290] sm:$0xff] (%p620_p0)  ;;  %v1498_v33 = vld [vmem:[%s10127_s4 + $0x658] sm:$0xff] (%p620_p0) }
 0x233   : > { %4877 = vtanh.f32 %v1251_v36  ;;  %v1487_v36 = vld [vmem:[%s10127_s4 + $0x600] sm:$0xff] (%p620_p0)  ;;  %1709 = vmatpush.msra.mxu3 (%p620_p0), %v1480_v34  ;;  %1577 = vmatpush.msra.mxu0 (%p620_p0), %v1351_v35  ;;  %v1505_v34 = vld [vmem:[%s10127_s4 + $0x690] sm:$0xff] (%p620_p0)  ;;  %v1362_v35 = vld [vmem:[%s10127_s4 + $0x218] sm:$0xff] (%p620_p0) }
 0x234   : > { %4879 = vtanh.f32 %v1255_v60  ;;  %v1344_v60 = vld [vmem:[%s10127_s4 + $0x188] sm:$0xff] (%p620_p0)  ;;  %1620 = vmatpush.msra.mxu1 (%p620_p0), %v1487_v36  ;;  %v1369_v36 = vld [vmem:[%s10127_s4 + $0x250] sm:$0xff] (%p620_p0) }
 0x235   : > { %v1142_v37 = vpop.f32.mrf.mxu0  ;;  %v1162_v38 = vpop.f32.mrf.mxu1  ;;  %1666 = vmatpush.msra.mxu2 (%p620_p0), %v1344_v60  ;;  %v1490_v60 = vld [vmem:[%s10127_s4 + $0x618] sm:$0xff] (%p620_p0) }
 0x236   : > { %v1163_v28 = vadd.f32 %v1162_v38, %v1142_v37  ;;  %v1472_v37 = vld [vmem:[%s10127_s4 + $0x588] sm:$0xff] (%p620_p0)  ;;  %v1343_v38 = vld [vmem:[%s10127_s4 + $0x180] sm:$0xff] (%p620_p0) }
 0x237   :  { %1710 = vmatpush.msra.mxu3 (%p620_p0), %v1472_v37  ;;  %1578 = vmatpush.msra.mxu0 (%p620_p0), %v1343_v38  ;;  %v1497_v37 = vld [vmem:[%s10127_s4 + $0x650] sm:$0xff] (%p620_p0)  ;;  %v1354_v38 = vld [vmem:[%s10127_s4 + $0x1d8] sm:$0xff] (%p620_p0) }
 0x238   : > { %v1229_v9 = vadd.f32 %v1225_v27, %v1163_v28  ;;  %v1479_v27 = vld [vmem:[%s10127_s4 + $0x5c0] sm:$0xff] (%p620_p0)  ;;  %v1336_v28 = vld [vmem:[%s10127_s4 + $0x148] sm:$0xff] (%p620_p0) }
 0x239   : > { %v4878_v11 = vpop.eup %4877  ;;  %1621 = vmatpush.msra.mxu1 (%p620_p0), %v1479_v27  ;;  %1667 = vmatpush.msra.mxu2 (%p620_p0), %v1336_v28  ;;  %v1361_v27 = vld [vmem:[%s10127_s4 + $0x210] sm:$0xff] (%p620_p0)  ;;  %v1482_v28 = vld [vmem:[%s10127_s4 + $0x5d8] sm:$0xff] (%p620_p0) }
 0x23a   : > { %v4880_v39 = vpop.eup %4879  ;;  %v1253_v40 = vadd.f32 1.0, %v4878_v11  ;;  %4881 = vtanh.f32 %v1229_v9  ;;  %v1464_v9 = vld [vmem:[%s10127_s4 + $0x548] sm:$0xff] (%p620_p0)  ;;  %v1335_v11 = vld [vmem:[%s10127_s4 + $0x140] sm:$0xff] (%p620_p0) }
 0x23b   : > { %v1257_v41 = vadd.f32 1.0, %v4880_v39  ;;  %v1471_v39 = vld [vmem:[%s10127_s4 + $0x580] sm:$0xff] (%p620_p0)  ;;  %1711 = vmatpush.msra.mxu3 (%p620_p0), %v1464_v9  ;;  %1579 = vmatpush.msra.mxu0 (%p620_p0), %v1335_v11  ;;  %v6744_v9 = vld [vmem:[#allocation3 + $0x18] sm:$0xff] (%p620_p0) }
 0x23c   : > { %v1182_v43 = vpop.f32.mrf.mxu2  ;;  %v1202_v44 = vpop.f32.mrf.mxu3  ;;  %v1254_v46 = vmul.f32 0.5, %v1253_v40  ;;  %v1328_v40 = vld [vmem:[%s10127_s4 + $0x108] sm:$0xff] (%p620_p0)  ;;  %1622 = vmatpush.msra.mxu1 (%p620_p0), %v1471_v39  ;;  %v1489_v39 = vld [vmem:[%s10127_s4 + $0x610] sm:$0xff] (%p620_p0) }
 0x23d   : > { %v1258_v47 = vmul.f32 0.5, %v1257_v41  ;;  %v1203_v48 = vadd.f32 %v1202_v44, %v1182_v43  ;;  %v1456_v41 = vld [vmem:[%s10127_s4 + $0x508] sm:$0xff] (%p620_p0)  ;;  %v1463_v43 = vld [vmem:[%s10127_s4 + $0x540] sm:$0xff] (%p620_p0)  ;;  %1668 = vmatpush.msra.mxu2 (%p620_p0), %v1328_v40  ;;  %v1346_v40 = vld [vmem:[%s10127_s4 + $0x198] sm:$0xff] (%p620_p0) }
 0x23e   :  { %v1320_v44 = vld [vmem:[%s10127_s4 + $0xc8] sm:$0xff] (%p620_p0)  ;;  %1712 = vmatpush.msra.mxu3 (%p620_p0), %v1456_v41  ;;  %1623 = vmatpush.msra.mxu1 (%p620_p0), %v1463_v43  ;;  %v1353_v41 = vld [vmem:[%s10127_s4 + $0x1d0] sm:$0xff] (%p620_p0) }
 0x23f   : > { %v1264_v49 = vmul.f32 %v1258_v47, %v1232_v42  ;;  %v1230_v50 = vadd.f32 %v1226_v45, %v1203_v48  ;;  %v1327_v42 = vld [vmem:[%s10127_s4 + $0x100] sm:$0xff] (%p620_p0)  ;;  %v1448_v45 = vld [vmem:[%s10127_s4 + $0x4c8] sm:$0xff] (%p620_p0)  ;;  %1669 = vmatpush.msra.mxu2 (%p620_p0), %v1320_v44  ;;  %v1481_v43 = vld [vmem:[%s10127_s4 + $0x5d0] sm:$0xff] (%p620_p0) }
 0x240   : > { %v4882_v51 = vpop.eup %4881  ;;  %v1455_v47 = vld [vmem:[%s10127_s4 + $0x500] sm:$0xff] (%p620_p0)  ;;  %v1312_v48 = vld [vmem:[%s10127_s4 + $0x88] sm:$0xff] (%p620_p0)  ;;  %1580 = vmatpush.msra.mxu0 (%p620_p0), %v1327_v42  ;;  %1713 = vmatpush.msra.mxu3 (%p620_p0), %v1448_v45  ;;  %v1474_v42 = vld [vmem:[%s10127_s4 + $0x598] sm:$0xff] (%p620_p0) }
 0x241   : > { %v1265_v52 = vmul.f32 %v4882_v51, %v1254_v46  ;;  %v1260_v53 = vmul.f32 0.5, %v1230_v50  ;;  %v1319_v46 = vld [vmem:[%s10127_s4 + $0xc0] sm:$0xff] (%p620_p0)  ;;  %1624 = vmatpush.msra.mxu1 (%p620_p0), %v1455_v47  ;;  %1670 = vmatpush.msra.mxu2 (%p620_p0), %v1312_v48  ;;  %v1338_v44 = vld [vmem:[%s10127_s4 + $0x158] sm:$0xff] (%p620_p0)  ;;  %v1345_v45 = vld [vmem:[%s10127_s4 + $0x190] sm:$0xff] (%p620_p0) }
 0x242   :  { %v1311_v50 = vld [vmem:[%s10127_s4 + $0x80] sm:$0xff] (%p620_p0)  ;;  %1581 = vmatpush.msra.mxu0 (%p620_p0), %v1319_v46  ;;  %v1466_v46 = vld [vmem:[%s10127_s4 + $0x558] sm:$0xff] (%p620_p0)  ;;  %v1473_v47 = vld [vmem:[%s10127_s4 + $0x590] sm:$0xff] (%p620_p0) }
 0x243   : > { %v1266_v54 = vadd.f32 %v1265_v52, %v1264_v49  ;;  %4883 = vtanh.f32 %v1260_v53  ;;  %v1440_v49 = vld [vmem:[%s10127_s4 + $0x488] sm:$0xff] (%p620_p0)  ;;  %v1447_v51 = vld [vmem:[%s10127_s4 + $0x4c0] sm:$0xff] (%p620_p0)  ;;  %v1330_v48 = vld [vmem:[%s10127_s4 + $0x118] sm:$0xff] (%p620_p0) }
 0x244   :  { %v1304_v52 = vld [vmem:[%s10127_s4 + $0x48] sm:$0xff] (%p620_p0)  ;;  %1714 = vmatpush.msra.mxu3 (%p620_p0), %v1440_v49  ;;  %1582 = vmatpush.msra.mxu0 (%p620_p0), %v1311_v50  ;;  %v1337_v49 = vld [vmem:[%s10127_s4 + $0x150] sm:$0xff] (%p620_p0)  ;;  %v1458_v50 = vld [vmem:[%s10127_s4 + $0x518] sm:$0xff] (%p620_p0) }
 0x245   : > { %4885 = vtanh.f32 %v1266_v54  ;;  %1272 = vst [vmem:[#allocation6] sm:$0xff] %v1266_v54  ;;  %v1432_v53 = vld [vmem:[%s10127_s4 + $0x448] sm:$0xff] (%p620_p0)  ;;  %v1303_v54 = vld [vmem:[%s10127_s4 + $0x40] sm:$0xff] (%p620_p0)  ;;  %1625 = vmatpush.msra.mxu1 (%p620_p0), %v1447_v51  ;;  %1671 = vmatpush.msra.mxu2 (%p620_p0), %v1304_v52 }
 0x246   :  { %2348 = vst [vmem:[#allocation6] sm:$0xff] (%p620_p0), %v4987_v3  ;;  %1715 = vmatpush.msra.mxu3 (%p620_p0), %v1432_v53  ;;  %1583 = vmatpush.msra.mxu0 (%p620_p0), %v1303_v54  ;;  %v6788_v51 = vld [vmem:[#allocation3 + $0x20] sm:$0xff] (%p620_p0)  ;;  %v1465_v53 = vld [vmem:[%s10127_s4 + $0x550] sm:$0xff] (%p620_p0)  ;;  %v1322_v54 = vld [vmem:[%s10127_s4 + $0xd8] sm:$0xff] (%p620_p0) }
 0x248   :  { %1584 = vmatpush.msra.mxu0 (%p620_p0), %v1295_v61  ;;  %v1442_v61 = vld [vmem:[%s10127_s4 + $0x498] sm:$0xff] (%p620_p0) }
 0x249   : > { %v4884_v55 = vpop.eup %4883 }
 0x24a   : > { %v1262_v56 = vadd.f32 1.0, %v4884_v55  ;;  %v1439_v55 = vld [vmem:[%s10127_s4 + $0x480] sm:$0xff] (%p620_p0)  ;;  %1745 = vmatpush.msrb.mxu0 (%p620_p0), %v1417_v0  ;;  %v1313_v0 = vld [vmem:[%s10127_s4 + $0x90] sm:$0xff] (%p620_p0) }
 0x24b   : > { %v4886_v30 = vpop.eup %4885  ;;  %1626 = vmatpush.msra.mxu1 (%p620_p0), %v1439_v55  ;;  %v1329_v55 = vld [vmem:[%s10127_s4 + $0x110] sm:$0xff] (%p620_p0) }
 0x24c   : > { %v1263_v31 = vmul.f32 0.5, %v1262_v56  ;;  %v1296_v56 = vld [vmem:[%s10127_s4 + $0x8] sm:$0xff] (%p620_p0)  ;;  %1746 = vmatpush.msrb.mxu0 (%p620_p0), %v1409_v6  ;;  %v1298_v6 = vld [vmem:[%s10127_s4 + $0x18] sm:$0xff] (%p620_p0) }
 0x24d   :  { %622 = sbr.rel (!%p620_p0) target bundleno = 305 (0x131), region = 93  ;;  %1672 = vmatpush.msra.mxu2 (%p620_p0), %v1296_v56  ;;  %1627 = vmatpush.msra.mxu1 (%p620_p0), %v1431_v62  ;;  %v1450_v56 = vld [vmem:[%s10127_s4 + $0x4d8] sm:$0xff] (%p620_p0)  ;;  %v1449_v62 = vld [vmem:[%s10127_s4 + $0x4d0] sm:$0xff] (%p620_p0) }
 0x24e   : > { %v1268_v57 = vmul.f32 %v4886_v30, %v1263_v31  ;;  %v1424_v30 = vld [vmem:[%s10127_s4 + $0x408] sm:$0xff] (%p620_p0)  ;;  %v6612_v31 = vld [vmem:[#allocation3] sm:$0xff] (%p620_p0)  ;;  %1747 = vmatpush.msrb.mxu0 (%p620_p0), %v1401_v16 }
 0x24f   :  { %1716 = vmatpush.msra.mxu3 (%p620_p0), %v1424_v30  ;;  %1673 = vmatmul.f32.vlgmr.msra.gmra.mxu2 (%p620_p0), %v6612_v31  ;;  %v1457_v30 = vld [vmem:[%s10127_s4 + $0x510] sm:$0xff] (%p620_p0)  ;;  %v1420_v16 = vld [vmem:[%s10127_s4 + $0x3e8] sm:$0xff] (%p620_p0) }
 0x250   : > { %1270 = vst [vmem:[#allocation5 + $0x8] sm:$0xff] %v1268_v57  ;;  %1833 = vmatpush.msrb.mxu2 (%p620_p0), %v1418_v58  ;;  %1585 = vmatmul.f32.vlgmr.msra.gmra.mxu0 (%p620_p0), %v6612_v31  ;;  %v1314_v58 = vld [vmem:[%s10127_s4 + $0x98] sm:$0xff] (%p620_p0) }
 0x251   : > { %1276 = vst [vmem:[%s1275_s23] sm:$0xff] %v1268_v57  ;;  %1877 = vmatpush.msrb.mxu3 (%p620_p0), %v1546_v59  ;;  %1628 = vmatpush.msra.mxu1 (%p620_p0), %v1423_v1  ;;  %v1321_v59 = vld [vmem:[%s10127_s4 + $0xd0] sm:$0xff] (%p620_p0)  ;;  %v1434_v1 = vld [vmem:[%s10127_s4 + $0x458] sm:$0xff] (%p620_p0) }
 0x252   :  { %2346 = vst [vmem:[#allocation5 + $0x8] sm:$0xff] %v4987_v3  ;;  %1834 = vmatpush.msrb.mxu2 %v1410_v63  ;;  %1748 = vmatpush.msrb.mxu0 %v1393_v20  ;;  %v1306_v63 = vld [vmem:[%s10127_s4 + $0x58] sm:$0xff]  ;;  %v1412_v20 = vld [vmem:[%s10127_s4 + $0x3a8] sm:$0xff] }
 0x253   :  { %1878 = vmatpush.msrb.mxu3 %v1538_v2  ;;  %1789 = vmatpush.msrb.mxu1 %v1545_v4  ;;  %v6832_v2 = vld [vmem:[#allocation3 + $0x28] sm:$0xff] }
 0x254   :  { %1835 = vmatpush.msrb.mxu2 %v1402_v5  ;;  %1749 = vmatpush.msrb.mxu0 %v1385_v24  ;;  %v1441_v5 = vld [vmem:[%s10127_s4 + $0x490] sm:$0xff] }
 0x255   :  { %1879 = vmatpush.msrb.mxu3 %v1530_v7  ;;  %1790 = vmatpush.msrb.mxu1 %v1537_v14  ;;  %v1305_v7 = vld [vmem:[%s10127_s4 + $0x50] sm:$0xff]  ;;  %v1426_v14 = vld [vmem:[%s10127_s4 + $0x418] sm:$0xff] }
 0x256   :  { %1836 = vmatpush.msrb.mxu2 %v1394_v15  ;;  %1750 = vmatpush.msrb.mxu0 %v1377_v32  ;;  %v1433_v15 = vld [vmem:[%s10127_s4 + $0x450] sm:$0xff]  ;;  %v1532_v32 = vld [vmem:[%s10127_s4 + $0x768] sm:$0xff] }
 0x257   :  { %1676 = vmatmul.f32.gmra.mxu2 %v6656_v8  ;;  %1880 = vmatpush.msrb.mxu3 %v1522_v17  ;;  %v1297_v17 = vld [vmem:[%s10127_s4 + $0x10] sm:$0xff] }
 0x258   :  { %v6614_v57 = vld [vmem:[#allocation4] sm:$0xff]  ;;  %v6658_v10 = vld [vmem:[#allocation4 + $0x8] sm:$0xff]  ;;  %1588 = vmatmul.f32.gmra.mxu0 %v6656_v8  ;;  %1791 = vmatpush.msrb.mxu1 %v1529_v18  ;;  %v6702_v29 = vld [vmem:[#allocation4 + $0x10] sm:$0xff] }
 0x259   :  { %1717 = vmatmul.f32.vlgmr.msra.gmra.mxu3 %v6614_v57  ;;  %1629 = vmatmul.f32.vlgmr.msra.gmra.mxu1 %v6614_v57  ;;  %v6746_v11 = vld [vmem:[#allocation4 + $0x18] sm:$0xff]  ;;  %v6790_v52 = vld [vmem:[#allocation4 + $0x20] sm:$0xff]  ;;  %v6834_v4 = vld [vmem:[#allocation4 + $0x28] sm:$0xff] }
 0x25a   :  { %1837 = vmatpush.msrb.mxu2 %v1386_v19  ;;  %1881 = vmatpush.msrb.mxu3 %v1514_v21  ;;  %v1548_v18 = vld [vmem:[%s10127_s4 + $0x7e8] sm:$0xff]  ;;  %v1425_v19 = vld [vmem:[%s10127_s4 + $0x410] sm:$0xff]  ;;  %v1419_v21 = vld [vmem:[%s10127_s4 + $0x3e0] sm:$0xff] }
 0x25b   :  { %1792 = vmatpush.msrb.mxu1 %v1521_v22  ;;  %1751 = vmatpush.msrb.mxu0 %v1369_v36  ;;  %v1540_v22 = vld [vmem:[%s10127_s4 + $0x7a8] sm:$0xff]  ;;  %v6878_v24 = vld [vmem:[#allocation4 + $0x30] sm:$0xff] }
 0x25c   :  { %1838 = vmatpush.msrb.mxu2 %v1378_v23  ;;  %1882 = vmatpush.msrb.mxu3 %v1506_v25  ;;  %v6876_v23 = vld [vmem:[#allocation3 + $0x30] sm:$0xff]  ;;  %v1547_v25 = vld [vmem:[%s10127_s4 + $0x7e0] sm:$0xff]  ;;  %v6905_v36 = vld [vmem:[#allocation3 + $0x38] sm:$0xff] }
 0x25d   :  { %1793 = vmatpush.msrb.mxu1 %v1513_v12  ;;  %1752 = vmatpush.msrb.mxu0 %v1361_v27  ;;  %v1404_v12 = vld [vmem:[%s10127_s4 + $0x368] sm:$0xff] }
 0x25e   :  { %1839 = vmatpush.msrb.mxu2 %v1370_v13  ;;  %1883 = vmatpush.msrb.mxu3 %v1498_v33  ;;  %v1411_v13 = vld [vmem:[%s10127_s4 + $0x3a0] sm:$0xff]  ;;  %v1388_v27 = vld [vmem:[%s10127_s4 + $0x2e8] sm:$0xff] }
 0x25f   :  { %1679 = vmatmul.f32.gmra.mxu2 %v6700_v26  ;;  %1794 = vmatpush.msrb.mxu1 %v1505_v34  ;;  %v1539_v33 = vld [vmem:[%s10127_s4 + $0x7a0] sm:$0xff]  ;;  %v1396_v34 = vld [vmem:[%s10127_s4 + $0x328] sm:$0xff] }
 0x260   :  { %1591 = vmatmul.f32.gmra.mxu0 %v6700_v26  ;;  %1840 = vmatpush.msrb.mxu2 %v1362_v35  ;;  %v1403_v35 = vld [vmem:[%s10127_s4 + $0x360] sm:$0xff] }
 0x261   :  { %1720 = vmatmul.f32.gmra.mxu3 %v6658_v10  ;;  %1632 = vmatmul.f32.gmra.mxu1 %v6658_v10 }
 0x262   :  { %1884 = vmatpush.msrb.mxu3 %v1490_v60  ;;  %1795 = vmatpush.msrb.mxu1 %v1497_v37  ;;  %v6907_v60 = vld [vmem:[#allocation4 + $0x38] sm:$0xff]  ;;  %v1524_v37 = vld [vmem:[%s10127_s4 + $0x728] sm:$0xff] }
 0x263   :  { %1841 = vmatpush.msrb.mxu2 %v1354_v38  ;;  %1753 = vmatpush.msrb.mxu0 %v1353_v41  ;;  %v1531_v38 = vld [vmem:[%s10127_s4 + $0x760] sm:$0xff]  ;;  %v1380_v41 = vld [vmem:[%s10127_s4 + $0x2a8] sm:$0xff] }
 0x264   :  { %1885 = vmatpush.msrb.mxu3 %v1482_v28  ;;  %1796 = vmatpush.msrb.mxu1 %v1489_v39  ;;  %v1395_v28 = vld [vmem:[%s10127_s4 + $0x320] sm:$0xff]  ;;  %v1516_v39 = vld [vmem:[%s10127_s4 + $0x6e8] sm:$0xff] }
 0x265   :  { %1842 = vmatpush.msrb.mxu2 %v1346_v40  ;;  %1754 = vmatpush.msrb.mxu0 %v1345_v45  ;;  %v1523_v40 = vld [vmem:[%s10127_s4 + $0x720] sm:$0xff]  ;;  %v1508_v45 = vld [vmem:[%s10127_s4 + $0x6a8] sm:$0xff] }
 0x266   :  { %1886 = vmatpush.msrb.mxu3 %v1474_v42  ;;  %1797 = vmatpush.msrb.mxu1 %v1481_v43  ;;  %v6934_v42 = vld [vmem:[#allocation3 + $0x40] sm:$0xff]  ;;  %v6936_v43 = vld [vmem:[#allocation4 + $0x40] sm:$0xff] }
 0x267   :  { %1682 = vmatmul.f32.gmra.mxu2 %v6744_v9  ;;  %1755 = vmatpush.msrb.mxu0 %v1337_v49  ;;  %v1500_v49 = vld [vmem:[%s10127_s4 + $0x668] sm:$0xff] }
 0x268   :  { %1594 = vmatmul.f32.gmra.mxu0 %v6744_v9  ;;  %1843 = vmatpush.msrb.mxu2 %v1338_v44  ;;  %v1387_v44 = vld [vmem:[%s10127_s4 + $0x2e0] sm:$0xff] }
 0x269   :  { %1723 = vmatmul.f32.gmra.mxu3 %v6702_v29  ;;  %1635 = vmatmul.f32.gmra.mxu1 %v6702_v29 }
 0x26a   :  { %1887 = vmatpush.msrb.mxu3 %v1466_v46  ;;  %1798 = vmatpush.msrb.mxu1 %v1473_v47  ;;  %v1515_v46 = vld [vmem:[%s10127_s4 + $0x6e0] sm:$0xff]  ;;  %v1372_v47 = vld [vmem:[%s10127_s4 + $0x268] sm:$0xff] }
 0x26b   :  { %1844 = vmatpush.msrb.mxu2 %v1330_v48  ;;  %1756 = vmatpush.msrb.mxu0 %v1329_v55  ;;  %v1379_v48 = vld [vmem:[%s10127_s4 + $0x2a0] sm:$0xff]  ;;  %v1492_v55 = vld [vmem:[%s10127_s4 + $0x628] sm:$0xff] }
 0x26c   :  { %1888 = vmatpush.msrb.mxu3 %v1458_v50  ;;  %1799 = vmatpush.msrb.mxu1 %v1465_v53  ;;  %v1507_v50 = vld [vmem:[%s10127_s4 + $0x6a0] sm:$0xff]  ;;  %v1364_v53 = vld [vmem:[%s10127_s4 + $0x228] sm:$0xff] }
 0x26d   :  { %1845 = vmatpush.msrb.mxu2 %v1322_v54  ;;  %1757 = vmatpush.msrb.mxu0 %v1321_v59  ;;  %v1371_v54 = vld [vmem:[%s10127_s4 + $0x260] sm:$0xff]  ;;  %v1484_v59 = vld [vmem:[%s10127_s4 + $0x5e8] sm:$0xff] }
 0x26e   :  { %1889 = vmatpush.msrb.mxu3 %v1450_v56  ;;  %1800 = vmatpush.msrb.mxu1 %v1457_v30  ;;  %v1499_v56 = vld [vmem:[%s10127_s4 + $0x660] sm:$0xff]  ;;  %v1356_v30 = vld [vmem:[%s10127_s4 + $0x1e8] sm:$0xff] }
 0x26f   :  { %1685 = vmatmul.f32.gmra.mxu2 %v6788_v51  ;;  %1758 = vmatpush.msrb.mxu0 %v1313_v0  ;;  %v1476_v0 = vld [vmem:[%s10127_s4 + $0x5a8] sm:$0xff] }
 0x270   :  { %1597 = vmatmul.f32.gmra.mxu0 %v6788_v51  ;;  %1846 = vmatpush.msrb.mxu2 %v1314_v58  ;;  %v1363_v58 = vld [vmem:[%s10127_s4 + $0x220] sm:$0xff] }
 0x271   :  { %1726 = vmatmul.f32.gmra.mxu3 %v6746_v11  ;;  %1638 = vmatmul.f32.gmra.mxu1 %v6746_v11 }
 0x272   :  { %1890 = vmatpush.msrb.mxu3 %v1442_v61  ;;  %1801 = vmatpush.msrb.mxu1 %v1449_v62  ;;  %v1491_v61 = vld [vmem:[%s10127_s4 + $0x620] sm:$0xff]  ;;  %v1348_v62 = vld [vmem:[%s10127_s4 + $0x1a8] sm:$0xff] }
 0x273   :  { %1847 = vmatpush.msrb.mxu2 %v1306_v63  ;;  %1759 = vmatpush.msrb.mxu0 %v1305_v7  ;;  %v1355_v63 = vld [vmem:[%s10127_s4 + $0x1e0] sm:$0xff]  ;;  %v1468_v7 = vld [vmem:[%s10127_s4 + $0x568] sm:$0xff] }
 0x274   :  { %1891 = vmatpush.msrb.mxu3 %v1434_v1  ;;  %1802 = vmatpush.msrb.mxu1 %v1441_v5  ;;  %v1483_v1 = vld [vmem:[%s10127_s4 + $0x5e0] sm:$0xff]  ;;  %v1340_v5 = vld [vmem:[%s10127_s4 + $0x168] sm:$0xff] }
 0x275   :  { %1848 = vmatpush.msrb.mxu2 %v1298_v6  ;;  %1760 = vmatpush.msrb.mxu0 %v1297_v17  ;;  %v1347_v6 = vld [vmem:[%s10127_s4 + $0x1a0] sm:$0xff]  ;;  %v1460_v17 = vld [vmem:[%s10127_s4 + $0x528] sm:$0xff] }
 0x276   :  { %1892 = vmatpush.msrb.mxu3 %v1426_v14  ;;  %1803 = vmatpush.msrb.mxu1 %v1433_v15  ;;  %v1475_v14 = vld [vmem:[%s10127_s4 + $0x5a0] sm:$0xff]  ;;  %v1332_v15 = vld [vmem:[%s10127_s4 + $0x128] sm:$0xff] }
 0x277   :  { %1688 = vmatmul.f32.gmra.mxu2 %v6832_v2  ;;  %1921 = vmatpush.msra.mxu0 %v1419_v21  ;;  %v1452_v21 = vld [vmem:[%s10127_s4 + $0x4e8] sm:$0xff] }
 0x278   :  { %1600 = vmatmul.f32.gmra.mxu0 %v6832_v2  ;;  %2009 = vmatpush.msra.mxu2 %v1420_v16  ;;  %v1339_v16 = vld [vmem:[%s10127_s4 + $0x160] sm:$0xff] }
 0x279   :  { %1729 = vmatmul.f32.gmra.mxu3 %v6790_v52  ;;  %1641 = vmatmul.f32.gmra.mxu1 %v6790_v52 }
 0x27a   :  { %2053 = vmatpush.msra.mxu3 %v1548_v18  ;;  %1804 = vmatpush.msrb.mxu1 %v1425_v19  ;;  %v1467_v18 = vld [vmem:[%s10127_s4 + $0x560] sm:$0xff]  ;;  %v1324_v19 = vld [vmem:[%s10127_s4 + $0xe8] sm:$0xff] }
 0x27b   :  { %2010 = vmatpush.msra.mxu2 %v1412_v20  ;;  %1922 = vmatpush.msra.mxu0 %v1411_v13  ;;  %v1331_v20 = vld [vmem:[%s10127_s4 + $0x120] sm:$0xff]  ;;  %v1444_v13 = vld [vmem:[%s10127_s4 + $0x4a8] sm:$0xff] }
 0x27c   :  { %2054 = vmatpush.msra.mxu3 %v1540_v22  ;;  %1965 = vmatpush.msra.mxu1 %v1547_v25  ;;  %v1459_v22 = vld [vmem:[%s10127_s4 + $0x520] sm:$0xff]  ;;  %v1316_v25 = vld [vmem:[%s10127_s4 + $0xa8] sm:$0xff] }
 0x27d   :  { %2011 = vmatpush.msra.mxu2 %v1404_v12  ;;  %1923 = vmatpush.msra.mxu0 %v1403_v35  ;;  %v1323_v12 = vld [vmem:[%s10127_s4 + $0xe0] sm:$0xff]  ;;  %v1436_v35 = vld [vmem:[%s10127_s4 + $0x468] sm:$0xff] }
 0x27e   :  { %2055 = vmatpush.msra.mxu3 %v1532_v32  ;;  %1966 = vmatpush.msra.mxu1 %v1539_v33  ;;  %v1451_v32 = vld [vmem:[%s10127_s4 + $0x4e0] sm:$0xff]  ;;  %v1308_v33 = vld [vmem:[%s10127_s4 + $0x68] sm:$0xff] }
 0x27f   :  { %1691 = vmatmul.f32.gmra.mxu2 %v6876_v23  ;;  %1924 = vmatpush.msra.mxu0 %v1395_v28  ;;  %v1428_v28 = vld [vmem:[%s10127_s4 + $0x428] sm:$0xff] }
 0x280   :  { %1603 = vmatmul.f32.gmra.mxu0 %v6876_v23  ;;  %2012 = vmatpush.msra.mxu2 %v1396_v34  ;;  %v1315_v34 = vld [vmem:[%s10127_s4 + $0xa0] sm:$0xff] }
 0x281   :  { %1732 = vmatmul.f32.gmra.mxu3 %v6834_v4  ;;  %1644 = vmatmul.f32.gmra.mxu1 %v6834_v4 }
 0x282   :  { %2056 = vmatpush.msra.mxu3 %v1524_v37  ;;  %1967 = vmatpush.msra.mxu1 %v1531_v38  ;;  %v1443_v37 = vld [vmem:[%s10127_s4 + $0x4a0] sm:$0xff]  ;;  %v1300_v38 = vld [vmem:[%s10127_s4 + $0x28] sm:$0xff] }
 0x283   :  { %2013 = vmatpush.msra.mxu2 %v1388_v27  ;;  %1925 = vmatpush.msra.mxu0 %v1387_v44  ;;  %v1307_v27 = vld [vmem:[%s10127_s4 + $0x60] sm:$0xff]  ;;  %v1550_v44 = vld [vmem:[%s10127_s4 + $0x7f8] sm:$0xff] }
 0x284   :  { %2057 = vmatpush.msra.mxu3 %v1516_v39  ;;  %1968 = vmatpush.msra.mxu1 %v1523_v40  ;;  %v1435_v39 = vld [vmem:[%s10127_s4 + $0x460] sm:$0xff]  ;;  %v1422_v40 = vld [vmem:[%s10127_s4 + $0x3f8] sm:$0xff] }
 0x285   :  { %2014 = vmatpush.msra.mxu2 %v1380_v41  ;;  %1926 = vmatpush.msra.mxu0 %v1379_v48  ;;  %v1299_v41 = vld [vmem:[%s10127_s4 + $0x20] sm:$0xff]  ;;  %v1542_v48 = vld [vmem:[%s10127_s4 + $0x7b8] sm:$0xff] }
 0x286   :  { %2058 = vmatpush.msra.mxu3 %v1508_v45  ;;  %1969 = vmatpush.msra.mxu1 %v1515_v46  ;;  %v1427_v45 = vld [vmem:[%s10127_s4 + $0x420] sm:$0xff]  ;;  %v1414_v46 = vld [vmem:[%s10127_s4 + $0x3b8] sm:$0xff] }
 0x287   :  { %1694 = vmatmul.f32.gmra.mxu2 %v6905_v36  ;;  %1927 = vmatpush.msra.mxu0 %v1371_v54  ;;  %v1413_v54 = vld [vmem:[%s10127_s4 + $0x3b0] sm:$0xff] }
 0x288   :  { %1606 = vmatmul.f32.gmra.mxu0 %v6905_v36  ;;  %2015 = vmatpush.msra.mxu2 %v1372_v47  ;;  %v1421_v47 = vld [vmem:[%s10127_s4 + $0x3f0] sm:$0xff] }
 0x289   :  { %1735 = vmatmul.f32.gmra.mxu3 %v6878_v24  ;;  %1647 = vmatmul.f32.gmra.mxu1 %v6878_v24 }
 0x28a   :  { %2059 = vmatpush.msra.mxu3 %v1500_v49  ;;  %1970 = vmatpush.msra.mxu1 %v1507_v50  ;;  %v1549_v49 = vld [vmem:[%s10127_s4 + $0x7f0] sm:$0xff]  ;;  %v1406_v50 = vld [vmem:[%s10127_s4 + $0x378] sm:$0xff] }
 0x28b   :  { %2016 = vmatpush.msra.mxu2 %v1364_v53  ;;  %1928 = vmatpush.msra.mxu0 %v1363_v58  ;;  %v7127_v53 = vld [vmem:[%s10129_s6] sm:$0xff] }
 0x28c   :  { %2060 = vmatpush.msra.mxu3 %v1492_v55  ;;  %1971 = vmatpush.msra.mxu1 %v1499_v56  ;;  %v1534_v55 = vld [vmem:[%s10127_s4 + $0x778] sm:$0xff]  ;;  %v7138_v56 = vperm.slane %v7127_v53, 0  ;;  %v7143_v58 = vperm.slane %v7127_v53, 1 }
 0x28d   :  { %2017 = vmatpush.msra.mxu2 %v1356_v30  ;;  %1929 = vmatpush.msra.mxu0 %v1355_v63 }
 0x28e   :  { %2061 = vmatpush.msra.mxu3 %v1484_v59  ;;  %1972 = vmatpush.msra.mxu1 %v1491_v61  ;;  %v1541_v59 = vld [vmem:[%s10127_s4 + $0x7b0] sm:$0xff]  ;;  %v1398_v61 = vld [vmem:[%s10127_s4 + $0x338] sm:$0xff] }
 0x28f   :  { %1697 = vmatmul.f32.gmra.mxu2 %v6934_v42  ;;  %1930 = vmatpush.msra.mxu0 %v1347_v6 }
 0x290   :  { %1609 = vmatmul.f32.gmra.mxu0 %v6934_v42  ;;  %2018 = vmatpush.msra.mxu2 %v1348_v62  ;;  %v1405_v62 = vld [vmem:[%s10127_s4 + $0x370] sm:$0xff] }
 0x291   :  { %1738 = vmatmul.f32.gmra.mxu3 %v6907_v60  ;;  %1650 = vmatmul.f32.gmra.mxu1 %v6907_v60 }
 0x292   :  { %2062 = vmatpush.msra.mxu3 %v1476_v0  ;;  %1973 = vmatpush.msra.mxu1 %v1483_v1  ;;  %v1526_v0 = vld [vmem:[%s10127_s4 + $0x738] sm:$0xff]  ;;  %v1533_v1 = vld [vmem:[%s10127_s4 + $0x770] sm:$0xff] }
 0x293   :  { %2019 = vmatpush.msra.mxu2 %v1340_v5  ;;  %1931 = vmatpush.msra.mxu0 %v1339_v16  ;;  %v1390_v5 = vld [vmem:[%s10127_s4 + $0x2f8] sm:$0xff] }
 0x294   :  { %2063 = vmatpush.msra.mxu3 %v1468_v7  ;;  %1974 = vmatpush.msra.mxu1 %v1475_v14 }
 0x295   :  { %2020 = vmatpush.msra.mxu2 %v1332_v15  ;;  %1932 = vmatpush.msra.mxu0 %v1331_v20 }
 0x296   :  { %2064 = vmatpush.msra.mxu3 %v1460_v17  ;;  %1975 = vmatpush.msra.mxu1 %v1467_v18  ;;  %v1397_v17 = vld [vmem:[%s10127_s4 + $0x330] sm:$0xff]  ;;  %v1518_v18 = vld [vmem:[%s10127_s4 + $0x6f8] sm:$0xff] }
 0x297   :  { %1849 = vmatmul.f32.vlgmr.msrb.gmra.mxu2 %v6612_v31  ;;  %1933 = vmatpush.msra.mxu0 %v1323_v12 }
 0x298   :  { %1761 = vmatmul.f32.vlgmr.msrb.gmra.mxu0 %v6612_v31  ;;  %2021 = vmatpush.msra.mxu2 %v1324_v19 }
 0x299   :  { %1741 = vmatmul.f32.gmra.mxu3 %v6936_v43  ;;  %1653 = vmatmul.f32.gmra.mxu1 %v6936_v43 }
 0x29a   :  { %2065 = vmatpush.msra.mxu3 %v1452_v21  ;;  %1976 = vmatpush.msra.mxu1 %v1459_v22  ;;  %v1525_v21 = vld [vmem:[%s10127_s4 + $0x730] sm:$0xff]  ;;  %v1382_v22 = vld [vmem:[%s10127_s4 + $0x2b8] sm:$0xff] }
 0x29b   :  { %2022 = vmatpush.msra.mxu2 %v1316_v25  ;;  %1934 = vmatpush.msra.mxu0 %v1315_v34  ;;  %v1389_v25 = vld [vmem:[%s10127_s4 + $0x2f0] sm:$0xff] }
 0x29c   :  { %2066 = vmatpush.msra.mxu3 %v1444_v13  ;;  %1977 = vmatpush.msra.mxu1 %v1451_v32  ;;  %v1510_v13 = vld [vmem:[%s10127_s4 + $0x6b8] sm:$0xff]  ;;  %v1517_v32 = vld [vmem:[%s10127_s4 + $0x6f0] sm:$0xff] }
 0x29d   :  { %2023 = vmatpush.msra.mxu2 %v1308_v33  ;;  %1935 = vmatpush.msra.mxu0 %v1307_v27  ;;  %v1374_v27 = vld [vmem:[%s10127_s4 + $0x278] sm:$0xff] }
 0x29e   :  { %2067 = vmatpush.msra.mxu3 %v1436_v35  ;;  %1978 = vmatpush.msra.mxu1 %v1443_v37 }
 0x29f   :  { %1852 = vmatmul.f32.gmra.mxu2 %v6656_v8  ;;  %1936 = vmatpush.msra.mxu0 %v1299_v41  ;;  %v1502_v41 = vld [vmem:[%s10127_s4 + $0x678] sm:$0xff] }
 0x2a0   :  { %1764 = vmatmul.f32.gmra.mxu0 %v6656_v8  ;;  %2024 = vmatpush.msra.mxu2 %v1300_v38 }
 0x2a1   :  { %1893 = vmatmul.f32.vlgmr.msrb.gmra.mxu3 %v6614_v57  ;;  %1805 = vmatmul.f32.vlgmr.msrb.gmra.mxu1 %v6614_v57 }
 0x2a2   :  { %2068 = vmatpush.msra.mxu3 %v1428_v28  ;;  %1979 = vmatpush.msra.mxu1 %v1435_v39 }
 0x2a3   :  { %2185 = vmatpush.msrb.mxu2 %v1422_v40  ;;  %2097 = vmatpush.msrb.mxu0 %v1421_v47  ;;  %v1381_v40 = vld [vmem:[%s10127_s4 + $0x2b0] sm:$0xff] }
 0x2a4   :  { %2229 = vmatpush.msrb.mxu3 %v1550_v44  ;;  %1980 = vmatpush.msra.mxu1 %v1427_v45  ;;  %v1509_v44 = vld [vmem:[%s10127_s4 + $0x6b0] sm:$0xff] }
 0x2a5   :  { %2186 = vmatpush.msrb.mxu2 %v1414_v46  ;;  %2098 = vmatpush.msrb.mxu0 %v1413_v54  ;;  %v1366_v46 = vld [vmem:[%s10127_s4 + $0x238] sm:$0xff]  ;;  %v1373_v47 = vld [vmem:[%s10127_s4 + $0x270] sm:$0xff] }
 0x2a6   :  { %2230 = vmatpush.msrb.mxu3 %v1542_v48  ;;  %2141 = vmatpush.msrb.mxu1 %v1549_v49  ;;  %v1494_v48 = vld [vmem:[%s10127_s4 + $0x638] sm:$0xff] }
 0x2a7   :  { %1855 = vmatmul.f32.gmra.mxu2 %v6700_v26  ;;  %2099 = vmatpush.msrb.mxu0 %v1405_v62 }
 0x2a8   :  { %1767 = vmatmul.f32.gmra.mxu0 %v6700_v26  ;;  %2187 = vmatpush.msrb.mxu2 %v1406_v50 }
 0x2a9   :  { %1896 = vmatmul.f32.gmra.mxu3 %v6658_v10  ;;  %1808 = vmatmul.f32.gmra.mxu1 %v6658_v10 }
 0x2aa   :  { %2231 = vmatpush.msrb.mxu3 %v1534_v55  ;;  %2142 = vmatpush.msrb.mxu1 %v1541_v59  ;;  %v1501_v59 = vld [vmem:[%s10127_s4 + $0x670] sm:$0xff] }
 0x2ab   :  { %2188 = vmatpush.msrb.mxu2 %v1398_v61  ;;  %2100 = vmatpush.msrb.mxu0 %v1397_v17  ;;  %v1358_v61 = vld [vmem:[%s10127_s4 + $0x1f8] sm:$0xff] }
 0x2ac   :  { %2232 = vmatpush.msrb.mxu3 %v1526_v0  ;;  %2143 = vmatpush.msrb.mxu1 %v1533_v1  ;;  %v1486_v0 = vld [vmem:[%s10127_s4 + $0x5f8] sm:$0xff] }
 0x2ad   :  { %2189 = vmatpush.msrb.mxu2 %v1390_v5  ;;  %2101 = vmatpush.msrb.mxu0 %v1389_v25  ;;  %v1350_v5 = vld [vmem:[%s10127_s4 + $0x1b8] sm:$0xff] }
 0x2ae   :  { %2233 = vmatpush.msrb.mxu3 %v1518_v18  ;;  %2144 = vmatpush.msrb.mxu1 %v1525_v21  ;;  %v1478_v18 = vld [vmem:[%s10127_s4 + $0x5b8] sm:$0xff] }
 0x2af   :  { %1858 = vmatmul.f32.gmra.mxu2 %v6744_v9  ;;  %2102 = vmatpush.msrb.mxu0 %v1381_v40  ;;  %v1342_v21 = vld [vmem:[%s10127_s4 + $0x178] sm:$0xff] }
 0x2b0   :  { %1770 = vmatmul.f32.gmra.mxu0 %v6744_v9  ;;  %2190 = vmatpush.msrb.mxu2 %v1382_v22  ;;  %v1349_v22 = vld [vmem:[%s10127_s4 + $0x1b0] sm:$0xff]  ;;  %v1326_v40 = vld [vmem:[%s10127_s4 + $0xf8] sm:$0xff] }
 0x2b1   :  { %1899 = vmatmul.f32.gmra.mxu3 %v6702_v29  ;;  %1811 = vmatmul.f32.gmra.mxu1 %v6702_v29 }
 0x2b2   :  { %2234 = vmatpush.msrb.mxu3 %v1510_v13  ;;  %2145 = vmatpush.msrb.mxu1 %v1517_v32  ;;  %v1334_v13 = vld [vmem:[%s10127_s4 + $0x138] sm:$0xff] }
 0x2b3   :  { %2191 = vmatpush.msrb.mxu2 %v1374_v27  ;;  %2103 = vmatpush.msrb.mxu0 %v1373_v47  ;;  %v1462_v27 = vld [vmem:[%s10127_s4 + $0x538] sm:$0xff] }
 0x2b4   :  { %2235 = vmatpush.msrb.mxu3 %v1502_v41  ;;  %2146 = vmatpush.msrb.mxu1 %v1509_v44  ;;  %v1454_v44 = vld [vmem:[%s10127_s4 + $0x4f8] sm:$0xff] }
 0x2b5   :  { %2192 = vmatpush.msrb.mxu2 %v1366_v46 }
 0x2b6   :  { %2236 = vmatpush.msrb.mxu3 %v1494_v48  ;;  %2147 = vmatpush.msrb.mxu1 %v1501_v59  ;;  %v1446_v59 = vld [vmem:[%s10127_s4 + $0x4b8] sm:$0xff] }
 0x2b7   :  { %1861 = vmatmul.f32.gmra.mxu2 %v6788_v51 }
 0x2b8   :  { %1773 = vmatmul.f32.gmra.mxu0 %v6788_v51  ;;  %2193 = vmatpush.msrb.mxu2 %v1358_v61  ;;  %v1453_v61 = vld [vmem:[%s10127_s4 + $0x4f0] sm:$0xff] }
 0x2b9   :  { %1902 = vmatmul.f32.gmra.mxu3 %v6746_v11  ;;  %1814 = vmatmul.f32.gmra.mxu1 %v6746_v11 }
 0x2ba   :  { %2237 = vmatpush.msrb.mxu3 %v1486_v0  ;;  %2194 = vmatpush.msrb.mxu2 %v1350_v5 }
 0x2bc   :  { %2238 = vmatpush.msrb.mxu3 %v1478_v18  ;;  %2195 = vmatpush.msrb.mxu2 %v1342_v21 }
 0x2be   :  { %2196 = vmatpush.msrb.mxu2 %v1334_v13 }
 0x2bf   :  { %1864 = vmatmul.f32.gmra.mxu2 %v6832_v2 }
 0x2c0   :  { %1776 = vmatmul.f32.gmra.mxu0 %v6832_v2  ;;  %2197 = vmatpush.msrb.mxu2 %v1326_v40 }
 0x2c1   :  { %1905 = vmatmul.f32.gmra.mxu3 %v6790_v52  ;;  %1817 = vmatmul.f32.gmra.mxu1 %v6790_v52 }
 0x2c7   :  { %1867 = vmatmul.f32.gmra.mxu2 %v6876_v23 }
 0x2c8   :  { %1779 = vmatmul.f32.gmra.mxu0 %v6876_v23 }
 0x2c9   :  { %1908 = vmatmul.f32.gmra.mxu3 %v6834_v4  ;;  %1820 = vmatmul.f32.gmra.mxu1 %v6834_v4 }
 0x2cd   :  { %v1586_v30 = vpop.f32.mrf.mxu0 }
 0x2ce   :  { %v1587_v63 = vadd.f32 %v1586_v30, %v7138_v56 }
 0x2cf   :  { %1870 = vmatmul.f32.gmra.mxu2 %v6905_v36 }
 0x2d0   :  { %1782 = vmatmul.f32.gmra.mxu0 %v6905_v36 }
 0x2d1   :  { %1911 = vmatmul.f32.gmra.mxu3 %v6878_v24  ;;  %1823 = vmatmul.f32.gmra.mxu1 %v6878_v24 }
 0x2d2   :  { %v1674_v7 = vpop.f32.mrf.mxu2 }
 0x2d3   :  { %v1675_v16 = vadd.f32 %v1674_v7, %v7143_v58 }
 0x2d5   :  { %v1589_v20 = vpop.f32.mrf.mxu0 }
 0x2d6   :  { %v1630_v6 = vpop.f32.mrf.mxu1  ;;  %v1590_v12 = vadd.f32 %v1589_v20, %v7138_v56 }
 0x2d7   :  { %v1631_v14 = vadd.f32 %v1630_v6, %v1587_v63  ;;  %1873 = vmatmul.f32.gmra.mxu2 %v6934_v42  ;;  %v1365_v63 = vld [vmem:[%s10127_s4 + $0x230] sm:$0xff] }
 0x2d8   :  { %1785 = vmatmul.f32.gmra.mxu0 %v6934_v42  ;;  %v1357_v6 = vld [vmem:[%s10127_s4 + $0x1f0] sm:$0xff] }
 0x2d9   :  { %1914 = vmatmul.f32.gmra.mxu3 %v6907_v60  ;;  %2273 = vst [vmem:[#allocation2] sm:$0xff] %v1631_v14  ;;  %1826 = vmatmul.f32.gmra.mxu1 %v6907_v60 }
 0x2da   :  { %v1677_v34 = vpop.f32.mrf.mxu2  ;;  %2104 = vmatpush.msrb.mxu0 %v1365_v63  ;;  %v1438_v63 = vld [vmem:[%s10127_s4 + $0x478] sm:$0xff] }
 0x2db   :  { %v1678_v38 = vadd.f32 %v1677_v34, %v7143_v58 }
 0x2dc   :  { %v1718_v15 = vpop.f32.mrf.mxu3  ;;  %2105 = vmatpush.msrb.mxu0 %v1357_v6 }
 0x2dd   :  { %v1719_v19 = vadd.f32 %v1718_v15, %v1675_v16  ;;  %v1592_v39 = vpop.f32.mrf.mxu0 }
 0x2de   :  { %v1633_v33 = vpop.f32.mrf.mxu1  ;;  %v1593_v45 = vadd.f32 %v1592_v39, %v7138_v56  ;;  %2106 = vmatpush.msrb.mxu0 %v1349_v22  ;;  %v1469_v39 = vld [vmem:[%s10127_s4 + $0x570] sm:$0xff] }
 0x2df   :  { %2274 = vst [vmem:[#allocation2 + $0x8] sm:$0xff] %v1719_v19  ;;  %v1634_v35 = vadd.f32 %v1633_v33, %v1590_v12  ;;  %2025 = vmatmul.f32.vlgmr.msra.gmra.mxu2 %v6612_v31  ;;  %v1485_v19 = vld [vmem:[%s10127_s4 + $0x5f0] sm:$0xff] }
 0x2e0   :  { %1937 = vmatmul.f32.vlgmr.msra.gmra.mxu0 %v6612_v31  ;;  %v1477_v12 = vld [vmem:[%s10127_s4 + $0x5b0] sm:$0xff] }
 0x2e1   :  { %1917 = vmatmul.f32.gmra.mxu3 %v6936_v43  ;;  %2281 = vst [vmem:[#allocation2 + $0x40] sm:$0xff] %v1634_v35  ;;  %1829 = vmatmul.f32.gmra.mxu1 %v6936_v43 }
 0x2e2   :  { %v1680_v50 = vpop.f32.mrf.mxu2 }
 0x2e3   :  { %v1681_v30 = vadd.f32 %v1680_v50, %v7143_v58 }
 0x2e4   :  { %v1721_v37 = vpop.f32.mrf.mxu3 }
 0x2e5   :  { %v1722_v28 = vadd.f32 %v1721_v37, %v1678_v38  ;;  %v1595_v31 = vpop.f32.mrf.mxu0  ;;  %v1341_v38 = vld [vmem:[%s10127_s4 + $0x170] sm:$0xff] }
 0x2e6   :  { %v1636_v49 = vpop.f32.mrf.mxu1  ;;  %v1596_v1 = vadd.f32 %v1595_v31, %v7138_v56  ;;  %2107 = vmatpush.msrb.mxu0 %v1341_v38  ;;  %v1317_v31 = vld [vmem:[%s10127_s4 + $0xb0] sm:$0xff] }
 0x2e7   :  { %2282 = vst [vmem:[#allocation2 + $0x48] sm:$0xff] %v1722_v28  ;;  %v1637_v54 = vadd.f32 %v1636_v49, %v1593_v45  ;;  %2028 = vmatmul.f32.gmra.mxu2 %v6656_v8  ;;  %v1461_v45 = vld [vmem:[%s10127_s4 + $0x530] sm:$0xff] }
 0x2e8   :  { %1940 = vmatmul.f32.gmra.mxu0 %v6656_v8 }
 0x2e9   :  { %2069 = vmatmul.f32.vlgmr.msra.gmra.mxu3 %v6614_v57  ;;  %2289 = vst [vmem:[#allocation2 + $0x80] sm:$0xff] %v1637_v54  ;;  %1981 = vmatmul.f32.vlgmr.msra.gmra.mxu1 %v6614_v57  ;;  %v1493_v57 = vld [vmem:[%s10127_s4 + $0x630] sm:$0xff]  ;;  %v1318_v54 = vld [vmem:[%s10127_s4 + $0xb8] sm:$0xff] }
 0x2ea   :  { %2148 = vmatpush.msrb.mxu1 %v1493_v57  ;;  %v1683_v14 = vpop.f32.mrf.mxu2  ;;  %2198 = vmatpush.msrb.mxu2 %v1318_v54 }
 0x2eb   :  { %v1684_v17 = vadd.f32 %v1683_v14, %v7143_v58  ;;  %v1302_v14 = vld [vmem:[%s10127_s4 + $0x38] sm:$0xff] }
 0x2ec   :  { %v1724_v55 = vpop.f32.mrf.mxu3  ;;  %2149 = vmatpush.msrb.mxu1 %v1485_v19  ;;  %v1301_v19 = vld [vmem:[%s10127_s4 + $0x30] sm:$0xff] }
 0x2ed   :  { %v1725_v62 = vadd.f32 %v1724_v55, %v1681_v30  ;;  %v1598_v8 = vpop.f32.mrf.mxu0  ;;  %v1325_v55 = vld [vmem:[%s10127_s4 + $0xf0] sm:$0xff] }
 0x2ee   :  { %v1639_v7 = vpop.f32.mrf.mxu1  ;;  %v1599_v25 = vadd.f32 %v1598_v8, %v7138_v56  ;;  %2150 = vmatpush.msrb.mxu1 %v1477_v12 }
 0x2ef   :  { %2290 = vst [vmem:[#allocation2 + $0x88] sm:$0xff] %v1725_v62  ;;  %v1640_v15 = vadd.f32 %v1639_v7, %v1596_v1  ;;  %2031 = vmatmul.f32.gmra.mxu2 %v6700_v26  ;;  %v1445_v7 = vld [vmem:[%s10127_s4 + $0x4b0] sm:$0xff] }
 0x2f0   :  { %1943 = vmatmul.f32.gmra.mxu0 %v6700_v26  ;;  %2151 = vmatpush.msrb.mxu1 %v1469_v39 }
 0x2f1   :  { %2072 = vmatmul.f32.gmra.mxu3 %v6658_v10  ;;  %2297 = vst [vmem:[#allocation2 + $0xc0] sm:$0xff] %v1640_v15  ;;  %1984 = vmatmul.f32.gmra.mxu1 %v6658_v10  ;;  %v1470_v10 = vld [vmem:[%s10127_s4 + $0x578] sm:$0xff] }
 0x2f2   :  { %2239 = vmatpush.msrb.mxu3 %v1470_v10  ;;  %v1686_v33 = vpop.f32.mrf.mxu2  ;;  %2152 = vmatpush.msrb.mxu1 %v1461_v45 }
 0x2f3   :  { %v1687_v37 = vadd.f32 %v1686_v33, %v7143_v58 }
 0x2f4   :  { %v1727_v16 = vpop.f32.mrf.mxu3  ;;  %2240 = vmatpush.msrb.mxu3 %v1462_v27  ;;  %2153 = vmatpush.msrb.mxu1 %v1453_v61  ;;  %v7368_v27 = vperm.slane %v7127_v53, 3 }
 0x2f5   :  { %v1728_v20 = vadd.f32 %v1727_v16, %v1684_v17  ;;  %v1601_v26 = vpop.f32.mrf.mxu0  ;;  %v1309_v16 = vld [vmem:[%s10127_s4 + $0x70] sm:$0xff]  ;;  %v1430_v17 = vld [vmem:[%s10127_s4 + $0x438] sm:$0xff] }
 0x2f6   :  { %v1642_v32 = vpop.f32.mrf.mxu1  ;;  %v1602_v41 = vadd.f32 %v1601_v26, %v7138_v56  ;;  %2241 = vmatpush.msrb.mxu3 %v1454_v44  ;;  %2154 = vmatpush.msrb.mxu1 %v1445_v7  ;;  %v4891_v7 = vld [vmem:[#allocation3 + $0x10] sm:$0xff] }
 0x2f7   :  { %2298 = vst [vmem:[#allocation2 + $0xc8] sm:$0xff] %v1728_v20  ;;  %v1643_v34 = vadd.f32 %v1642_v32, %v1599_v25  ;;  %2034 = vmatmul.f32.gmra.mxu2 %v6744_v9  ;;  %v1429_v25 = vld [vmem:[%s10127_s4 + $0x430] sm:$0xff] }
 0x2f8   :  { %1946 = vmatmul.f32.gmra.mxu0 %v6744_v9  ;;  %2242 = vmatpush.msrb.mxu3 %v1446_v59 }
 0x2f9   :  { %2075 = vmatmul.f32.gmra.mxu3 %v6702_v29  ;;  %2305 = vst [vmem:[#allocation2 + $0x100] sm:$0xff] %v1643_v34  ;;  %1987 = vmatmul.f32.gmra.mxu1 %v6702_v29  ;;  %v1333_v29 = vld [vmem:[%s10127_s4 + $0x130] sm:$0xff] }
 0x2fa   :  { %2108 = vmatpush.msrb.mxu0 %v1333_v29  ;;  %v1689_v47 = vpop.f32.mrf.mxu2  ;;  %2243 = vmatpush.msrb.mxu3 %v1438_v63 }
 0x2fb   :  { %v1690_v50 = vadd.f32 %v1689_v47, %v7143_v58 }
 0x2fc   :  { %v1730_v35 = vpop.f32.mrf.mxu3  ;;  %2109 = vmatpush.msrb.mxu0 %v1325_v55  ;;  %2244 = vmatpush.msrb.mxu3 %v1430_v17 }
 0x2fd   :  { %v1731_v28 = vadd.f32 %v1730_v35, %v1687_v37  ;;  %v1604_v9 = vpop.f32.mrf.mxu0 }
 0x2fe   :  { %v1645_v46 = vpop.f32.mrf.mxu1  ;;  %v1605_v62 = vadd.f32 %v1604_v9, %v7138_v56  ;;  %2110 = vmatpush.msrb.mxu0 %v1317_v31 }
 0x2ff   :  { %2306 = vst [vmem:[#allocation2 + $0x108] sm:$0xff] %v1731_v28  ;;  %v1646_v48 = vadd.f32 %v1645_v46, %v1602_v41  ;;  %2037 = vmatmul.f32.gmra.mxu2 %v6788_v51 }
 0x300   :  { %1949 = vmatmul.f32.gmra.mxu0 %v6788_v51 }
 0x301   :  { %2078 = vmatmul.f32.gmra.mxu3 %v6746_v11  ;;  %2313 = vst [vmem:[#allocation2 + $0x140] sm:$0xff] %v1646_v48  ;;  %1990 = vmatmul.f32.gmra.mxu1 %v6746_v11  ;;  %v1310_v11 = vld [vmem:[%s10127_s4 + $0x78] sm:$0xff]  ;;  %v4887_v48 = vld [vmem:[#allocation3] sm:$0xff] }
 0x302   :  { %2199 = vmatpush.msrb.mxu2 %v1310_v11  ;;  %v1692_v57 = vpop.f32.mrf.mxu2  ;;  %2111 = vmatpush.msrb.mxu0 %v1309_v16  ;;  %v4890_v11 = vld [vmem:[#allocation4 + $0x8] sm:$0xff] }
 0x303   :  { %v1693_v6 = vadd.f32 %v1692_v57, %v7143_v58 }
 0x304   :  { %v1733_v49 = vpop.f32.mrf.mxu3  ;;  %2200 = vmatpush.msrb.mxu2 %v1302_v14  ;;  %2112 = vmatpush.msrb.mxu0 %v1301_v19  ;;  %v4892_v14 = vld [vmem:[#allocation4 + $0x10] sm:$0xff] }
 0x305   :  { %v1734_v30 = vadd.f32 %v1733_v49, %v1690_v50  ;;  %v1607_v51 = vpop.f32.mrf.mxu0  ;;  %v4888_v49 = vld [vmem:[#allocation4] sm:$0xff] }
 0x306   :  { %v1648_v0 = vpop.f32.mrf.mxu1  ;;  %v1608_v18 = vadd.f32 %v1607_v51, %v7138_v56 }
 0x307   :  { %2314 = vst [vmem:[#allocation2 + $0x148] sm:$0xff] %v1734_v30  ;;  %v1649_v1 = vadd.f32 %v1648_v0, %v1605_v62  ;;  %2040 = vmatmul.f32.gmra.mxu2 %v6832_v2 }
 0x308   :  { %1952 = vmatmul.f32.gmra.mxu0 %v6832_v2 }
 0x309   :  { %2081 = vmatmul.f32.gmra.mxu3 %v6790_v52  ;;  %2321 = vst [vmem:[#allocation2 + $0x180] sm:$0xff] %v1649_v1  ;;  %1993 = vmatmul.f32.gmra.mxu1 %v6790_v52  ;;  %v1437_v52 = vld [vmem:[%s10127_s4 + $0x470] sm:$0xff]  ;;  %s7442_s4 = smov 0  }
 0x30a   :  { %2155 = vmatpush.msrb.mxu1 %v1437_v52  ;;  %v1695_v8 = vpop.f32.mrf.mxu2 }
 0x30b   :  { %v1696_v10 = vadd.f32 %v1695_v8, %v7143_v58  ;;  %v4893_v8 = vld [vmem:[#allocation3 + $0x18] sm:$0xff] }
 0x30c   :  { %v1736_v5 = vpop.f32.mrf.mxu3  ;;  %2156 = vmatpush.msrb.mxu1 %v1429_v25 }
 0x30d   :  { %v1737_v15 = vadd.f32 %v1736_v5, %v1693_v6  ;;  %v1610_v13 = vpop.f32.mrf.mxu0 }
 0x30e   :  { %v1651_v20 = vpop.f32.mrf.mxu1  ;;  %v1611_v2 = vadd.f32 %v1610_v13, %v7138_v56 }
 0x30f   :  { %2322 = vst [vmem:[#allocation2 + $0x188] sm:$0xff] %v1737_v15  ;;  %v1652_v21 = vadd.f32 %v1651_v20, %v1608_v18  ;;  %2043 = vmatmul.f32.gmra.mxu2 %v6876_v23 }
 0x310   :  { %1955 = vmatmul.f32.gmra.mxu0 %v6876_v23 }
 0x311   :  { %2084 = vmatmul.f32.gmra.mxu3 %v6834_v4  ;;  %2329 = vst [vmem:[#allocation2 + $0x1c0] sm:$0xff] %v1652_v21  ;;  %1996 = vmatmul.f32.gmra.mxu1 %v6834_v4  ;;  %v7363_v4 = vperm.slane %v7127_v53, 2  ;;  %v4894_v21 = vld [vmem:[#allocation4 + $0x18] sm:$0xff] }
 0x312   :  { %v1698_v33 = vpop.f32.mrf.mxu2 }
 0x313   :  { %v1699_v37 = vadd.f32 %v1698_v33, %v7143_v58 }
 0x314   :  { %v1739_v22 = vpop.f32.mrf.mxu3 }
 0x315   :  { %v1740_v12 = vadd.f32 %v1739_v22, %v1696_v10  ;;  %v1762_v56 = vpop.f32.mrf.mxu0 }
 0x316   :  { %v1654_v32 = vpop.f32.mrf.mxu1  ;;  %v1763_v23 = vadd.f32 %v1762_v56, %v7363_v4 }
 0x317   :  { %2330 = vst [vmem:[#allocation2 + $0x1c8] sm:$0xff] %v1740_v12  ;;  %v1655_v34 = vadd.f32 %v1654_v32, %v1611_v2  ;;  %2046 = vmatmul.f32.gmra.mxu2 %v6905_v36 }
 0x318   :  { %1958 = vmatmul.f32.gmra.mxu0 %v6905_v36 }
 0x319   :  { %2087 = vmatmul.f32.gmra.mxu3 %v6878_v24  ;;  %2337 = vst [vmem:[#allocation2 + $0x200] sm:$0xff] %v1655_v34  ;;  %1999 = vmatmul.f32.gmra.mxu1 %v6878_v24  ;;  %v4895_v34 = vld [vmem:[#allocation3 + $0x20] sm:$0xff] }
 0x31a   :  { %v1850_v58 = vpop.f32.mrf.mxu2 }
 0x31b   :  { %v1851_v24 = vadd.f32 %v1850_v58, %v7368_v27 }
 0x31c   :  { %v1742_v35 = vpop.f32.mrf.mxu3 }
 0x31d   :  { %v1743_v38 = vadd.f32 %v1742_v35, %v1699_v37  ;;  %v1765_v29 = vpop.f32.mrf.mxu0  ;;  %v4896_v35 = vld [vmem:[#allocation4 + $0x20] sm:$0xff] }
 0x31e   :  { %v1806_v28 = vpop.f32.mrf.mxu1  ;;  %v1766_v41 = vadd.f32 %v1765_v29, %v7363_v4 }
 0x31f   :  { %2338 = vst [vmem:[#allocation2 + $0x208] sm:$0xff] %v1743_v38  ;;  %v1807_v26 = vadd.f32 %v1806_v28, %v1763_v23  ;;  %2049 = vmatmul.f32.gmra.mxu2 %v6934_v42 }
 0x320   :  { %1961 = vmatmul.f32.gmra.mxu0 %v6934_v42 }
 0x321   :  { %2090 = vmatmul.f32.gmra.mxu3 %v6907_v60  ;;  %2275 = vst [vmem:[#allocation2 + $0x10] sm:$0xff] %v1807_v26  ;;  %2002 = vmatmul.f32.gmra.mxu1 %v6907_v60 }
 0x322   :  { %v1853_v45 = vpop.f32.mrf.mxu2 }
 0x323   :  { %v1854_v36 = vadd.f32 %v1853_v45, %v7368_v27 }
 0x324   :  { %v1894_v39 = vpop.f32.mrf.mxu3 }
 0x325   :  { %v1895_v40 = vadd.f32 %v1894_v39, %v1851_v24  ;;  %v1768_v50 = vpop.f32.mrf.mxu0  ;;  %v4897_v24 = vld [vmem:[#allocation3 + $0x28] sm:$0xff] }
 0x326   :  { %v1809_v44 = vpop.f32.mrf.mxu1  ;;  %v1769_v54 = vadd.f32 %v1768_v50, %v7363_v4 }
 0x327   :  { %2276 = vst [vmem:[#allocation2 + $0x18] sm:$0xff] %v1895_v40  ;;  %v1810_v46 = vadd.f32 %v1809_v44, %v1766_v41  ;;  %2201 = vmatmul.f32.vlgmr.msrb.gmra.mxu2 %v4887_v48  ;;  %v4898_v40 = vld [vmem:[#allocation4 + $0x28] sm:$0xff] }
 0x328   :  { %2113 = vmatmul.f32.vlgmr.msrb.gmra.mxu0 %v4887_v48  ;;  %v4899_v48 = vld [vmem:[#allocation3 + $0x30] sm:$0xff] }
 0x329   :  { %2093 = vmatmul.f32.gmra.mxu3 %v6936_v43  ;;  %2283 = vst [vmem:[#allocation2 + $0x50] sm:$0xff] %v1810_v46  ;;  %2005 = vmatmul.f32.gmra.mxu1 %v6936_v43  ;;  %v4889_v43 = vld [vmem:[#allocation3 + $0x8] sm:$0xff] }
 0x32a   :  { %v1856_v30 = vpop.f32.mrf.mxu2 }
 0x32b   :  { %v1857_v42 = vadd.f32 %v1856_v30, %v7368_v27 }
 0x32c   :  { %v1897_v47 = vpop.f32.mrf.mxu3 }
 0x32d   :  { %v1898_v60 = vadd.f32 %v1897_v47, %v1854_v36  ;;  %v1771_v62 = vpop.f32.mrf.mxu0 }
 0x32e   :  { %v1812_v55 = vpop.f32.mrf.mxu1  ;;  %v1772_v31 = vadd.f32 %v1771_v62, %v7363_v4  ;;  %v4902_v62 = vld [vmem:[#allocation4 + $0x38] sm:$0xff] }
 0x32f   :  { %2284 = vst [vmem:[#allocation2 + $0x58] sm:$0xff] %v1898_v60  ;;  %v1813_v9 = vadd.f32 %v1812_v55, %v1769_v54  ;;  %2204 = vmatmul.f32.gmra.mxu2 %v4889_v43 }
 0x330   :  { %2116 = vmatmul.f32.gmra.mxu0 %v4889_v43 }
 0x331   :  { %2245 = vmatmul.f32.vlgmr.msrb.gmra.mxu3 %v4888_v49  ;;  %2291 = vst [vmem:[#allocation2 + $0x90] sm:$0xff] %v1813_v9  ;;  %2157 = vmatmul.f32.vlgmr.msrb.gmra.mxu1 %v4888_v49  ;;  %v4900_v49 = vld [vmem:[#allocation4 + $0x30] sm:$0xff] }
 0x332   :  { %v1859_v0 = vpop.f32.mrf.mxu2 }
 0x333   :  { %v1860_v5 = vadd.f32 %v1859_v0, %v7368_v27 }
 0x334   :  { %v1900_v59 = vpop.f32.mrf.mxu3 }
 0x335   :  { %v1901_v61 = vadd.f32 %v1900_v59, %v1857_v42  ;;  %v1774_v15 = vpop.f32.mrf.mxu0 }
 0x336   :  { %v1815_v63 = vpop.f32.mrf.mxu1  ;;  %v1775_v51 = vadd.f32 %v1774_v15, %v7363_v4 }
 0x337   :  { %2292 = vst [vmem:[#allocation2 + $0x98] sm:$0xff] %v1901_v61  ;;  %v1816_v57 = vadd.f32 %v1815_v63, %v1772_v31  ;;  %2207 = vmatmul.f32.gmra.mxu2 %v4891_v7  ;;  %v7395_v61 = vperm.slane %v7127_v53, 4 }
 0x338   :  { %2119 = vmatmul.f32.gmra.mxu0 %v4891_v7  ;;  %v4903_v7 = vld [vmem:[#allocation3 + $0x40] sm:$0xff] }
 0x339   :  { %2248 = vmatmul.f32.gmra.mxu3 %v4890_v11  ;;  %2299 = vst [vmem:[#allocation2 + $0xd0] sm:$0xff] %v1816_v57  ;;  %2160 = vmatmul.f32.gmra.mxu1 %v4890_v11  ;;  %v4901_v11 = vld [vmem:[#allocation3 + $0x38] sm:$0xff] }
 0x33a   :  { %v1862_v17 = vpop.f32.mrf.mxu2 }
 0x33b   :  { %v1863_v19 = vadd.f32 %v1862_v17, %v7368_v27 }
 0x33c   :  { %v1903_v1 = vpop.f32.mrf.mxu3 }
 0x33d   :  { %v1904_v6 = vadd.f32 %v1903_v1, %v1860_v5  ;;  %v1777_v22 = vpop.f32.mrf.mxu0 }
 0x33e   :  { %v1818_v16 = vpop.f32.mrf.mxu1  ;;  %v1778_v10 = vadd.f32 %v1777_v22, %v7363_v4 }
 0x33f   :  { %2300 = vst [vmem:[#allocation2 + $0xd8] sm:$0xff] %v1904_v6  ;;  %v1819_v52 = vadd.f32 %v1818_v16, %v1775_v51  ;;  %2210 = vmatmul.f32.gmra.mxu2 %v4893_v8 }
 0x340   :  { %2122 = vmatmul.f32.gmra.mxu0 %v4893_v8 }
 0x341   :  { %2251 = vmatmul.f32.gmra.mxu3 %v4892_v14  ;;  %2307 = vst [vmem:[#allocation2 + $0x110] sm:$0xff] %v1819_v52  ;;  %2163 = vmatmul.f32.gmra.mxu1 %v4892_v14  ;;  %v4904_v14 = vld [vmem:[#allocation4 + $0x40] sm:$0xff] }
 0x342   :  { %v1865_v12 = vpop.f32.mrf.mxu2 }
 0x343   :  { %v1866_v32 = vadd.f32 %v1865_v12, %v7368_v27 }
 0x344   :  { %v1906_v18 = vpop.f32.mrf.mxu3 }
 0x345   :  { %v1907_v20 = vadd.f32 %v1906_v18, %v1863_v19  ;;  %v1780_v37 = vpop.f32.mrf.mxu0 }
 0x346   :  { %v1821_v25 = vpop.f32.mrf.mxu1  ;;  %v1781_v38 = vadd.f32 %v1780_v37, %v7363_v4 }
 0x347   :  { %2308 = vst [vmem:[#allocation2 + $0x118] sm:$0xff] %v1907_v20  ;;  %v1822_v13 = vadd.f32 %v1821_v25, %v1778_v10  ;;  %2213 = vmatmul.f32.gmra.mxu2 %v4895_v34 }
 0x348   :  { %2125 = vmatmul.f32.gmra.mxu0 %v4895_v34 }
 0x349   :  { %2254 = vmatmul.f32.gmra.mxu3 %v4894_v21  ;;  %2315 = vst [vmem:[#allocation2 + $0x150] sm:$0xff] %v1822_v13  ;;  %2166 = vmatmul.f32.gmra.mxu1 %v4894_v21 }
 0x34a   :  { %v1868_v23 = vpop.f32.mrf.mxu2 }
 0x34b   :  { %v1869_v26 = vadd.f32 %v1868_v23, %v7368_v27 }
 0x34c   :  { %v1909_v2 = vpop.f32.mrf.mxu3 }
 0x34d   :  { %v1910_v33 = vadd.f32 %v1909_v2, %v1866_v32  ;;  %v1783_v29 = vpop.f32.mrf.mxu0 }
 0x34e   :  { %v1824_v56 = vpop.f32.mrf.mxu1  ;;  %v1784_v41 = vadd.f32 %v1783_v29, %v7363_v4 }
 0x34f   :  { %2316 = vst [vmem:[#allocation2 + $0x158] sm:$0xff] %v1910_v33  ;;  %v1825_v28 = vadd.f32 %v1824_v56, %v1781_v38  ;;  %2216 = vmatmul.f32.gmra.mxu2 %v4897_v24 }
 0x350   :  { %2128 = vmatmul.f32.gmra.mxu0 %v4897_v24 }
 0x351   :  { %2257 = vmatmul.f32.gmra.mxu3 %v4896_v35  ;;  %2323 = vst [vmem:[#allocation2 + $0x190] sm:$0xff] %v1825_v28  ;;  %2169 = vmatmul.f32.gmra.mxu1 %v4896_v35 }
 0x352   :  { %v1871_v45 = vpop.f32.mrf.mxu2 }
 0x353   :  { %v1872_v36 = vadd.f32 %v1871_v45, %v7368_v27 }
 0x354   :  { %v1912_v58 = vpop.f32.mrf.mxu3 }
 0x355   :  { %v1913_v39 = vadd.f32 %v1912_v58, %v1869_v26  ;;  %v1786_v50 = vpop.f32.mrf.mxu0 }
 0x356   :  { %v1827_v44 = vpop.f32.mrf.mxu1  ;;  %v1787_v54 = vadd.f32 %v1786_v50, %v7363_v4  ;;  %v7398_v4 = vperm.slane %v7127_v53, 5 }
 0x357   :  { %2324 = vst [vmem:[#allocation2 + $0x198] sm:$0xff] %v1913_v39  ;;  %v1828_v46 = vadd.f32 %v1827_v44, %v1784_v41  ;;  %2219 = vmatmul.f32.gmra.mxu2 %v4899_v48 }
 0x358   :  { %2131 = vmatmul.f32.gmra.mxu0 %v4899_v48 }
 0x359   :  { %2260 = vmatmul.f32.gmra.mxu3 %v4898_v40  ;;  %2331 = vst [vmem:[#allocation2 + $0x1d0] sm:$0xff] %v1828_v46  ;;  %2172 = vmatmul.f32.gmra.mxu1 %v4898_v40 }
 0x35a   :  { %v1874_v30 = vpop.f32.mrf.mxu2 }
 0x35b   :  { %v1875_v42 = vadd.f32 %v1874_v30, %v7368_v27 }
 0x35c   :  { %v1915_v47 = vpop.f32.mrf.mxu3 }
 0x35d   :  { %v1916_v60 = vadd.f32 %v1915_v47, %v1872_v36  ;;  %v1938_v31 = vpop.f32.mrf.mxu0 }
 0x35e   :  { %v1830_v55 = vpop.f32.mrf.mxu1  ;;  %v1939_v63 = vadd.f32 %v1938_v31, %v7395_v61 }
 0x35f   :  { %2332 = vst [vmem:[#allocation2 + $0x1d8] sm:$0xff] %v1916_v60  ;;  %v1831_v9 = vadd.f32 %v1830_v55, %v1787_v54  ;;  %2222 = vmatmul.f32.gmra.mxu2 %v4901_v11 }
 0x360   :  { %2134 = vmatmul.f32.gmra.mxu0 %v4901_v11 }
 0x361   :  { %2263 = vmatmul.f32.gmra.mxu3 %v4900_v49  ;;  %2339 = vst [vmem:[#allocation2 + $0x210] sm:$0xff] %v1831_v9  ;;  %2175 = vmatmul.f32.gmra.mxu1 %v4900_v49 }
 0x362   :  { %v2026_v57 = vpop.f32.mrf.mxu2 }
 0x363   :  { %v2027_v5 = vadd.f32 %v2026_v57, %v7398_v4 }
 0x364   :  { %v1918_v59 = vpop.f32.mrf.mxu3 }
 0x365   :  { %v1919_v43 = vadd.f32 %v1918_v59, %v1875_v42  ;;  %v1941_v15 = vpop.f32.mrf.mxu0 }
 0x366   :  { %v1982_v0 = vpop.f32.mrf.mxu1  ;;  %v1942_v51 = vadd.f32 %v1941_v15, %v7395_v61 }
 0x367   :  { %2340 = vst [vmem:[#allocation2 + $0x218] sm:$0xff] %v1919_v43  ;;  %v1983_v27 = vadd.f32 %v1982_v0, %v1939_v63  ;;  %2225 = vmatmul.f32.gmra.mxu2 %v4903_v7 }
 0x368   :  { %2137 = vmatmul.f32.gmra.mxu0 %v4903_v7 }
 0x369   :  { %2266 = vmatmul.f32.gmra.mxu3 %v4902_v62  ;;  %2277 = vst [vmem:[#allocation2 + $0x20] sm:$0xff] %v1983_v27  ;;  %2178 = vmatmul.f32.gmra.mxu1 %v4902_v62 }
 0x36a   :  { %v2029_v17 = vpop.f32.mrf.mxu2 }
 0x36b   :  { %v2030_v19 = vadd.f32 %v2029_v17, %v7398_v4  ;;  %v7419_v17 = vperm.slane %v7127_v53, 6 }
 0x36c   :  { %v2070_v1 = vpop.f32.mrf.mxu3 }
 0x36d   :  { %v2071_v6 = vadd.f32 %v2070_v1, %v2027_v5  ;;  %v1944_v8 = vpop.f32.mrf.mxu0 }
 0x36e   :  { %v1985_v16 = vpop.f32.mrf.mxu1  ;;  %v1945_v21 = vadd.f32 %v1944_v8, %v7395_v61 }
 0x36f   :  { %2278 = vst [vmem:[#allocation2 + $0x28] sm:$0xff] %v2071_v6  ;;  %v1986_v52 = vadd.f32 %v1985_v16, %v1942_v51 }
 0x371   :  { %2269 = vmatmul.f32.gmra.mxu3 %v4904_v14  ;;  %2285 = vst [vmem:[#allocation2 + $0x60] sm:$0xff] %v1986_v52  ;;  %2181 = vmatmul.f32.gmra.mxu1 %v4904_v14 }
 0x372   :  { %v2032_v10 = vpop.f32.mrf.mxu2 }
 0x373   :  { %v2033_v13 = vadd.f32 %v2032_v10, %v7398_v4 }
 0x374   :  { %v2073_v18 = vpop.f32.mrf.mxu3 }
 0x375   :  { %v2074_v20 = vadd.f32 %v2073_v18, %v2030_v19  ;;  %v1947_v32 = vpop.f32.mrf.mxu0  ;;  %v7422_v19 = vperm.slane %v7127_v53, 7 }
 0x376   :  { %v1988_v22 = vpop.f32.mrf.mxu1  ;;  %v1948_v33 = vadd.f32 %v1947_v32, %v7395_v61 }
 0x377   :  { %2286 = vst [vmem:[#allocation2 + $0x68] sm:$0xff] %v2074_v20  ;;  %v1989_v25 = vadd.f32 %v1988_v22, %v1945_v21 }
 0x379   :  { %2293 = vst [vmem:[#allocation2 + $0xa0] sm:$0xff] %v1989_v25 }
 0x37a   :  { %v2035_v35 = vpop.f32.mrf.mxu2 }
 0x37b   :  { %v2036_v56 = vadd.f32 %v2035_v35, %v7398_v4 }
 0x37c   :  { %v2076_v12 = vpop.f32.mrf.mxu3 }
 0x37d   :  { %v2077_v2 = vadd.f32 %v2076_v12, %v2033_v13  ;;  %v1950_v28 = vpop.f32.mrf.mxu0 }
 0x37e   :  { %v1991_v34 = vpop.f32.mrf.mxu1  ;;  %v1951_v58 = vadd.f32 %v1950_v28, %v7395_v61 }
 0x37f   :  { %2294 = vst [vmem:[#allocation2 + $0xa8] sm:$0xff] %v2077_v2  ;;  %v1992_v37 = vadd.f32 %v1991_v34, %v1948_v33 }
 0x381   :  { %2301 = vst [vmem:[#allocation2 + $0xe0] sm:$0xff] %v1992_v37 }
 0x382   :  { %v2038_v39 = vpop.f32.mrf.mxu2 }
 0x383   :  { %v2039_v29 = vadd.f32 %v2038_v39, %v7398_v4 }
 0x384   :  { %v2079_v38 = vpop.f32.mrf.mxu3 }
 0x385   :  { %v2080_v23 = vadd.f32 %v2079_v38, %v2036_v56  ;;  %v1953_v44 = vpop.f32.mrf.mxu0 }
 0x386   :  { %v1994_v26 = vpop.f32.mrf.mxu1  ;;  %v1954_v45 = vadd.f32 %v1953_v44, %v7395_v61 }
 0x387   :  { %2302 = vst [vmem:[#allocation2 + $0xe8] sm:$0xff] %v2080_v23  ;;  %v1995_v24 = vadd.f32 %v1994_v26, %v1951_v58 }
 0x389   :  { %2309 = vst [vmem:[#allocation2 + $0x120] sm:$0xff] %v1995_v24 }
 0x38a   :  { %v2041_v47 = vpop.f32.mrf.mxu2 }
 0x38b   :  { %v2042_v48 = vadd.f32 %v2041_v47, %v7398_v4 }
 0x38c   :  { %v2082_v40 = vpop.f32.mrf.mxu3 }
 0x38d   :  { %v2083_v41 = vadd.f32 %v2082_v40, %v2039_v29  ;;  %v1956_v50 = vpop.f32.mrf.mxu0 }
 0x38e   :  { %v1997_v46 = vpop.f32.mrf.mxu1  ;;  %v1957_v54 = vadd.f32 %v1956_v50, %v7395_v61 }
 0x38f   :  { %2310 = vst [vmem:[#allocation2 + $0x128] sm:$0xff] %v2083_v41  ;;  %v1998_v36 = vadd.f32 %v1997_v46, %v1954_v45 }
 0x391   :  { %2317 = vst [vmem:[#allocation2 + $0x160] sm:$0xff] %v1998_v36 }
 0x392   :  { %v2044_v30 = vpop.f32.mrf.mxu2 }
 0x393   :  { %v2045_v42 = vadd.f32 %v2044_v30, %v7398_v4 }
 0x394   :  { %v2085_v60 = vpop.f32.mrf.mxu3 }
 0x395   :  { %v2086_v49 = vadd.f32 %v2085_v60, %v2042_v48  ;;  %v1959_v11 = vpop.f32.mrf.mxu0 }
 0x396   :  { %v2000_v55 = vpop.f32.mrf.mxu1  ;;  %v1960_v62 = vadd.f32 %v1959_v11, %v7395_v61 }
 0x397   :  { %2318 = vst [vmem:[#allocation2 + $0x168] sm:$0xff] %v2086_v49  ;;  %v2001_v9 = vadd.f32 %v2000_v55, %v1957_v54 }
 0x399   :  { %2325 = vst [vmem:[#allocation2 + $0x1a0] sm:$0xff] %v2001_v9 }
 0x39a   :  { %v2047_v63 = vpop.f32.mrf.mxu2 }
 0x39b   :  { %v2048_v27 = vadd.f32 %v2047_v63, %v7398_v4 }
 0x39c   :  { %v2088_v59 = vpop.f32.mrf.mxu3 }
 0x39d   :  { %v2089_v43 = vadd.f32 %v2088_v59, %v2045_v42  ;;  %v1962_v5 = vpop.f32.mrf.mxu0 }
 0x39e   :  { %v2003_v31 = vpop.f32.mrf.mxu1  ;;  %v1963_v6 = vadd.f32 %v1962_v5, %v7395_v61 }
 0x39f   :  { %2326 = vst [vmem:[#allocation2 + $0x1a8] sm:$0xff] %v2089_v43  ;;  %v2004_v0 = vadd.f32 %v2003_v31, %v1960_v62 }
 0x3a1   :  { %2333 = vst [vmem:[#allocation2 + $0x1e0] sm:$0xff] %v2004_v0 }
 0x3a2   :  { %v2050_v14 = vpop.f32.mrf.mxu2 }
 0x3a3   :  { %v2051_v16 = vadd.f32 %v2050_v14, %v7398_v4 }
 0x3a4   :  { %v2091_v57 = vpop.f32.mrf.mxu3 }
 0x3a5   :  { %v2092_v1 = vadd.f32 %v2091_v57, %v2048_v27  ;;  %v2114_v18 = vpop.f32.mrf.mxu0 }
 0x3a6   :  { %v2006_v7 = vpop.f32.mrf.mxu1  ;;  %v2115_v20 = vadd.f32 %v2114_v18, %v7419_v17 }
 0x3a7   :  { %2334 = vst [vmem:[#allocation2 + $0x1e8] sm:$0xff] %v2092_v1  ;;  %v2007_v15 = vadd.f32 %v2006_v7, %v1963_v6 }
 0x3a9   :  { %2341 = vst [vmem:[#allocation2 + $0x220] sm:$0xff] %v2007_v15 }
 0x3aa   :  { %v2202_v61 = vpop.f32.mrf.mxu2 }
 0x3ab   :  { %v2203_v10 = vadd.f32 %v2202_v61, %v7422_v19 }
 0x3ac   :  { %v2094_v51 = vpop.f32.mrf.mxu3 }
 0x3ad   :  { %v2095_v52 = vadd.f32 %v2094_v51, %v2051_v16  ;;  %v2117_v25 = vpop.f32.mrf.mxu0 }
 0x3ae   :  { %v2158_v8 = vpop.f32.mrf.mxu1  ;;  %v2118_v12 = vadd.f32 %v2117_v25, %v7419_v17 }
 0x3af   :  { %2342 = vst [vmem:[#allocation2 + $0x228] sm:$0xff] %v2095_v52  ;;  %v2159_v21 = vadd.f32 %v2158_v8, %v2115_v20 }
 0x3b1   :  { %2279 = vst [vmem:[#allocation2 + $0x30] sm:$0xff] %v2159_v21 }
 0x3b2   :  { %v2205_v2 = vpop.f32.mrf.mxu2 }
 0x3b3   :  { %v2206_v53 = vadd.f32 %v2205_v2, %v7422_v19 }
 0x3b4   :  { %v2246_v22 = vpop.f32.mrf.mxu3 }
 0x3b5   :  { %v2247_v4 = vadd.f32 %v2246_v22, %v2203_v10  ;;  %v2120_v35 = vpop.f32.mrf.mxu0 }
 0x3b6   :  { %v2161_v13 = vpop.f32.mrf.mxu1  ;;  %v2121_v37 = vadd.f32 %v2120_v35, %v7419_v17 }
 0x3b7   :  { %2280 = vst [vmem:[#allocation2 + $0x38] sm:$0xff] %v2247_v4  ;;  %v2162_v32 = vadd.f32 %v2161_v13, %v2118_v12 }
 0x3b9   :  { %2287 = vst [vmem:[#allocation2 + $0x70] sm:$0xff] %v2162_v32 }
 0x3ba   :  { %v2208_v56 = vpop.f32.mrf.mxu2 }
 0x3bb   :  { %v2209_v58 = vadd.f32 %v2208_v56, %v7422_v19 }
 0x3bc   :  { %v2249_v33 = vpop.f32.mrf.mxu3 }
 0x3bd   :  { %v2250_v34 = vadd.f32 %v2249_v33, %v2206_v53  ;;  %v2123_v39 = vpop.f32.mrf.mxu0 }
 0x3be   :  { %v2164_v38 = vpop.f32.mrf.mxu1  ;;  %v2124_v24 = vadd.f32 %v2123_v39, %v7419_v17 }
 0x3bf   :  { %2288 = vst [vmem:[#allocation2 + $0x78] sm:$0xff] %v2250_v34  ;;  %v2165_v23 = vadd.f32 %v2164_v38, %v2121_v37 }
 0x3c1   :  { %2295 = vst [vmem:[#allocation2 + $0xb0] sm:$0xff] %v2165_v23 }
 0x3c2   :  { %v2211_v29 = vpop.f32.mrf.mxu2 }
 0x3c3   :  { %v2212_v45 = vadd.f32 %v2211_v29, %v7422_v19 }
 0x3c4   :  { %v2252_v28 = vpop.f32.mrf.mxu3 }
 0x3c5   :  { %v2253_v26 = vadd.f32 %v2252_v28, %v2209_v58  ;;  %v2126_v47 = vpop.f32.mrf.mxu0 }
 0x3c6   :  { %v2167_v40 = vpop.f32.mrf.mxu1  ;;  %v2127_v36 = vadd.f32 %v2126_v47, %v7419_v17 }
 0x3c7   :  { %2296 = vst [vmem:[#allocation2 + $0xb8] sm:$0xff] %v2253_v26  ;;  %v2168_v41 = vadd.f32 %v2167_v40, %v2124_v24 }
 0x3c9   :  { %2303 = vst [vmem:[#allocation2 + $0xf0] sm:$0xff] %v2168_v41 }
 0x3ca   :  { %v2214_v48 = vpop.f32.mrf.mxu2 }
 0x3cb   :  { %v2215_v54 = vadd.f32 %v2214_v48, %v7422_v19 }
 0x3cc   :  { %v2255_v44 = vpop.f32.mrf.mxu3 }
 0x3cd   :  { %v2256_v46 = vadd.f32 %v2255_v44, %v2212_v45  ;;  %v2129_v30 = vpop.f32.mrf.mxu0 }
 0x3ce   :  { %v2170_v60 = vpop.f32.mrf.mxu1  ;;  %v2130_v9 = vadd.f32 %v2129_v30, %v7419_v17 }
 0x3cf   :  { %2304 = vst [vmem:[#allocation2 + $0xf8] sm:$0xff] %v2256_v46  ;;  %v2171_v49 = vadd.f32 %v2170_v60, %v2127_v36 }
 0x3d1   :  { %2311 = vst [vmem:[#allocation2 + $0x130] sm:$0xff] %v2171_v49 }
 0x3d2   :  { %v2217_v42 = vpop.f32.mrf.mxu2 }
 0x3d3   :  { %v2218_v62 = vadd.f32 %v2217_v42, %v7422_v19 }
 0x3d4   :  { %v2258_v50 = vpop.f32.mrf.mxu3 }
 0x3d5   :  { %v2259_v55 = vadd.f32 %v2258_v50, %v2215_v54  ;;  %v2132_v63 = vpop.f32.mrf.mxu0 }
 0x3d6   :  { %v2173_v59 = vpop.f32.mrf.mxu1  ;;  %v2133_v0 = vadd.f32 %v2132_v63, %v7419_v17 }
 0x3d7   :  { %2312 = vst [vmem:[#allocation2 + $0x138] sm:$0xff] %v2259_v55  ;;  %v2174_v43 = vadd.f32 %v2173_v59, %v2130_v9 }
 0x3d9   :  { %2319 = vst [vmem:[#allocation2 + $0x170] sm:$0xff] %v2174_v43 }
 0x3da   :  { %v2220_v27 = vpop.f32.mrf.mxu2 }
 0x3db   :  { %v2221_v6 = vadd.f32 %v2220_v27, %v7422_v19 }
 0x3dc   :  { %v2261_v11 = vpop.f32.mrf.mxu3 }
 0x3dd   :  { %v2262_v31 = vadd.f32 %v2261_v11, %v2218_v62  ;;  %v2135_v14 = vpop.f32.mrf.mxu0 }
 0x3de   :  { %v2176_v57 = vpop.f32.mrf.mxu1  ;;  %v2136_v15 = vadd.f32 %v2135_v14, %v7419_v17 }
 0x3df   :  { %2320 = vst [vmem:[#allocation2 + $0x178] sm:$0xff] %v2262_v31  ;;  %v2177_v1 = vadd.f32 %v2176_v57, %v2133_v0 }
 0x3e1   :  { %2327 = vst [vmem:[#allocation2 + $0x1b0] sm:$0xff] %v2177_v1 }
 0x3e2   :  { %v2223_v16 = vpop.f32.mrf.mxu2 }
 0x3e3   :  { %v2224_v20 = vadd.f32 %v2223_v16, %v7422_v19 }
 0x3e4   :  { %v2264_v5 = vpop.f32.mrf.mxu3 }
 0x3e5   :  { %v2265_v7 = vadd.f32 %v2264_v5, %v2221_v6  ;;  %v2138_v61 = vpop.f32.mrf.mxu0 }
 0x3e6   :  { %v2179_v51 = vpop.f32.mrf.mxu1  ;;  %v2139_v21 = vadd.f32 %v2138_v61, %v7419_v17 }
 0x3e7   :  { %2328 = vst [vmem:[#allocation2 + $0x1b8] sm:$0xff] %v2265_v7  ;;  %v2180_v52 = vadd.f32 %v2179_v51, %v2136_v15 }
 0x3e9   :  { %2335 = vst [vmem:[#allocation2 + $0x1f0] sm:$0xff] %v2180_v52 }
 0x3ea   :  { %v2226_v10 = vpop.f32.mrf.mxu2 }
 0x3eb   :  { %v2227_v12 = vadd.f32 %v2226_v10, %v7422_v19 }
 0x3ec   :  { %v2267_v18 = vpop.f32.mrf.mxu3 }
 0x3ed   :  { %v2268_v8 = vadd.f32 %v2267_v18, %v2224_v20 }
 0x3ee   :  { %v2182_v22 = vpop.f32.mrf.mxu1 }
 0x3ef   :  { %2336 = vst [vmem:[#allocation2 + $0x1f8] sm:$0xff] %v2268_v8  ;;  %v2183_v4 = vadd.f32 %v2182_v22, %v2139_v21 }
 0x3f1   :  { %2343 = vst [vmem:[#allocation2 + $0x230] sm:$0xff] %v2183_v4 }
 0x3f4   :  { %v2270_v25 = vpop.f32.mrf.mxu3 }
 0x3f5   :  { %v2271_v13 = vadd.f32 %v2270_v25, %v2227_v12 }
 0x3f7   :  { %2344 = vst [vmem:[#allocation2 + $0x238] sm:$0xff] %v2271_v13 }
 0x3f8 LB: > { %v2480_v17 = vld [vmem:[%s10128_s5 + $0x3c0] sm:$0xff]  ;;  %v2481_v19 = vld [vmem:[%s10128_s5 + $0x3c8] sm:$0xff]  ;;  %s4824_s17 = sshll.u32 %s4981_s4, 3  ;;  %s2355_s21 = ssub.s32 8, %s4981_s4  ;;  %s4981_s4 = sphi %s7442_s4, %s2354_s4  }
 0x3f9   : > { %v2608_v2 = vld [vmem:[%s10128_s5 + $0x7c0] sm:$0xff]  ;;  %2616 = vmatpush.msra.mxu0 %v2480_v17  ;;  %v2609_v32 = vld [vmem:[%s10128_s5 + $0x7c8] sm:$0xff]  ;;  %2656 = vmatpush.msra.mxu2 %v2481_v19  ;;  %v2610_v19 = vld [vmem:[%s10128_s5 + $0x7d0] sm:$0xff]  ;;  %s2936_s18 = sshra.s32 %s4824_s17, 3  ;;  %s3004_s20 = scalar_lea.vmem [#allocation3], %s4824_s17 }
 0x3fa   : > { %2636 = vmatpush.msra.mxu1 %v2608_v2  ;;  %v2472_v33 = vld [vmem:[%s10128_s5 + $0x380] sm:$0xff]  ;;  %2676 = vmatpush.msra.mxu3 %v2609_v32  ;;  %v2473_v34 = vld [vmem:[%s10128_s5 + $0x388] sm:$0xff]  ;;  %v2482_v2 = vld [vmem:[%s10128_s5 + $0x3d0] sm:$0xff]  ;;  %s4838_s19 = sshll.u32 %s2936_s18, 6  ;;  %s8241_s22 = sshll.u32 %s2355_s21, 3 }
 0x3fb   : > { %v2600_v53 = vld [vmem:[%s10128_s5 + $0x780] sm:$0xff]  ;;  %v2601_v35 = vld [vmem:[%s10128_s5 + $0x788] sm:$0xff]  ;;  %2617 = vmatpush.msra.mxu0 %v2472_v33  ;;  %2657 = vmatpush.msra.mxu2 %v2473_v34  ;;  %v2483_v32 = vld [vmem:[%s10128_s5 + $0x3d8] sm:$0xff]  ;;  %s2940_s6 = scalar_lea.vmem [#allocation2], %s4838_s19  ;;  %s2949_s23 = sshra.s32 %s8241_s22, 3 }
 0x3fc   : > { %v2464_v37 = vld [vmem:[%s10128_s5 + $0x340] sm:$0xff]  ;;  %2637 = vmatpush.msra.mxu1 %v2600_v53  ;;  %v2465_v56 = vld [vmem:[%s10128_s5 + $0x348] sm:$0xff]  ;;  %2677 = vmatpush.msra.mxu3 %v2601_v35  ;;  %v2611_v33 = vld [vmem:[%s10128_s5 + $0x7d8] sm:$0xff]  ;;  %s4839_s24 = sshll.u32 %s2949_s23, 6  ;;  %s3006_s25 = scalar_lea.vmem [#allocation4], %s8241_s22 }
 0x3fd   : > { %v2592_v38 = vld [vmem:[%s10128_s5 + $0x740] sm:$0xff]  ;;  %v2593_v23 = vld [vmem:[%s10128_s5 + $0x748] sm:$0xff]  ;;  %2618 = vmatpush.msra.mxu0 %v2464_v37  ;;  %2658 = vmatpush.msra.mxu2 %v2465_v56  ;;  %v2474_v53 = vld [vmem:[%s10128_s5 + $0x390] sm:$0xff]  ;;  %s2953_s1 = scalar_lea.vmem [#allocation2], %s4839_s24  ;;  %s2354_s4 = sadd.s32 1, %s4981_s4  }
 0x3fe   : > { %v2456_v28 = vld [vmem:[%s10128_s5 + $0x300] sm:$0xff]  ;;  %2638 = vmatpush.msra.mxu1 %v2592_v38  ;;  %v2457_v26 = vld [vmem:[%s10128_s5 + $0x308] sm:$0xff]  ;;  %2678 = vmatpush.msra.mxu3 %v2593_v23  ;;  %v2602_v34 = vld [vmem:[%s10128_s5 + $0x790] sm:$0xff]  ;;  %p2351_p1 = scmp.ge.s32.totalorder %s2354_s4, 9  }
 0x3ff   : > { %v2584_v58 = vld [vmem:[%s10128_s5 + $0x700] sm:$0xff]  ;;  %v2585_v39 = vld [vmem:[%s10128_s5 + $0x708] sm:$0xff]  ;;  %2619 = vmatpush.msra.mxu0 %v2456_v28  ;;  %2659 = vmatpush.msra.mxu2 %v2457_v26  ;;  %v2475_v35 = vld [vmem:[%s10128_s5 + $0x398] sm:$0xff] }
 0x400   : > { %v2448_v24 = vld [vmem:[%s10128_s5 + $0x2c0] sm:$0xff]  ;;  %2639 = vmatpush.msra.mxu1 %v2584_v58  ;;  %v2449_v29 = vld [vmem:[%s10128_s5 + $0x2c8] sm:$0xff]  ;;  %2679 = vmatpush.msra.mxu3 %v2585_v39  ;;  %v2603_v37 = vld [vmem:[%s10128_s5 + $0x798] sm:$0xff] }
 0x401   : > { %v2576_v40 = vld [vmem:[%s10128_s5 + $0x6c0] sm:$0xff]  ;;  %v2577_v41 = vld [vmem:[%s10128_s5 + $0x6c8] sm:$0xff]  ;;  %2620 = vmatpush.msra.mxu0 %v2448_v24  ;;  %2660 = vmatpush.msra.mxu2 %v2449_v29  ;;  %v2466_v38 = vld [vmem:[%s10128_s5 + $0x350] sm:$0xff] }
 0x402   : > { %v2440_v44 = vld [vmem:[%s10128_s5 + $0x280] sm:$0xff]  ;;  %2640 = vmatpush.msra.mxu1 %v2576_v40  ;;  %v2441_v46 = vld [vmem:[%s10128_s5 + $0x288] sm:$0xff]  ;;  %2680 = vmatpush.msra.mxu3 %v2577_v41  ;;  %v2594_v56 = vld [vmem:[%s10128_s5 + $0x750] sm:$0xff] }
 0x403   : > { %v2568_v45 = vld [vmem:[%s10128_s5 + $0x680] sm:$0xff]  ;;  %v2569_v47 = vld [vmem:[%s10128_s5 + $0x688] sm:$0xff]  ;;  %2621 = vmatpush.msra.mxu0 %v2440_v44  ;;  %2661 = vmatpush.msra.mxu2 %v2441_v46  ;;  %v2467_v23 = vld [vmem:[%s10128_s5 + $0x358] sm:$0xff] }
 0x404   : > { %v2432_v36 = vld [vmem:[%s10128_s5 + $0x240] sm:$0xff]  ;;  %2641 = vmatpush.msra.mxu1 %v2568_v45  ;;  %v2433_v48 = vld [vmem:[%s10128_s5 + $0x248] sm:$0xff]  ;;  %2681 = vmatpush.msra.mxu3 %v2569_v47  ;;  %v2595_v28 = vld [vmem:[%s10128_s5 + $0x758] sm:$0xff] }
 0x405   : > { %v2560_v60 = vld [vmem:[%s10128_s5 + $0x640] sm:$0xff]  ;;  %v2561_v49 = vld [vmem:[%s10128_s5 + $0x648] sm:$0xff]  ;;  %2622 = vmatpush.msra.mxu0 %v2432_v36  ;;  %2662 = vmatpush.msra.mxu2 %v2433_v48  ;;  %v2458_v58 = vld [vmem:[%s10128_s5 + $0x310] sm:$0xff] }
 0x406   : > { %v2424_v50 = vld [vmem:[%s10128_s5 + $0x200] sm:$0xff]  ;;  %2642 = vmatpush.msra.mxu1 %v2560_v60  ;;  %v2425_v55 = vld [vmem:[%s10128_s5 + $0x208] sm:$0xff]  ;;  %2682 = vmatpush.msra.mxu3 %v2561_v49  ;;  %v2586_v26 = vld [vmem:[%s10128_s5 + $0x710] sm:$0xff] }
 0x407   : > { %v2552_v54 = vld [vmem:[%s10128_s5 + $0x600] sm:$0xff]  ;;  %v2553_v30 = vld [vmem:[%s10128_s5 + $0x608] sm:$0xff]  ;;  %2623 = vmatpush.msra.mxu0 %v2424_v50  ;;  %2663 = vmatpush.msra.mxu2 %v2425_v55  ;;  %v2459_v39 = vld [vmem:[%s10128_s5 + $0x318] sm:$0xff] }
 0x408   : > { %v2416_v9 = vld [vmem:[%s10128_s5 + $0x1c0] sm:$0xff]  ;;  %2643 = vmatpush.msra.mxu1 %v2552_v54  ;;  %v2417_v42 = vld [vmem:[%s10128_s5 + $0x1c8] sm:$0xff]  ;;  %2683 = vmatpush.msra.mxu3 %v2553_v30  ;;  %v2587_v24 = vld [vmem:[%s10128_s5 + $0x718] sm:$0xff] }
 0x409   : > { %v2544_v59 = vld [vmem:[%s10128_s5 + $0x5c0] sm:$0xff]  ;;  %v2545_v43 = vld [vmem:[%s10128_s5 + $0x5c8] sm:$0xff]  ;;  %2624 = vmatpush.msra.mxu0 %v2416_v9  ;;  %2664 = vmatpush.msra.mxu2 %v2417_v42  ;;  %v2450_v40 = vld [vmem:[%s10128_s5 + $0x2d0] sm:$0xff] }
 0x40a   : > { %v2408_v11 = vld [vmem:[%s10128_s5 + $0x180] sm:$0xff]  ;;  %2644 = vmatpush.msra.mxu1 %v2544_v59  ;;  %v2409_v31 = vld [vmem:[%s10128_s5 + $0x188] sm:$0xff]  ;;  %2684 = vmatpush.msra.mxu3 %v2545_v43  ;;  %v2578_v29 = vld [vmem:[%s10128_s5 + $0x6d0] sm:$0xff] }
 0x40b   : > { %v2536_v62 = vld [vmem:[%s10128_s5 + $0x580] sm:$0xff]  ;;  %v2537_v63 = vld [vmem:[%s10128_s5 + $0x588] sm:$0xff]  ;;  %2625 = vmatpush.msra.mxu0 %v2408_v11  ;;  %2665 = vmatpush.msra.mxu2 %v2409_v31  ;;  %v2451_v41 = vld [vmem:[%s10128_s5 + $0x2d8] sm:$0xff] }
 0x40c   : > { %v2400_v0 = vld [vmem:[%s10128_s5 + $0x140] sm:$0xff]  ;;  %2645 = vmatpush.msra.mxu1 %v2536_v62  ;;  %v2401_v27 = vld [vmem:[%s10128_s5 + $0x148] sm:$0xff]  ;;  %2685 = vmatpush.msra.mxu3 %v2537_v63  ;;  %v2579_v44 = vld [vmem:[%s10128_s5 + $0x6d8] sm:$0xff] }
 0x40d   : > { %v2528_v57 = vld [vmem:[%s10128_s5 + $0x540] sm:$0xff]  ;;  %v2529_v1 = vld [vmem:[%s10128_s5 + $0x548] sm:$0xff]  ;;  %2626 = vmatpush.msra.mxu0 %v2400_v0  ;;  %2666 = vmatpush.msra.mxu2 %v2401_v27  ;;  %v2442_v45 = vld [vmem:[%s10128_s5 + $0x290] sm:$0xff] }
 0x40e   : > { %v2392_v5 = vld [vmem:[%s10128_s5 + $0x100] sm:$0xff]  ;;  %2646 = vmatpush.msra.mxu1 %v2528_v57  ;;  %v2393_v7 = vld [vmem:[%s10128_s5 + $0x108] sm:$0xff]  ;;  %2686 = vmatpush.msra.mxu3 %v2529_v1  ;;  %v2570_v46 = vld [vmem:[%s10128_s5 + $0x690] sm:$0xff] }
 0x40f   : > { %v2520_v6 = vld [vmem:[%s10128_s5 + $0x500] sm:$0xff]  ;;  %v2521_v14 = vld [vmem:[%s10128_s5 + $0x508] sm:$0xff]  ;;  %2627 = vmatpush.msra.mxu0 %v2392_v5  ;;  %2667 = vmatpush.msra.mxu2 %v2393_v7  ;;  %v2443_v47 = vld [vmem:[%s10128_s5 + $0x298] sm:$0xff] }
 0x410   : > { %v2384_v15 = vld [vmem:[%s10128_s5 + $0xc0] sm:$0xff]  ;;  %2647 = vmatpush.msra.mxu1 %v2520_v6  ;;  %v2385_v16 = vld [vmem:[%s10128_s5 + $0xc8] sm:$0xff]  ;;  %2687 = vmatpush.msra.mxu3 %v2521_v14  ;;  %v2571_v36 = vld [vmem:[%s10128_s5 + $0x698] sm:$0xff] }
 0x411   : > { %v2512_v51 = vld [vmem:[%s10128_s5 + $0x4c0] sm:$0xff]  ;;  %v2513_v52 = vld [vmem:[%s10128_s5 + $0x4c8] sm:$0xff]  ;;  %2628 = vmatpush.msra.mxu0 %v2384_v15  ;;  %2668 = vmatpush.msra.mxu2 %v2385_v16  ;;  %v2434_v60 = vld [vmem:[%s10128_s5 + $0x250] sm:$0xff] }
 0x412   : > { %v2376_v18 = vld [vmem:[%s10128_s5 + $0x80] sm:$0xff]  ;;  %2648 = vmatpush.msra.mxu1 %v2512_v51  ;;  %v2377_v8 = vld [vmem:[%s10128_s5 + $0x88] sm:$0xff]  ;;  %2688 = vmatpush.msra.mxu3 %v2513_v52  ;;  %v2562_v48 = vld [vmem:[%s10128_s5 + $0x650] sm:$0xff] }
 0x413   : > { %v2504_v20 = vld [vmem:[%s10128_s5 + $0x480] sm:$0xff]  ;;  %v2505_v61 = vld [vmem:[%s10128_s5 + $0x488] sm:$0xff]  ;;  %2629 = vmatpush.msra.mxu0 %v2376_v18  ;;  %2669 = vmatpush.msra.mxu2 %v2377_v8  ;;  %v2435_v49 = vld [vmem:[%s10128_s5 + $0x258] sm:$0xff] }
 0x414   : > { %v2368_v21 = vld [vmem:[%s10128_s5 + $0x40] sm:$0xff]  ;;  %2649 = vmatpush.msra.mxu1 %v2504_v20  ;;  %v2369_v10 = vld [vmem:[%s10128_s5 + $0x48] sm:$0xff]  ;;  %2689 = vmatpush.msra.mxu3 %v2505_v61  ;;  %v2563_v50 = vld [vmem:[%s10128_s5 + $0x658] sm:$0xff] }
 0x415   : > { %v2496_v22 = vld [vmem:[%s10128_s5 + $0x440] sm:$0xff]  ;;  %v2497_v4 = vld [vmem:[%s10128_s5 + $0x448] sm:$0xff]  ;;  %2630 = vmatpush.msra.mxu0 %v2368_v21  ;;  %2670 = vmatpush.msra.mxu2 %v2369_v10  ;;  %v2426_v54 = vld [vmem:[%s10128_s5 + $0x210] sm:$0xff] }
 0x416   : > { %v2360_v25 = vld [vmem:[%s10128_s5] sm:$0xff]  ;;  %2650 = vmatpush.msra.mxu1 %v2496_v22  ;;  %v2361_v13 = vld [vmem:[%s10128_s5 + $0x8] sm:$0xff]  ;;  %2690 = vmatpush.msra.mxu3 %v2497_v4  ;;  %v2554_v55 = vld [vmem:[%s10128_s5 + $0x610] sm:$0xff] }
 0x417   : > { %v2488_v12 = vld [vmem:[%s10128_s5 + $0x400] sm:$0xff]  ;;  %v2489_v17 = vld [vmem:[%s10128_s5 + $0x408] sm:$0xff]  ;;  %2631 = vmatpush.msra.mxu0 %v2360_v25  ;;  %2671 = vmatpush.msra.mxu2 %v2361_v13  ;;  %v2427_v30 = vld [vmem:[%s10128_s5 + $0x218] sm:$0xff] }
 0x418   : > { %2651 = vmatpush.msra.mxu1 %v2488_v12  ;;  %2691 = vmatpush.msra.mxu3 %v2489_v17  ;;  %v2555_v9 = vld [vmem:[%s10128_s5 + $0x618] sm:$0xff]  ;;  %v2418_v59 = vld [vmem:[%s10128_s5 + $0x1d0] sm:$0xff] }
 0x419   : > { %2696 = vmatpush.msrb.mxu0 %v2482_v2  ;;  %2736 = vmatpush.msrb.mxu2 %v2483_v32  ;;  %v2546_v42 = vld [vmem:[%s10128_s5 + $0x5d0] sm:$0xff]  ;;  %v2419_v43 = vld [vmem:[%s10128_s5 + $0x1d8] sm:$0xff] }
 0x41a   : > { %2716 = vmatpush.msrb.mxu1 %v2610_v19  ;;  %2756 = vmatpush.msrb.mxu3 %v2611_v33  ;;  %v2547_v11 = vld [vmem:[%s10128_s5 + $0x5d8] sm:$0xff]  ;;  %v2410_v62 = vld [vmem:[%s10128_s5 + $0x190] sm:$0xff]  ;;  %v2484_v33 = vld [vmem:[%s10128_s5 + $0x3e0] sm:$0xff] }
 0x41b   : > { %2697 = vmatpush.msrb.mxu0 %v2474_v53  ;;  %2737 = vmatpush.msrb.mxu2 %v2475_v35  ;;  %v2538_v31 = vld [vmem:[%s10128_s5 + $0x590] sm:$0xff]  ;;  %v2411_v63 = vld [vmem:[%s10128_s5 + $0x198] sm:$0xff]  ;;  %v2612_v53 = vld [vmem:[%s10128_s5 + $0x7e0] sm:$0xff] }
 0x41c   : > { %2717 = vmatpush.msrb.mxu1 %v2602_v34  ;;  %2757 = vmatpush.msrb.mxu3 %v2603_v37  ;;  %v2539_v0 = vld [vmem:[%s10128_s5 + $0x598] sm:$0xff]  ;;  %v2402_v57 = vld [vmem:[%s10128_s5 + $0x150] sm:$0xff]  ;;  %v2485_v34 = vld [vmem:[%s10128_s5 + $0x3e8] sm:$0xff] }
 0x41d   : > { %2698 = vmatpush.msrb.mxu0 %v2466_v38  ;;  %2738 = vmatpush.msrb.mxu2 %v2467_v23  ;;  %v2530_v27 = vld [vmem:[%s10128_s5 + $0x550] sm:$0xff]  ;;  %v2403_v1 = vld [vmem:[%s10128_s5 + $0x158] sm:$0xff]  ;;  %v2613_v35 = vld [vmem:[%s10128_s5 + $0x7e8] sm:$0xff] }
 0x41e   : > { %2718 = vmatpush.msrb.mxu1 %v2594_v56  ;;  %2758 = vmatpush.msrb.mxu3 %v2595_v28  ;;  %v2531_v5 = vld [vmem:[%s10128_s5 + $0x558] sm:$0xff]  ;;  %v2394_v6 = vld [vmem:[%s10128_s5 + $0x110] sm:$0xff]  ;;  %v2476_v37 = vld [vmem:[%s10128_s5 + $0x3a0] sm:$0xff] }
 0x41f   : > { %2699 = vmatpush.msrb.mxu0 %v2458_v58  ;;  %2739 = vmatpush.msrb.mxu2 %v2459_v39  ;;  %v2522_v7 = vld [vmem:[%s10128_s5 + $0x510] sm:$0xff]  ;;  %v2395_v14 = vld [vmem:[%s10128_s5 + $0x118] sm:$0xff]  ;;  %v2604_v38 = vld [vmem:[%s10128_s5 + $0x7a0] sm:$0xff] }
 0x420   : > { %2719 = vmatpush.msrb.mxu1 %v2586_v26  ;;  %2759 = vmatpush.msrb.mxu3 %v2587_v24  ;;  %v2523_v15 = vld [vmem:[%s10128_s5 + $0x518] sm:$0xff]  ;;  %v2386_v51 = vld [vmem:[%s10128_s5 + $0xd0] sm:$0xff]  ;;  %v2477_v56 = vld [vmem:[%s10128_s5 + $0x3a8] sm:$0xff] }
 0x421   : > { %2700 = vmatpush.msrb.mxu0 %v2450_v40  ;;  %2740 = vmatpush.msrb.mxu2 %v2451_v41  ;;  %v2514_v16 = vld [vmem:[%s10128_s5 + $0x4d0] sm:$0xff]  ;;  %v2387_v52 = vld [vmem:[%s10128_s5 + $0xd8] sm:$0xff]  ;;  %v2605_v23 = vld [vmem:[%s10128_s5 + $0x7a8] sm:$0xff] }
 0x422   : > { %2720 = vmatpush.msrb.mxu1 %v2578_v29  ;;  %2760 = vmatpush.msrb.mxu3 %v2579_v44  ;;  %v2515_v18 = vld [vmem:[%s10128_s5 + $0x4d8] sm:$0xff]  ;;  %v7795_v20 = vld [vmem:[#allocation5] sm:$0xff]  ;;  %v2468_v28 = vld [vmem:[%s10128_s5 + $0x360] sm:$0xff] }
 0x423   : > { %2701 = vmatpush.msrb.mxu0 %v2442_v45  ;;  %2741 = vmatpush.msrb.mxu2 %v2443_v47  ;;  %v7797_v8 = vld [vmem:[#allocation5 + $0x8] sm:$0xff]  ;;  %v2378_v61 = vld [vmem:[%s10128_s5 + $0x90] sm:$0xff]  ;;  %v2596_v58 = vld [vmem:[%s10128_s5 + $0x760] sm:$0xff] }
 0x424   : > { %2721 = vmatpush.msrb.mxu1 %v2570_v46  ;;  %2761 = vmatpush.msrb.mxu3 %v2571_v36  ;;  %v2506_v21 = vld [vmem:[%s10128_s5 + $0x490] sm:$0xff]  ;;  %v2379_v22 = vld [vmem:[%s10128_s5 + $0x98] sm:$0xff]  ;;  %v2469_v26 = vld [vmem:[%s10128_s5 + $0x368] sm:$0xff] }
 0x425   : > { %2702 = vmatpush.msrb.mxu0 %v2434_v60  ;;  %2742 = vmatpush.msrb.mxu2 %v2435_v49  ;;  %v2507_v10 = vld [vmem:[%s10128_s5 + $0x498] sm:$0xff]  ;;  %v2370_v4 = vld [vmem:[%s10128_s5 + $0x50] sm:$0xff]  ;;  %v2597_v39 = vld [vmem:[%s10128_s5 + $0x768] sm:$0xff] }
 0x426   : > { %2722 = vmatpush.msrb.mxu1 %v2562_v48  ;;  %2762 = vmatpush.msrb.mxu3 %v2563_v50  ;;  %v2498_v25 = vld [vmem:[%s10128_s5 + $0x450] sm:$0xff]  ;;  %v2371_v12 = vld [vmem:[%s10128_s5 + $0x58] sm:$0xff]  ;;  %v2460_v24 = vld [vmem:[%s10128_s5 + $0x320] sm:$0xff] }
 0x427   : > { %2703 = vmatpush.msrb.mxu0 %v2426_v54  ;;  %2743 = vmatpush.msrb.mxu2 %v2427_v30  ;;  %v2499_v13 = vld [vmem:[%s10128_s5 + $0x458] sm:$0xff]  ;;  %v2362_v17 = vld [vmem:[%s10128_s5 + $0x10] sm:$0xff]  ;;  %v2588_v40 = vld [vmem:[%s10128_s5 + $0x720] sm:$0xff] }
 0x428   : > { %2723 = vmatpush.msrb.mxu1 %v2554_v55  ;;  %2763 = vmatpush.msrb.mxu3 %v2555_v9  ;;  %v2490_v2 = vld [vmem:[%s10128_s5 + $0x410] sm:$0xff]  ;;  %v2363_v19 = vld [vmem:[%s10128_s5 + $0x18] sm:$0xff]  ;;  %v2461_v29 = vld [vmem:[%s10128_s5 + $0x328] sm:$0xff] }
 0x429   : > { %2704 = vmatpush.msrb.mxu0 %v2418_v59  ;;  %2744 = vmatpush.msrb.mxu2 %v2419_v43  ;;  %v2491_v32 = vld [vmem:[%s10128_s5 + $0x418] sm:$0xff]  ;;  %v2589_v41 = vld [vmem:[%s10128_s5 + $0x728] sm:$0xff]  ;;  %v2452_v44 = vld [vmem:[%s10128_s5 + $0x2e0] sm:$0xff] }
 0x42a   : > { %2724 = vmatpush.msrb.mxu1 %v2546_v42  ;;  %2764 = vmatpush.msrb.mxu3 %v2547_v11  ;;  %v2580_v45 = vld [vmem:[%s10128_s5 + $0x6e0] sm:$0xff]  ;;  %v2453_v46 = vld [vmem:[%s10128_s5 + $0x2e8] sm:$0xff] }
 0x42b   : > { %2705 = vmatpush.msrb.mxu0 %v2410_v62  ;;  %2745 = vmatpush.msrb.mxu2 %v2411_v63  ;;  %v2581_v47 = vld [vmem:[%s10128_s5 + $0x6e8] sm:$0xff]  ;;  %v2444_v36 = vld [vmem:[%s10128_s5 + $0x2a0] sm:$0xff] }
 0x42c   : > { %2725 = vmatpush.msrb.mxu1 %v2538_v31  ;;  %2765 = vmatpush.msrb.mxu3 %v2539_v0  ;;  %v2572_v60 = vld [vmem:[%s10128_s5 + $0x6a0] sm:$0xff]  ;;  %v2445_v48 = vld [vmem:[%s10128_s5 + $0x2a8] sm:$0xff] }
 0x42d   : > { %2706 = vmatpush.msrb.mxu0 %v2402_v57  ;;  %2746 = vmatpush.msrb.mxu2 %v2403_v1  ;;  %v2573_v49 = vld [vmem:[%s10128_s5 + $0x6a8] sm:$0xff]  ;;  %v2436_v50 = vld [vmem:[%s10128_s5 + $0x260] sm:$0xff] }
 0x42e   : > { %2726 = vmatpush.msrb.mxu1 %v2530_v27  ;;  %2766 = vmatpush.msrb.mxu3 %v2531_v5  ;;  %v2564_v54 = vld [vmem:[%s10128_s5 + $0x660] sm:$0xff]  ;;  %v2437_v55 = vld [vmem:[%s10128_s5 + $0x268] sm:$0xff] }
 0x42f   : > { %2707 = vmatpush.msrb.mxu0 %v2394_v6  ;;  %2747 = vmatpush.msrb.mxu2 %v2395_v14  ;;  %v2565_v30 = vld [vmem:[%s10128_s5 + $0x668] sm:$0xff]  ;;  %v2428_v9 = vld [vmem:[%s10128_s5 + $0x220] sm:$0xff] }
 0x430   : > { %2727 = vmatpush.msrb.mxu1 %v2522_v7  ;;  %2767 = vmatpush.msrb.mxu3 %v2523_v15  ;;  %v2556_v59 = vld [vmem:[%s10128_s5 + $0x620] sm:$0xff]  ;;  %v2429_v42 = vld [vmem:[%s10128_s5 + $0x228] sm:$0xff] }
 0x431   : > { %2708 = vmatpush.msrb.mxu0 %v2386_v51  ;;  %2748 = vmatpush.msrb.mxu2 %v2387_v52  ;;  %v2557_v43 = vld [vmem:[%s10128_s5 + $0x628] sm:$0xff]  ;;  %v2420_v11 = vld [vmem:[%s10128_s5 + $0x1e0] sm:$0xff] }
 0x432   : > { %2728 = vmatpush.msrb.mxu1 %v2514_v16  ;;  %2768 = vmatpush.msrb.mxu3 %v2515_v18  ;;  %v2548_v62 = vld [vmem:[%s10128_s5 + $0x5e0] sm:$0xff]  ;;  %v2421_v31 = vld [vmem:[%s10128_s5 + $0x1e8] sm:$0xff] }
 0x433   : > { %2672 = vmatmul.f32.vlgmr.msra.gmra.mxu2 %v7795_v20  ;;  %2692 = vmatmul.f32.vlgmr.msra.gmra.mxu3 %v7797_v8  ;;  %v2549_v63 = vld [vmem:[%s10128_s5 + $0x5e8] sm:$0xff]  ;;  %v2412_v0 = vld [vmem:[%s10128_s5 + $0x1a0] sm:$0xff] }
 0x434   : > { %2709 = vmatpush.msrb.mxu0 %v2378_v61  ;;  %2729 = vmatpush.msrb.mxu1 %v2506_v21  ;;  %v2540_v57 = vld [vmem:[%s10128_s5 + $0x5a0] sm:$0xff]  ;;  %v2413_v27 = vld [vmem:[%s10128_s5 + $0x1a8] sm:$0xff] }
 0x435   : > { %2749 = vmatpush.msrb.mxu2 %v2379_v22  ;;  %2769 = vmatpush.msrb.mxu3 %v2507_v10  ;;  %v2541_v1 = vld [vmem:[%s10128_s5 + $0x5a8] sm:$0xff]  ;;  %v2404_v5 = vld [vmem:[%s10128_s5 + $0x160] sm:$0xff] }
 0x436   : > { %2710 = vmatpush.msrb.mxu0 %v2370_v4  ;;  %2730 = vmatpush.msrb.mxu1 %v2498_v25  ;;  %v2532_v6 = vld [vmem:[%s10128_s5 + $0x560] sm:$0xff]  ;;  %v2405_v7 = vld [vmem:[%s10128_s5 + $0x168] sm:$0xff] }
 0x437   : > { %2750 = vmatpush.msrb.mxu2 %v2371_v12  ;;  %2770 = vmatpush.msrb.mxu3 %v2499_v13  ;;  %v2533_v14 = vld [vmem:[%s10128_s5 + $0x568] sm:$0xff]  ;;  %v2396_v15 = vld [vmem:[%s10128_s5 + $0x120] sm:$0xff] }
 0x438   : > { %2632 = vmatmul.f32.vlgmr.msra.gmra.mxu0 %v7795_v20  ;;  %2652 = vmatmul.f32.vlgmr.msra.gmra.mxu1 %v7797_v8  ;;  %v2524_v51 = vld [vmem:[%s10128_s5 + $0x520] sm:$0xff]  ;;  %v2397_v16 = vld [vmem:[%s10128_s5 + $0x128] sm:$0xff] }
 0x439   : > { %2711 = vmatpush.msrb.mxu0 %v2362_v17  ;;  %2731 = vmatpush.msrb.mxu1 %v2490_v2  ;;  %v2525_v52 = vld [vmem:[%s10128_s5 + $0x528] sm:$0xff]  ;;  %v2388_v18 = vld [vmem:[%s10128_s5 + $0xe0] sm:$0xff] }
 0x43a   : > { %2751 = vmatpush.msrb.mxu2 %v2363_v19  ;;  %2771 = vmatpush.msrb.mxu3 %v2491_v32  ;;  %v2516_v61 = vld [vmem:[%s10128_s5 + $0x4e0] sm:$0xff]  ;;  %v2389_v21 = vld [vmem:[%s10128_s5 + $0xe8] sm:$0xff] }
 0x43b   : > { %2776 = vmatpush.msra.mxu0 %v2484_v33  ;;  %2796 = vmatpush.msra.mxu1 %v2612_v53  ;;  %v2517_v22 = vld [vmem:[%s10128_s5 + $0x4e8] sm:$0xff]  ;;  %v2380_v10 = vld [vmem:[%s10128_s5 + $0xa0] sm:$0xff] }
 0x43c   : > { %2816 = vmatpush.msra.mxu2 %v2485_v34  ;;  %2836 = vmatpush.msra.mxu3 %v2613_v35  ;;  %v2508_v4 = vld [vmem:[%s10128_s5 + $0x4a0] sm:$0xff]  ;;  %v2381_v25 = vld [vmem:[%s10128_s5 + $0xa8] sm:$0xff]  ;;  %v2486_v35 = vld [vmem:[%s10128_s5 + $0x3f0] sm:$0xff] }
 0x43d   : > { %2777 = vmatpush.msra.mxu0 %v2476_v37  ;;  %2797 = vmatpush.msra.mxu1 %v2604_v38  ;;  %v2509_v12 = vld [vmem:[%s10128_s5 + $0x4a8] sm:$0xff]  ;;  %v2372_v13 = vld [vmem:[%s10128_s5 + $0x60] sm:$0xff]  ;;  %v2614_v37 = vld [vmem:[%s10128_s5 + $0x7f0] sm:$0xff] }
 0x43e   : > { %2817 = vmatpush.msra.mxu2 %v2477_v56  ;;  %2837 = vmatpush.msra.mxu3 %v2605_v23  ;;  %v2500_v17 = vld [vmem:[%s10128_s5 + $0x460] sm:$0xff]  ;;  %v2373_v2 = vld [vmem:[%s10128_s5 + $0x68] sm:$0xff]  ;;  %v2487_v38 = vld [vmem:[%s10128_s5 + $0x3f8] sm:$0xff] }
 0x43f   : > { %2778 = vmatpush.msra.mxu0 %v2468_v28  ;;  %2798 = vmatpush.msra.mxu1 %v2596_v58  ;;  %v2501_v19 = vld [vmem:[%s10128_s5 + $0x468] sm:$0xff]  ;;  %v2364_v32 = vld [vmem:[%s10128_s5 + $0x20] sm:$0xff]  ;;  %v2615_v56 = vld [vmem:[%s10128_s5 + $0x7f8] sm:$0xff] }
 0x440   : > { %2818 = vmatpush.msra.mxu2 %v2469_v26  ;;  %2838 = vmatpush.msra.mxu3 %v2597_v39  ;;  %v2492_v33 = vld [vmem:[%s10128_s5 + $0x420] sm:$0xff]  ;;  %v2365_v53 = vld [vmem:[%s10128_s5 + $0x28] sm:$0xff]  ;;  %v2478_v23 = vld [vmem:[%s10128_s5 + $0x3b0] sm:$0xff] }
 0x441   : > { %2752 = vmatmul.f32.vlgmr.msrb.gmra.mxu2 %v7795_v20  ;;  %2772 = vmatmul.f32.vlgmr.msrb.gmra.mxu3 %v7797_v8  ;;  %v2493_v34 = vld [vmem:[%s10128_s5 + $0x428] sm:$0xff]  ;;  %v2606_v28 = vld [vmem:[%s10128_s5 + $0x7b0] sm:$0xff]  ;;  %v2479_v58 = vld [vmem:[%s10128_s5 + $0x3b8] sm:$0xff] }
 0x442   : > { %2779 = vmatpush.msra.mxu0 %v2460_v24  ;;  %2799 = vmatpush.msra.mxu1 %v2588_v40  ;;  %v2607_v26 = vld [vmem:[%s10128_s5 + $0x7b8] sm:$0xff]  ;;  %v2470_v39 = vld [vmem:[%s10128_s5 + $0x370] sm:$0xff] }
 0x443   : > { %2819 = vmatpush.msra.mxu2 %v2461_v29  ;;  %2839 = vmatpush.msra.mxu3 %v2589_v41  ;;  %v2598_v24 = vld [vmem:[%s10128_s5 + $0x770] sm:$0xff]  ;;  %v2471_v40 = vld [vmem:[%s10128_s5 + $0x378] sm:$0xff] }
 0x444   : > { %2712 = vmatmul.f32.vlgmr.msrb.gmra.mxu0 %v7795_v20  ;;  %2732 = vmatmul.f32.vlgmr.msrb.gmra.mxu1 %v7797_v8  ;;  %v2599_v29 = vld [vmem:[%s10128_s5 + $0x778] sm:$0xff]  ;;  %v2462_v41 = vld [vmem:[%s10128_s5 + $0x330] sm:$0xff] }
 0x445   : > { %2780 = vmatpush.msra.mxu0 %v2452_v44  ;;  %2800 = vmatpush.msra.mxu1 %v2580_v45  ;;  %v2590_v44 = vld [vmem:[%s10128_s5 + $0x730] sm:$0xff]  ;;  %v2463_v45 = vld [vmem:[%s10128_s5 + $0x338] sm:$0xff] }
 0x446   : > { %2820 = vmatpush.msra.mxu2 %v2453_v46  ;;  %2840 = vmatpush.msra.mxu3 %v2581_v47  ;;  %v2591_v46 = vld [vmem:[%s10128_s5 + $0x738] sm:$0xff]  ;;  %v2454_v47 = vld [vmem:[%s10128_s5 + $0x2f0] sm:$0xff] }
 0x447   : > { %2781 = vmatpush.msra.mxu0 %v2444_v36  ;;  %2801 = vmatpush.msra.mxu1 %v2572_v60  ;;  %v2582_v36 = vld [vmem:[%s10128_s5 + $0x6f0] sm:$0xff]  ;;  %v2455_v60 = vld [vmem:[%s10128_s5 + $0x2f8] sm:$0xff] }
 0x448   : > { %2821 = vmatpush.msra.mxu2 %v2445_v48  ;;  %2841 = vmatpush.msra.mxu3 %v2573_v49  ;;  %v2583_v48 = vld [vmem:[%s10128_s5 + $0x6f8] sm:$0xff]  ;;  %v2446_v49 = vld [vmem:[%s10128_s5 + $0x2b0] sm:$0xff] }
 0x449   : > { %2782 = vmatpush.msra.mxu0 %v2436_v50  ;;  %2802 = vmatpush.msra.mxu1 %v2564_v54  ;;  %v2574_v50 = vld [vmem:[%s10128_s5 + $0x6b0] sm:$0xff]  ;;  %v2447_v54 = vld [vmem:[%s10128_s5 + $0x2b8] sm:$0xff] }
 0x44a   : > { %2822 = vmatpush.msra.mxu2 %v2437_v55  ;;  %2842 = vmatpush.msra.mxu3 %v2565_v30  ;;  %v2575_v55 = vld [vmem:[%s10128_s5 + $0x6b8] sm:$0xff]  ;;  %v2438_v30 = vld [vmem:[%s10128_s5 + $0x270] sm:$0xff] }
 0x44b   : > { %2783 = vmatpush.msra.mxu0 %v2428_v9  ;;  %2803 = vmatpush.msra.mxu1 %v2556_v59  ;;  %v2566_v9 = vld [vmem:[%s10128_s5 + $0x670] sm:$0xff]  ;;  %v2439_v59 = vld [vmem:[%s10128_s5 + $0x278] sm:$0xff] }
 0x44c   : > { %2823 = vmatpush.msra.mxu2 %v2429_v42  ;;  %2843 = vmatpush.msra.mxu3 %v2557_v43  ;;  %v2567_v42 = vld [vmem:[%s10128_s5 + $0x678] sm:$0xff]  ;;  %v2430_v43 = vld [vmem:[%s10128_s5 + $0x230] sm:$0xff] }
 0x44d   : > { %2784 = vmatpush.msra.mxu0 %v2420_v11  ;;  %2804 = vmatpush.msra.mxu1 %v2548_v62  ;;  %v2558_v11 = vld [vmem:[%s10128_s5 + $0x630] sm:$0xff]  ;;  %v2431_v62 = vld [vmem:[%s10128_s5 + $0x238] sm:$0xff] }
 0x44e   : > { %2824 = vmatpush.msra.mxu2 %v2421_v31  ;;  %2844 = vmatpush.msra.mxu3 %v2549_v63  ;;  %v2559_v31 = vld [vmem:[%s10128_s5 + $0x638] sm:$0xff]  ;;  %v2422_v63 = vld [vmem:[%s10128_s5 + $0x1f0] sm:$0xff] }
 0x44f   : > { %2785 = vmatpush.msra.mxu0 %v2412_v0  ;;  %2805 = vmatpush.msra.mxu1 %v2540_v57  ;;  %v2550_v0 = vld [vmem:[%s10128_s5 + $0x5f0] sm:$0xff]  ;;  %v2423_v57 = vld [vmem:[%s10128_s5 + $0x1f8] sm:$0xff] }
 0x450   : > { %2825 = vmatpush.msra.mxu2 %v2413_v27  ;;  %2845 = vmatpush.msra.mxu3 %v2541_v1  ;;  %v2551_v27 = vld [vmem:[%s10128_s5 + $0x5f8] sm:$0xff]  ;;  %v2414_v1 = vld [vmem:[%s10128_s5 + $0x1b0] sm:$0xff] }
 0x451   : > { %2786 = vmatpush.msra.mxu0 %v2404_v5  ;;  %2806 = vmatpush.msra.mxu1 %v2532_v6  ;;  %v2542_v5 = vld [vmem:[%s10128_s5 + $0x5b0] sm:$0xff]  ;;  %v2415_v6 = vld [vmem:[%s10128_s5 + $0x1b8] sm:$0xff] }
 0x452   : > { %2826 = vmatpush.msra.mxu2 %v2405_v7  ;;  %2846 = vmatpush.msra.mxu3 %v2533_v14  ;;  %v2543_v7 = vld [vmem:[%s10128_s5 + $0x5b8] sm:$0xff]  ;;  %v2406_v14 = vld [vmem:[%s10128_s5 + $0x170] sm:$0xff] }
 0x453   : > { %2787 = vmatpush.msra.mxu0 %v2396_v15  ;;  %2807 = vmatpush.msra.mxu1 %v2524_v51  ;;  %v2534_v15 = vld [vmem:[%s10128_s5 + $0x570] sm:$0xff]  ;;  %v2407_v51 = vld [vmem:[%s10128_s5 + $0x178] sm:$0xff] }
 0x454   : > { %2827 = vmatpush.msra.mxu2 %v2397_v16  ;;  %2847 = vmatpush.msra.mxu3 %v2525_v52  ;;  %v2535_v16 = vld [vmem:[%s10128_s5 + $0x578] sm:$0xff]  ;;  %v2398_v52 = vld [vmem:[%s10128_s5 + $0x130] sm:$0xff] }
 0x455   : > { %2788 = vmatpush.msra.mxu0 %v2388_v18  ;;  %2808 = vmatpush.msra.mxu1 %v2516_v61  ;;  %v2526_v18 = vld [vmem:[%s10128_s5 + $0x530] sm:$0xff]  ;;  %v2399_v61 = vld [vmem:[%s10128_s5 + $0x138] sm:$0xff] }
 0x456   : > { %2828 = vmatpush.msra.mxu2 %v2389_v21  ;;  %2848 = vmatpush.msra.mxu3 %v2517_v22  ;;  %v2527_v21 = vld [vmem:[%s10128_s5 + $0x538] sm:$0xff]  ;;  %v2390_v22 = vld [vmem:[%s10128_s5 + $0xf0] sm:$0xff] }
 0x457   : > { %2789 = vmatpush.msra.mxu0 %v2380_v10  ;;  %2809 = vmatpush.msra.mxu1 %v2508_v4  ;;  %v2518_v10 = vld [vmem:[%s10128_s5 + $0x4f0] sm:$0xff]  ;;  %v2391_v4 = vld [vmem:[%s10128_s5 + $0xf8] sm:$0xff] }
 0x458   : > { %2829 = vmatpush.msra.mxu2 %v2381_v25  ;;  %2849 = vmatpush.msra.mxu3 %v2509_v12  ;;  %v2519_v25 = vld [vmem:[%s10128_s5 + $0x4f8] sm:$0xff]  ;;  %v2382_v12 = vld [vmem:[%s10128_s5 + $0xb0] sm:$0xff] }
 0x459   : > { %2790 = vmatpush.msra.mxu0 %v2372_v13  ;;  %2810 = vmatpush.msra.mxu1 %v2500_v17  ;;  %v2510_v13 = vld [vmem:[%s10128_s5 + $0x4b0] sm:$0xff]  ;;  %v2383_v17 = vld [vmem:[%s10128_s5 + $0xb8] sm:$0xff] }
 0x45a   : > { %2830 = vmatpush.msra.mxu2 %v2373_v2  ;;  %2850 = vmatpush.msra.mxu3 %v2501_v19  ;;  %v2511_v2 = vld [vmem:[%s10128_s5 + $0x4b8] sm:$0xff]  ;;  %v2374_v19 = vld [vmem:[%s10128_s5 + $0x70] sm:$0xff] }
 0x45b   : > { %2791 = vmatpush.msra.mxu0 %v2364_v32  ;;  %2811 = vmatpush.msra.mxu1 %v2492_v33  ;;  %v2502_v32 = vld [vmem:[%s10128_s5 + $0x470] sm:$0xff]  ;;  %v2375_v33 = vld [vmem:[%s10128_s5 + $0x78] sm:$0xff] }
 0x45c   : > { %2831 = vmatpush.msra.mxu2 %v2365_v53  ;;  %2851 = vmatpush.msra.mxu3 %v2493_v34  ;;  %v2503_v53 = vld [vmem:[%s10128_s5 + $0x478] sm:$0xff]  ;;  %v2366_v34 = vld [vmem:[%s10128_s5 + $0x30] sm:$0xff] }
 0x45d   : > { %2856 = vmatpush.msrb.mxu0 %v2486_v35  ;;  %2876 = vmatpush.msrb.mxu1 %v2614_v37  ;;  %v2494_v35 = vld [vmem:[%s10128_s5 + $0x430] sm:$0xff]  ;;  %v2367_v37 = vld [vmem:[%s10128_s5 + $0x38] sm:$0xff] }
 0x45e   : > { %2896 = vmatpush.msrb.mxu2 %v2487_v38  ;;  %2916 = vmatpush.msrb.mxu3 %v2615_v56  ;;  %v2495_v38 = vld [vmem:[%s10128_s5 + $0x438] sm:$0xff] }
 0x45f   : > { %2857 = vmatpush.msrb.mxu0 %v2478_v23  ;;  %2877 = vmatpush.msrb.mxu1 %v2606_v28  ;;  %v2941_v28 = vld [vmem:[%s2940_s6] sm:$0xff] }
 0x460   : > { %2897 = vmatpush.msrb.mxu2 %v2479_v58  ;;  %2917 = vmatpush.msrb.mxu3 %v2607_v26 }
 0x461   : > { %2858 = vmatpush.msrb.mxu0 %v2470_v39  ;;  %2878 = vmatpush.msrb.mxu1 %v2598_v24  ;;  %v2942_v24 = vld [vmem:[%s2940_s6 + $0x8] sm:$0xff] }
 0x462   : > { %2898 = vmatpush.msrb.mxu2 %v2471_v40  ;;  %2918 = vmatpush.msrb.mxu3 %v2599_v29 }
 0x463   : > { %2859 = vmatpush.msrb.mxu0 %v2462_v41  ;;  %2879 = vmatpush.msrb.mxu1 %v2590_v44 }
 0x464   : > { %2899 = vmatpush.msrb.mxu2 %v2463_v45  ;;  %2919 = vmatpush.msrb.mxu3 %v2591_v46  ;;  %v2943_v46 = vld [vmem:[%s2940_s6 + $0x10] sm:$0xff] }
 0x465   : > { %2860 = vmatpush.msrb.mxu0 %v2454_v47  ;;  %2880 = vmatpush.msrb.mxu1 %v2582_v36 }
 0x466   : > { %2900 = vmatpush.msrb.mxu2 %v2455_v60  ;;  %2920 = vmatpush.msrb.mxu3 %v2583_v48 }
 0x467   : > { %2861 = vmatpush.msrb.mxu0 %v2446_v49  ;;  %2881 = vmatpush.msrb.mxu1 %v2574_v50 }
 0x468   : > { %2901 = vmatpush.msrb.mxu2 %v2447_v54  ;;  %2921 = vmatpush.msrb.mxu3 %v2575_v55  ;;  %v2944_v55 = vld [vmem:[%s2940_s6 + $0x18] sm:$0xff] }
 0x469   : > { %2862 = vmatpush.msrb.mxu0 %v2438_v30  ;;  %2882 = vmatpush.msrb.mxu1 %v2566_v9 }
 0x46a   : > { %2902 = vmatpush.msrb.mxu2 %v2439_v59  ;;  %2922 = vmatpush.msrb.mxu3 %v2567_v42 }
 0x46b   : > { %2863 = vmatpush.msrb.mxu0 %v2430_v43  ;;  %2883 = vmatpush.msrb.mxu1 %v2558_v11  ;;  %v2962_v43 = vld [vmem:[#allocation6 + $0x8] sm:$0xff] }
 0x46c   : > { %2903 = vmatpush.msrb.mxu2 %v2431_v62  ;;  %2923 = vmatpush.msrb.mxu3 %v2559_v31 }
 0x46d   : > { %2864 = vmatpush.msrb.mxu0 %v2422_v63  ;;  %2884 = vmatpush.msrb.mxu1 %v2550_v0 }
 0x46e   : > { %2904 = vmatpush.msrb.mxu2 %v2423_v57  ;;  %2924 = vmatpush.msrb.mxu3 %v2551_v27 }
 0x46f   : > { %2865 = vmatpush.msrb.mxu0 %v2414_v1  ;;  %2885 = vmatpush.msrb.mxu1 %v2542_v5 }
 0x470   : > { %2905 = vmatpush.msrb.mxu2 %v2415_v6  ;;  %2925 = vmatpush.msrb.mxu3 %v2543_v7 }
 0x471   : > { %2832 = vmatmul.f32.vlgmr.msra.gmra.mxu2 %v7795_v20  ;;  %2852 = vmatmul.f32.vlgmr.msra.gmra.mxu3 %v7797_v8 }
 0x472   : > { %2866 = vmatpush.msrb.mxu0 %v2406_v14  ;;  %2886 = vmatpush.msrb.mxu1 %v2534_v15 }
 0x473   : > { %2906 = vmatpush.msrb.mxu2 %v2407_v51  ;;  %2926 = vmatpush.msrb.mxu3 %v2535_v16  ;;  %v2954_v51 = vld [vmem:[%s2953_s1 + $0x20] sm:$0xff] }
 0x474   : > { %2867 = vmatpush.msrb.mxu0 %v2398_v52  ;;  %2887 = vmatpush.msrb.mxu1 %v2526_v18 }
 0x475   : > { %2907 = vmatpush.msrb.mxu2 %v2399_v61  ;;  %2927 = vmatpush.msrb.mxu3 %v2527_v21  ;;  %v2955_v61 = vld [vmem:[%s2953_s1 + $0x28] sm:$0xff] }
 0x476   : > { %2792 = vmatmul.f32.vlgmr.msra.gmra.mxu0 %v7795_v20  ;;  %2812 = vmatmul.f32.vlgmr.msra.gmra.mxu1 %v7797_v8 }
 0x477   : > { %2868 = vmatpush.msrb.mxu0 %v2390_v22  ;;  %2888 = vmatpush.msrb.mxu1 %v2518_v10 }
 0x478   : > { %2908 = vmatpush.msrb.mxu2 %v2391_v4  ;;  %2928 = vmatpush.msrb.mxu3 %v2519_v25 }
 0x479   : > { %2869 = vmatpush.msrb.mxu0 %v2382_v12  ;;  %2889 = vmatpush.msrb.mxu1 %v2510_v13 }
 0x47a   : > { %2909 = vmatpush.msrb.mxu2 %v2383_v17  ;;  %2929 = vmatpush.msrb.mxu3 %v2511_v2  ;;  %v2956_v17 = vld [vmem:[%s2953_s1 + $0x30] sm:$0xff] }
 0x47b   : > { %2870 = vmatpush.msrb.mxu0 %v2374_v19  ;;  %2890 = vmatpush.msrb.mxu1 %v2502_v32 }
 0x47c   : > { %2910 = vmatpush.msrb.mxu2 %v2375_v33  ;;  %2930 = vmatpush.msrb.mxu3 %v2503_v53 }
 0x47d   : > { %2871 = vmatpush.msrb.mxu0 %v2366_v34  ;;  %2891 = vmatpush.msrb.mxu1 %v2494_v35  ;;  %v2963_v35 = vld [vmem:[#allocation6] sm:$0xff] }
 0x47e   : > { %2911 = vmatpush.msrb.mxu2 %v2367_v37  ;;  %2931 = vmatpush.msrb.mxu3 %v2495_v38 }
 0x47f   : > { %2872 = vmatmul.f32.vlgmr.msrb.gmra.mxu0 %v7795_v20  ;;  %2892 = vmatmul.f32.vlgmr.msrb.gmra.mxu1 %v7797_v8 }
 0x480   : > { %2912 = vmatmul.f32.vlgmr.msrb.gmra.mxu2 %v7795_v20  ;;  %2932 = vmatmul.f32.vlgmr.msrb.gmra.mxu3 %v7797_v8 }
 0x4b5   : > { %v2633_v56 = vpop.f32.mrf.mxu0  ;;  %v2653_v23 = vpop.f32.mrf.mxu1 }
 0x4b6   : > { %v2654_v58 = vadd.f32 %v2653_v23, %v2633_v56  ;;  %v2673_v26 = vpop.f32.mrf.mxu2  ;;  %v2693_v39 = vpop.f32.mrf.mxu3  ;;  %v2957_v56 = vld [vmem:[%s2953_s1 + $0x38] sm:$0xff] }
 0x4b7   : > { %v2694_v40 = vadd.f32 %v2693_v39, %v2673_v26 }
 0x4b8   : > { %v2945_v29 = vadd.f32 %v2941_v28, %v2654_v58 }
 0x4b9   : > { %v2946_v41 = vadd.f32 %v2942_v24, %v2694_v40 }
 0x4ba   : > { %v2964_v44 = vmul.f32 0.5, %v2945_v29 }
 0x4bb   : > { %v2968_v45 = vmul.f32 0.5, %v2946_v41 }
 0x4bc   : > { %4905 = vtanh.f32 %v2964_v44 }
 0x4bd   : > { %4907 = vtanh.f32 %v2968_v45 }
 0x4c1   : > { %v2713_v20 = vpop.f32.mrf.mxu0  ;;  %v2733_v8 = vpop.f32.mrf.mxu1 }
 0x4c2   : > { %v4906_v47 = vpop.eup %4905  ;;  %v2734_v36 = vadd.f32 %v2733_v8, %v2713_v20 }
 0x4c3   : > { %v4908_v60 = vpop.eup %4907  ;;  %v2966_v30 = vadd.f32 1.0, %v4906_v47  ;;  %v3147_v47 = vld [vmem:[%s10130_s7 + $0x3c8] sm:$0xff] (%p2351_p1) }
 0x4c4   : > { %v2970_v48 = vadd.f32 1.0, %v4908_v60  ;;  %v2947_v49 = vadd.f32 %v2943_v46, %v2734_v36  ;;  %v2753_v50 = vpop.f32.mrf.mxu2  ;;  %v2773_v54 = vpop.f32.mrf.mxu3  ;;  %v3139_v36 = vld [vmem:[%s10130_s7 + $0x388] sm:$0xff] (%p2351_p1)  ;;  %3388 = vmatpush.msra.mxu2 (%p2351_p1), %v3147_v47  ;;  %v3277_v47 = vld [vmem:[%s10130_s7 + $0x7d8] sm:$0xff] (%p2351_p1) }
 0x4c5   : > { %v2774_v9 = vadd.f32 %v2773_v54, %v2753_v50  ;;  %v2967_v11 = vmul.f32 0.5, %v2966_v30  ;;  %v3275_v60 = vld [vmem:[%s10130_s7 + $0x7c8] sm:$0xff] (%p2351_p1) }
 0x4c6   : > { %4909 = vtanh.f32 %v2947_v49  ;;  %v2971_v59 = vmul.f32 0.5, %v2970_v48  ;;  %3432 = vmatpush.msra.mxu3 (%p2351_p1), %v3275_v60  ;;  %v3267_v48 = vld [vmem:[%s10130_s7 + $0x788] sm:$0xff] (%p2351_p1)  ;;  %v3146_v49 = vld [vmem:[%s10130_s7 + $0x3c0] sm:$0xff] (%p2351_p1)  ;;  %3389 = vmatpush.msra.mxu2 (%p2351_p1), %v3139_v36 }
 0x4c7   : > { %v2948_v42 = vadd.f32 %v2944_v55, %v2774_v9  ;;  %v3131_v50 = vld [vmem:[%s10130_s7 + $0x348] sm:$0xff] (%p2351_p1)  ;;  %3300 = vmatpush.msra.mxu0 (%p2351_p1), %v3146_v49  ;;  %v3138_v55 = vld [vmem:[%s10130_s7 + $0x380] sm:$0xff] (%p2351_p1)  ;;  %v3148_v49 = vld [vmem:[%s10130_s7 + $0x3d0] sm:$0xff] (%p2351_p1) }
 0x4c8   : > { %v2977_v31 = vmul.f32 %v2971_v59, %v2962_v43  ;;  %v3259_v54 = vld [vmem:[%s10130_s7 + $0x748] sm:$0xff] (%p2351_p1)  ;;  %3433 = vmatpush.msra.mxu3 (%p2351_p1), %v3267_v48  ;;  %v3274_v9 = vld [vmem:[%s10130_s7 + $0x7c0] sm:$0xff] (%p2351_p1)  ;;  %3390 = vmatpush.msra.mxu2 (%p2351_p1), %v3131_v50  ;;  %v3141_v48 = vld [vmem:[%s10130_s7 + $0x398] sm:$0xff] (%p2351_p1) }
 0x4c9   : > { %v2973_v62 = vmul.f32 0.5, %v2948_v42  ;;  %v3123_v30 = vld [vmem:[%s10130_s7 + $0x308] sm:$0xff] (%p2351_p1)  ;;  %3301 = vmatpush.msra.mxu0 (%p2351_p1), %v3138_v55  ;;  %3344 = vmatpush.msra.mxu1 (%p2351_p1), %v3274_v9  ;;  %v3130_v42 = vld [vmem:[%s10130_s7 + $0x340] sm:$0xff] (%p2351_p1)  ;;  %v3276_v55 = vld [vmem:[%s10130_s7 + $0x7d0] sm:$0xff] (%p2351_p1) }
 0x4ca   :  { %v3251_v59 = vld [vmem:[%s10130_s7 + $0x708] sm:$0xff] (%p2351_p1)  ;;  %v3266_v43 = vld [vmem:[%s10130_s7 + $0x780] sm:$0xff] (%p2351_p1)  ;;  %3434 = vmatpush.msra.mxu3 (%p2351_p1), %v3259_v54  ;;  %3391 = vmatpush.msra.mxu2 (%p2351_p1), %v3123_v30  ;;  %v3269_v54 = vld [vmem:[%s10130_s7 + $0x798] sm:$0xff] (%p2351_p1) }
 0x4cb   : > { %4911 = vtanh.f32 %v2973_v62  ;;  %v3115_v62 = vld [vmem:[%s10130_s7 + $0x2c8] sm:$0xff] (%p2351_p1)  ;;  %3302 = vmatpush.msra.mxu0 (%p2351_p1), %v3130_v42  ;;  %3345 = vmatpush.msra.mxu1 (%p2351_p1), %v3266_v43  ;;  %v3026_v36 = vld [vmem:[%s10130_s7] sm:$0xff] (%p2351_p1)  ;;  %v3133_v30 = vld [vmem:[%s10130_s7 + $0x358] sm:$0xff] (%p2351_p1) }
 0x4cc   : > { %v4910_v63 = vpop.eup %4909  ;;  %3435 = vmatpush.msra.mxu3 (%p2351_p1), %v3251_v59  ;;  %3392 = vmatpush.msra.mxu2 (%p2351_p1), %v3115_v62  ;;  %v3162_v60 = vld [vmem:[%s10130_s7 + $0x440] sm:$0xff] (%p2351_p1)  ;;  %v3140_v9 = vld [vmem:[%s10130_s7 + $0x390] sm:$0xff] (%p2351_p1)  ;;  %v3261_v59 = vld [vmem:[%s10130_s7 + $0x758] sm:$0xff] (%p2351_p1) }
 0x4cd   : > { %v2978_v0 = vmul.f32 %v4910_v63, %v2967_v11  ;;  %v3258_v11 = vld [vmem:[%s10130_s7 + $0x740] sm:$0xff] (%p2351_p1)  ;;  %v3132_v62 = vld [vmem:[%s10130_s7 + $0x350] sm:$0xff] (%p2351_p1) }
 0x4ce   :  { %v3114_v63 = vld [vmem:[%s10130_s7 + $0x2c0] sm:$0xff] (%p2351_p1)  ;;  %3346 = vmatpush.msra.mxu1 (%p2351_p1), %v3258_v11  ;;  %v3125_v11 = vld [vmem:[%s10130_s7 + $0x318] sm:$0xff] (%p2351_p1) }
 0x4cf   : > { %v2979_v57 = vadd.f32 %v2978_v0, %v2977_v31  ;;  %v3243_v31 = vld [vmem:[%s10130_s7 + $0x6c8] sm:$0xff] (%p2351_p1)  ;;  %v3250_v0 = vld [vmem:[%s10130_s7 + $0x700] sm:$0xff] (%p2351_p1) }
 0x4d0   :  { %3436 = vmatpush.msra.mxu3 (%p2351_p1), %v3243_v31  ;;  %3347 = vmatpush.msra.mxu1 (%p2351_p1), %v3250_v0  ;;  %v3154_v50 = vld [vmem:[%s10130_s7 + $0x400] sm:$0xff] (%p2351_p1)  ;;  %v3253_v31 = vld [vmem:[%s10130_s7 + $0x718] sm:$0xff] (%p2351_p1) }
 0x4d1   : > { %v4912_v27 = vpop.eup %4911  ;;  %4913 = vtanh.f32 %v2979_v57  ;;  %3002 = vst [vmem:[#allocation6 + $0x8] sm:$0xff] %v2979_v57  ;;  %v3107_v57 = vld [vmem:[%s10130_s7 + $0x288] sm:$0xff] (%p2351_p1)  ;;  %v3117_v0 = vld [vmem:[%s10130_s7 + $0x2d8] sm:$0xff] (%p2351_p1) }
 0x4d2   : > { %v2975_v1 = vadd.f32 1.0, %v4912_v27  ;;  %4078 = vst [vmem:[#allocation6 + $0x8] sm:$0xff] (%p2351_p1), %v4987_v3  ;;  %v3235_v27 = vld [vmem:[%s10130_s7 + $0x688] sm:$0xff] (%p2351_p1)  ;;  %3393 = vmatpush.msra.mxu2 (%p2351_p1), %v3107_v57  ;;  %v3124_v57 = vld [vmem:[%s10130_s7 + $0x310] sm:$0xff] (%p2351_p1) }
 0x4d3   :  { %3437 = vmatpush.msra.mxu3 (%p2351_p1), %v3235_v27  ;;  %v3245_v27 = vld [vmem:[%s10130_s7 + $0x6d8] sm:$0xff] (%p2351_p1) }
 0x4d4   : > { %v2976_v5 = vmul.f32 0.5, %v2975_v1  ;;  %v3106_v1 = vld [vmem:[%s10130_s7 + $0x280] sm:$0xff] (%p2351_p1) }
 0x4d7   : > { %v4914_v6 = vpop.eup %4913 }
 0x4d8   : > { %v2981_v7 = vmul.f32 %v4914_v6, %v2976_v5  ;;  %v3242_v5 = vld [vmem:[%s10130_s7 + $0x6c0] sm:$0xff] (%p2351_p1)  ;;  %v3099_v6 = vld [vmem:[%s10130_s7 + $0x248] sm:$0xff] (%p2351_p1) }
 0x4d9   :  { %3348 = vmatpush.msra.mxu1 (%p2351_p1), %v3242_v5  ;;  %3394 = vmatpush.msra.mxu2 (%p2351_p1), %v3099_v6  ;;  %v3109_v5 = vld [vmem:[%s10130_s7 + $0x298] sm:$0xff] (%p2351_p1)  ;;  %v3116_v6 = vld [vmem:[%s10130_s7 + $0x2d0] sm:$0xff] (%p2351_p1) }
 0x4da   : > { %3000 = vst [vmem:[#allocation5] sm:$0xff] %v2981_v7 }
 0x4db   : > { %3005 = vst [vmem:[%s3004_s20] sm:$0xff] %v2981_v7  ;;  %v3227_v7 = vld [vmem:[%s10130_s7 + $0x648] sm:$0xff] (%p2351_p1) }
 0x4dc   :  { %4076 = vst [vmem:[#allocation5] sm:$0xff] (%p2351_p1), %v4987_v3  ;;  %3438 = vmatpush.msra.mxu3 (%p2351_p1), %v3227_v7  ;;  %v3237_v7 = vld [vmem:[%s10130_s7 + $0x698] sm:$0xff] (%p2351_p1) }
 0x4e2   :  { %v8479_v42 = vld [vmem:[#allocation3 + $0x8] sm:$0xff] (%p2351_p1) }
 0x4f3   : > { %v2793_v14 = vpop.f32.mrf.mxu0  ;;  %v2813_v15 = vpop.f32.mrf.mxu1 }
 0x4f4   : > { %v2814_v16 = vadd.f32 %v2813_v15, %v2793_v14  ;;  %v2833_v52 = vpop.f32.mrf.mxu2  ;;  %v2853_v18 = vpop.f32.mrf.mxu3  ;;  %v3098_v14 = vld [vmem:[%s10130_s7 + $0x240] sm:$0xff] (%p2351_p1) }
 0x4f5   : > { %v2854_v21 = vadd.f32 %v2853_v18, %v2833_v52  ;;  %v3234_v15 = vld [vmem:[%s10130_s7 + $0x680] sm:$0xff] (%p2351_p1) }
 0x4f6   : > { %v2958_v22 = vadd.f32 %v2954_v51, %v2814_v16  ;;  %v3091_v51 = vld [vmem:[%s10130_s7 + $0x208] sm:$0xff] (%p2351_p1)  ;;  %v3090_v52 = vld [vmem:[%s10130_s7 + $0x200] sm:$0xff] (%p2351_p1)  ;;  %3349 = vmatpush.msra.mxu1 (%p2351_p1), %v3234_v15 }
 0x4f7   : > { %v2959_v10 = vadd.f32 %v2955_v61, %v2854_v21  ;;  %v3219_v16 = vld [vmem:[%s10130_s7 + $0x608] sm:$0xff] (%p2351_p1)  ;;  %v3226_v18 = vld [vmem:[%s10130_s7 + $0x640] sm:$0xff] (%p2351_p1)  ;;  %3395 = vmatpush.msra.mxu2 (%p2351_p1), %v3091_v51  ;;  %v3244_v51 = vld [vmem:[%s10130_s7 + $0x6d0] sm:$0xff] (%p2351_p1) }
 0x4f8   : > { %v2982_v4 = vmul.f32 0.5, %v2958_v22  ;;  %v3083_v61 = vld [vmem:[%s10130_s7 + $0x1c8] sm:$0xff] (%p2351_p1)  ;;  %3439 = vmatpush.msra.mxu3 (%p2351_p1), %v3219_v16  ;;  %v3082_v22 = vld [vmem:[%s10130_s7 + $0x1c0] sm:$0xff] (%p2351_p1)  ;;  %3350 = vmatpush.msra.mxu1 (%p2351_p1), %v3226_v18  ;;  %v3101_v16 = vld [vmem:[%s10130_s7 + $0x258] sm:$0xff] (%p2351_p1) }
 0x4f9   : > { %v2986_v25 = vmul.f32 0.5, %v2959_v10  ;;  %v3211_v21 = vld [vmem:[%s10130_s7 + $0x5c8] sm:$0xff] (%p2351_p1)  ;;  %v3218_v10 = vld [vmem:[%s10130_s7 + $0x600] sm:$0xff] (%p2351_p1)  ;;  %3396 = vmatpush.msra.mxu2 (%p2351_p1), %v3083_v61  ;;  %v3229_v18 = vld [vmem:[%s10130_s7 + $0x658] sm:$0xff] (%p2351_p1) }
 0x4fa   : > { %4915 = vtanh.f32 %v2982_v4  ;;  %v3075_v4 = vld [vmem:[%s10130_s7 + $0x188] sm:$0xff] (%p2351_p1)  ;;  %3440 = vmatpush.msra.mxu3 (%p2351_p1), %v3211_v21  ;;  %3351 = vmatpush.msra.mxu1 (%p2351_p1), %v3218_v10  ;;  %v3236_v61 = vld [vmem:[%s10130_s7 + $0x690] sm:$0xff] (%p2351_p1)  ;;  %v3093_v21 = vld [vmem:[%s10130_s7 + $0x218] sm:$0xff] (%p2351_p1) }
 0x4fb   : > { %4917 = vtanh.f32 %v2986_v25  ;;  %v3203_v25 = vld [vmem:[%s10130_s7 + $0x588] sm:$0xff] (%p2351_p1)  ;;  %3397 = vmatpush.msra.mxu2 (%p2351_p1), %v3075_v4  ;;  %v3221_v10 = vld [vmem:[%s10130_s7 + $0x618] sm:$0xff] (%p2351_p1)  ;;  %v3228_v4 = vld [vmem:[%s10130_s7 + $0x650] sm:$0xff] (%p2351_p1) }
 0x4fc   : > { %v2873_v12 = vpop.f32.mrf.mxu0  ;;  %v2893_v13 = vpop.f32.mrf.mxu1  ;;  %3441 = vmatpush.msra.mxu3 (%p2351_p1), %v3203_v25  ;;  %v3085_v25 = vld [vmem:[%s10130_s7 + $0x1d8] sm:$0xff] (%p2351_p1) }
 0x4fd   : > { %v2894_v2 = vadd.f32 %v2893_v13, %v2873_v12  ;;  %v3074_v12 = vld [vmem:[%s10130_s7 + $0x180] sm:$0xff] (%p2351_p1) }
 0x4fe   :  { %v3210_v13 = vld [vmem:[%s10130_s7 + $0x5c0] sm:$0xff] (%p2351_p1) }
 0x4ff   : > { %v2960_v19 = vadd.f32 %v2956_v17, %v2894_v2  ;;  %v3067_v17 = vld [vmem:[%s10130_s7 + $0x148] sm:$0xff] (%p2351_p1)  ;;  %3352 = vmatpush.msra.mxu1 (%p2351_p1), %v3210_v13  ;;  %v3213_v13 = vld [vmem:[%s10130_s7 + $0x5d8] sm:$0xff] (%p2351_p1) }
 0x500   : > { %v4916_v32 = vpop.eup %4915  ;;  %v3195_v2 = vld [vmem:[%s10130_s7 + $0x548] sm:$0xff] (%p2351_p1)  ;;  %3398 = vmatpush.msra.mxu2 (%p2351_p1), %v3067_v17  ;;  %v8567_v17 = vld [vmem:[#allocation3 + $0x18] sm:$0xff] (%p2351_p1) }
 0x501   : > { %v4918_v33 = vpop.eup %4917  ;;  %v2984_v53 = vadd.f32 1.0, %v4916_v32  ;;  %4919 = vtanh.f32 %v2960_v19  ;;  %v3066_v19 = vld [vmem:[%s10130_s7 + $0x140] sm:$0xff] (%p2351_p1)  ;;  %3442 = vmatpush.msra.mxu3 (%p2351_p1), %v3195_v2 }
 0x502   : > { %v2988_v34 = vadd.f32 1.0, %v4918_v33  ;;  %v3202_v32 = vld [vmem:[%s10130_s7 + $0x580] sm:$0xff] (%p2351_p1)  ;;  %v3059_v33 = vld [vmem:[%s10130_s7 + $0x108] sm:$0xff] (%p2351_p1) }
 0x503   : > { %v2913_v37 = vpop.f32.mrf.mxu2  ;;  %v2933_v38 = vpop.f32.mrf.mxu3  ;;  %v2985_v23 = vmul.f32 0.5, %v2984_v53  ;;  %v3187_v53 = vld [vmem:[%s10130_s7 + $0x508] sm:$0xff] (%p2351_p1)  ;;  %3353 = vmatpush.msra.mxu1 (%p2351_p1), %v3202_v32  ;;  %3399 = vmatpush.msra.mxu2 (%p2351_p1), %v3059_v33  ;;  %v3077_v32 = vld [vmem:[%s10130_s7 + $0x198] sm:$0xff] (%p2351_p1)  ;;  %v3084_v33 = vld [vmem:[%s10130_s7 + $0x1d0] sm:$0xff] (%p2351_p1) }
 0x504   : > { %v2989_v28 = vmul.f32 0.5, %v2988_v34  ;;  %v2934_v58 = vadd.f32 %v2933_v38, %v2913_v37  ;;  %v3058_v34 = vld [vmem:[%s10130_s7 + $0x100] sm:$0xff] (%p2351_p1)  ;;  %v3051_v37 = vld [vmem:[%s10130_s7 + $0xc8] sm:$0xff] (%p2351_p1)  ;;  %3443 = vmatpush.msra.mxu3 (%p2351_p1), %v3187_v53  ;;  %v3205_v53 = vld [vmem:[%s10130_s7 + $0x598] sm:$0xff] (%p2351_p1) }
 0x505   :  { %v3179_v38 = vld [vmem:[%s10130_s7 + $0x4c8] sm:$0xff] (%p2351_p1)  ;;  %3400 = vmatpush.msra.mxu2 (%p2351_p1), %v3051_v37  ;;  %v3076_v37 = vld [vmem:[%s10130_s7 + $0x190] sm:$0xff] (%p2351_p1) }
 0x506   : > { %v2995_v26 = vmul.f32 %v2989_v28, %v2963_v35  ;;  %v2961_v39 = vadd.f32 %v2957_v56, %v2934_v58  ;;  %v3194_v35 = vld [vmem:[%s10130_s7 + $0x540] sm:$0xff] (%p2351_p1)  ;;  %v3043_v28 = vld [vmem:[%s10130_s7 + $0x88] sm:$0xff] (%p2351_p1)  ;;  %3444 = vmatpush.msra.mxu3 (%p2351_p1), %v3179_v38  ;;  %v3197_v38 = vld [vmem:[%s10130_s7 + $0x558] sm:$0xff] (%p2351_p1) }
 0x507   : > { %v4920_v24 = vpop.eup %4919  ;;  %v3050_v56 = vld [vmem:[%s10130_s7 + $0xc0] sm:$0xff] (%p2351_p1)  ;;  %3354 = vmatpush.msra.mxu1 (%p2351_p1), %v3194_v35  ;;  %v3171_v58 = vld [vmem:[%s10130_s7 + $0x488] sm:$0xff] (%p2351_p1)  ;;  %3401 = vmatpush.msra.mxu2 (%p2351_p1), %v3043_v28  ;;  %v3069_v35 = vld [vmem:[%s10130_s7 + $0x158] sm:$0xff] (%p2351_p1) }
 0x508   : > { %v2996_v40 = vmul.f32 %v4920_v24, %v2985_v23  ;;  %v2991_v29 = vmul.f32 0.5, %v2961_v39  ;;  %v3186_v23 = vld [vmem:[%s10130_s7 + $0x500] sm:$0xff] (%p2351_p1)  ;;  %v3035_v24 = vld [vmem:[%s10130_s7 + $0x48] sm:$0xff] (%p2351_p1)  ;;  %3445 = vmatpush.msra.mxu3 (%p2351_p1), %v3171_v58  ;;  %v3068_v28 = vld [vmem:[%s10130_s7 + $0x150] sm:$0xff] (%p2351_p1) }
 0x509   :  { %v3178_v39 = vld [vmem:[%s10130_s7 + $0x4c0] sm:$0xff] (%p2351_p1)  ;;  %3355 = vmatpush.msra.mxu1 (%p2351_p1), %v3186_v23  ;;  %3402 = vmatpush.msra.mxu2 (%p2351_p1), %v3035_v24  ;;  %v3061_v23 = vld [vmem:[%s10130_s7 + $0x118] sm:$0xff] (%p2351_p1)  ;;  %v3196_v24 = vld [vmem:[%s10130_s7 + $0x550] sm:$0xff] (%p2351_p1) }
 0x50a   : > { %v2997_v41 = vadd.f32 %v2996_v40, %v2995_v26  ;;  %4921 = vtanh.f32 %v2991_v29  ;;  %v3042_v26 = vld [vmem:[%s10130_s7 + $0x80] sm:$0xff] (%p2351_p1)  ;;  %v3163_v40 = vld [vmem:[%s10130_s7 + $0x448] sm:$0xff] (%p2351_p1)  ;;  %v3189_v58 = vld [vmem:[%s10130_s7 + $0x518] sm:$0xff] (%p2351_p1) }
 0x50b   :  { %v3034_v29 = vld [vmem:[%s10130_s7 + $0x40] sm:$0xff] (%p2351_p1)  ;;  %3356 = vmatpush.msra.mxu1 (%p2351_p1), %v3178_v39  ;;  %3446 = vmatpush.msra.mxu3 (%p2351_p1), %v3163_v40  ;;  %v3053_v40 = vld [vmem:[%s10130_s7 + $0xd8] sm:$0xff] (%p2351_p1) }
 0x50c   : > { %4923 = vtanh.f32 %v2997_v41  ;;  %3003 = vst [vmem:[#allocation6] sm:$0xff] %v2997_v41  ;;  %v3170_v41 = vld [vmem:[%s10130_s7 + $0x480] sm:$0xff] (%p2351_p1) }
 0x50d   :  { %4079 = vst [vmem:[#allocation6] sm:$0xff] (%p2351_p1), %v4987_v3  ;;  %3357 = vmatpush.msra.mxu1 (%p2351_p1), %v3170_v41  ;;  %v3181_v41 = vld [vmem:[%s10130_s7 + $0x4d8] sm:$0xff] (%p2351_p1) }
 0x50f   :  { %3358 = vmatpush.msra.mxu1 (%p2351_p1), %v3162_v60  ;;  %v3037_v60 = vld [vmem:[%s10130_s7 + $0x58] sm:$0xff] (%p2351_p1) }
 0x510   : > { %v4922_v44 = vpop.eup %4921 }
 0x511   : > { %v2993_v45 = vadd.f32 1.0, %v4922_v44  ;;  %v3027_v44 = vld [vmem:[%s10130_s7 + $0x8] sm:$0xff] (%p2351_p1)  ;;  %3359 = vmatpush.msra.mxu1 (%p2351_p1), %v3154_v50 }
 0x512   : > { %v4924_v20 = vpop.eup %4923  ;;  %3403 = vmatpush.msra.mxu2 (%p2351_p1), %v3027_v44  ;;  %v3188_v44 = vld [vmem:[%s10130_s7 + $0x510] sm:$0xff] (%p2351_p1)  ;;  %v8655_v50 = vld [vmem:[#allocation3 + $0x28] sm:$0xff] (%p2351_p1) }
 0x513   : > { %v2994_v8 = vmul.f32 0.5, %v2993_v45  ;;  %v3155_v45 = vld [vmem:[%s10130_s7 + $0x408] sm:$0xff] (%p2351_p1)  ;;  %3520 = vmatpush.msrb.mxu1 (%p2351_p1), %v3276_v55  ;;  %v3172_v55 = vld [vmem:[%s10130_s7 + $0x490] sm:$0xff] (%p2351_p1) }
 0x514   :  { %2353 = sbr.rel (!%p2351_p1) target bundleno = 1016 (0x3f8), region = 104  ;;  %3447 = vmatpush.msra.mxu3 (%p2351_p1), %v3155_v45  ;;  %v3045_v45 = vld [vmem:[%s10130_s7 + $0x98] sm:$0xff] (%p2351_p1) }
 0x515   : > { %v2999_v46 = vmul.f32 %v4924_v20, %v2994_v8  ;;  %v8435_v20 = vld [vmem:[#allocation3] sm:$0xff] (%p2351_p1) }
 0x516   :  { %3404 = vmatmul.f32.vlgmr.msra.gmra.mxu2 (%p2351_p1), %v8435_v20  ;;  %3608 = vmatpush.msrb.mxu3 (%p2351_p1), %v3277_v47  ;;  %v3173_v47 = vld [vmem:[%s10130_s7 + $0x498] sm:$0xff] (%p2351_p1) }
 0x517   : > { %3001 = vst [vmem:[#allocation5 + $0x8] sm:$0xff] %v2999_v46 }
 0x518   : > { %3007 = vst [vmem:[%s3006_s25] sm:$0xff] %v2999_v46  ;;  %v3149_v46 = vld [vmem:[%s10130_s7 + $0x3d8] sm:$0xff] (%p2351_p1)  ;;  %3609 = vmatpush.msrb.mxu3 (%p2351_p1), %v3269_v54 }
 0x519   :  { %4077 = vst [vmem:[#allocation5 + $0x8] sm:$0xff] %v4987_v3  ;;  %v3122_v3 = vld [vmem:[%s10130_s7 + $0x300] sm:$0xff]  ;;  %3564 = vmatpush.msrb.mxu2 %v3149_v46  ;;  %v3052_v46 = vld [vmem:[%s10130_s7 + $0xd0] sm:$0xff] }
 0x51a   :  { %3303 = vmatpush.msra.mxu0 %v3122_v3  ;;  %v3268_v3 = vld [vmem:[%s10130_s7 + $0x790] sm:$0xff]  ;;  %3610 = vmatpush.msrb.mxu3 %v3261_v59  ;;  %v3157_v59 = vld [vmem:[%s10130_s7 + $0x418] sm:$0xff] }
 0x51b   :  { %3565 = vmatpush.msrb.mxu2 %v3141_v48  ;;  %3521 = vmatpush.msrb.mxu1 %v3268_v3  ;;  %v3044_v48 = vld [vmem:[%s10130_s7 + $0x90] sm:$0xff] }
 0x51c   :  { %3304 = vmatpush.msra.mxu0 %v3114_v63  ;;  %v3260_v63 = vld [vmem:[%s10130_s7 + $0x750] sm:$0xff]  ;;  %3611 = vmatpush.msrb.mxu3 %v3253_v31  ;;  %v3279_v31 = vld [vmem:[%s10130_s7 + $0x7e8] sm:$0xff] }
 0x51d   :  { %3566 = vmatpush.msrb.mxu2 %v3133_v30  ;;  %3522 = vmatpush.msrb.mxu1 %v3260_v63  ;;  %v3029_v30 = vld [vmem:[%s10130_s7 + $0x18] sm:$0xff]  ;;  %v3164_v3 = vld [vmem:[%s10130_s7 + $0x450] sm:$0xff] }
 0x51e   :  { %3305 = vmatpush.msra.mxu0 %v3106_v1  ;;  %3407 = vmatmul.f32.gmra.mxu2 %v8479_v42  ;;  %v3252_v1 = vld [vmem:[%s10130_s7 + $0x710] sm:$0xff] }
 0x51f   :  { %v8437_v8 = vld [vmem:[#allocation4] sm:$0xff]  ;;  %v8481_v43 = vld [vmem:[#allocation4 + $0x8] sm:$0xff]  ;;  %3567 = vmatpush.msrb.mxu2 %v3125_v11  ;;  %v8525_v15 = vld [vmem:[#allocation4 + $0x10] sm:$0xff]  ;;  %3612 = vmatpush.msrb.mxu3 %v3245_v27 }
 0x520   :  { %3306 = vmatpush.msra.mxu0 %v3098_v14  ;;  %3448 = vmatmul.f32.vlgmr.msra.gmra.mxu3 %v8437_v8  ;;  %v8523_v14 = vld [vmem:[#allocation3 + $0x10] sm:$0xff]  ;;  %v8569_v2 = vld [vmem:[#allocation4 + $0x18] sm:$0xff]  ;;  %v8613_v39 = vld [vmem:[#allocation4 + $0x20] sm:$0xff] }
 0x521   :  { %3360 = vmatmul.f32.vlgmr.msra.gmra.mxu1 %v8437_v8  ;;  %3568 = vmatpush.msrb.mxu2 %v3117_v0  ;;  %v8657_v54 = vld [vmem:[#allocation4 + $0x28] sm:$0xff]  ;;  %v3151_v11 = vld [vmem:[%s10130_s7 + $0x3e8] sm:$0xff] }
 0x522   :  { %3307 = vmatpush.msra.mxu0 %v3090_v52  ;;  %3523 = vmatpush.msrb.mxu1 %v3252_v1  ;;  %v3108_v52 = vld [vmem:[%s10130_s7 + $0x290] sm:$0xff]  ;;  %v3143_v0 = vld [vmem:[%s10130_s7 + $0x3a8] sm:$0xff] }
 0x523   :  { %3569 = vmatpush.msrb.mxu2 %v3109_v5  ;;  %3613 = vmatpush.msrb.mxu3 %v3237_v7  ;;  %v3156_v63 = vld [vmem:[%s10130_s7 + $0x410] sm:$0xff]  ;;  %v3271_v27 = vld [vmem:[%s10130_s7 + $0x7a8] sm:$0xff]  ;;  %v8701_v5 = vld [vmem:[#allocation4 + $0x30] sm:$0xff] }
 0x524   :  { %3308 = vmatpush.msra.mxu0 %v3082_v22  ;;  %3524 = vmatpush.msrb.mxu1 %v3244_v51  ;;  %v3100_v22 = vld [vmem:[%s10130_s7 + $0x250] sm:$0xff]  ;;  %v3135_v7 = vld [vmem:[%s10130_s7 + $0x368] sm:$0xff]  ;;  %v3142_v51 = vld [vmem:[%s10130_s7 + $0x3a0] sm:$0xff] }
 0x525   :  { %3570 = vmatpush.msrb.mxu2 %v3101_v16  ;;  %3614 = vmatpush.msrb.mxu3 %v3229_v18  ;;  %v8699_v1 = vld [vmem:[#allocation3 + $0x30] sm:$0xff]  ;;  %v3263_v16 = vld [vmem:[%s10130_s7 + $0x768] sm:$0xff] }
 0x526   :  { %3309 = vmatpush.msra.mxu0 %v3074_v12  ;;  %3410 = vmatmul.f32.gmra.mxu2 %v8523_v14  ;;  %v3092_v12 = vld [vmem:[%s10130_s7 + $0x210] sm:$0xff]  ;;  %v3127_v18 = vld [vmem:[%s10130_s7 + $0x328] sm:$0xff] }
 0x527   :  { %3525 = vmatpush.msrb.mxu1 %v3236_v61  ;;  %3571 = vmatpush.msrb.mxu2 %v3093_v21  ;;  %v3134_v61 = vld [vmem:[%s10130_s7 + $0x360] sm:$0xff]  ;;  %v8728_v21 = vld [vmem:[#allocation3 + $0x38] sm:$0xff] }
 0x528   :  { %3310 = vmatpush.msra.mxu0 %v3066_v19  ;;  %3451 = vmatmul.f32.gmra.mxu3 %v8481_v43  ;;  %v3220_v19 = vld [vmem:[%s10130_s7 + $0x610] sm:$0xff] }
 0x529   :  { %3363 = vmatmul.f32.gmra.mxu1 %v8481_v43  ;;  %3615 = vmatpush.msrb.mxu3 %v3221_v10  ;;  %v3255_v10 = vld [vmem:[%s10130_s7 + $0x728] sm:$0xff] }
 0x52a   :  { %3311 = vmatpush.msra.mxu0 %v3058_v34  ;;  %3526 = vmatpush.msrb.mxu1 %v3228_v4  ;;  %v3212_v34 = vld [vmem:[%s10130_s7 + $0x5d0] sm:$0xff]  ;;  %v3262_v4 = vld [vmem:[%s10130_s7 + $0x760] sm:$0xff] }
 0x52b   :  { %3572 = vmatpush.msrb.mxu2 %v3085_v25  ;;  %3616 = vmatpush.msrb.mxu3 %v3213_v13  ;;  %v3119_v25 = vld [vmem:[%s10130_s7 + $0x2e8] sm:$0xff] }
 0x52c   :  { %3312 = vmatpush.msra.mxu0 %v3050_v56  ;;  %3527 = vmatpush.msrb.mxu1 %v3220_v19  ;;  %v3204_v56 = vld [vmem:[%s10130_s7 + $0x590] sm:$0xff]  ;;  %v3247_v13 = vld [vmem:[%s10130_s7 + $0x6e8] sm:$0xff]  ;;  %v3254_v19 = vld [vmem:[%s10130_s7 + $0x720] sm:$0xff] }
 0x52d   :  { %3573 = vmatpush.msrb.mxu2 %v3077_v32  ;;  %3617 = vmatpush.msrb.mxu3 %v3205_v53  ;;  %v3111_v32 = vld [vmem:[%s10130_s7 + $0x2a8] sm:$0xff] }
 0x52e   :  { %3313 = vmatpush.msra.mxu0 %v3042_v26  ;;  %3413 = vmatmul.f32.gmra.mxu2 %v8567_v17  ;;  %v8611_v26 = vld [vmem:[#allocation3 + $0x20] sm:$0xff]  ;;  %v8759_v53 = vld [vmem:[#allocation4 + $0x40] sm:$0xff] }
 0x52f   :  { %3528 = vmatpush.msrb.mxu1 %v3212_v34  ;;  %3574 = vmatpush.msrb.mxu2 %v3069_v35  ;;  %v3118_v34 = vld [vmem:[%s10130_s7 + $0x2e0] sm:$0xff]  ;;  %v3239_v35 = vld [vmem:[%s10130_s7 + $0x6a8] sm:$0xff] }
 0x530   :  { %3314 = vmatpush.msra.mxu0 %v3034_v29  ;;  %3454 = vmatmul.f32.gmra.mxu3 %v8525_v15  ;;  %v3060_v29 = vld [vmem:[%s10130_s7 + $0x110] sm:$0xff] }
 0x531   :  { %3366 = vmatmul.f32.gmra.mxu1 %v8525_v15  ;;  %3618 = vmatpush.msrb.mxu3 %v3197_v38  ;;  %v3103_v38 = vld [vmem:[%s10130_s7 + $0x268] sm:$0xff] }
 0x532   :  { %3315 = vmatpush.msra.mxu0 %v3026_v36  ;;  %3529 = vmatpush.msrb.mxu1 %v3204_v56  ;;  %v3180_v36 = vld [vmem:[%s10130_s7 + $0x4d0] sm:$0xff]  ;;  %v3110_v56 = vld [vmem:[%s10130_s7 + $0x2a0] sm:$0xff] }
 0x533   :  { %3316 = vmatmul.f32.vlgmr.msra.gmra.mxu0 %v8435_v20  ;;  %3575 = vmatpush.msrb.mxu2 %v3061_v23  ;;  %v3231_v23 = vld [vmem:[%s10130_s7 + $0x668] sm:$0xff] }
 0x534   :  { %3476 = vmatpush.msrb.mxu0 %v3148_v49  ;;  %3619 = vmatpush.msrb.mxu3 %v3189_v58  ;;  %v3165_v49 = vld [vmem:[%s10130_s7 + $0x458] sm:$0xff]  ;;  %v3095_v58 = vld [vmem:[%s10130_s7 + $0x228] sm:$0xff] }
 0x535   :  { %3530 = vmatpush.msrb.mxu1 %v3196_v24  ;;  %3576 = vmatpush.msrb.mxu2 %v3053_v40  ;;  %v3102_v24 = vld [vmem:[%s10130_s7 + $0x260] sm:$0xff]  ;;  %v3223_v40 = vld [vmem:[%s10130_s7 + $0x628] sm:$0xff] }
 0x536   :  { %3477 = vmatpush.msrb.mxu0 %v3140_v9  ;;  %3416 = vmatmul.f32.gmra.mxu2 %v8611_v26  ;;  %v3036_v9 = vld [vmem:[%s10130_s7 + $0x50] sm:$0xff] }
 0x537   :  { %3620 = vmatpush.msrb.mxu3 %v3181_v41  ;;  %3531 = vmatpush.msrb.mxu1 %v3188_v44  ;;  %v3087_v41 = vld [vmem:[%s10130_s7 + $0x1e8] sm:$0xff]  ;;  %v3094_v44 = vld [vmem:[%s10130_s7 + $0x220] sm:$0xff] }
 0x538   :  { %3478 = vmatpush.msrb.mxu0 %v3132_v62  ;;  %3457 = vmatmul.f32.gmra.mxu3 %v8569_v2  ;;  %v3028_v62 = vld [vmem:[%s10130_s7 + $0x10] sm:$0xff] }
 0x539   :  { %3369 = vmatmul.f32.gmra.mxu1 %v8569_v2  ;;  %3577 = vmatpush.msrb.mxu2 %v3045_v45  ;;  %v3215_v45 = vld [vmem:[%s10130_s7 + $0x5e8] sm:$0xff] }
 0x53a   :  { %3479 = vmatpush.msrb.mxu0 %v3124_v57  ;;  %3621 = vmatpush.msrb.mxu3 %v3173_v47  ;;  %v3150_v57 = vld [vmem:[%s10130_s7 + $0x3e0] sm:$0xff]  ;;  %v3079_v47 = vld [vmem:[%s10130_s7 + $0x1a8] sm:$0xff] }
 0x53b   :  { %3319 = vmatmul.f32.gmra.mxu0 %v8479_v42  ;;  %3532 = vmatpush.msrb.mxu1 %v3180_v36  ;;  %v3086_v36 = vld [vmem:[%s10130_s7 + $0x1e0] sm:$0xff] }
 0x53c   :  { %3480 = vmatpush.msrb.mxu0 %v3116_v6  ;;  %3578 = vmatpush.msrb.mxu2 %v3037_v60  ;;  %v3278_v6 = vld [vmem:[%s10130_s7 + $0x7e0] sm:$0xff]  ;;  %v3207_v60 = vld [vmem:[%s10130_s7 + $0x5a8] sm:$0xff] }
 0x53d   :  { %3622 = vmatpush.msrb.mxu3 %v3165_v49  ;;  %3533 = vmatpush.msrb.mxu1 %v3172_v55  ;;  %v3071_v49 = vld [vmem:[%s10130_s7 + $0x168] sm:$0xff]  ;;  %v3078_v55 = vld [vmem:[%s10130_s7 + $0x1a0] sm:$0xff] }
 0x53e   :  { %3481 = vmatpush.msrb.mxu0 %v3108_v52  ;;  %3419 = vmatmul.f32.gmra.mxu2 %v8655_v50  ;;  %v3270_v52 = vld [vmem:[%s10130_s7 + $0x7a0] sm:$0xff] }
 0x53f   :  { %3579 = vmatpush.msrb.mxu2 %v3029_v30  ;;  %3623 = vmatpush.msrb.mxu3 %v3157_v59  ;;  %v3199_v30 = vld [vmem:[%s10130_s7 + $0x568] sm:$0xff] }
 0x540   :  { %3482 = vmatpush.msrb.mxu0 %v3100_v22  ;;  %3460 = vmatmul.f32.gmra.mxu3 %v8613_v39  ;;  %v8730_v22 = vld [vmem:[#allocation4 + $0x38] sm:$0xff]  ;;  %v3063_v59 = vld [vmem:[%s10130_s7 + $0x128] sm:$0xff] }
 0x541   :  { %3372 = vmatmul.f32.gmra.mxu1 %v8613_v39  ;;  %3740 = vmatpush.msra.mxu2 %v3151_v11  ;;  %v3191_v11 = vld [vmem:[%s10130_s7 + $0x528] sm:$0xff] }
 0x542   :  { %3483 = vmatpush.msrb.mxu0 %v3092_v12  ;;  %3534 = vmatpush.msrb.mxu1 %v3164_v3  ;;  %v3126_v12 = vld [vmem:[%s10130_s7 + $0x320] sm:$0xff] }
 0x543   :  { %3322 = vmatmul.f32.gmra.mxu0 %v8523_v14  ;;  %3784 = vmatpush.msra.mxu3 %v3279_v31  ;;  %v3070_v3 = vld [vmem:[%s10130_s7 + $0x160] sm:$0xff]  ;;  %v3055_v31 = vld [vmem:[%s10130_s7 + $0xe8] sm:$0xff] }
 0x544   :  { %3484 = vmatpush.msrb.mxu0 %v3084_v33  ;;  %3535 = vmatpush.msrb.mxu1 %v3156_v63  ;;  %v8757_v33 = vld [vmem:[#allocation3 + $0x40] sm:$0xff] }
 0x545   :  { %3741 = vmatpush.msra.mxu2 %v3143_v0  ;;  %3785 = vmatpush.msra.mxu3 %v3271_v27  ;;  %v3062_v63 = vld [vmem:[%s10130_s7 + $0x120] sm:$0xff]  ;;  %v3183_v0 = vld [vmem:[%s10130_s7 + $0x4e8] sm:$0xff] }
 0x546   :  { %3485 = vmatpush.msrb.mxu0 %v3076_v37  ;;  %3422 = vmatmul.f32.gmra.mxu2 %v8699_v1  ;;  %v3246_v37 = vld [vmem:[%s10130_s7 + $0x6e0] sm:$0xff]  ;;  %v3047_v27 = vld [vmem:[%s10130_s7 + $0xa8] sm:$0xff] }
 0x547   :  { %3696 = vmatpush.msra.mxu1 %v3278_v6  ;;  %3742 = vmatpush.msra.mxu2 %v3135_v7  ;;  %v3054_v6 = vld [vmem:[%s10130_s7 + $0xe0] sm:$0xff]  ;;  %v3175_v7 = vld [vmem:[%s10130_s7 + $0x4a8] sm:$0xff] }
 0x548   :  { %3486 = vmatpush.msrb.mxu0 %v3068_v28  ;;  %3463 = vmatmul.f32.gmra.mxu3 %v8657_v54  ;;  %v3238_v28 = vld [vmem:[%s10130_s7 + $0x6a0] sm:$0xff] }
 0x549   :  { %3375 = vmatmul.f32.gmra.mxu1 %v8657_v54  ;;  %3786 = vmatpush.msra.mxu3 %v3263_v16  ;;  %v3039_v16 = vld [vmem:[%s10130_s7 + $0x68] sm:$0xff] }
 0x54a   :  { %3487 = vmatpush.msrb.mxu0 %v3060_v29  ;;  %3697 = vmatpush.msra.mxu1 %v3270_v52  ;;  %v3230_v29 = vld [vmem:[%s10130_s7 + $0x660] sm:$0xff] }
 0x54b   :  { %3325 = vmatmul.f32.gmra.mxu0 %v8567_v17  ;;  %3743 = vmatpush.msra.mxu2 %v3127_v18  ;;  %v3046_v52 = vld [vmem:[%s10130_s7 + $0xa0] sm:$0xff]  ;;  %v3167_v18 = vld [vmem:[%s10130_s7 + $0x468] sm:$0xff] }
 0x54c   :  { %3488 = vmatpush.msrb.mxu0 %v3052_v46  ;;  %3787 = vmatpush.msra.mxu3 %v3255_v10  ;;  %v3222_v46 = vld [vmem:[%s10130_s7 + $0x620] sm:$0xff]  ;;  %v3031_v10 = vld [vmem:[%s10130_s7 + $0x28] sm:$0xff] }
 0x54d   :  { %3698 = vmatpush.msra.mxu1 %v3262_v4  ;;  %3744 = vmatpush.msra.mxu2 %v3119_v25  ;;  %v3038_v4 = vld [vmem:[%s10130_s7 + $0x60] sm:$0xff]  ;;  %v3159_v25 = vld [vmem:[%s10130_s7 + $0x428] sm:$0xff] }
 0x54e   :  { %3489 = vmatpush.msrb.mxu0 %v3044_v48  ;;  %3425 = vmatmul.f32.gmra.mxu2 %v8728_v21  ;;  %v3214_v48 = vld [vmem:[%s10130_s7 + $0x5e0] sm:$0xff] }
 0x54f   :  { %3788 = vmatpush.msra.mxu3 %v3247_v13  ;;  %3699 = vmatpush.msra.mxu1 %v3254_v19  ;;  %v3153_v13 = vld [vmem:[%s10130_s7 + $0x3f8] sm:$0xff]  ;;  %v3030_v19 = vld [vmem:[%s10130_s7 + $0x20] sm:$0xff] }
 0x550   :  { %3490 = vmatpush.msrb.mxu0 %v3036_v9  ;;  %3466 = vmatmul.f32.gmra.mxu3 %v8701_v5  ;;  %v3206_v9 = vld [vmem:[%s10130_s7 + $0x5a0] sm:$0xff] }
 0x551   :  { %3378 = vmatmul.f32.gmra.mxu1 %v8701_v5  ;;  %3745 = vmatpush.msra.mxu2 %v3111_v32  ;;  %v3281_v32 = vld [vmem:[%s10130_s7 + $0x7f8] sm:$0xff] }
 0x552   :  { %3491 = vmatpush.msrb.mxu0 %v3028_v62  ;;  %3789 = vmatpush.msra.mxu3 %v3239_v35  ;;  %v3198_v62 = vld [vmem:[%s10130_s7 + $0x560] sm:$0xff]  ;;  %v3145_v35 = vld [vmem:[%s10130_s7 + $0x3b8] sm:$0xff] }
 0x553   :  { %3328 = vmatmul.f32.gmra.mxu0 %v8611_v26  ;;  %3700 = vmatpush.msra.mxu1 %v3246_v37  ;;  %v3152_v37 = vld [vmem:[%s10130_s7 + $0x3f0] sm:$0xff] }
 0x554   :  { %3652 = vmatpush.msra.mxu0 %v3150_v57  ;;  %3746 = vmatpush.msra.mxu2 %v3103_v38  ;;  %v3190_v57 = vld [vmem:[%s10130_s7 + $0x520] sm:$0xff]  ;;  %v3273_v38 = vld [vmem:[%s10130_s7 + $0x7b8] sm:$0xff] }
 0x555   :  { %3790 = vmatpush.msra.mxu3 %v3231_v23  ;;  %3701 = vmatpush.msra.mxu1 %v3238_v28  ;;  %v3137_v23 = vld [vmem:[%s10130_s7 + $0x378] sm:$0xff]  ;;  %v8950_v28 = vld [vmem:[%s10132_s9] sm:$0xff] }
 0x556   :  { %3653 = vmatpush.msra.mxu0 %v3142_v51  ;;  %3428 = vmatmul.f32.gmra.mxu2 %v8757_v33  ;;  %v3182_v51 = vld [vmem:[%s10130_s7 + $0x4e0] sm:$0xff] }
 0x557   :  { %3747 = vmatpush.msra.mxu2 %v3095_v58  ;;  %3791 = vmatpush.msra.mxu3 %v3223_v40  ;;  %v3144_v58 = vld [vmem:[%s10130_s7 + $0x3b0] sm:$0xff]  ;;  %v8961_v40 = vperm.slane %v8950_v28, 0 }
 0x558   :  { %3654 = vmatpush.msra.mxu0 %v3134_v61  ;;  %3469 = vmatmul.f32.gmra.mxu3 %v8730_v22  ;;  %v3174_v61 = vld [vmem:[%s10130_s7 + $0x4a0] sm:$0xff] }
 0x559   :  { %3381 = vmatmul.f32.gmra.mxu1 %v8730_v22  ;;  %3748 = vmatpush.msra.mxu2 %v3087_v41  ;;  %v8966_v41 = vperm.slane %v8950_v28, 1 }
 0x55a   :  { %3655 = vmatpush.msra.mxu0 %v3126_v12  ;;  %3702 = vmatpush.msra.mxu1 %v3230_v29  ;;  %v3166_v12 = vld [vmem:[%s10130_s7 + $0x460] sm:$0xff] }
 0x55b   :  { %3331 = vmatmul.f32.gmra.mxu0 %v8655_v50  ;;  %3792 = vmatpush.msra.mxu3 %v3215_v45  ;;  %v3129_v45 = vld [vmem:[%s10130_s7 + $0x338] sm:$0xff] }
 0x55c   :  { %3656 = vmatpush.msra.mxu0 %v3118_v34  ;;  %3703 = vmatpush.msra.mxu1 %v3222_v46  ;;  %v3158_v34 = vld [vmem:[%s10130_s7 + $0x420] sm:$0xff]  ;;  %v3136_v46 = vld [vmem:[%s10130_s7 + $0x370] sm:$0xff] }
 0x55d   :  { %3749 = vmatpush.msra.mxu2 %v3079_v47  ;;  %3793 = vmatpush.msra.mxu3 %v3207_v60  ;;  %v3264_v60 = vld [vmem:[%s10130_s7 + $0x770] sm:$0xff] }
 0x55e   :  { %3657 = vmatpush.msra.mxu0 %v3110_v56  ;;  %3580 = vmatmul.f32.vlgmr.msrb.gmra.mxu2 %v8435_v20  ;;  %v3280_v56 = vld [vmem:[%s10130_s7 + $0x7f0] sm:$0xff] }
 0x55f   :  { %3704 = vmatpush.msra.mxu1 %v3214_v48  ;;  %3750 = vmatpush.msra.mxu2 %v3071_v49  ;;  %v3121_v48 = vld [vmem:[%s10130_s7 + $0x2f8] sm:$0xff] }
 0x560   :  { %3472 = vmatmul.f32.gmra.mxu3 %v8759_v53  ;;  %3658 = vmatpush.msra.mxu0 %v3102_v24  ;;  %v3265_v24 = vld [vmem:[%s10130_s7 + $0x778] sm:$0xff] }
 0x561   :  { %3384 = vmatmul.f32.gmra.mxu1 %v8759_v53  ;;  %3794 = vmatpush.msra.mxu3 %v3199_v30 }
 0x562   :  { %3659 = vmatpush.msra.mxu0 %v3094_v44  ;;  %3705 = vmatpush.msra.mxu1 %v3206_v9  ;;  %v3272_v44 = vld [vmem:[%s10130_s7 + $0x7b0] sm:$0xff] }
 0x563   :  { %3334 = vmatmul.f32.gmra.mxu0 %v8699_v1  ;;  %3751 = vmatpush.msra.mxu2 %v3063_v59 }
 0x564   :  { %3660 = vmatpush.msra.mxu0 %v3086_v36  ;;  %3795 = vmatpush.msra.mxu3 %v3191_v11  ;;  %v3257_v36 = vld [vmem:[%s10130_s7 + $0x738] sm:$0xff] }
 0x565   :  { %3706 = vmatpush.msra.mxu1 %v3198_v62  ;;  %3752 = vmatpush.msra.mxu2 %v3055_v31  ;;  %v3249_v11 = vld [vmem:[%s10130_s7 + $0x6f8] sm:$0xff] }
 0x566   :  { %3583 = vmatmul.f32.gmra.mxu2 %v8479_v42  ;;  %3661 = vmatpush.msra.mxu0 %v3078_v55 }
 0x567   :  { %3796 = vmatpush.msra.mxu3 %v3183_v0  ;;  %3707 = vmatpush.msra.mxu1 %v3190_v57  ;;  %v3113_v0 = vld [vmem:[%s10130_s7 + $0x2b8] sm:$0xff]  ;;  %v3120_v57 = vld [vmem:[%s10130_s7 + $0x2f0] sm:$0xff] }
 0x568   :  { %3624 = vmatmul.f32.vlgmr.msrb.gmra.mxu3 %v8437_v8  ;;  %3662 = vmatpush.msra.mxu0 %v3070_v3  ;;  %v3128_v3 = vld [vmem:[%s10130_s7 + $0x330] sm:$0xff] }
 0x569   :  { %3536 = vmatmul.f32.vlgmr.msrb.gmra.mxu1 %v8437_v8  ;;  %3753 = vmatpush.msra.mxu2 %v3047_v27 }
 0x56a   :  { %3663 = vmatpush.msra.mxu0 %v3062_v63  ;;  %3797 = vmatpush.msra.mxu3 %v3175_v7  ;;  %v3256_v63 = vld [vmem:[%s10130_s7 + $0x730] sm:$0xff] }
 0x56b   :  { %3337 = vmatmul.f32.gmra.mxu0 %v8728_v21  ;;  %3708 = vmatpush.msra.mxu1 %v3182_v51  ;;  %v3248_v7 = vld [vmem:[%s10130_s7 + $0x6f0] sm:$0xff] }
 0x56c   :  { %3664 = vmatpush.msra.mxu0 %v3054_v6  ;;  %3754 = vmatpush.msra.mxu2 %v3039_v16  ;;  %v3241_v6 = vld [vmem:[%s10130_s7 + $0x6b8] sm:$0xff] }
 0x56d   :  { %3798 = vmatpush.msra.mxu3 %v3167_v18  ;;  %3709 = vmatpush.msra.mxu1 %v3174_v61 }
 0x56e   :  { %3586 = vmatmul.f32.gmra.mxu2 %v8523_v14  ;;  %3665 = vmatpush.msra.mxu0 %v3046_v52 }
 0x56f   :  { %3755 = vmatpush.msra.mxu2 %v3031_v10  ;;  %3799 = vmatpush.msra.mxu3 %v3159_v25  ;;  %v3105_v10 = vld [vmem:[%s10130_s7 + $0x278] sm:$0xff] }
 0x570   :  { %3627 = vmatmul.f32.gmra.mxu3 %v8481_v43  ;;  %3666 = vmatpush.msra.mxu0 %v3038_v4 }
 0x571   :  { %3539 = vmatmul.f32.gmra.mxu1 %v8481_v43  ;;  %3916 = vmatpush.msrb.mxu2 %v3153_v13  ;;  %v3233_v13 = vld [vmem:[%s10130_s7 + $0x678] sm:$0xff] }
 0x572   :  { %3710 = vmatpush.msra.mxu1 %v3166_v12  ;;  %3960 = vmatpush.msrb.mxu3 %v3281_v32  ;;  %v3112_v12 = vld [vmem:[%s10130_s7 + $0x2b0] sm:$0xff] }
 0x573   :  { %3340 = vmatmul.f32.gmra.mxu0 %v8757_v33  ;;  %3917 = vmatpush.msrb.mxu2 %v3145_v35  ;;  %v3104_v35 = vld [vmem:[%s10130_s7 + $0x270] sm:$0xff] }
 0x574   :  { %3667 = vmatpush.msra.mxu0 %v3030_v19  ;;  %3711 = vmatpush.msra.mxu1 %v3158_v34  ;;  %v3240_v19 = vld [vmem:[%s10130_s7 + $0x6b0] sm:$0xff]  ;;  %v3097_v34 = vld [vmem:[%s10130_s7 + $0x238] sm:$0xff] }
 0x575   :  { %3961 = vmatpush.msrb.mxu3 %v3273_v38  ;;  %3918 = vmatpush.msrb.mxu2 %v3137_v23 }
 0x576   :  { %3589 = vmatmul.f32.gmra.mxu2 %v8567_v17  ;;  %3872 = vmatpush.msrb.mxu1 %v3280_v56 }
 0x577   :  { %3962 = vmatpush.msrb.mxu3 %v3265_v24  ;;  %3919 = vmatpush.msrb.mxu2 %v3129_v45 }
 0x578   :  { %3630 = vmatmul.f32.gmra.mxu3 %v8525_v15  ;;  %3873 = vmatpush.msrb.mxu1 %v3272_v44  ;;  %v3089_v44 = vld [vmem:[%s10130_s7 + $0x1f8] sm:$0xff] }
 0x579   :  { %3542 = vmatmul.f32.gmra.mxu1 %v8525_v15  ;;  %3963 = vmatpush.msrb.mxu3 %v3257_v36 }
 0x57a   :  { %3874 = vmatpush.msrb.mxu1 %v3264_v60  ;;  %3920 = vmatpush.msrb.mxu2 %v3121_v48  ;;  %v3081_v60 = vld [vmem:[%s10130_s7 + $0x1b8] sm:$0xff]  ;;  %v3088_v48 = vld [vmem:[%s10130_s7 + $0x1f0] sm:$0xff] }
 0x57b   :  { %3492 = vmatmul.f32.vlgmr.msrb.gmra.mxu0 %v8435_v20  ;;  %3964 = vmatpush.msrb.mxu3 %v3249_v11  ;;  %v3216_v11 = vld [vmem:[%s10130_s7 + $0x5f0] sm:$0xff] }
 0x57c   :  { %3828 = vmatpush.msrb.mxu0 %v3152_v37  ;;  %3875 = vmatpush.msrb.mxu1 %v3256_v63  ;;  %v3225_v37 = vld [vmem:[%s10130_s7 + $0x638] sm:$0xff]  ;;  %v3080_v63 = vld [vmem:[%s10130_s7 + $0x1b0] sm:$0xff] }
 0x57d   :  { %3921 = vmatpush.msrb.mxu2 %v3113_v0  ;;  %3965 = vmatpush.msrb.mxu3 %v3241_v6 }
 0x57e   :  { %3592 = vmatmul.f32.gmra.mxu2 %v8611_v26  ;;  %3829 = vmatpush.msrb.mxu0 %v3144_v58 }
 0x57f   :  { %3876 = vmatpush.msrb.mxu1 %v3248_v7  ;;  %3922 = vmatpush.msrb.mxu2 %v3105_v10 }
 0x580   :  { %3633 = vmatmul.f32.gmra.mxu3 %v8569_v2  ;;  %3830 = vmatpush.msrb.mxu0 %v3136_v46  ;;  %v3096_v46 = vld [vmem:[%s10130_s7 + $0x230] sm:$0xff] }
 0x581   :  { %3545 = vmatmul.f32.gmra.mxu1 %v8569_v2  ;;  %3966 = vmatpush.msrb.mxu3 %v3233_v13  ;;  %v3185_v13 = vld [vmem:[%s10130_s7 + $0x4f8] sm:$0xff] }
 0x582   :  { %3831 = vmatpush.msrb.mxu0 %v3128_v3  ;;  %3877 = vmatpush.msrb.mxu1 %v3240_v19  ;;  %v3209_v3 = vld [vmem:[%s10130_s7 + $0x5b8] sm:$0xff]  ;;  %v3192_v19 = vld [vmem:[%s10130_s7 + $0x530] sm:$0xff] }
 0x583   :  { %3495 = vmatmul.f32.gmra.mxu0 %v8479_v42  ;;  %3923 = vmatpush.msrb.mxu2 %v3097_v34 }
 0x584   :  { %3832 = vmatpush.msrb.mxu0 %v3120_v57  ;;  %3967 = vmatpush.msrb.mxu3 %v3225_v37  ;;  %v3208_v57 = vld [vmem:[%s10130_s7 + $0x5b0] sm:$0xff] }
 0x585   :  { %3924 = vmatpush.msrb.mxu2 %v3089_v44 }
 0x586   :  { %3595 = vmatmul.f32.gmra.mxu2 %v8655_v50  ;;  %3833 = vmatpush.msrb.mxu0 %v3112_v12 }
 0x587   :  { %3925 = vmatpush.msrb.mxu2 %v3081_v60 }
 0x588   :  { %3636 = vmatmul.f32.gmra.mxu3 %v8613_v39  ;;  %3834 = vmatpush.msrb.mxu0 %v3104_v35 }
 0x589   :  { %3548 = vmatmul.f32.gmra.mxu1 %v8613_v39 }
 0x58a   :  { %3835 = vmatpush.msrb.mxu0 %v3096_v46 }
 0x58b   :  { %3498 = vmatmul.f32.gmra.mxu0 %v8523_v14 }
 0x58c   :  { %3836 = vmatpush.msrb.mxu0 %v3088_v48  ;;  %v3176_v48 = vld [vmem:[%s10130_s7 + $0x4b0] sm:$0xff] }
 0x58e   :  { %3598 = vmatmul.f32.gmra.mxu2 %v8699_v1  ;;  %3837 = vmatpush.msrb.mxu0 %v3080_v63 }
 0x590   :  { %3639 = vmatmul.f32.gmra.mxu3 %v8657_v54 }
 0x591   :  { %3551 = vmatmul.f32.gmra.mxu1 %v8657_v54 }
 0x593   :  { %3501 = vmatmul.f32.gmra.mxu0 %v8567_v17 }
 0x596   :  { %3601 = vmatmul.f32.gmra.mxu2 %v8728_v21 }
 0x598   :  { %3642 = vmatmul.f32.gmra.mxu3 %v8701_v5 }
 0x599   :  { %3554 = vmatmul.f32.gmra.mxu1 %v8701_v5  ;;  %v3405_v55 = vpop.f32.mrf.mxu2 }
 0x59a   :  { %v3406_v59 = vadd.f32 %v3405_v55, %v8966_v41 }
 0x59b   :  { %3504 = vmatmul.f32.gmra.mxu0 %v8611_v26 }
 0x59e   :  { %v3361_v49 = vpop.f32.mrf.mxu1  ;;  %3604 = vmatmul.f32.gmra.mxu2 %v8757_v33 }
 0x5a0   :  { %3645 = vmatmul.f32.gmra.mxu3 %v8730_v22 }
 0x5a1   :  { %3557 = vmatmul.f32.gmra.mxu1 %v8730_v22  ;;  %v3408_v16 = vpop.f32.mrf.mxu2 }
 0x5a2   :  { %v3409_v61 = vadd.f32 %v3408_v16, %v8966_v41 }
 0x5a3   :  { %3507 = vmatmul.f32.gmra.mxu0 %v8655_v50  ;;  %v3449_v9 = vpop.f32.mrf.mxu3 }
 0x5a4   :  { %v3450_v62 = vadd.f32 %v3449_v9, %v3406_v59 }
 0x5a6   :  { %4005 = vst [vmem:[#allocation2 + $0x8] sm:$0xff] %v3450_v62  ;;  %v3364_v51 = vpop.f32.mrf.mxu1  ;;  %3756 = vmatmul.f32.vlgmr.msra.gmra.mxu2 %v8435_v20 }
 0x5a8   :  { %3648 = vmatmul.f32.gmra.mxu3 %v8759_v53 }
 0x5a9   :  { %3560 = vmatmul.f32.gmra.mxu1 %v8759_v53  ;;  %v3411_v56 = vpop.f32.mrf.mxu2 }
 0x5aa   :  { %v3412_v24 = vadd.f32 %v3411_v56, %v8966_v41  ;;  %v3049_v56 = vld [vmem:[%s10130_s7 + $0xb8] sm:$0xff] }
 0x5ab   :  { %3510 = vmatmul.f32.gmra.mxu0 %v8699_v1  ;;  %v3452_v18 = vpop.f32.mrf.mxu3 }
 0x5ac   :  { %v3453_v4 = vadd.f32 %v3452_v18, %v3409_v61  ;;  %v3072_v18 = vld [vmem:[%s10130_s7 + $0x170] sm:$0xff]  ;;  %v3193_v61 = vld [vmem:[%s10130_s7 + $0x538] sm:$0xff] }
 0x5ad   :  { %3838 = vmatpush.msrb.mxu0 %v3072_v18  ;;  %v9191_v18 = vperm.slane %v8950_v28, 3 }
 0x5ae   :  { %4013 = vst [vmem:[#allocation2 + $0x48] sm:$0xff] %v3453_v4  ;;  %v3367_v38 = vpop.f32.mrf.mxu1  ;;  %3759 = vmatmul.f32.gmra.mxu2 %v8479_v42  ;;  %v3200_v4 = vld [vmem:[%s10130_s7 + $0x570] sm:$0xff] }
 0x5b0   :  { %v3317_v29 = vpop.f32.mrf.mxu0  ;;  %3800 = vmatmul.f32.vlgmr.msra.gmra.mxu3 %v8437_v8 }
 0x5b1   :  { %v3318_v47 = vadd.f32 %v3317_v29, %v8961_v40  ;;  %v3232_v29 = vld [vmem:[%s10130_s7 + $0x670] sm:$0xff]  ;;  %3712 = vmatmul.f32.vlgmr.msra.gmra.mxu1 %v8437_v8  ;;  %v3414_v55 = vpop.f32.mrf.mxu2 }
 0x5b2   :  { %3878 = vmatpush.msrb.mxu1 %v3232_v29  ;;  %v3224_v8 = vld [vmem:[%s10130_s7 + $0x630] sm:$0xff]  ;;  %v3415_v59 = vadd.f32 %v3414_v55, %v8966_v41 }
 0x5b3   :  { %v3362_v30 = vadd.f32 %v3361_v49, %v3318_v47  ;;  %3513 = vmatmul.f32.gmra.mxu0 %v8728_v21  ;;  %v3455_v58 = vpop.f32.mrf.mxu3  ;;  %v3217_v47 = vld [vmem:[%s10130_s7 + $0x5f8] sm:$0xff]  ;;  %v3184_v29 = vld [vmem:[%s10130_s7 + $0x4f0] sm:$0xff] }
 0x5b4   :  { %v3456_v45 = vadd.f32 %v3455_v58, %v3412_v24  ;;  %3968 = vmatpush.msrb.mxu3 %v3217_v47  ;;  %3879 = vmatpush.msrb.mxu1 %v3224_v8  ;;  %v3177_v24 = vld [vmem:[%s10130_s7 + $0x4b8] sm:$0xff] }
 0x5b5   :  { %4004 = vst [vmem:[#allocation2] sm:$0xff] %v3362_v30 }
 0x5b6   :  { %4021 = vst [vmem:[#allocation2 + $0x88] sm:$0xff] %v3456_v45  ;;  %v3370_v49 = vpop.f32.mrf.mxu1  ;;  %3969 = vmatpush.msrb.mxu3 %v3209_v3  ;;  %3880 = vmatpush.msrb.mxu1 %v3216_v11  ;;  %v3048_v45 = vld [vmem:[%s10130_s7 + $0xb0] sm:$0xff] }
 0x5b7   :  { %3762 = vmatmul.f32.gmra.mxu2 %v8523_v14  ;;  %v3032_v3 = vld [vmem:[%s10130_s7 + $0x30] sm:$0xff] }
 0x5b8   :  { %v3320_v31 = vpop.f32.mrf.mxu0  ;;  %3803 = vmatmul.f32.gmra.mxu3 %v8481_v43  ;;  %3881 = vmatpush.msrb.mxu1 %v3208_v57 }
 0x5b9   :  { %v3321_v27 = vadd.f32 %v3320_v31, %v8961_v40  ;;  %3715 = vmatmul.f32.gmra.mxu1 %v8481_v43  ;;  %v3073_v31 = vld [vmem:[%s10130_s7 + $0x178] sm:$0xff]  ;;  %v3417_v7 = vpop.f32.mrf.mxu2 }
 0x5ba   :  { %v3201_v43 = vld [vmem:[%s10130_s7 + $0x578] sm:$0xff]  ;;  %3926 = vmatpush.msrb.mxu2 %v3073_v31  ;;  %3882 = vmatpush.msrb.mxu1 %v3200_v4 }
 0x5bb   :  { %v3365_v52 = vadd.f32 %v3364_v51, %v3321_v27  ;;  %3516 = vmatmul.f32.gmra.mxu0 %v8757_v33  ;;  %v3458_v9 = vpop.f32.mrf.mxu3  ;;  %v3065_v27 = vld [vmem:[%s10130_s7 + $0x138] sm:$0xff]  ;;  %3970 = vmatpush.msrb.mxu3 %v3201_v43  ;;  %v3160_v43 = vld [vmem:[%s10130_s7 + $0x430] sm:$0xff] }
 0x5bc   :  { %v3459_v62 = vadd.f32 %v3458_v9, %v3415_v59  ;;  %3927 = vmatpush.msrb.mxu2 %v3065_v27  ;;  %3883 = vmatpush.msrb.mxu1 %v3192_v19  ;;  %v3161_v9 = vld [vmem:[%s10130_s7 + $0x438] sm:$0xff] }
 0x5bd   :  { %4012 = vst [vmem:[#allocation2 + $0x40] sm:$0xff] %v3365_v52  ;;  %v3418_v52 = vadd.f32 %v3417_v7, %v8966_v41  ;;  %3971 = vmatpush.msrb.mxu3 %v3193_v61 }
 0x5be   :  { %4029 = vst [vmem:[#allocation2 + $0xc8] sm:$0xff] %v3459_v62  ;;  %v3373_v6 = vpop.f32.mrf.mxu1  ;;  %3884 = vmatpush.msrb.mxu1 %v3184_v29  ;;  %v4928_v29 = vld [vmem:[#allocation4 + $0x8] sm:$0xff] }
 0x5bf   :  { %3765 = vmatmul.f32.gmra.mxu2 %v8567_v17  ;;  %3972 = vmatpush.msrb.mxu3 %v3185_v13 }
 0x5c0   :  { %v3323_v25 = vpop.f32.mrf.mxu0  ;;  %3806 = vmatmul.f32.gmra.mxu3 %v8525_v15  ;;  %3885 = vmatpush.msrb.mxu1 %v3176_v48  ;;  %v4930_v48 = vld [vmem:[#allocation4 + $0x10] sm:$0xff] }
 0x5c1   :  { %v3324_v32 = vadd.f32 %v3323_v25, %v8961_v40  ;;  %3718 = vmatmul.f32.gmra.mxu1 %v8525_v15  ;;  %v3057_v25 = vld [vmem:[%s10130_s7 + $0xf8] sm:$0xff]  ;;  %v3064_v15 = vld [vmem:[%s10130_s7 + $0x130] sm:$0xff]  ;;  %v3420_v34 = vpop.f32.mrf.mxu2  ;;  %3973 = vmatpush.msrb.mxu3 %v3177_v24 }
 0x5c2   :  { %3928 = vmatpush.msrb.mxu2 %v3057_v25  ;;  %3839 = vmatpush.msrb.mxu0 %v3064_v15 }
 0x5c3   :  { %v3368_v23 = vadd.f32 %v3367_v38, %v3324_v32  ;;  %3668 = vmatmul.f32.vlgmr.msra.gmra.mxu0 %v8435_v20  ;;  %v3461_v16 = vpop.f32.mrf.mxu3  ;;  %v3421_v38 = vadd.f32 %v3420_v34, %v8966_v41  ;;  %v4925_v34 = vld [vmem:[#allocation3] sm:$0xff] }
 0x5c4   :  { %v3462_v10 = vadd.f32 %v3461_v16, %v3418_v52  ;;  %3929 = vmatpush.msrb.mxu2 %v3049_v56 }
 0x5c5   :  { %4020 = vst [vmem:[#allocation2 + $0x80] sm:$0xff] %v3368_v23  ;;  %v3056_v23 = vld [vmem:[%s10130_s7 + $0xf0] sm:$0xff] }
 0x5c6   :  { %4037 = vst [vmem:[#allocation2 + $0x108] sm:$0xff] %v3462_v10  ;;  %v3376_v32 = vpop.f32.mrf.mxu1  ;;  %3840 = vmatpush.msrb.mxu0 %v3056_v23 }
 0x5c7   :  { %3768 = vmatmul.f32.gmra.mxu2 %v8611_v26 }
 0x5c8   :  { %v3326_v20 = vpop.f32.mrf.mxu0  ;;  %3809 = vmatmul.f32.gmra.mxu3 %v8569_v2  ;;  %3841 = vmatpush.msrb.mxu0 %v3048_v45 }
 0x5c9   :  { %v3327_v36 = vadd.f32 %v3326_v20, %v8961_v40  ;;  %3721 = vmatmul.f32.gmra.mxu1 %v8569_v2  ;;  %v3041_v2 = vld [vmem:[%s10130_s7 + $0x78] sm:$0xff]  ;;  %v3423_v47 = vpop.f32.mrf.mxu2 }
 0x5ca   :  { %v3169_v20 = vld [vmem:[%s10130_s7 + $0x478] sm:$0xff]  ;;  %3930 = vmatpush.msrb.mxu2 %v3041_v2  ;;  %v3424_v60 = vadd.f32 %v3423_v47, %v8966_v41 }
 0x5cb   :  { %v3371_v30 = vadd.f32 %v3370_v49, %v3327_v36  ;;  %3671 = vmatmul.f32.gmra.mxu0 %v8479_v42  ;;  %v3464_v37 = vpop.f32.mrf.mxu3  ;;  %3974 = vmatpush.msrb.mxu3 %v3169_v20  ;;  %v3033_v49 = vld [vmem:[%s10130_s7 + $0x38] sm:$0xff] }
 0x5cc   :  { %v3465_v58 = vadd.f32 %v3464_v37, %v3421_v38  ;;  %3931 = vmatpush.msrb.mxu2 %v3033_v49 }
 0x5cd   :  { %4028 = vst [vmem:[#allocation2 + $0xc0] sm:$0xff] %v3371_v30  ;;  %v3040_v30 = vld [vmem:[%s10130_s7 + $0x70] sm:$0xff]  ;;  %3975 = vmatpush.msrb.mxu3 %v3161_v9 }
 0x5ce   :  { %4045 = vst [vmem:[#allocation2 + $0x148] sm:$0xff] %v3465_v58  ;;  %v3379_v46 = vpop.f32.mrf.mxu1  ;;  %3842 = vmatpush.msrb.mxu0 %v3040_v30 }
 0x5cf   :  { %3771 = vmatmul.f32.gmra.mxu2 %v8655_v50 }
 0x5d0   :  { %v3329_v42 = vpop.f32.mrf.mxu0  ;;  %3812 = vmatmul.f32.gmra.mxu3 %v8613_v39  ;;  %3843 = vmatpush.msrb.mxu0 %v3032_v3 }
 0x5d1   :  { %v3330_v0 = vadd.f32 %v3329_v42, %v8961_v40  ;;  %3724 = vmatmul.f32.gmra.mxu1 %v8613_v39  ;;  %v3168_v39 = vld [vmem:[%s10130_s7 + $0x470] sm:$0xff]  ;;  %v3426_v62 = vpop.f32.mrf.mxu2  ;;  %s9265_s7 = smov 0  }
 0x5d2   :  { %3886 = vmatpush.msrb.mxu1 %v3168_v39  ;;  %v3427_v63 = vadd.f32 %v3426_v62, %v8966_v41  ;;  %v4932_v62 = vld [vmem:[#allocation4 + $0x18] sm:$0xff] }
 0x5d3   :  { %v3374_v51 = vadd.f32 %v3373_v6, %v3330_v0  ;;  %3674 = vmatmul.f32.gmra.mxu0 %v8523_v14  ;;  %v3467_v36 = vpop.f32.mrf.mxu3 }
 0x5d4   :  { %v3468_v55 = vadd.f32 %v3467_v36, %v3424_v60  ;;  %3887 = vmatpush.msrb.mxu1 %v3160_v43  ;;  %v4929_v60 = vld [vmem:[#allocation3 + $0x10] sm:$0xff] }
 0x5d5   :  { %4036 = vst [vmem:[#allocation2 + $0x100] sm:$0xff] %v3374_v51 }
 0x5d6   :  { %4053 = vst [vmem:[#allocation2 + $0x188] sm:$0xff] %v3468_v55  ;;  %v3382_v11 = vpop.f32.mrf.mxu1 }
 0x5d7   :  { %3774 = vmatmul.f32.gmra.mxu2 %v8699_v1 }
 0x5d8   :  { %v3332_v14 = vpop.f32.mrf.mxu0  ;;  %3815 = vmatmul.f32.gmra.mxu3 %v8657_v54 }
 0x5d9   :  { %v3333_v12 = vadd.f32 %v3332_v14, %v8961_v40  ;;  %3727 = vmatmul.f32.gmra.mxu1 %v8657_v54  ;;  %v3429_v6 = vpop.f32.mrf.mxu2  ;;  %v9186_v54 = vperm.slane %v8950_v28, 2 }
 0x5da   :  { %v3430_v16 = vadd.f32 %v3429_v6, %v8966_v41  ;;  %v4933_v6 = vld [vmem:[#allocation3 + $0x20] sm:$0xff] }
 0x5db   :  { %v3377_v35 = vadd.f32 %v3376_v32, %v3333_v12  ;;  %3677 = vmatmul.f32.gmra.mxu0 %v8567_v17  ;;  %v3470_v31 = vpop.f32.mrf.mxu3 }
 0x5dc   :  { %v3471_v0 = vadd.f32 %v3470_v31, %v3427_v63 }
 0x5dd   :  { %4044 = vst [vmem:[#allocation2 + $0x140] sm:$0xff] %v3377_v35  ;;  %v4926_v35 = vld [vmem:[#allocation4] sm:$0xff] }
 0x5de   :  { %4061 = vst [vmem:[#allocation2 + $0x1c8] sm:$0xff] %v3471_v0  ;;  %v3385_v27 = vpop.f32.mrf.mxu1 }
 0x5df   :  { %3777 = vmatmul.f32.gmra.mxu2 %v8728_v21 }
 0x5e0   :  { %v3335_v17 = vpop.f32.mrf.mxu0  ;;  %3818 = vmatmul.f32.gmra.mxu3 %v8701_v5 }
 0x5e1   :  { %v3336_v44 = vadd.f32 %v3335_v17, %v8961_v40  ;;  %3730 = vmatmul.f32.gmra.mxu1 %v8701_v5  ;;  %v3581_v41 = vpop.f32.mrf.mxu2 }
 0x5e2   :  { %v3582_v5 = vadd.f32 %v3581_v41, %v9191_v18 }
 0x5e3   :  { %v3380_v8 = vadd.f32 %v3379_v46, %v3336_v44  ;;  %3680 = vmatmul.f32.gmra.mxu0 %v8611_v26  ;;  %v3473_v51 = vpop.f32.mrf.mxu3 }
 0x5e4   :  { %v3474_v52 = vadd.f32 %v3473_v51, %v3430_v16 }
 0x5e5   :  { %4052 = vst [vmem:[#allocation2 + $0x180] sm:$0xff] %v3380_v8 }
 0x5e6   :  { %4069 = vst [vmem:[#allocation2 + $0x208] sm:$0xff] %v3474_v52  ;;  %v3537_v61 = vpop.f32.mrf.mxu1 }
 0x5e7   :  { %3780 = vmatmul.f32.gmra.mxu2 %v8757_v33 }
 0x5e8   :  { %v3338_v26 = vpop.f32.mrf.mxu0  ;;  %3821 = vmatmul.f32.gmra.mxu3 %v8730_v22 }
 0x5e9   :  { %v3339_v59 = vadd.f32 %v3338_v26, %v8961_v40  ;;  %3733 = vmatmul.f32.gmra.mxu1 %v8730_v22  ;;  %v3584_v13 = vpop.f32.mrf.mxu2 }
 0x5eb   :  { %v3383_v42 = vadd.f32 %v3382_v11, %v3339_v59  ;;  %3683 = vmatmul.f32.gmra.mxu0 %v8655_v50  ;;  %v3625_v14 = vpop.f32.mrf.mxu3  ;;  %v4931_v11 = vld [vmem:[#allocation3 + $0x18] sm:$0xff] }
 0x5ec   :  { %v3626_v4 = vadd.f32 %v3625_v14, %v3582_v5  ;;  %v4935_v14 = vld [vmem:[#allocation3 + $0x28] sm:$0xff]  ;;  %v4936_v5 = vld [vmem:[#allocation4 + $0x28] sm:$0xff] }
 0x5ed   :  { %4060 = vst [vmem:[#allocation2 + $0x1c0] sm:$0xff] %v3383_v42 }
 0x5ee   :  { %4007 = vst [vmem:[#allocation2 + $0x18] sm:$0xff] %v3626_v4  ;;  %v3540_v12 = vpop.f32.mrf.mxu1 }
 0x5ef   :  { %3932 = vmatmul.f32.vlgmr.msrb.gmra.mxu2 %v4925_v34 }
 0x5f0   :  { %v3341_v57 = vpop.f32.mrf.mxu0  ;;  %3824 = vmatmul.f32.gmra.mxu3 %v8759_v53 }
 0x5f1   :  { %v3342_v50 = vadd.f32 %v3341_v57, %v8961_v40  ;;  %3736 = vmatmul.f32.gmra.mxu1 %v8759_v53  ;;  %v3587_v23 = vpop.f32.mrf.mxu2  ;;  %v4927_v53 = vld [vmem:[#allocation3 + $0x8] sm:$0xff] }
 0x5f3   :  { %v3386_v7 = vadd.f32 %v3385_v27, %v3342_v50  ;;  %3686 = vmatmul.f32.gmra.mxu0 %v8699_v1  ;;  %v3628_v32 = vpop.f32.mrf.mxu3 }
 0x5f5   :  { %4068 = vst [vmem:[#allocation2 + $0x200] sm:$0xff] %v3386_v7  ;;  %v4934_v7 = vld [vmem:[#allocation4 + $0x20] sm:$0xff] }
 0x5f6   :  { %v3543_v56 = vpop.f32.mrf.mxu1 }
 0x5f7   :  { %3935 = vmatmul.f32.gmra.mxu2 %v4927_v53 }
 0x5f8   :  { %v3493_v40 = vpop.f32.mrf.mxu0  ;;  %3976 = vmatmul.f32.vlgmr.msrb.gmra.mxu3 %v4926_v35 }
 0x5f9   :  { %v3494_v1 = vadd.f32 %v3493_v40, %v9186_v54  ;;  %3888 = vmatmul.f32.vlgmr.msrb.gmra.mxu1 %v4926_v35  ;;  %v3590_v20 = vpop.f32.mrf.mxu2 }
 0x5fa   :  { %v3591_v8 = vadd.f32 %v3590_v20, %v9191_v18 }
 0x5fb   :  { %v3538_v10 = vadd.f32 %v3537_v61, %v3494_v1  ;;  %3689 = vmatmul.f32.gmra.mxu0 %v8728_v21  ;;  %v3585_v21 = vadd.f32 %v3584_v13, %v9191_v18  ;;  %v3631_v17 = vpop.f32.mrf.mxu3 }
 0x5fd   :  { %4006 = vst [vmem:[#allocation2 + $0x10] sm:$0xff] %v3538_v10  ;;  %v3629_v22 = vadd.f32 %v3628_v32, %v3585_v21 }
 0x5fe   :  { %v3546_v45 = vpop.f32.mrf.mxu1 }
 0x5ff   :  { %4015 = vst [vmem:[#allocation2 + $0x58] sm:$0xff] %v3629_v22  ;;  %3938 = vmatmul.f32.gmra.mxu2 %v4929_v60  ;;  %v4937_v22 = vld [vmem:[#allocation3 + $0x30] sm:$0xff] }
 0x600   :  { %v3496_v25 = vpop.f32.mrf.mxu0  ;;  %3979 = vmatmul.f32.gmra.mxu3 %v4928_v29 }
 0x601   :  { %v3497_v15 = vadd.f32 %v3496_v25, %v9186_v54  ;;  %3891 = vmatmul.f32.gmra.mxu1 %v4928_v29  ;;  %v3593_v30 = vpop.f32.mrf.mxu2  ;;  %v4940_v29 = vld [vmem:[#allocation4 + $0x38] sm:$0xff] }
 0x602   :  { %v3594_v59 = vadd.f32 %v3593_v30, %v9191_v18 }
 0x603   :  { %v3541_v19 = vadd.f32 %v3540_v12, %v3497_v15  ;;  %3692 = vmatmul.f32.gmra.mxu0 %v8757_v33  ;;  %v3588_v33 = vadd.f32 %v3587_v23, %v9191_v18  ;;  %v3634_v47 = vpop.f32.mrf.mxu3 }
 0x604   :  { %v3635_v36 = vadd.f32 %v3634_v47, %v3591_v8 }
 0x605   :  { %4014 = vst [vmem:[#allocation2 + $0x50] sm:$0xff] %v3541_v19  ;;  %v3632_v24 = vadd.f32 %v3631_v17, %v3588_v33  ;;  %v9218_v33 = vperm.slane %v8950_v28, 4 }
 0x606   :  { %4031 = vst [vmem:[#allocation2 + $0xd8] sm:$0xff] %v3635_v36  ;;  %v3549_v26 = vpop.f32.mrf.mxu1  ;;  %v4941_v36 = vld [vmem:[#allocation3 + $0x40] sm:$0xff] }
 0x607   :  { %4023 = vst [vmem:[#allocation2 + $0x98] sm:$0xff] %v3632_v24  ;;  %3941 = vmatmul.f32.gmra.mxu2 %v4931_v11 }
 0x608   :  { %v3499_v37 = vpop.f32.mrf.mxu0  ;;  %3982 = vmatmul.f32.gmra.mxu3 %v4930_v48 }
 0x609   :  { %v3500_v38 = vadd.f32 %v3499_v37, %v9186_v54  ;;  %3894 = vmatmul.f32.gmra.mxu1 %v4930_v48  ;;  %v3596_v43 = vpop.f32.mrf.mxu2 }
 0x60a   :  { %v3597_v50 = vadd.f32 %v3596_v43, %v9191_v18 }
 0x60b   :  { %v3544_v58 = vadd.f32 %v3543_v56, %v3500_v38  ;;  %3844 = vmatmul.f32.vlgmr.msrb.gmra.mxu0 %v4925_v34  ;;  %v3637_v39 = vpop.f32.mrf.mxu3  ;;  %v4938_v34 = vld [vmem:[#allocation4 + $0x30] sm:$0xff] }
 0x60c   :  { %v3638_v3 = vadd.f32 %v3637_v39, %v3594_v59 }
 0x60d   :  { %4022 = vst [vmem:[#allocation2 + $0x90] sm:$0xff] %v3544_v58 }
 0x60e   :  { %4039 = vst [vmem:[#allocation2 + $0x118] sm:$0xff] %v3638_v3  ;;  %v3552_v63 = vpop.f32.mrf.mxu1 }
 0x60f   :  { %3944 = vmatmul.f32.gmra.mxu2 %v4933_v6 }
 0x610   :  { %v3502_v2 = vpop.f32.mrf.mxu0  ;;  %3985 = vmatmul.f32.gmra.mxu3 %v4932_v62 }
 0x611   :  { %v3503_v44 = vadd.f32 %v3502_v2, %v9186_v54  ;;  %3897 = vmatmul.f32.gmra.mxu1 %v4932_v62  ;;  %v3599_v40 = vpop.f32.mrf.mxu2 }
 0x612   :  { %v3600_v41 = vadd.f32 %v3599_v40, %v9191_v18 }
 0x613   :  { %v3547_v46 = vadd.f32 %v3546_v45, %v3503_v44  ;;  %3847 = vmatmul.f32.gmra.mxu0 %v4927_v53  ;;  %v3640_v57 = vpop.f32.mrf.mxu3  ;;  %v4939_v53 = vld [vmem:[#allocation3 + $0x38] sm:$0xff] }
 0x614   :  { %v3641_v27 = vadd.f32 %v3640_v57, %v3597_v50 }
 0x615   :  { %4030 = vst [vmem:[#allocation2 + $0xd0] sm:$0xff] %v3547_v46 }
 0x616   :  { %4047 = vst [vmem:[#allocation2 + $0x158] sm:$0xff] %v3641_v27  ;;  %v3555_v52 = vpop.f32.mrf.mxu1 }
 0x617   :  { %3947 = vmatmul.f32.gmra.mxu2 %v4935_v14 }
 0x618   :  { %v3505_v49 = vpop.f32.mrf.mxu0  ;;  %3988 = vmatmul.f32.gmra.mxu3 %v4934_v7 }
 0x619   :  { %v3506_v55 = vadd.f32 %v3505_v49, %v9186_v54  ;;  %3900 = vmatmul.f32.gmra.mxu1 %v4934_v7  ;;  %v3602_v12 = vpop.f32.mrf.mxu2 }
 0x61a   :  { %v3603_v32 = vadd.f32 %v3602_v12, %v9191_v18 }
 0x61b   :  { %v3550_v9 = vadd.f32 %v3549_v26, %v3506_v55  ;;  %3850 = vmatmul.f32.gmra.mxu0 %v4929_v60  ;;  %v3643_v61 = vpop.f32.mrf.mxu3  ;;  %v4942_v60 = vld [vmem:[#allocation4 + $0x40] sm:$0xff] }
 0x61c   :  { %v3644_v10 = vadd.f32 %v3643_v61, %v3600_v41 }
 0x61d   :  { %4038 = vst [vmem:[#allocation2 + $0x110] sm:$0xff] %v3550_v9 }
 0x61e   :  { %4055 = vst [vmem:[#allocation2 + $0x198] sm:$0xff] %v3644_v10  ;;  %v3558_v15 = vpop.f32.mrf.mxu1 }
 0x61f   :  { %3950 = vmatmul.f32.gmra.mxu2 %v4937_v22 }
 0x620   :  { %v3508_v42 = vpop.f32.mrf.mxu0  ;;  %3991 = vmatmul.f32.gmra.mxu3 %v4936_v5 }
 0x621   :  { %v3509_v31 = vadd.f32 %v3508_v42, %v9186_v54  ;;  %3903 = vmatmul.f32.gmra.mxu1 %v4936_v5  ;;  %v3605_v56 = vpop.f32.mrf.mxu2 }
 0x622   :  { %v3606_v17 = vadd.f32 %v3605_v56, %v9191_v18 }
 0x623   :  { %v3553_v0 = vadd.f32 %v3552_v63, %v3509_v31  ;;  %3853 = vmatmul.f32.gmra.mxu0 %v4931_v11  ;;  %v3646_v19 = vpop.f32.mrf.mxu3 }
 0x624   :  { %v3647_v21 = vadd.f32 %v3646_v19, %v3603_v32 }
 0x625   :  { %4046 = vst [vmem:[#allocation2 + $0x150] sm:$0xff] %v3553_v0 }
 0x626   :  { %4063 = vst [vmem:[#allocation2 + $0x1d8] sm:$0xff] %v3647_v21  ;;  %v3561_v38 = vpop.f32.mrf.mxu1 }
 0x627   :  { %3953 = vmatmul.f32.gmra.mxu2 %v4939_v53 }
 0x628   :  { %v3511_v51 = vpop.f32.mrf.mxu0  ;;  %3994 = vmatmul.f32.gmra.mxu3 %v4938_v34 }
 0x629   :  { %v3512_v16 = vadd.f32 %v3511_v51, %v9186_v54  ;;  %3906 = vmatmul.f32.gmra.mxu1 %v4938_v34  ;;  %v3757_v20 = vpop.f32.mrf.mxu2 }
 0x62b   :  { %v3556_v1 = vadd.f32 %v3555_v52, %v3512_v16  ;;  %3856 = vmatmul.f32.gmra.mxu0 %v4933_v6  ;;  %v3649_v58 = vpop.f32.mrf.mxu3 }
 0x62c   :  { %v3650_v24 = vadd.f32 %v3649_v58, %v3606_v17 }
 0x62d   :  { %4054 = vst [vmem:[#allocation2 + $0x190] sm:$0xff] %v3556_v1 }
 0x62e   :  { %4071 = vst [vmem:[#allocation2 + $0x218] sm:$0xff] %v3650_v24  ;;  %v3713_v45 = vpop.f32.mrf.mxu1 }
 0x62f   :  { %3956 = vmatmul.f32.gmra.mxu2 %v4941_v36 }
 0x630   :  { %v3514_v4 = vpop.f32.mrf.mxu0  ;;  %3997 = vmatmul.f32.gmra.mxu3 %v4940_v29 }
 0x631   :  { %v3515_v25 = vadd.f32 %v3514_v4, %v9186_v54  ;;  %3909 = vmatmul.f32.gmra.mxu1 %v4940_v29  ;;  %v3760_v26 = vpop.f32.mrf.mxu2 }
 0x633   :  { %v3559_v13 = vadd.f32 %v3558_v15, %v3515_v25  ;;  %3859 = vmatmul.f32.gmra.mxu0 %v4935_v14  ;;  %v3801_v46 = vpop.f32.mrf.mxu3 }
 0x635   :  { %4062 = vst [vmem:[#allocation2 + $0x1d0] sm:$0xff] %v3559_v13 }
 0x636   :  { %v3716_v55 = vpop.f32.mrf.mxu1 }
 0x638   :  { %v3517_v35 = vpop.f32.mrf.mxu0  ;;  %4000 = vmatmul.f32.gmra.mxu3 %v4942_v60 }
 0x639   :  { %v3518_v37 = vadd.f32 %v3517_v35, %v9186_v54  ;;  %v9221_v54 = vperm.slane %v8950_v28, 5  ;;  %3912 = vmatmul.f32.gmra.mxu1 %v4942_v60 }
 0x63a   :  { %v3763_v42 = vpop.f32.mrf.mxu2 }
 0x63b   :  { %v3562_v23 = vadd.f32 %v3561_v38, %v3518_v37  ;;  %3862 = vmatmul.f32.gmra.mxu0 %v4937_v22  ;;  %v3758_v47 = vadd.f32 %v3757_v20, %v9221_v54  ;;  %v3804_v9 = vpop.f32.mrf.mxu3  ;;  %v3761_v39 = vadd.f32 %v3760_v26, %v9221_v54  ;;  %v3764_v43 = vadd.f32 %v3763_v42, %v9221_v54 }
 0x63d   :  { %4070 = vst [vmem:[#allocation2 + $0x210] sm:$0xff] %v3562_v23  ;;  %v3802_v8 = vadd.f32 %v3801_v46, %v3758_v47  ;;  %v3805_v59 = vadd.f32 %v3804_v9, %v3761_v39  ;;  %v9245_v9 = vperm.slane %v8950_v28, 7 }
 0x63e   :  { %v3719_v62 = vpop.f32.mrf.mxu1 }
 0x63f   :  { %4009 = vst [vmem:[#allocation2 + $0x28] sm:$0xff] %v3802_v8 }
 0x640   :  { %v3669_v2 = vpop.f32.mrf.mxu0  ;;  %4017 = vst [vmem:[#allocation2 + $0x68] sm:$0xff] %v3805_v59 }
 0x641   :  { %v3670_v44 = vadd.f32 %v3669_v2, %v9218_v33 }
 0x642   :  { %v3766_v6 = vpop.f32.mrf.mxu2 }
 0x643   :  { %v3714_v18 = vadd.f32 %v3713_v45, %v3670_v44  ;;  %3865 = vmatmul.f32.gmra.mxu0 %v4939_v53  ;;  %v3807_v63 = vpop.f32.mrf.mxu3  ;;  %v3767_v16 = vadd.f32 %v3766_v6, %v9221_v54 }
 0x644   :  { %v3808_v0 = vadd.f32 %v3807_v63, %v3764_v43 }
 0x645   :  { %4008 = vst [vmem:[#allocation2 + $0x20] sm:$0xff] %v3714_v18 }
 0x646   :  { %4025 = vst [vmem:[#allocation2 + $0xa8] sm:$0xff] %v3808_v0  ;;  %v3722_v27 = vpop.f32.mrf.mxu1 }
 0x648   :  { %v3672_v48 = vpop.f32.mrf.mxu0 }
 0x649   :  { %v3673_v49 = vadd.f32 %v3672_v48, %v9218_v33 }
 0x64a   :  { %v3769_v41 = vpop.f32.mrf.mxu2 }
 0x64b   :  { %v3717_v30 = vadd.f32 %v3716_v55, %v3673_v49  ;;  %3868 = vmatmul.f32.gmra.mxu0 %v4941_v36  ;;  %v3810_v51 = vpop.f32.mrf.mxu3  ;;  %v3770_v5 = vadd.f32 %v3769_v41, %v9221_v54  ;;  %v9242_v55 = vperm.slane %v8950_v28, 6 }
 0x64c   :  { %v3811_v52 = vadd.f32 %v3810_v51, %v3767_v16 }
 0x64d   :  { %4016 = vst [vmem:[#allocation2 + $0x60] sm:$0xff] %v3717_v30 }
 0x64e   :  { %4033 = vst [vmem:[#allocation2 + $0xe8] sm:$0xff] %v3811_v52  ;;  %v3725_v61 = vpop.f32.mrf.mxu1 }
 0x650   :  { %v3675_v3 = vpop.f32.mrf.mxu0 }
 0x651   :  { %v3676_v11 = vadd.f32 %v3675_v3, %v9218_v33 }
 0x652   :  { %v3772_v13 = vpop.f32.mrf.mxu2 }
 0x653   :  { %v3720_v31 = vadd.f32 %v3719_v62, %v3676_v11  ;;  %v3813_v14 = vpop.f32.mrf.mxu3  ;;  %v3773_v21 = vadd.f32 %v3772_v13, %v9221_v54 }
 0x654   :  { %v3814_v4 = vadd.f32 %v3813_v14, %v3770_v5 }
 0x655   :  { %4024 = vst [vmem:[#allocation2 + $0xa0] sm:$0xff] %v3720_v31 }
 0x656   :  { %4041 = vst [vmem:[#allocation2 + $0x128] sm:$0xff] %v3814_v4  ;;  %v3728_v12 = vpop.f32.mrf.mxu1 }
 0x658   :  { %v3678_v57 = vpop.f32.mrf.mxu0 }
 0x659   :  { %v3679_v50 = vadd.f32 %v3678_v57, %v9218_v33 }
 0x65a   :  { %v3775_v38 = vpop.f32.mrf.mxu2 }
 0x65b   :  { %v3723_v7 = vadd.f32 %v3722_v27, %v3679_v50  ;;  %v3816_v32 = vpop.f32.mrf.mxu3  ;;  %v3776_v58 = vadd.f32 %v3775_v38, %v9221_v54 }
 0x65c   :  { %v3817_v22 = vadd.f32 %v3816_v32, %v3773_v21 }
 0x65d   :  { %4032 = vst [vmem:[#allocation2 + $0xe0] sm:$0xff] %v3723_v7 }
 0x65e   :  { %4049 = vst [vmem:[#allocation2 + $0x168] sm:$0xff] %v3817_v22  ;;  %v3731_v37 = vpop.f32.mrf.mxu1 }
 0x660   :  { %v3681_v40 = vpop.f32.mrf.mxu0 }
 0x661   :  { %v3682_v1 = vadd.f32 %v3681_v40, %v9218_v33 }
 0x662   :  { %v3778_v2 = vpop.f32.mrf.mxu2 }
 0x663   :  { %v3726_v10 = vadd.f32 %v3725_v61, %v3682_v1  ;;  %v3819_v23 = vpop.f32.mrf.mxu3  ;;  %v3779_v20 = vadd.f32 %v3778_v2, %v9221_v54 }
 0x664   :  { %v3820_v17 = vadd.f32 %v3819_v23, %v3776_v58 }
 0x665   :  { %4040 = vst [vmem:[#allocation2 + $0x120] sm:$0xff] %v3726_v10 }
 0x666   :  { %4057 = vst [vmem:[#allocation2 + $0x1a8] sm:$0xff] %v3820_v17  ;;  %v3734_v29 = vpop.f32.mrf.mxu1 }
 0x668   :  { %v3684_v25 = vpop.f32.mrf.mxu0 }
 0x669   :  { %v3685_v15 = vadd.f32 %v3684_v25, %v9218_v33 }
 0x66a   :  { %v3781_v36 = vpop.f32.mrf.mxu2 }
 0x66b   :  { %v3729_v19 = vadd.f32 %v3728_v12, %v3685_v15  ;;  %v3822_v45 = vpop.f32.mrf.mxu3  ;;  %v3782_v49 = vadd.f32 %v3781_v36, %v9221_v54 }
 0x66c   :  { %v3823_v18 = vadd.f32 %v3822_v45, %v3779_v20 }
 0x66d   :  { %4048 = vst [vmem:[#allocation2 + $0x160] sm:$0xff] %v3729_v19 }
 0x66e   :  { %4065 = vst [vmem:[#allocation2 + $0x1e8] sm:$0xff] %v3823_v18  ;;  %v3737_v8 = vpop.f32.mrf.mxu1 }
 0x670   :  { %v3687_v34 = vpop.f32.mrf.mxu0 }
 0x671   :  { %v3688_v35 = vadd.f32 %v3687_v34, %v9218_v33 }
 0x673   :  { %v3732_v56 = vadd.f32 %v3731_v37, %v3688_v35  ;;  %v3825_v48 = vpop.f32.mrf.mxu3 }
 0x674   :  { %v3826_v26 = vadd.f32 %v3825_v48, %v3782_v49 }
 0x675   :  { %4056 = vst [vmem:[#allocation2 + $0x1a0] sm:$0xff] %v3732_v56 }
 0x676   :  { %4073 = vst [vmem:[#allocation2 + $0x228] sm:$0xff] %v3826_v26  ;;  %v3889_v59 = vpop.f32.mrf.mxu1 }
 0x678   :  { %v3690_v24 = vpop.f32.mrf.mxu0 }
 0x679   :  { %v3691_v53 = vadd.f32 %v3690_v24, %v9218_v33 }
 0x67b   :  { %v3735_v44 = vadd.f32 %v3734_v29, %v3691_v53  ;;  %v3977_v11 = vpop.f32.mrf.mxu3 }
 0x67d   :  { %4064 = vst [vmem:[#allocation2 + $0x1e0] sm:$0xff] %v3735_v44 }
 0x67e   :  { %v3892_v63 = vpop.f32.mrf.mxu1 }
 0x680   :  { %v3693_v46 = vpop.f32.mrf.mxu0 }
 0x681   :  { %v3694_v47 = vadd.f32 %v3693_v46, %v9218_v33  ;;  %v3933_v33 = vpop.f32.mrf.mxu2 }
 0x682   :  { %v3934_v62 = vadd.f32 %v3933_v33, %v9245_v9 }
 0x683   :  { %v3738_v60 = vadd.f32 %v3737_v8, %v3694_v47  ;;  %v3980_v57 = vpop.f32.mrf.mxu3 }
 0x684   :  { %v3978_v54 = vadd.f32 %v3977_v11, %v3934_v62 }
 0x685   :  { %4072 = vst [vmem:[#allocation2 + $0x220] sm:$0xff] %v3738_v60 }
 0x686   :  { %4011 = vst [vmem:[#allocation2 + $0x38] sm:$0xff] %v3978_v54  ;;  %v3895_v7 = vpop.f32.mrf.mxu1 }
 0x688   :  { %v3845_v30 = vpop.f32.mrf.mxu0 }
 0x689   :  { %v3846_v39 = vadd.f32 %v3845_v30, %v9242_v55  ;;  %v3936_v43 = vpop.f32.mrf.mxu2 }
 0x68a   :  { %v3937_v28 = vadd.f32 %v3936_v43, %v9245_v9 }
 0x68b   :  { %v3890_v3 = vadd.f32 %v3889_v59, %v3846_v39  ;;  %v3983_v52 = vpop.f32.mrf.mxu3 }
 0x68c   :  { %v3981_v50 = vadd.f32 %v3980_v57, %v3937_v28 }
 0x68d   :  { %4010 = vst [vmem:[#allocation2 + $0x30] sm:$0xff] %v3890_v3 }
 0x68e   :  { %4019 = vst [vmem:[#allocation2 + $0x78] sm:$0xff] %v3981_v50  ;;  %v3898_v10 = vpop.f32.mrf.mxu1 }
 0x690   :  { %v3848_v42 = vpop.f32.mrf.mxu0 }
 0x691   :  { %v3849_v31 = vadd.f32 %v3848_v42, %v9242_v55  ;;  %v3939_v51 = vpop.f32.mrf.mxu2 }
 0x692   :  { %v3940_v40 = vadd.f32 %v3939_v51, %v9245_v9 }
 0x693   :  { %v3893_v0 = vadd.f32 %v3892_v63, %v3849_v31  ;;  %v3986_v4 = vpop.f32.mrf.mxu3 }
 0x694   :  { %v3984_v1 = vadd.f32 %v3983_v52, %v3940_v40 }
 0x695   :  { %4018 = vst [vmem:[#allocation2 + $0x70] sm:$0xff] %v3893_v0 }
 0x696   :  { %4027 = vst [vmem:[#allocation2 + $0xb8] sm:$0xff] %v3984_v1  ;;  %v3901_v19 = vpop.f32.mrf.mxu1 }
 0x698   :  { %v3851_v27 = vpop.f32.mrf.mxu0 }
 0x699   :  { %v3852_v6 = vadd.f32 %v3851_v27, %v9242_v55  ;;  %v3942_v14 = vpop.f32.mrf.mxu2 }
 0x69a   :  { %v3943_v25 = vadd.f32 %v3942_v14, %v9245_v9 }
 0x69b   :  { %v3896_v16 = vadd.f32 %v3895_v7, %v3852_v6  ;;  %v3989_v22 = vpop.f32.mrf.mxu3 }
 0x69c   :  { %v3987_v15 = vadd.f32 %v3986_v4, %v3943_v25 }
 0x69d   :  { %4026 = vst [vmem:[#allocation2 + $0xb0] sm:$0xff] %v3896_v16 }
 0x69e   :  { %4035 = vst [vmem:[#allocation2 + $0xf8] sm:$0xff] %v3987_v15  ;;  %v3904_v56 = vpop.f32.mrf.mxu1 }
 0x6a0   :  { %v3854_v61 = vpop.f32.mrf.mxu0 }
 0x6a1   :  { %v3855_v41 = vadd.f32 %v3854_v61, %v9242_v55  ;;  %v3945_v32 = vpop.f32.mrf.mxu2 }
 0x6a2   :  { %v3946_v34 = vadd.f32 %v3945_v32, %v9245_v9 }
 0x6a3   :  { %v3899_v5 = vadd.f32 %v3898_v10, %v3855_v41  ;;  %v3992_v17 = vpop.f32.mrf.mxu3 }
 0x6a4   :  { %v3990_v35 = vadd.f32 %v3989_v22, %v3946_v34 }
 0x6a5   :  { %4034 = vst [vmem:[#allocation2 + $0xf0] sm:$0xff] %v3899_v5 }
 0x6a6   :  { %4043 = vst [vmem:[#allocation2 + $0x138] sm:$0xff] %v3990_v35  ;;  %v3907_v44 = vpop.f32.mrf.mxu1 }
 0x6a8   :  { %v3857_v12 = vpop.f32.mrf.mxu0 }
 0x6a9   :  { %v3858_v13 = vadd.f32 %v3857_v12, %v9242_v55  ;;  %v3948_v23 = vpop.f32.mrf.mxu2 }
 0x6aa   :  { %v3949_v24 = vadd.f32 %v3948_v23, %v9245_v9 }
 0x6ab   :  { %v3902_v21 = vadd.f32 %v3901_v19, %v3858_v13  ;;  %v3995_v18 = vpop.f32.mrf.mxu3 }
 0x6ac   :  { %v3993_v53 = vadd.f32 %v3992_v17, %v3949_v24 }
 0x6ad   :  { %4042 = vst [vmem:[#allocation2 + $0x130] sm:$0xff] %v3902_v21 }
 0x6ae   :  { %4051 = vst [vmem:[#allocation2 + $0x178] sm:$0xff] %v3993_v53  ;;  %v3910_v60 = vpop.f32.mrf.mxu1 }
 0x6b0   :  { %v3860_v37 = vpop.f32.mrf.mxu0 }
 0x6b1   :  { %v3861_v38 = vadd.f32 %v3860_v37, %v9242_v55  ;;  %v3951_v45 = vpop.f32.mrf.mxu2 }
 0x6b2   :  { %v3952_v46 = vadd.f32 %v3951_v45, %v9245_v9 }
 0x6b3   :  { %v3905_v58 = vadd.f32 %v3904_v56, %v3861_v38  ;;  %v3998_v26 = vpop.f32.mrf.mxu3 }
 0x6b4   :  { %v3996_v47 = vadd.f32 %v3995_v18, %v3952_v46 }
 0x6b5   :  { %4050 = vst [vmem:[#allocation2 + $0x170] sm:$0xff] %v3905_v58 }
 0x6b6   :  { %4059 = vst [vmem:[#allocation2 + $0x1b8] sm:$0xff] %v3996_v47  ;;  %v3913_v3 = vpop.f32.mrf.mxu1 }
 0x6b8   :  { %v3863_v29 = vpop.f32.mrf.mxu0 }
 0x6b9   :  { %v3864_v2 = vadd.f32 %v3863_v29, %v9242_v55  ;;  %v3954_v48 = vpop.f32.mrf.mxu2 }
 0x6ba   :  { %v3955_v30 = vadd.f32 %v3954_v48, %v9245_v9 }
 0x6bb   :  { %v3908_v20 = vadd.f32 %v3907_v44, %v3864_v2  ;;  %v4001_v54 = vpop.f32.mrf.mxu3 }
 0x6bc   :  { %v3999_v39 = vadd.f32 %v3998_v26, %v3955_v30 }
 0x6bd   :  { %4058 = vst [vmem:[#allocation2 + $0x1b0] sm:$0xff] %v3908_v20 }
 0x6be   :  { %4067 = vst [vmem:[#allocation2 + $0x1f8] sm:$0xff] %v3999_v39 }
 0x6c0   :  { %v3866_v8 = vpop.f32.mrf.mxu0 }
 0x6c1   :  { %v3867_v36 = vadd.f32 %v3866_v8, %v9242_v55  ;;  %v3957_v11 = vpop.f32.mrf.mxu2 }
 0x6c2   :  { %v3958_v42 = vadd.f32 %v3957_v11, %v9245_v9 }
 0x6c3   :  { %v3911_v49 = vadd.f32 %v3910_v60, %v3867_v36 }
 0x6c4   :  { %v4002_v31 = vadd.f32 %v4001_v54, %v3958_v42 }
 0x6c5   :  { %4066 = vst [vmem:[#allocation2 + $0x1f0] sm:$0xff] %v3911_v49 }
 0x6c6   :  { %4075 = vst [vmem:[#allocation2 + $0x238] sm:$0xff] %v4002_v31 }
 0x6c8   :  { %v3869_v59 = vpop.f32.mrf.mxu0 }
 0x6c9   :  { %v3870_v33 = vadd.f32 %v3869_v59, %v9242_v55 }
 0x6cb   :  { %v3914_v62 = vadd.f32 %v3913_v3, %v3870_v33 }
 0x6cd   :  { %4074 = vst [vmem:[#allocation2 + $0x230] sm:$0xff] %v3914_v62 }
 0x6ce LB: > { %v4211_v55 = vld [vmem:[%s10131_s8 + $0x3c0] sm:$0xff]  ;;  %v4212_v9 = vld [vmem:[%s10131_s8 + $0x3c8] sm:$0xff]  ;;  %s4830_s29 = sshll.u32 %s4985_s7, 3  ;;  %s4086_s4 = ssub.s32 8, %s4985_s7  ;;  %s4985_s7 = sphi %s9265_s7, %s4085_s7  }
 0x6cf   : > { %v4339_v63 = vld [vmem:[%s10131_s8 + $0x7c0] sm:$0xff]  ;;  %4347 = vmatpush.msra.mxu0 %v4211_v55  ;;  %v4340_v43 = vld [vmem:[%s10131_s8 + $0x7c8] sm:$0xff]  ;;  %4387 = vmatpush.msra.mxu2 %v4212_v9  ;;  %v4213_v55 = vld [vmem:[%s10131_s8 + $0x3d0] sm:$0xff]  ;;  %s4667_s2 = sshra.s32 %s4830_s29, 3  ;;  %s4735_s5 = scalar_lea.vmem [#allocation3], %s4830_s29 }
 0x6d0   : > { %4367 = vmatpush.msra.mxu1 %v4339_v63  ;;  %v4203_v0 = vld [vmem:[%s10131_s8 + $0x380] sm:$0xff]  ;;  %4407 = vmatpush.msra.mxu3 %v4340_v43  ;;  %v4204_v28 = vld [vmem:[%s10131_s8 + $0x388] sm:$0xff]  ;;  %v4341_v63 = vld [vmem:[%s10131_s8 + $0x7d0] sm:$0xff]  ;;  %s4840_s3 = sshll.u32 %s4667_s2, 6  ;;  %s10064_s11 = sshll.u32 %s4086_s4, 3 }
 0x6d1   : > { %v4331_v57 = vld [vmem:[%s10131_s8 + $0x780] sm:$0xff]  ;;  %v4332_v50 = vld [vmem:[%s10131_s8 + $0x788] sm:$0xff]  ;;  %4348 = vmatpush.msra.mxu0 %v4203_v0  ;;  %4388 = vmatpush.msra.mxu2 %v4204_v28  ;;  %v4214_v9 = vld [vmem:[%s10131_s8 + $0x3d8] sm:$0xff]  ;;  %s4671_s30 = scalar_lea.vmem [#allocation2], %s4840_s3  ;;  %s4680_s12 = sshra.s32 %s10064_s11, 3 }
 0x6d2   : > { %v4195_v27 = vld [vmem:[%s10131_s8 + $0x340] sm:$0xff]  ;;  %4368 = vmatpush.msra.mxu1 %v4331_v57  ;;  %v4196_v7 = vld [vmem:[%s10131_s8 + $0x348] sm:$0xff]  ;;  %4408 = vmatpush.msra.mxu3 %v4332_v50  ;;  %v4342_v43 = vld [vmem:[%s10131_s8 + $0x7d8] sm:$0xff]  ;;  %s4841_s13 = sshll.u32 %s4680_s12, 6  ;;  %s4737_s15 = scalar_lea.vmem [#allocation4], %s10064_s11 }
 0x6d3   : > { %v4323_v6 = vld [vmem:[%s10131_s8 + $0x740] sm:$0xff]  ;;  %v4324_v51 = vld [vmem:[%s10131_s8 + $0x748] sm:$0xff]  ;;  %4349 = vmatpush.msra.mxu0 %v4195_v27  ;;  %4389 = vmatpush.msra.mxu2 %v4196_v7  ;;  %v4205_v0 = vld [vmem:[%s10131_s8 + $0x390] sm:$0xff]  ;;  %s4684_s14 = scalar_lea.vmem [#allocation2], %s4841_s13  ;;  %s4085_s7 = sadd.s32 1, %s4985_s7  }
 0x6d4   : > { %v4187_v16 = vld [vmem:[%s10131_s8 + $0x300] sm:$0xff]  ;;  %4369 = vmatpush.msra.mxu1 %v4323_v6  ;;  %v4188_v40 = vld [vmem:[%s10131_s8 + $0x308] sm:$0xff]  ;;  %4409 = vmatpush.msra.mxu3 %v4324_v51  ;;  %v4333_v57 = vld [vmem:[%s10131_s8 + $0x790] sm:$0xff]  ;;  %p4082_p2 = scmp.ge.s32.totalorder %s4085_s7, 9  }
 0x6d5   : > { %v4315_v52 = vld [vmem:[%s10131_s8 + $0x700] sm:$0xff]  ;;  %v4316_v1 = vld [vmem:[%s10131_s8 + $0x708] sm:$0xff]  ;;  %4350 = vmatpush.msra.mxu0 %v4187_v16  ;;  %4390 = vmatpush.msra.mxu2 %v4188_v40  ;;  %v4206_v28 = vld [vmem:[%s10131_s8 + $0x398] sm:$0xff] }
 0x6d6   : > { %v4179_v61 = vld [vmem:[%s10131_s8 + $0x2c0] sm:$0xff]  ;;  %4370 = vmatpush.msra.mxu1 %v4315_v52  ;;  %v4180_v10 = vld [vmem:[%s10131_s8 + $0x2c8] sm:$0xff]  ;;  %4410 = vmatpush.msra.mxu3 %v4316_v1  ;;  %v4334_v50 = vld [vmem:[%s10131_s8 + $0x798] sm:$0xff] }
 0x6d7   : > { %v4307_v41 = vld [vmem:[%s10131_s8 + $0x6c0] sm:$0xff]  ;;  %v4308_v14 = vld [vmem:[%s10131_s8 + $0x6c8] sm:$0xff]  ;;  %4351 = vmatpush.msra.mxu0 %v4179_v61  ;;  %4391 = vmatpush.msra.mxu2 %v4180_v10  ;;  %v4197_v27 = vld [vmem:[%s10131_s8 + $0x350] sm:$0xff] }
 0x6d8   : > { %v4171_v5 = vld [vmem:[%s10131_s8 + $0x280] sm:$0xff]  ;;  %4371 = vmatpush.msra.mxu1 %v4307_v41  ;;  %v4172_v25 = vld [vmem:[%s10131_s8 + $0x288] sm:$0xff]  ;;  %4411 = vmatpush.msra.mxu3 %v4308_v14  ;;  %v4325_v6 = vld [vmem:[%s10131_s8 + $0x750] sm:$0xff] }
 0x6d9   : > { %v4299_v4 = vld [vmem:[%s10131_s8 + $0x680] sm:$0xff]  ;;  %v4300_v15 = vld [vmem:[%s10131_s8 + $0x688] sm:$0xff]  ;;  %4352 = vmatpush.msra.mxu0 %v4171_v5  ;;  %4392 = vmatpush.msra.mxu2 %v4172_v25  ;;  %v4198_v7 = vld [vmem:[%s10131_s8 + $0x358] sm:$0xff] }
 0x6da   : > { %v4163_v12 = vld [vmem:[%s10131_s8 + $0x240] sm:$0xff]  ;;  %4372 = vmatpush.msra.mxu1 %v4299_v4  ;;  %v4164_v19 = vld [vmem:[%s10131_s8 + $0x248] sm:$0xff]  ;;  %4412 = vmatpush.msra.mxu3 %v4300_v15  ;;  %v4326_v51 = vld [vmem:[%s10131_s8 + $0x758] sm:$0xff] }
 0x6db   : > { %v4291_v13 = vld [vmem:[%s10131_s8 + $0x640] sm:$0xff]  ;;  %v4292_v32 = vld [vmem:[%s10131_s8 + $0x648] sm:$0xff]  ;;  %4353 = vmatpush.msra.mxu0 %v4163_v12  ;;  %4393 = vmatpush.msra.mxu2 %v4164_v19  ;;  %v4189_v16 = vld [vmem:[%s10131_s8 + $0x310] sm:$0xff] }
 0x6dc   : > { %v4155_v21 = vld [vmem:[%s10131_s8 + $0x200] sm:$0xff]  ;;  %4373 = vmatpush.msra.mxu1 %v4291_v13  ;;  %v4156_v34 = vld [vmem:[%s10131_s8 + $0x208] sm:$0xff]  ;;  %4413 = vmatpush.msra.mxu3 %v4292_v32  ;;  %v4317_v52 = vld [vmem:[%s10131_s8 + $0x710] sm:$0xff] }
 0x6dd   : > { %v4283_v22 = vld [vmem:[%s10131_s8 + $0x600] sm:$0xff]  ;;  %v4284_v35 = vld [vmem:[%s10131_s8 + $0x608] sm:$0xff]  ;;  %4354 = vmatpush.msra.mxu0 %v4155_v21  ;;  %4394 = vmatpush.msra.mxu2 %v4156_v34  ;;  %v4190_v40 = vld [vmem:[%s10131_s8 + $0x318] sm:$0xff] }
 0x6de   : > { %v4147_v37 = vld [vmem:[%s10131_s8 + $0x1c0] sm:$0xff]  ;;  %4374 = vmatpush.msra.mxu1 %v4283_v22  ;;  %v4148_v56 = vld [vmem:[%s10131_s8 + $0x1c8] sm:$0xff]  ;;  %4414 = vmatpush.msra.mxu3 %v4284_v35  ;;  %v4318_v1 = vld [vmem:[%s10131_s8 + $0x718] sm:$0xff] }
 0x6df   : > { %v4275_v38 = vld [vmem:[%s10131_s8 + $0x5c0] sm:$0xff]  ;;  %v4276_v23 = vld [vmem:[%s10131_s8 + $0x5c8] sm:$0xff]  ;;  %4355 = vmatpush.msra.mxu0 %v4147_v37  ;;  %4395 = vmatpush.msra.mxu2 %v4148_v56  ;;  %v4181_v61 = vld [vmem:[%s10131_s8 + $0x2d0] sm:$0xff] }
 0x6e0   : > { %v4139_v58 = vld [vmem:[%s10131_s8 + $0x180] sm:$0xff]  ;;  %4375 = vmatpush.msra.mxu1 %v4275_v38  ;;  %v4140_v24 = vld [vmem:[%s10131_s8 + $0x188] sm:$0xff]  ;;  %4415 = vmatpush.msra.mxu3 %v4276_v23  ;;  %v4309_v41 = vld [vmem:[%s10131_s8 + $0x6d0] sm:$0xff] }
 0x6e1   : > { %v4267_v17 = vld [vmem:[%s10131_s8 + $0x580] sm:$0xff]  ;;  %v4268_v53 = vld [vmem:[%s10131_s8 + $0x588] sm:$0xff]  ;;  %4356 = vmatpush.msra.mxu0 %v4139_v58  ;;  %4396 = vmatpush.msra.mxu2 %v4140_v24  ;;  %v4182_v10 = vld [vmem:[%s10131_s8 + $0x2d8] sm:$0xff] }
 0x6e2   : > { %v4131_v29 = vld [vmem:[%s10131_s8 + $0x140] sm:$0xff]  ;;  %4376 = vmatpush.msra.mxu1 %v4267_v17  ;;  %v4132_v44 = vld [vmem:[%s10131_s8 + $0x148] sm:$0xff]  ;;  %4416 = vmatpush.msra.mxu3 %v4268_v53  ;;  %v4310_v14 = vld [vmem:[%s10131_s8 + $0x6d8] sm:$0xff] }
 0x6e3   : > { %v4259_v2 = vld [vmem:[%s10131_s8 + $0x540] sm:$0xff]  ;;  %v4260_v45 = vld [vmem:[%s10131_s8 + $0x548] sm:$0xff]  ;;  %4357 = vmatpush.msra.mxu0 %v4131_v29  ;;  %4397 = vmatpush.msra.mxu2 %v4132_v44  ;;  %v4173_v5 = vld [vmem:[%s10131_s8 + $0x290] sm:$0xff] }
 0x6e4   : > { %v4123_v20 = vld [vmem:[%s10131_s8 + $0x100] sm:$0xff]  ;;  %4377 = vmatpush.msra.mxu1 %v4259_v2  ;;  %v4124_v46 = vld [vmem:[%s10131_s8 + $0x108] sm:$0xff]  ;;  %4417 = vmatpush.msra.mxu3 %v4260_v45  ;;  %v4301_v4 = vld [vmem:[%s10131_s8 + $0x690] sm:$0xff] }
 0x6e5   : > { %v4251_v18 = vld [vmem:[%s10131_s8 + $0x500] sm:$0xff]  ;;  %v4252_v47 = vld [vmem:[%s10131_s8 + $0x508] sm:$0xff]  ;;  %4358 = vmatpush.msra.mxu0 %v4123_v20  ;;  %4398 = vmatpush.msra.mxu2 %v4124_v46  ;;  %v4174_v25 = vld [vmem:[%s10131_s8 + $0x298] sm:$0xff] }
 0x6e6   : > { %v4115_v8 = vld [vmem:[%s10131_s8 + $0xc0] sm:$0xff]  ;;  %4378 = vmatpush.msra.mxu1 %v4251_v18  ;;  %v4116_v60 = vld [vmem:[%s10131_s8 + $0xc8] sm:$0xff]  ;;  %4418 = vmatpush.msra.mxu3 %v4252_v47  ;;  %v4302_v15 = vld [vmem:[%s10131_s8 + $0x698] sm:$0xff] }
 0x6e7   : > { %v4243_v36 = vld [vmem:[%s10131_s8 + $0x4c0] sm:$0xff]  ;;  %v4244_v48 = vld [vmem:[%s10131_s8 + $0x4c8] sm:$0xff]  ;;  %4359 = vmatpush.msra.mxu0 %v4115_v8  ;;  %4399 = vmatpush.msra.mxu2 %v4116_v60  ;;  %v4165_v12 = vld [vmem:[%s10131_s8 + $0x250] sm:$0xff] }
 0x6e8   : > { %v4107_v49 = vld [vmem:[%s10131_s8 + $0x80] sm:$0xff]  ;;  %4379 = vmatpush.msra.mxu1 %v4243_v36  ;;  %v4108_v30 = vld [vmem:[%s10131_s8 + $0x88] sm:$0xff]  ;;  %4419 = vmatpush.msra.mxu3 %v4244_v48  ;;  %v4293_v13 = vld [vmem:[%s10131_s8 + $0x650] sm:$0xff] }
 0x6e9   : > { %v4235_v26 = vld [vmem:[%s10131_s8 + $0x480] sm:$0xff]  ;;  %v4236_v39 = vld [vmem:[%s10131_s8 + $0x488] sm:$0xff]  ;;  %4360 = vmatpush.msra.mxu0 %v4107_v49  ;;  %4400 = vmatpush.msra.mxu2 %v4108_v30  ;;  %v4166_v19 = vld [vmem:[%s10131_s8 + $0x258] sm:$0xff] }
 0x6ea   : > { %v4099_v59 = vld [vmem:[%s10131_s8 + $0x40] sm:$0xff]  ;;  %4380 = vmatpush.msra.mxu1 %v4235_v26  ;;  %v4100_v3 = vld [vmem:[%s10131_s8 + $0x48] sm:$0xff]  ;;  %4420 = vmatpush.msra.mxu3 %v4236_v39  ;;  %v4294_v32 = vld [vmem:[%s10131_s8 + $0x658] sm:$0xff] }
 0x6eb   : > { %v4227_v33 = vld [vmem:[%s10131_s8 + $0x440] sm:$0xff]  ;;  %v4228_v11 = vld [vmem:[%s10131_s8 + $0x448] sm:$0xff]  ;;  %4361 = vmatpush.msra.mxu0 %v4099_v59  ;;  %4401 = vmatpush.msra.mxu2 %v4100_v3  ;;  %v4157_v21 = vld [vmem:[%s10131_s8 + $0x210] sm:$0xff] }
 0x6ec   : > { %v4091_v62 = vld [vmem:[%s10131_s8] sm:$0xff]  ;;  %4381 = vmatpush.msra.mxu1 %v4227_v33  ;;  %v4092_v42 = vld [vmem:[%s10131_s8 + $0x8] sm:$0xff]  ;;  %4421 = vmatpush.msra.mxu3 %v4228_v11  ;;  %v4285_v22 = vld [vmem:[%s10131_s8 + $0x610] sm:$0xff] }
 0x6ed   : > { %v4219_v54 = vld [vmem:[%s10131_s8 + $0x400] sm:$0xff]  ;;  %v4220_v31 = vld [vmem:[%s10131_s8 + $0x408] sm:$0xff]  ;;  %4362 = vmatpush.msra.mxu0 %v4091_v62  ;;  %4402 = vmatpush.msra.mxu2 %v4092_v42  ;;  %v4158_v34 = vld [vmem:[%s10131_s8 + $0x218] sm:$0xff] }
 0x6ee   : > { %4382 = vmatpush.msra.mxu1 %v4219_v54  ;;  %4422 = vmatpush.msra.mxu3 %v4220_v31  ;;  %v4286_v35 = vld [vmem:[%s10131_s8 + $0x618] sm:$0xff]  ;;  %v4149_v37 = vld [vmem:[%s10131_s8 + $0x1d0] sm:$0xff] }
 0x6ef   : > { %4427 = vmatpush.msrb.mxu0 %v4213_v55  ;;  %4467 = vmatpush.msrb.mxu2 %v4214_v9  ;;  %v4277_v38 = vld [vmem:[%s10131_s8 + $0x5d0] sm:$0xff]  ;;  %v4150_v56 = vld [vmem:[%s10131_s8 + $0x1d8] sm:$0xff]  ;;  %v4215_v9 = vld [vmem:[%s10131_s8 + $0x3e0] sm:$0xff] }
 0x6f0   : > { %4447 = vmatpush.msrb.mxu1 %v4341_v63  ;;  %4487 = vmatpush.msrb.mxu3 %v4342_v43  ;;  %v4278_v23 = vld [vmem:[%s10131_s8 + $0x5d8] sm:$0xff]  ;;  %v4141_v58 = vld [vmem:[%s10131_s8 + $0x190] sm:$0xff]  ;;  %v4343_v43 = vld [vmem:[%s10131_s8 + $0x7e0] sm:$0xff] }
 0x6f1   : > { %4428 = vmatpush.msrb.mxu0 %v4205_v0  ;;  %4468 = vmatpush.msrb.mxu2 %v4206_v28  ;;  %v4269_v17 = vld [vmem:[%s10131_s8 + $0x590] sm:$0xff]  ;;  %v4142_v24 = vld [vmem:[%s10131_s8 + $0x198] sm:$0xff]  ;;  %v4216_v0 = vld [vmem:[%s10131_s8 + $0x3e8] sm:$0xff] }
 0x6f2   : > { %4448 = vmatpush.msrb.mxu1 %v4333_v57  ;;  %4488 = vmatpush.msrb.mxu3 %v4334_v50  ;;  %v4270_v53 = vld [vmem:[%s10131_s8 + $0x598] sm:$0xff]  ;;  %v4133_v29 = vld [vmem:[%s10131_s8 + $0x150] sm:$0xff]  ;;  %v4344_v57 = vld [vmem:[%s10131_s8 + $0x7e8] sm:$0xff] }
 0x6f3   : > { %4429 = vmatpush.msrb.mxu0 %v4197_v27  ;;  %4469 = vmatpush.msrb.mxu2 %v4198_v7  ;;  %v4261_v2 = vld [vmem:[%s10131_s8 + $0x550] sm:$0xff]  ;;  %v4134_v44 = vld [vmem:[%s10131_s8 + $0x158] sm:$0xff]  ;;  %v4207_v28 = vld [vmem:[%s10131_s8 + $0x3a0] sm:$0xff] }
 0x6f4   : > { %4449 = vmatpush.msrb.mxu1 %v4325_v6  ;;  %4489 = vmatpush.msrb.mxu3 %v4326_v51  ;;  %v4262_v45 = vld [vmem:[%s10131_s8 + $0x558] sm:$0xff]  ;;  %v4125_v20 = vld [vmem:[%s10131_s8 + $0x110] sm:$0xff]  ;;  %v4335_v50 = vld [vmem:[%s10131_s8 + $0x7a0] sm:$0xff] }
 0x6f5   : > { %4430 = vmatpush.msrb.mxu0 %v4189_v16  ;;  %4470 = vmatpush.msrb.mxu2 %v4190_v40  ;;  %v4253_v18 = vld [vmem:[%s10131_s8 + $0x510] sm:$0xff]  ;;  %v4126_v46 = vld [vmem:[%s10131_s8 + $0x118] sm:$0xff]  ;;  %v4208_v27 = vld [vmem:[%s10131_s8 + $0x3a8] sm:$0xff] }
 0x6f6   : > { %4450 = vmatpush.msrb.mxu1 %v4317_v52  ;;  %4490 = vmatpush.msrb.mxu3 %v4318_v1  ;;  %v4254_v47 = vld [vmem:[%s10131_s8 + $0x518] sm:$0xff]  ;;  %v4117_v8 = vld [vmem:[%s10131_s8 + $0xd0] sm:$0xff]  ;;  %v4336_v6 = vld [vmem:[%s10131_s8 + $0x7a8] sm:$0xff] }
 0x6f7   : > { %4431 = vmatpush.msrb.mxu0 %v4181_v61  ;;  %4471 = vmatpush.msrb.mxu2 %v4182_v10  ;;  %v4245_v36 = vld [vmem:[%s10131_s8 + $0x4d0] sm:$0xff]  ;;  %v4118_v60 = vld [vmem:[%s10131_s8 + $0xd8] sm:$0xff]  ;;  %v4199_v7 = vld [vmem:[%s10131_s8 + $0x360] sm:$0xff] }
 0x6f8   : > { %4451 = vmatpush.msrb.mxu1 %v4309_v41  ;;  %4491 = vmatpush.msrb.mxu3 %v4310_v14  ;;  %v4246_v48 = vld [vmem:[%s10131_s8 + $0x4d8] sm:$0xff]  ;;  %v9618_v49 = vld [vmem:[#allocation5] sm:$0xff]  ;;  %v4327_v51 = vld [vmem:[%s10131_s8 + $0x760] sm:$0xff] }
 0x6f9   : > { %4432 = vmatpush.msrb.mxu0 %v4173_v5  ;;  %4472 = vmatpush.msrb.mxu2 %v4174_v25  ;;  %v9620_v26 = vld [vmem:[#allocation5 + $0x8] sm:$0xff]  ;;  %v4109_v30 = vld [vmem:[%s10131_s8 + $0x90] sm:$0xff]  ;;  %v4200_v16 = vld [vmem:[%s10131_s8 + $0x368] sm:$0xff] }
 0x6fa   : > { %4452 = vmatpush.msrb.mxu1 %v4301_v4  ;;  %4492 = vmatpush.msrb.mxu3 %v4302_v15  ;;  %v4237_v39 = vld [vmem:[%s10131_s8 + $0x490] sm:$0xff]  ;;  %v4110_v59 = vld [vmem:[%s10131_s8 + $0x98] sm:$0xff]  ;;  %v4328_v52 = vld [vmem:[%s10131_s8 + $0x768] sm:$0xff] }
 0x6fb   : > { %4433 = vmatpush.msrb.mxu0 %v4165_v12  ;;  %4473 = vmatpush.msrb.mxu2 %v4166_v19  ;;  %v4238_v33 = vld [vmem:[%s10131_s8 + $0x498] sm:$0xff]  ;;  %v4101_v3 = vld [vmem:[%s10131_s8 + $0x50] sm:$0xff]  ;;  %v4191_v40 = vld [vmem:[%s10131_s8 + $0x320] sm:$0xff] }
 0x6fc   : > { %4453 = vmatpush.msrb.mxu1 %v4293_v13  ;;  %4493 = vmatpush.msrb.mxu3 %v4294_v32  ;;  %v4229_v11 = vld [vmem:[%s10131_s8 + $0x450] sm:$0xff]  ;;  %v4102_v62 = vld [vmem:[%s10131_s8 + $0x58] sm:$0xff]  ;;  %v4319_v1 = vld [vmem:[%s10131_s8 + $0x720] sm:$0xff] }
 0x6fd   : > { %4434 = vmatpush.msrb.mxu0 %v4157_v21  ;;  %4474 = vmatpush.msrb.mxu2 %v4158_v34  ;;  %v4230_v54 = vld [vmem:[%s10131_s8 + $0x458] sm:$0xff]  ;;  %v4093_v42 = vld [vmem:[%s10131_s8 + $0x10] sm:$0xff]  ;;  %v4192_v61 = vld [vmem:[%s10131_s8 + $0x328] sm:$0xff] }
 0x6fe   : > { %4454 = vmatpush.msrb.mxu1 %v4285_v22  ;;  %4494 = vmatpush.msrb.mxu3 %v4286_v35  ;;  %v4221_v31 = vld [vmem:[%s10131_s8 + $0x410] sm:$0xff]  ;;  %v4094_v55 = vld [vmem:[%s10131_s8 + $0x18] sm:$0xff]  ;;  %v4320_v41 = vld [vmem:[%s10131_s8 + $0x728] sm:$0xff] }
 0x6ff   : > { %4435 = vmatpush.msrb.mxu0 %v4149_v37  ;;  %4475 = vmatpush.msrb.mxu2 %v4150_v56  ;;  %v4222_v63 = vld [vmem:[%s10131_s8 + $0x418] sm:$0xff]  ;;  %v4183_v10 = vld [vmem:[%s10131_s8 + $0x2e0] sm:$0xff]  ;;  %v4184_v5 = vld [vmem:[%s10131_s8 + $0x2e8] sm:$0xff] }
 0x700   : > { %4455 = vmatpush.msrb.mxu1 %v4277_v38  ;;  %4495 = vmatpush.msrb.mxu3 %v4278_v23  ;;  %v4311_v14 = vld [vmem:[%s10131_s8 + $0x6e0] sm:$0xff]  ;;  %v4312_v4 = vld [vmem:[%s10131_s8 + $0x6e8] sm:$0xff] }
 0x701   : > { %4436 = vmatpush.msrb.mxu0 %v4141_v58  ;;  %4476 = vmatpush.msrb.mxu2 %v4142_v24  ;;  %v4175_v25 = vld [vmem:[%s10131_s8 + $0x2a0] sm:$0xff]  ;;  %v4176_v12 = vld [vmem:[%s10131_s8 + $0x2a8] sm:$0xff] }
 0x702   : > { %4456 = vmatpush.msrb.mxu1 %v4269_v17  ;;  %4496 = vmatpush.msrb.mxu3 %v4270_v53  ;;  %v4303_v15 = vld [vmem:[%s10131_s8 + $0x6a0] sm:$0xff]  ;;  %v4304_v13 = vld [vmem:[%s10131_s8 + $0x6a8] sm:$0xff] }
 0x703   : > { %4437 = vmatpush.msrb.mxu0 %v4133_v29  ;;  %4477 = vmatpush.msrb.mxu2 %v4134_v44  ;;  %v4167_v19 = vld [vmem:[%s10131_s8 + $0x260] sm:$0xff]  ;;  %v4168_v21 = vld [vmem:[%s10131_s8 + $0x268] sm:$0xff] }
 0x704   : > { %4457 = vmatpush.msrb.mxu1 %v4261_v2  ;;  %4497 = vmatpush.msrb.mxu3 %v4262_v45  ;;  %v4295_v32 = vld [vmem:[%s10131_s8 + $0x660] sm:$0xff]  ;;  %v4296_v22 = vld [vmem:[%s10131_s8 + $0x668] sm:$0xff] }
 0x705   : > { %4438 = vmatpush.msrb.mxu0 %v4125_v20  ;;  %4478 = vmatpush.msrb.mxu2 %v4126_v46  ;;  %v4159_v34 = vld [vmem:[%s10131_s8 + $0x220] sm:$0xff]  ;;  %v4160_v37 = vld [vmem:[%s10131_s8 + $0x228] sm:$0xff] }
 0x706   : > { %4458 = vmatpush.msrb.mxu1 %v4253_v18  ;;  %4498 = vmatpush.msrb.mxu3 %v4254_v47  ;;  %v4287_v35 = vld [vmem:[%s10131_s8 + $0x620] sm:$0xff]  ;;  %v4288_v38 = vld [vmem:[%s10131_s8 + $0x628] sm:$0xff] }
 0x707   : > { %4439 = vmatpush.msrb.mxu0 %v4117_v8  ;;  %4479 = vmatpush.msrb.mxu2 %v4118_v60  ;;  %v4151_v56 = vld [vmem:[%s10131_s8 + $0x1e0] sm:$0xff]  ;;  %v4152_v58 = vld [vmem:[%s10131_s8 + $0x1e8] sm:$0xff] }
 0x708   : > { %4459 = vmatpush.msrb.mxu1 %v4245_v36  ;;  %4499 = vmatpush.msrb.mxu3 %v4246_v48  ;;  %v4279_v23 = vld [vmem:[%s10131_s8 + $0x5e0] sm:$0xff]  ;;  %v4280_v17 = vld [vmem:[%s10131_s8 + $0x5e8] sm:$0xff] }
 0x709   : > { %4403 = vmatmul.f32.vlgmr.msra.gmra.mxu2 %v9618_v49  ;;  %4423 = vmatmul.f32.vlgmr.msra.gmra.mxu3 %v9620_v26  ;;  %v4143_v24 = vld [vmem:[%s10131_s8 + $0x1a0] sm:$0xff]  ;;  %v4144_v29 = vld [vmem:[%s10131_s8 + $0x1a8] sm:$0xff] }
 0x70a   : > { %4440 = vmatpush.msrb.mxu0 %v4109_v30  ;;  %4460 = vmatpush.msrb.mxu1 %v4237_v39  ;;  %v4271_v53 = vld [vmem:[%s10131_s8 + $0x5a0] sm:$0xff]  ;;  %v4272_v2 = vld [vmem:[%s10131_s8 + $0x5a8] sm:$0xff] }
 0x70b   : > { %4480 = vmatpush.msrb.mxu2 %v4110_v59  ;;  %4500 = vmatpush.msrb.mxu3 %v4238_v33  ;;  %v4135_v44 = vld [vmem:[%s10131_s8 + $0x160] sm:$0xff]  ;;  %v4136_v20 = vld [vmem:[%s10131_s8 + $0x168] sm:$0xff] }
 0x70c   : > { %4441 = vmatpush.msrb.mxu0 %v4101_v3  ;;  %4461 = vmatpush.msrb.mxu1 %v4229_v11  ;;  %v4263_v45 = vld [vmem:[%s10131_s8 + $0x560] sm:$0xff]  ;;  %v4264_v18 = vld [vmem:[%s10131_s8 + $0x568] sm:$0xff] }
 0x70d   : > { %4481 = vmatpush.msrb.mxu2 %v4102_v62  ;;  %4501 = vmatpush.msrb.mxu3 %v4230_v54  ;;  %v4127_v46 = vld [vmem:[%s10131_s8 + $0x120] sm:$0xff]  ;;  %v4128_v8 = vld [vmem:[%s10131_s8 + $0x128] sm:$0xff] }
 0x70e   : > { %4363 = vmatmul.f32.vlgmr.msra.gmra.mxu0 %v9618_v49  ;;  %4383 = vmatmul.f32.vlgmr.msra.gmra.mxu1 %v9620_v26  ;;  %v4255_v47 = vld [vmem:[%s10131_s8 + $0x520] sm:$0xff]  ;;  %v4256_v36 = vld [vmem:[%s10131_s8 + $0x528] sm:$0xff] }
 0x70f   : > { %4442 = vmatpush.msrb.mxu0 %v4093_v42  ;;  %4462 = vmatpush.msrb.mxu1 %v4221_v31  ;;  %v4119_v60 = vld [vmem:[%s10131_s8 + $0xe0] sm:$0xff]  ;;  %v4120_v30 = vld [vmem:[%s10131_s8 + $0xe8] sm:$0xff] }
 0x710   : > { %4482 = vmatpush.msrb.mxu2 %v4094_v55  ;;  %4502 = vmatpush.msrb.mxu3 %v4222_v63  ;;  %v4247_v48 = vld [vmem:[%s10131_s8 + $0x4e0] sm:$0xff]  ;;  %v4248_v39 = vld [vmem:[%s10131_s8 + $0x4e8] sm:$0xff] }
 0x711   : > { %4507 = vmatpush.msra.mxu0 %v4215_v9  ;;  %4527 = vmatpush.msra.mxu1 %v4343_v43  ;;  %v4111_v59 = vld [vmem:[%s10131_s8 + $0xa0] sm:$0xff]  ;;  %v4112_v3 = vld [vmem:[%s10131_s8 + $0xa8] sm:$0xff] }
 0x712   : > { %4547 = vmatpush.msra.mxu2 %v4216_v0  ;;  %4567 = vmatpush.msra.mxu3 %v4344_v57  ;;  %v4239_v33 = vld [vmem:[%s10131_s8 + $0x4a0] sm:$0xff]  ;;  %v4240_v11 = vld [vmem:[%s10131_s8 + $0x4a8] sm:$0xff]  ;;  %v4217_v0 = vld [vmem:[%s10131_s8 + $0x3f0] sm:$0xff] }
 0x713   : > { %4508 = vmatpush.msra.mxu0 %v4207_v28  ;;  %4528 = vmatpush.msra.mxu1 %v4335_v50  ;;  %v4103_v62 = vld [vmem:[%s10131_s8 + $0x60] sm:$0xff]  ;;  %v4104_v42 = vld [vmem:[%s10131_s8 + $0x68] sm:$0xff]  ;;  %v4345_v57 = vld [vmem:[%s10131_s8 + $0x7f0] sm:$0xff] }
 0x714   : > { %4548 = vmatpush.msra.mxu2 %v4208_v27  ;;  %4568 = vmatpush.msra.mxu3 %v4336_v6  ;;  %v4231_v54 = vld [vmem:[%s10131_s8 + $0x460] sm:$0xff]  ;;  %v4232_v31 = vld [vmem:[%s10131_s8 + $0x468] sm:$0xff]  ;;  %v4218_v28 = vld [vmem:[%s10131_s8 + $0x3f8] sm:$0xff] }
 0x715   : > { %4509 = vmatpush.msra.mxu0 %v4199_v7  ;;  %4529 = vmatpush.msra.mxu1 %v4327_v51  ;;  %v4095_v55 = vld [vmem:[%s10131_s8 + $0x20] sm:$0xff]  ;;  %v4096_v9 = vld [vmem:[%s10131_s8 + $0x28] sm:$0xff]  ;;  %v4346_v50 = vld [vmem:[%s10131_s8 + $0x7f8] sm:$0xff] }
 0x716   : > { %4549 = vmatpush.msra.mxu2 %v4200_v16  ;;  %4569 = vmatpush.msra.mxu3 %v4328_v52  ;;  %v4223_v63 = vld [vmem:[%s10131_s8 + $0x420] sm:$0xff]  ;;  %v4224_v43 = vld [vmem:[%s10131_s8 + $0x428] sm:$0xff]  ;;  %v4209_v27 = vld [vmem:[%s10131_s8 + $0x3b0] sm:$0xff] }
 0x717   : > { %4483 = vmatmul.f32.vlgmr.msrb.gmra.mxu2 %v9618_v49  ;;  %4503 = vmatmul.f32.vlgmr.msrb.gmra.mxu3 %v9620_v26  ;;  %v4337_v6 = vld [vmem:[%s10131_s8 + $0x7b0] sm:$0xff]  ;;  %v4210_v7 = vld [vmem:[%s10131_s8 + $0x3b8] sm:$0xff] }
 0x718   : > { %4510 = vmatpush.msra.mxu0 %v4191_v40  ;;  %4530 = vmatpush.msra.mxu1 %v4319_v1  ;;  %v4338_v51 = vld [vmem:[%s10131_s8 + $0x7b8] sm:$0xff]  ;;  %v4201_v16 = vld [vmem:[%s10131_s8 + $0x370] sm:$0xff] }
 0x719   : > { %4550 = vmatpush.msra.mxu2 %v4192_v61  ;;  %4570 = vmatpush.msra.mxu3 %v4320_v41  ;;  %v4329_v52 = vld [vmem:[%s10131_s8 + $0x770] sm:$0xff]  ;;  %v4202_v40 = vld [vmem:[%s10131_s8 + $0x378] sm:$0xff] }
 0x71a   : > { %4443 = vmatmul.f32.vlgmr.msrb.gmra.mxu0 %v9618_v49  ;;  %4463 = vmatmul.f32.vlgmr.msrb.gmra.mxu1 %v9620_v26  ;;  %v4330_v1 = vld [vmem:[%s10131_s8 + $0x778] sm:$0xff]  ;;  %v4193_v61 = vld [vmem:[%s10131_s8 + $0x330] sm:$0xff] }
 0x71b   : > { %4511 = vmatpush.msra.mxu0 %v4183_v10  ;;  %4531 = vmatpush.msra.mxu1 %v4311_v14  ;;  %v4321_v41 = vld [vmem:[%s10131_s8 + $0x730] sm:$0xff]  ;;  %v4194_v10 = vld [vmem:[%s10131_s8 + $0x338] sm:$0xff] }
 0x71c   : > { %4551 = vmatpush.msra.mxu2 %v4184_v5  ;;  %4571 = vmatpush.msra.mxu3 %v4312_v4  ;;  %v4322_v14 = vld [vmem:[%s10131_s8 + $0x738] sm:$0xff]  ;;  %v4185_v5 = vld [vmem:[%s10131_s8 + $0x2f0] sm:$0xff] }
 0x71d   : > { %4512 = vmatpush.msra.mxu0 %v4175_v25  ;;  %4532 = vmatpush.msra.mxu1 %v4303_v15  ;;  %v4313_v4 = vld [vmem:[%s10131_s8 + $0x6f0] sm:$0xff]  ;;  %v4186_v25 = vld [vmem:[%s10131_s8 + $0x2f8] sm:$0xff] }
 0x71e   : > { %4552 = vmatpush.msra.mxu2 %v4176_v12  ;;  %4572 = vmatpush.msra.mxu3 %v4304_v13  ;;  %v4314_v15 = vld [vmem:[%s10131_s8 + $0x6f8] sm:$0xff]  ;;  %v4177_v12 = vld [vmem:[%s10131_s8 + $0x2b0] sm:$0xff] }
 0x71f   : > { %4513 = vmatpush.msra.mxu0 %v4167_v19  ;;  %4533 = vmatpush.msra.mxu1 %v4295_v32  ;;  %v4305_v13 = vld [vmem:[%s10131_s8 + $0x6b0] sm:$0xff]  ;;  %v4178_v19 = vld [vmem:[%s10131_s8 + $0x2b8] sm:$0xff] }
 0x720   : > { %4553 = vmatpush.msra.mxu2 %v4168_v21  ;;  %4573 = vmatpush.msra.mxu3 %v4296_v22  ;;  %v4306_v32 = vld [vmem:[%s10131_s8 + $0x6b8] sm:$0xff]  ;;  %v4169_v21 = vld [vmem:[%s10131_s8 + $0x270] sm:$0xff] }
 0x721   : > { %4514 = vmatpush.msra.mxu0 %v4159_v34  ;;  %4534 = vmatpush.msra.mxu1 %v4287_v35  ;;  %v4297_v22 = vld [vmem:[%s10131_s8 + $0x670] sm:$0xff]  ;;  %v4170_v34 = vld [vmem:[%s10131_s8 + $0x278] sm:$0xff] }
 0x722   : > { %4554 = vmatpush.msra.mxu2 %v4160_v37  ;;  %4574 = vmatpush.msra.mxu3 %v4288_v38  ;;  %v4298_v35 = vld [vmem:[%s10131_s8 + $0x678] sm:$0xff]  ;;  %v4161_v37 = vld [vmem:[%s10131_s8 + $0x230] sm:$0xff] }
 0x723   : > { %4515 = vmatpush.msra.mxu0 %v4151_v56  ;;  %4535 = vmatpush.msra.mxu1 %v4279_v23  ;;  %v4289_v38 = vld [vmem:[%s10131_s8 + $0x630] sm:$0xff]  ;;  %v4162_v56 = vld [vmem:[%s10131_s8 + $0x238] sm:$0xff] }
 0x724   : > { %4555 = vmatpush.msra.mxu2 %v4152_v58  ;;  %4575 = vmatpush.msra.mxu3 %v4280_v17  ;;  %v4290_v23 = vld [vmem:[%s10131_s8 + $0x638] sm:$0xff]  ;;  %v4153_v58 = vld [vmem:[%s10131_s8 + $0x1f0] sm:$0xff] }
 0x725   : > { %4516 = vmatpush.msra.mxu0 %v4143_v24  ;;  %4536 = vmatpush.msra.mxu1 %v4271_v53  ;;  %v4281_v17 = vld [vmem:[%s10131_s8 + $0x5f0] sm:$0xff]  ;;  %v4154_v24 = vld [vmem:[%s10131_s8 + $0x1f8] sm:$0xff] }
 0x726   : > { %4556 = vmatpush.msra.mxu2 %v4144_v29  ;;  %4576 = vmatpush.msra.mxu3 %v4272_v2  ;;  %v4282_v53 = vld [vmem:[%s10131_s8 + $0x5f8] sm:$0xff]  ;;  %v4145_v29 = vld [vmem:[%s10131_s8 + $0x1b0] sm:$0xff] }
 0x727   : > { %4517 = vmatpush.msra.mxu0 %v4135_v44  ;;  %4537 = vmatpush.msra.mxu1 %v4263_v45  ;;  %v4273_v2 = vld [vmem:[%s10131_s8 + $0x5b0] sm:$0xff]  ;;  %v4146_v44 = vld [vmem:[%s10131_s8 + $0x1b8] sm:$0xff] }
 0x728   : > { %4557 = vmatpush.msra.mxu2 %v4136_v20  ;;  %4577 = vmatpush.msra.mxu3 %v4264_v18  ;;  %v4274_v45 = vld [vmem:[%s10131_s8 + $0x5b8] sm:$0xff]  ;;  %v4137_v20 = vld [vmem:[%s10131_s8 + $0x170] sm:$0xff] }
 0x729   : > { %4518 = vmatpush.msra.mxu0 %v4127_v46  ;;  %4538 = vmatpush.msra.mxu1 %v4255_v47  ;;  %v4265_v18 = vld [vmem:[%s10131_s8 + $0x570] sm:$0xff]  ;;  %v4138_v46 = vld [vmem:[%s10131_s8 + $0x178] sm:$0xff] }
 0x72a   : > { %4558 = vmatpush.msra.mxu2 %v4128_v8  ;;  %4578 = vmatpush.msra.mxu3 %v4256_v36  ;;  %v4266_v47 = vld [vmem:[%s10131_s8 + $0x578] sm:$0xff]  ;;  %v4129_v8 = vld [vmem:[%s10131_s8 + $0x130] sm:$0xff] }
 0x72b   : > { %4519 = vmatpush.msra.mxu0 %v4119_v60  ;;  %4539 = vmatpush.msra.mxu1 %v4247_v48  ;;  %v4257_v36 = vld [vmem:[%s10131_s8 + $0x530] sm:$0xff]  ;;  %v4130_v60 = vld [vmem:[%s10131_s8 + $0x138] sm:$0xff] }
 0x72c   : > { %4559 = vmatpush.msra.mxu2 %v4120_v30  ;;  %4579 = vmatpush.msra.mxu3 %v4248_v39  ;;  %v4258_v48 = vld [vmem:[%s10131_s8 + $0x538] sm:$0xff]  ;;  %v4121_v30 = vld [vmem:[%s10131_s8 + $0xf0] sm:$0xff] }
 0x72d   : > { %4520 = vmatpush.msra.mxu0 %v4111_v59  ;;  %4540 = vmatpush.msra.mxu1 %v4239_v33  ;;  %v4249_v39 = vld [vmem:[%s10131_s8 + $0x4f0] sm:$0xff]  ;;  %v4122_v59 = vld [vmem:[%s10131_s8 + $0xf8] sm:$0xff] }
 0x72e   : > { %4560 = vmatpush.msra.mxu2 %v4112_v3  ;;  %4580 = vmatpush.msra.mxu3 %v4240_v11  ;;  %v4250_v33 = vld [vmem:[%s10131_s8 + $0x4f8] sm:$0xff]  ;;  %v4113_v3 = vld [vmem:[%s10131_s8 + $0xb0] sm:$0xff] }
 0x72f   : > { %4521 = vmatpush.msra.mxu0 %v4103_v62  ;;  %4541 = vmatpush.msra.mxu1 %v4231_v54  ;;  %v4241_v11 = vld [vmem:[%s10131_s8 + $0x4b0] sm:$0xff]  ;;  %v4114_v62 = vld [vmem:[%s10131_s8 + $0xb8] sm:$0xff] }
 0x730   : > { %4561 = vmatpush.msra.mxu2 %v4104_v42  ;;  %4581 = vmatpush.msra.mxu3 %v4232_v31  ;;  %v4242_v54 = vld [vmem:[%s10131_s8 + $0x4b8] sm:$0xff]  ;;  %v4105_v42 = vld [vmem:[%s10131_s8 + $0x70] sm:$0xff] }
 0x731   : > { %4522 = vmatpush.msra.mxu0 %v4095_v55  ;;  %4542 = vmatpush.msra.mxu1 %v4223_v63  ;;  %v4233_v31 = vld [vmem:[%s10131_s8 + $0x470] sm:$0xff]  ;;  %v4106_v55 = vld [vmem:[%s10131_s8 + $0x78] sm:$0xff] }
 0x732   : > { %4562 = vmatpush.msra.mxu2 %v4096_v9  ;;  %4582 = vmatpush.msra.mxu3 %v4224_v43  ;;  %v4234_v63 = vld [vmem:[%s10131_s8 + $0x478] sm:$0xff]  ;;  %v4097_v9 = vld [vmem:[%s10131_s8 + $0x30] sm:$0xff] }
 0x733   : > { %4587 = vmatpush.msrb.mxu0 %v4217_v0  ;;  %4607 = vmatpush.msrb.mxu1 %v4345_v57  ;;  %v4225_v43 = vld [vmem:[%s10131_s8 + $0x430] sm:$0xff]  ;;  %v4098_v0 = vld [vmem:[%s10131_s8 + $0x38] sm:$0xff] }
 0x734   : > { %4627 = vmatpush.msrb.mxu2 %v4218_v28  ;;  %4647 = vmatpush.msrb.mxu3 %v4346_v50  ;;  %v4226_v57 = vld [vmem:[%s10131_s8 + $0x438] sm:$0xff] }
 0x735   : > { %4588 = vmatpush.msrb.mxu0 %v4209_v27  ;;  %4608 = vmatpush.msrb.mxu1 %v4337_v6  ;;  %v4672_v27 = vld [vmem:[%s4671_s30] sm:$0xff] }
 0x736   : > { %4628 = vmatpush.msrb.mxu2 %v4210_v7  ;;  %4648 = vmatpush.msrb.mxu3 %v4338_v51 }
 0x737   : > { %4589 = vmatpush.msrb.mxu0 %v4201_v16  ;;  %4609 = vmatpush.msrb.mxu1 %v4329_v52  ;;  %v4673_v16 = vld [vmem:[%s4671_s30 + $0x8] sm:$0xff] }
 0x738   : > { %4629 = vmatpush.msrb.mxu2 %v4202_v40  ;;  %4649 = vmatpush.msrb.mxu3 %v4330_v1 }
 0x739   : > { %4590 = vmatpush.msrb.mxu0 %v4193_v61  ;;  %4610 = vmatpush.msrb.mxu1 %v4321_v41 }
 0x73a   : > { %4630 = vmatpush.msrb.mxu2 %v4194_v10  ;;  %4650 = vmatpush.msrb.mxu3 %v4322_v14  ;;  %v4674_v10 = vld [vmem:[%s4671_s30 + $0x10] sm:$0xff] }
 0x73b   : > { %4591 = vmatpush.msrb.mxu0 %v4185_v5  ;;  %4611 = vmatpush.msrb.mxu1 %v4313_v4 }
 0x73c   : > { %4631 = vmatpush.msrb.mxu2 %v4186_v25  ;;  %4651 = vmatpush.msrb.mxu3 %v4314_v15 }
 0x73d   : > { %4592 = vmatpush.msrb.mxu0 %v4177_v12  ;;  %4612 = vmatpush.msrb.mxu1 %v4305_v13 }
 0x73e   : > { %4632 = vmatpush.msrb.mxu2 %v4178_v19  ;;  %4652 = vmatpush.msrb.mxu3 %v4306_v32  ;;  %v4675_v19 = vld [vmem:[%s4671_s30 + $0x18] sm:$0xff] }
 0x73f   : > { %4593 = vmatpush.msrb.mxu0 %v4169_v21  ;;  %4613 = vmatpush.msrb.mxu1 %v4297_v22 }
 0x740   : > { %4633 = vmatpush.msrb.mxu2 %v4170_v34  ;;  %4653 = vmatpush.msrb.mxu3 %v4298_v35  ;;  %v4693_v35 = vld [vmem:[#allocation6 + $0x8] sm:$0xff] }
 0x741   : > { %4594 = vmatpush.msrb.mxu0 %v4161_v37  ;;  %4614 = vmatpush.msrb.mxu1 %v4289_v38 }
 0x742   : > { %4634 = vmatpush.msrb.mxu2 %v4162_v56  ;;  %4654 = vmatpush.msrb.mxu3 %v4290_v23 }
 0x743   : > { %4595 = vmatpush.msrb.mxu0 %v4153_v58  ;;  %4615 = vmatpush.msrb.mxu1 %v4281_v17 }
 0x744   : > { %4635 = vmatpush.msrb.mxu2 %v4154_v24  ;;  %4655 = vmatpush.msrb.mxu3 %v4282_v53 }
 0x745   : > { %4596 = vmatpush.msrb.mxu0 %v4145_v29  ;;  %4616 = vmatpush.msrb.mxu1 %v4273_v2 }
 0x746   : > { %4636 = vmatpush.msrb.mxu2 %v4146_v44  ;;  %4656 = vmatpush.msrb.mxu3 %v4274_v45 }
 0x747   : > { %4563 = vmatmul.f32.vlgmr.msra.gmra.mxu2 %v9618_v49  ;;  %4583 = vmatmul.f32.vlgmr.msra.gmra.mxu3 %v9620_v26 }
 0x748   : > { %4597 = vmatpush.msrb.mxu0 %v4137_v20  ;;  %4617 = vmatpush.msrb.mxu1 %v4265_v18  ;;  %v4685_v18 = vld [vmem:[%s4684_s14 + $0x20] sm:$0xff] }
 0x749   : > { %4637 = vmatpush.msrb.mxu2 %v4138_v46  ;;  %4657 = vmatpush.msrb.mxu3 %v4266_v47 }
 0x74a   : > { %4598 = vmatpush.msrb.mxu0 %v4129_v8  ;;  %4618 = vmatpush.msrb.mxu1 %v4257_v36  ;;  %v4686_v36 = vld [vmem:[%s4684_s14 + $0x28] sm:$0xff] }
 0x74b   : > { %4638 = vmatpush.msrb.mxu2 %v4130_v60  ;;  %4658 = vmatpush.msrb.mxu3 %v4258_v48 }
 0x74c   : > { %4523 = vmatmul.f32.vlgmr.msra.gmra.mxu0 %v9618_v49  ;;  %4543 = vmatmul.f32.vlgmr.msra.gmra.mxu1 %v9620_v26 }
 0x74d   : > { %4599 = vmatpush.msrb.mxu0 %v4121_v30  ;;  %4619 = vmatpush.msrb.mxu1 %v4249_v39 }
 0x74e   : > { %4639 = vmatpush.msrb.mxu2 %v4122_v59  ;;  %4659 = vmatpush.msrb.mxu3 %v4250_v33 }
 0x74f   : > { %4600 = vmatpush.msrb.mxu0 %v4113_v3  ;;  %4620 = vmatpush.msrb.mxu1 %v4241_v11  ;;  %v4687_v11 = vld [vmem:[%s4684_s14 + $0x30] sm:$0xff] }
 0x750   : > { %4640 = vmatpush.msrb.mxu2 %v4114_v62  ;;  %4660 = vmatpush.msrb.mxu3 %v4242_v54 }
 0x751   : > { %4601 = vmatpush.msrb.mxu0 %v4105_v42  ;;  %4621 = vmatpush.msrb.mxu1 %v4233_v31 }
 0x752   : > { %4641 = vmatpush.msrb.mxu2 %v4106_v55  ;;  %4661 = vmatpush.msrb.mxu3 %v4234_v63 }
 0x753   : > { %4602 = vmatpush.msrb.mxu0 %v4097_v9  ;;  %4622 = vmatpush.msrb.mxu1 %v4225_v43  ;;  %v4694_v9 = vld [vmem:[#allocation6] sm:$0xff] }
 0x754   : > { %4642 = vmatpush.msrb.mxu2 %v4098_v0  ;;  %4662 = vmatpush.msrb.mxu3 %v4226_v57  ;;  %v4688_v57 = vld [vmem:[%s4684_s14 + $0x38] sm:$0xff] }
 0x755   : > { %4603 = vmatmul.f32.vlgmr.msrb.gmra.mxu0 %v9618_v49  ;;  %4623 = vmatmul.f32.vlgmr.msrb.gmra.mxu1 %v9620_v26 }
 0x756   : > { %4643 = vmatmul.f32.vlgmr.msrb.gmra.mxu2 %v9618_v49  ;;  %4663 = vmatmul.f32.vlgmr.msrb.gmra.mxu3 %v9620_v26 }
 0x78b   : > { %v4364_v28 = vpop.f32.mrf.mxu0  ;;  %v4384_v50 = vpop.f32.mrf.mxu1 }
 0x78c   : > { %v4385_v6 = vadd.f32 %v4384_v50, %v4364_v28  ;;  %v4404_v7 = vpop.f32.mrf.mxu2  ;;  %v4424_v51 = vpop.f32.mrf.mxu3 }
 0x78d   : > { %v4425_v52 = vadd.f32 %v4424_v51, %v4404_v7 }
 0x78e   : > { %v4676_v40 = vadd.f32 %v4672_v27, %v4385_v6 }
 0x78f   : > { %v4677_v1 = vadd.f32 %v4673_v16, %v4425_v52 }
 0x790   : > { %v4695_v61 = vmul.f32 0.5, %v4676_v40 }
 0x791   : > { %v4699_v41 = vmul.f32 0.5, %v4677_v1 }
 0x792   : > { %4943 = vtanh.f32 %v4695_v61 }
 0x793   : > { %4945 = vtanh.f32 %v4699_v41 }
 0x797   : > { %v4444_v49 = vpop.f32.mrf.mxu0  ;;  %v4464_v26 = vpop.f32.mrf.mxu1 }
 0x798   : > { %v4944_v14 = vpop.eup %4943  ;;  %v4465_v5 = vadd.f32 %v4464_v26, %v4444_v49 }
 0x799   : > { %v4946_v4 = vpop.eup %4945  ;;  %v4697_v32 = vadd.f32 1.0, %v4944_v14 }
 0x79a   : > { %v4701_v25 = vadd.f32 1.0, %v4946_v4  ;;  %v4678_v15 = vadd.f32 %v4674_v10, %v4465_v5  ;;  %v4484_v12 = vpop.f32.mrf.mxu2  ;;  %v4504_v13 = vpop.f32.mrf.mxu3 }
 0x79b   : > { %v4505_v21 = vadd.f32 %v4504_v13, %v4484_v12  ;;  %v4698_v37 = vmul.f32 0.5, %v4697_v32 }
 0x79c   : > { %4947 = vtanh.f32 %v4678_v15  ;;  %v4702_v22 = vmul.f32 0.5, %v4701_v25 }
 0x79d   : > { %v4679_v34 = vadd.f32 %v4675_v19, %v4505_v21 }
 0x79e   : > { %v4708_v56 = vmul.f32 %v4702_v22, %v4693_v35 }
 0x79f   : > { %v4704_v38 = vmul.f32 0.5, %v4679_v34 }
 0x7a1   : > { %4949 = vtanh.f32 %v4704_v38 }
 0x7a2   : > { %v4948_v23 = vpop.eup %4947 }
 0x7a3   : > { %v4709_v58 = vmul.f32 %v4948_v23, %v4698_v37 }
 0x7a5   : > { %v4710_v17 = vadd.f32 %v4709_v58, %v4708_v56 }
 0x7a7   : > { %v4950_v24 = vpop.eup %4949  ;;  %4951 = vtanh.f32 %v4710_v17  ;;  %4733 = vst [vmem:[#allocation6 + $0x8] sm:$0xff] %v4710_v17 }
 0x7a8   : > { %v4706_v53 = vadd.f32 1.0, %v4950_v24 }
 0x7aa   : > { %v4707_v29 = vmul.f32 0.5, %v4706_v53 }
 0x7ad   : > { %v4952_v2 = vpop.eup %4951 }
 0x7ae   : > { %v4712_v44 = vmul.f32 %v4952_v2, %v4707_v29 }
 0x7b0   : > { %4731 = vst [vmem:[#allocation5] sm:$0xff] %v4712_v44 }
 0x7b1   : > { %4736 = vst [vmem:[%s4735_s5] sm:$0xff] %v4712_v44 }
 0x7b8   :  { %v4739_v10 = vld [vmem:[#allocation3] sm:$0xff] (%p4082_p2)  ;;  %v4740_v5 = vld [vmem:[#allocation3 + $0x8] sm:$0xff] (%p4082_p2)  ;;  %v4741_v25 = vld [vmem:[#allocation3 + $0x10] sm:$0xff] (%p4082_p2) }
 0x7b9   :  { %4757 = vst [vmem:[%s10133_s10] sm:$0xff] (%p4082_p2), %v4739_v10  ;;  %v4742_v12 = vld [vmem:[#allocation3 + $0x18] sm:$0xff] (%p4082_p2)  ;;  %v4743_v19 = vld [vmem:[#allocation3 + $0x20] sm:$0xff] (%p4082_p2)  ;;  %v4744_v21 = vld [vmem:[#allocation3 + $0x28] sm:$0xff] (%p4082_p2) }
 0x7ba   :  { %4759 = vst [vmem:[%s10133_s10 + $0x10] sm:$0xff] (%p4082_p2), %v4740_v5  ;;  %v4745_v34 = vld [vmem:[#allocation3 + $0x30] sm:$0xff] (%p4082_p2)  ;;  %v4746_v37 = vld [vmem:[#allocation3 + $0x38] sm:$0xff] (%p4082_p2)  ;;  %v4747_v56 = vld [vmem:[#allocation3 + $0x40] sm:$0xff] (%p4082_p2) }
 0x7bb   :  { %4761 = vst [vmem:[%s10133_s10 + $0x20] sm:$0xff] (%p4082_p2), %v4741_v25 }
 0x7bc   :  { %4763 = vst [vmem:[%s10133_s10 + $0x30] sm:$0xff] (%p4082_p2), %v4742_v12 }
 0x7bd   :  { %4765 = vst [vmem:[%s10133_s10 + $0x40] sm:$0xff] (%p4082_p2), %v4743_v19 }
 0x7be   :  { %4767 = vst [vmem:[%s10133_s10 + $0x50] sm:$0xff] (%p4082_p2), %v4744_v21 }
 0x7bf   :  { %4769 = vst [vmem:[%s10133_s10 + $0x60] sm:$0xff] (%p4082_p2), %v4745_v34 }
 0x7c0   :  { %4771 = vst [vmem:[%s10133_s10 + $0x70] sm:$0xff] (%p4082_p2), %v4746_v37 }
 0x7c1   :  { %4773 = vst [vmem:[%s10133_s10 + $0x80] sm:$0xff] (%p4082_p2), %v4747_v56 }
 0x7c9   : > { %v4524_v45 = vpop.f32.mrf.mxu0  ;;  %v4544_v20 = vpop.f32.mrf.mxu1 }
 0x7ca   : > { %v4545_v46 = vadd.f32 %v4544_v20, %v4524_v45  ;;  %v4564_v47 = vpop.f32.mrf.mxu2  ;;  %v4584_v8 = vpop.f32.mrf.mxu3 }
 0x7cb   : > { %v4585_v60 = vadd.f32 %v4584_v8, %v4564_v47 }
 0x7cc   : > { %v4689_v48 = vadd.f32 %v4685_v18, %v4545_v46 }
 0x7cd   : > { %v4690_v30 = vadd.f32 %v4686_v36, %v4585_v60 }
 0x7ce   : > { %v4713_v39 = vmul.f32 0.5, %v4689_v48 }
 0x7cf   : > { %v4717_v59 = vmul.f32 0.5, %v4690_v30 }
 0x7d0   : > { %4953 = vtanh.f32 %v4713_v39 }
 0x7d1   : > { %4955 = vtanh.f32 %v4717_v59 }
 0x7d2   : > { %v4604_v33 = vpop.f32.mrf.mxu0  ;;  %v4624_v3 = vpop.f32.mrf.mxu1 }
 0x7d3   : > { %v4625_v62 = vadd.f32 %v4624_v3, %v4604_v33 }
 0x7d5   : > { %v4691_v54 = vadd.f32 %v4687_v11, %v4625_v62 }
 0x7d6   : > { %v4954_v42 = vpop.eup %4953 }
 0x7d7   : > { %v4956_v31 = vpop.eup %4955  ;;  %v4715_v55 = vadd.f32 1.0, %v4954_v42  ;;  %4957 = vtanh.f32 %v4691_v54 }
 0x7d8   : > { %v4719_v63 = vadd.f32 1.0, %v4956_v31 }
 0x7d9   : > { %v4644_v43 = vpop.f32.mrf.mxu2  ;;  %v4664_v0 = vpop.f32.mrf.mxu3  ;;  %v4716_v28 = vmul.f32 0.5, %v4715_v55 }
 0x7da   : > { %v4720_v50 = vmul.f32 0.5, %v4719_v63  ;;  %v4665_v27 = vadd.f32 %v4664_v0, %v4644_v43 }
 0x7dc   : > { %v4726_v6 = vmul.f32 %v4720_v50, %v4694_v9  ;;  %v4692_v7 = vadd.f32 %v4688_v57, %v4665_v27 }
 0x7dd   : > { %v4958_v51 = vpop.eup %4957 }
 0x7de   : > { %v4727_v16 = vmul.f32 %v4958_v51, %v4716_v28  ;;  %v4722_v52 = vmul.f32 0.5, %v4692_v7 }
 0x7e0   : > { %v4728_v40 = vadd.f32 %v4727_v16, %v4726_v6  ;;  %4959 = vtanh.f32 %v4722_v52 }
 0x7e2   : > { %4961 = vtanh.f32 %v4728_v40  ;;  %4734 = vst [vmem:[#allocation6] sm:$0xff] %v4728_v40 }
 0x7e6   : > { %v4960_v1 = vpop.eup %4959 }
 0x7e7   : > { %v4724_v61 = vadd.f32 1.0, %v4960_v1 }
 0x7e8   : > { %v4962_v41 = vpop.eup %4961 }
 0x7e9   : > { %v4725_v49 = vmul.f32 0.5, %v4724_v61 }
 0x7ea   :  { %4084 = sbr.rel (!%p4082_p2) target bundleno = 1742 (0x6ce), region = 115 }
 0x7eb   : > { %v4730_v26 = vmul.f32 %v4962_v41, %v4725_v49 }
 0x7ed   : > { %4732 = vst [vmem:[#allocation5 + $0x8] sm:$0xff] %v4730_v26 }
 0x7ee   : > { %4738 = vst [vmem:[%s4737_s15] sm:$0xff] %v4730_v26 }
 0x7f5   :  { %v4748_v14 = vld [vmem:[#allocation4] sm:$0xff]  ;;  %v4749_v4 = vld [vmem:[#allocation4 + $0x8] sm:$0xff]  ;;  %v4750_v15 = vld [vmem:[#allocation4 + $0x10] sm:$0xff] }
 0x7f6   :  { %4758 = vst [vmem:[%s10133_s10 + $0x8] sm:$0xff] %v4748_v14  ;;  %v4751_v13 = vld [vmem:[#allocation4 + $0x18] sm:$0xff]  ;;  %v4752_v32 = vld [vmem:[#allocation4 + $0x20] sm:$0xff]  ;;  %v4753_v22 = vld [vmem:[#allocation4 + $0x28] sm:$0xff] }
 0x7f7   :  { %4760 = vst [vmem:[%s10133_s10 + $0x18] sm:$0xff] %v4749_v4  ;;  %v4754_v35 = vld [vmem:[#allocation4 + $0x30] sm:$0xff]  ;;  %v4755_v38 = vld [vmem:[#allocation4 + $0x38] sm:$0xff]  ;;  %v4756_v23 = vld [vmem:[#allocation4 + $0x40] sm:$0xff] }
 0x7f8   :  { %4762 = vst [vmem:[%s10133_s10 + $0x28] sm:$0xff] %v4750_v15 }
 0x7f9   :  { %4764 = vst [vmem:[%s10133_s10 + $0x38] sm:$0xff] %v4751_v13 }
 0x7fa   :  { %4766 = vst [vmem:[%s10133_s10 + $0x48] sm:$0xff] %v4752_v32 }
 0x7fb   :  { %4768 = vst [vmem:[%s10133_s10 + $0x58] sm:$0xff] %v4753_v22 }
 0x7fc   :  { %4770 = vst [vmem:[%s10133_s10 + $0x68] sm:$0xff] %v4754_v35 }
 0x7fd   :  { %4772 = vst [vmem:[%s10133_s10 + $0x78] sm:$0xff] %v4755_v38 }
 0x7fe   :  { %4774 = vst [vmem:[%s10133_s10 + $0x88] sm:$0xff] %v4756_v23 }

</bundles_post_ra>
